<compile_context>
chip_gen: v6e
topology: v6e:2x2x1
jax: 0.10.0
libtpu: 0.0.40
codegen_flags: <defaults>
</compile_context>

<pallas_src>
import functools
import math

import jax
import jax.numpy as jnp
from jax.experimental import pallas as pl
from jax.experimental.pallas import tpu as pltpu

_BN_EPS = 1e-5


# ---------------------------------------------------------------------------
# Pallas kernel: one (image, row-tile) step of the fused DB head.
# ---------------------------------------------------------------------------
def _make_db_head_kernel(tile_rows, Wp, Cin, C2):
    M = tile_rows * Wp                    # output "pixels" per tile (incl. 2 junk cols/row)

    def kernel(xwin_ref,          # ((tile_rows+3)*Wp, Cin) bf16  flat padded row window
               w1_ref,            # (9, Cin, C2)  bf16  3x3 conv taps, both branches fused
               s1_ref, b1_ref,    # (1, C2)       f32   folded BN1 scale / bias
               w2_ref,            # (4, C2, C2)   bf16  deconv1 per sub-position, block-diag
               s2_ref, b2_ref,    # (1, C2)       f32   folded (deconv1 bias + BN2)
               w3_ref,            # (C2, 8)       bf16  deconv2, block-diag [bin | thr]
               b3_ref,            # (1, 8)        f32
               out_ref):          # (M, 32)       f32   col = s1*8 + branch*4 + s2
        # --- Conv2d(Cin, Cmid, 3, pad=1), both branches fused on the output dim.
        #     Each tap is a contiguous row-offset slice of the flat window, feeding a
        #     (M, Cin) x (Cin, C2) bf16 MXU matmul with f32 accumulation.
        acc = jnp.zeros((M, C2), jnp.float32)
        for di in range(3):
            for dj in range(3):
                patch = xwin_ref[pl.ds(di * Wp + dj, M), :]
                acc = acc + jnp.dot(patch, w1_ref[di * 3 + dj],
                                    preferred_element_type=jnp.float32)
        h1 = jnp.maximum(acc * s1_ref[...] + b1_ref[...], 0.0)       # f32 (M, C2)
        h1 = h1.astype(jnp.bfloat16)

        # --- ConvTranspose2d(2,2) + BN + ReLU, then ConvTranspose2d(2,2) + Sigmoid,
        #     per upsample sub-position (keeps the live set ~4x smaller than a full
        #     (M, 4*C2) h2), finished with ONE 32-lane store.
        z_parts = []
        for s1 in range(4):
            h2 = jnp.dot(h1, w2_ref[s1], preferred_element_type=jnp.float32)
            h2 = jnp.maximum(h2 * s2_ref[...] + b2_ref[...], 0.0)
            z = jnp.dot(h2.astype(jnp.bfloat16), w3_ref[...],
                        preferred_element_type=jnp.float32) + b3_ref[...]
            z_parts.append(jax.nn.sigmoid(z))       # (M, 8): [bin s2=0..3 | thr s2=0..3]
        out_ref[...] = jnp.concatenate(z_parts, axis=-1)

    return kernel


# ---------------------------------------------------------------------------
# Tile sizing / VMEM budgeting.
# ---------------------------------------------------------------------------
def _vmem_bytes_estimate(tile_rows, Wp, Cin, C2):
    r_in = (tile_rows + 3) * Wp
    m = tile_rows * Wp
    x_win = 2 * r_in * Cin * 2                         # double-buffered bf16 window
    out_b = 2 * m * 32 * 4                             # double-buffered f32 output
    wts = 2 * (9 * Cin * C2 * 2 + 4 * C2 * C2 * 2      # w1, w2 (bf16, 2 buffers)
               + C2 * 128 * 2 + 8 * C2 * 4 + 4096)     # w3 (lane padded), scales/biases
    interm = m * C2 * 12                               # acc f32 + h1/h2 temporaries
    return x_win + out_b + wts + interm


def _pick_tile_rows(H, Wp, Cin, C2, budget=22 * 2**20):
    # Largest tile height whose working set fits the budget (conservative enough for
    # v7x's 64 MiB VMEM; v5e/v6e have more headroom).
    th = H
    while th > 1 and _vmem_bytes_estimate(th, Wp, Cin, C2) > budget:
        th -= 1
    return th


# ---------------------------------------------------------------------------
# Parameter construction (raw, PyTorch-layout) and kernel-ready fusion/folding.
# ---------------------------------------------------------------------------
def init_params(key, in_channels=512):
    """Deterministic Kaiming-style conv weights + non-trivial BN stats, both branches.

    Returns [binarize_params, thresh_params]; each is the raw PyTorch-layout tuple
    (w1, g1, be1, mu1, va1, w2, bd2, g2, be2, mu2, va2, w3, b3).
    """
    cmid = in_channels // 4

    def branch(k):
        ks = jax.random.split(k, 12)
        w1 = jax.random.normal(ks[0], (cmid, in_channels, 3, 3), jnp.float32) \
            * math.sqrt(2.0 / (in_channels * 9))
        g1 = jax.random.uniform(ks[1], (cmid,), minval=0.5, maxval=1.5)
        be1 = 0.1 * jax.random.normal(ks[2], (cmid,))
        mu1 = 0.2 * jax.random.normal(ks[3], (cmid,))
        va1 = jax.random.uniform(ks[4], (cmid,), minval=0.5, maxval=1.5)
        w2 = jax.random.normal(ks[5], (cmid, cmid, 2, 2), jnp.float32) \
            * math.sqrt(2.0 / (cmid * 4))
        bd2 = 0.1 * jax.random.normal(ks[6], (cmid,))
        g2 = jax.random.uniform(ks[7], (cmid,), minval=0.5, maxval=1.5)
        be2 = 0.1 * jax.random.normal(ks[8], (cmid,))
        mu2 = 0.1 * jax.random.normal(ks[9], (cmid,))
        va2 = jax.random.uniform(ks[10], (cmid,), minval=0.5, maxval=1.5)
        w3 = jax.random.normal(ks[11], (cmid, 1, 2, 2), jnp.float32) \
            * math.sqrt(2.0 / (cmid * 4))
        b3 = 0.05 * jax.random.normal(jax.random.fold_in(k, 77), (1,))
        return (w1, g1, be1, mu1, va1, w2, bd2, g2, be2, mu2, va2, w3, b3)

    kb, kt = jax.random.split(key)
    return [branch(kb), branch(kt)]


def fuse_params(raw_params, eps=_BN_EPS, mxu_dtype=jnp.bfloat16):
    """Fold eval BN into per-channel scale/bias, fuse both branches, go channels-last."""
    cmid = raw_params[0][0].shape[0]
    cin = raw_params[0][0].shape[1]
    c2 = 2 * cmid

    w1t, s1s, b1s, w2s, s2s, b2s, w3s, b3s = [], [], [], [], [], [], [], []
    for (w1, g1, be1, mu1, va1, w2, bd2, g2, be2, mu2, va2, w3, b3) in raw_params:
        # conv1: (O, I, kh, kw) -> (kh, kw, I, O) -> (9, I, O); tap index = kh*3+kw
        w1t.append(jnp.transpose(w1, (2, 3, 1, 0)).reshape(9, cin, cmid))
        s1 = g1 / jnp.sqrt(va1 + eps)
        s1s.append(s1)
        b1s.append(be1 - mu1 * s1)
        # deconv1: (in, out, kh, kw) -> (kh, kw, in, out)  (per sub-position matrix)
        w2s.append(jnp.transpose(w2, (2, 3, 0, 1)))
        s2 = g2 / jnp.sqrt(va2 + eps)
        s2s.append(s2)
        b2s.append(bd2 * s2 + be2 - mu2 * s2)
        # deconv2: (in, 1, kh, kw) -> (in, 4), col = kh*2+kw
        w3s.append(w3[:, 0].reshape(cmid, 4))
        b3s.append(jnp.broadcast_to(b3, (4,)))

    w1_f = jnp.concatenate(w1t, axis=-1)                       # (9, Cin, C2)
    s1_f = jnp.concatenate(s1s).reshape(1, c2)
    b1_f = jnp.concatenate(b1s).reshape(1, c2)
    w2_f = jnp.zeros((4, c2, c2), jnp.float32)                 # block-diag per sub-pos
    for s in range(4):
        di1, dj1 = s // 2, s % 2
        w2_f = w2_f.at[s, :cmid, :cmid].set(w2s[0][di1, dj1])
        w2_f = w2_f.at[s, cmid:, cmid:].set(w2s[1][di1, dj1])
    s2_f = jnp.concatenate(s2s).reshape(1, c2)
    b2_f = jnp.concatenate(b2s).reshape(1, c2)
    w3_f = jnp.zeros((c2, 8), jnp.float32)
    w3_f = w3_f.at[:cmid, 0:4].set(w3s[0]).at[cmid:, 4:8].set(w3s[1])
    b3_f = jnp.concatenate(b3s).reshape(1, 8)
    return (w1_f.astype(mxu_dtype), s1_f, b1_f,
            w2_f.astype(mxu_dtype), s2_f, b2_f,
            w3_f.astype(mxu_dtype), b3_f)


# ---------------------------------------------------------------------------
# Forward wrapper: NCHW -> padded/flattened bf16 row windows -> pallas_call over
# grid (image, row_tile) -> x4 pixel shuffle + junk trim.
# ---------------------------------------------------------------------------
@functools.partial(jax.jit, static_argnames=("tile_rows",))
def db_head_forward(x_feat_nchw, fused_params, tile_rows=None):
    w1_f, s1_f, b1_f, w2_f, s2_f, b2_f, w3_f, b3_f = fused_params
    N, Cin, H, W = x_feat_nchw.shape
    C2 = w1_f.shape[-1]
    Wp = W + 2

    if tile_rows is None:
        th = _pick_tile_rows(H, Wp, Cin, C2)
        # prefer a tile height that divides H (no wasted junk rows), if not much smaller
        for d in range(th, 0, -1):
            if H % d == 0:
                if 2 * d >= th:
                    th = d
                break
    else:
        th = tile_rows
    th = max(1, min(th, H))
    T = -(-H // th)
    H_eff = T * th
    R_in = (th + 3) * Wp
    M_out = th * Wp

    # NCHW f32 -> padded NHWC bf16 -> per-tile flat row windows (tile rows + 2 halo
    # rows + 1 slack row so every 3x3 tap slice stays in bounds).  XLA fuses the
    # transpose + pad + cast + gather into a single HBM pass; the Pallas kernel then
    # streams the windows via regular BlockSpec double-buffering (the 2-row halo
    # overlap cannot be expressed with a non-overlapping Blocked index_map, so the
    # overlap is materialized here at a cost of ~2/tile_rows extra HBM bytes).
    x = jnp.transpose(x_feat_nchw, (0, 2, 3, 1))
    xpad = jnp.pad(x, ((0, 0), (1, H_eff - H + 2), (1, 1), (0, 0)))
    xpad = xpad.astype(jnp.bfloat16)
    rows = jnp.arange(T)[:, None] * th + jnp.arange(th + 3)[None, :]
    xwin = xpad[:, rows].reshape(N, T, R_in, Cin)

    kernel = _make_db_head_kernel(th, Wp, Cin, C2)
    vmem_limit = int(min(64 * 2**20,
                         max(32 * 2**20, 2 * _vmem_bytes_estimate(th, Wp, Cin, C2))))

    out_pre = pl.pallas_call(
        kernel,
        out_shape=jax.ShapeDtypeStruct((N, T, M_out, 32), jnp.float32),
        grid_spec=pltpu.PrefetchScalarGridSpec(
            num_scalar_prefetch=0,
            grid=(N, T),
            in_specs=[
                pl.BlockSpec((None, None, R_in, Cin), lambda n, t: (n, t, 0, 0)),
                # weights/scales: constant index maps -> DMA'd once, resident thereafter
                pl.BlockSpec((9, Cin, C2), lambda n, t: (0, 0, 0)),
                pl.BlockSpec((1, C2), lambda n, t: (0, 0)),
                pl.BlockSpec((1, C2), lambda n, t: (0, 0)),
                pl.BlockSpec((4, C2, C2), lambda n, t: (0, 0, 0)),
                pl.BlockSpec((1, C2), lambda n, t: (0, 0)),
                pl.BlockSpec((1, C2), lambda n, t: (0, 0)),
                pl.BlockSpec((C2, 8), lambda n, t: (0, 0)),
                pl.BlockSpec((1, 8), lambda n, t: (0, 0)),
            ],
            out_specs=pl.BlockSpec((None, None, M_out, 32),
                                   lambda n, t: (n, t, 0, 0)),
        ),
        compiler_params=pltpu.CompilerParams(
            dimension_semantics=("parallel", "parallel"),
            vmem_limit_bytes=vmem_limit),
    )(xwin, w1_f, s1_f, b1_f, w2_f, s2_f, b2_f, w3_f, b3_f)

    # x4 pixel shuffle + junk row/col trim (pure data movement, JAX glue).
    # out_pre column layout: (di1, dj1, branch, di2, dj2); branch 0 = shrink maps.
    o = out_pre.reshape(N, T, th, Wp, 2, 2, 2, 2, 2)
    o = o[:, :, :, :W]                                   # drop junk columns
    o = o.reshape(N, H_eff, W, 2, 2, 2, 2, 2)[:, :H]     # drop junk rows
    o = jnp.transpose(o, (0, 5, 1, 3, 6, 2, 4, 7))       # n, br, i, di1, di2, j, dj1, dj2
    return o.reshape(N, 2, 4 * H, 4 * W)


# ---------------------------------------------------------------------------
# References for numerical verification.
# ---------------------------------------------------------------------------
def _reference_forward(x_nchw, raw_params, eps=_BN_EPS):
    """Plain-JAX f32 (HIGHEST precision) eval-mode DBHead, straight from PyTorch defs."""
    N, _, H, W = x_nchw.shape
    x = jnp.transpose(x_nchw, (0, 2, 3, 1)).astype(jnp.float32)
    hp = jax.lax.Precision.HIGHEST
    outs = []
    for (w1, g1, be1, mu1, va1, w2, bd2, g2, be2, mu2, va2, w3, b3) in raw_params:
        h = jax.lax.conv_general_dilated(
            x, jnp.transpose(w1, (2, 3, 1, 0)), (1, 1), 'SAME',
            dimension_numbers=('NHWC', 'HWIO', 'NHWC'), precision=hp)
        h = jnp.maximum((h - mu1) * (g1 / jnp.sqrt(va1 + eps)) + be1, 0.0)
        h2 = jnp.einsum('nhwc,cokl->nhwklo', h, w2, precision=hp) + bd2
        h2 = jnp.maximum((h2 - mu2) * (g2 / jnp.sqrt(va2 + eps)) + be2, 0.0)
        z = jnp.einsum('nhwklc,cpq->nhwklpq', h2, w3[:, 0], precision=hp) + b3[0]
        z = jax.nn.sigmoid(z)
        z = jnp.transpose(z, (0, 1, 3, 5, 2, 4, 6)).reshape(N, 4 * H, 4 * W)
        outs.append(z)
    return jnp.stack(outs, axis=1)


def _mirror_fused_forward(x_nchw, fused_params):
    """Pure-JAX mirror of the kernel's exact arithmetic (bf16 operands, f32
    accumulation) — validates kernel plumbing at tight tolerance."""
    w1_f, s1_f, b1_f, w2_f, s2_f, b2_f, w3_f, b3_f = fused_params
    N, Cin, H, W = x_nchw.shape
    C2 = w1_f.shape[-1]
    x = jnp.transpose(x_nchw, (0, 2, 3, 1)).astype(jnp.bfloat16)
    h = jax.lax.conv_general_dilated(
        x, w1_f.reshape(3, 3, Cin, C2), (1, 1), 'SAME',
        dimension_numbers=('NHWC', 'HWIO', 'NHWC'),
        preferred_element_type=jnp.float32)
    h1 = jnp.maximum(h * s1_f[0] + b1_f[0], 0.0).astype(jnp.bfloat16)
    zs = []
    for s1 in range(4):
        h2 = jnp.einsum('nhwc,ck->nhwk', h1, w2_f[s1],
                        preferred_element_type=jnp.float32)
        h2 = jnp.maximum(h2 * s2_f[0] + b2_f[0], 0.0).astype(jnp.bfloat16)
        z = jnp.einsum('nhwc,ck->nhwk', h2, w3_f,
                       preferred_element_type=jnp.float32) + b3_f[0]
        zs.append(jax.nn.sigmoid(z))
    z = jnp.stack(zs, axis=3).reshape(N, H, W, 2, 2, 2, 2, 2)
    z = jnp.transpose(z, (0, 5, 1, 3, 6, 2, 4, 7))
    return z.reshape(N, 2, 4 * H, 4 * W)


if __name__ == "__main__":
    key = jax.random.PRNGKey(0)
    kx, kp = jax.random.split(key)

    # DBHead(512) fixes 512 input channels; 16x16 is the stride-4 feature map of a
    # 64x64 input image -> DB output is (N, 2, 64, 64).
    N, Cin, H, W = 2, 512, 16, 16
    x_feat = jax.random.normal(kx, (N, Cin, H, W), jnp.float32)
    raw = init_params(kp, Cin)
    fused = fuse_params(raw)

    # Force a small tile height so the multi-tile / halo / junk-row-trim paths are
    # exercised (H=16, tile_rows=6 -> 3 tiles, H_eff=18 > H).
    y = db_head_forward(x_feat, fused, tile_rows=6)
    y = jax.block_until_ready(y)
    assert y.shape == (N, 2, 4 * H, 4 * W), y.shape
    assert bool(jnp.all(jnp.isfinite(y)))

    # Auto-tiled path (single tile here) must match the forced-tile path exactly.
    y_auto = jax.block_until_ready(db_head_forward(x_feat, fused))
    assert float(jnp.max(jnp.abs(y - y_auto))) < 1e-5

    # Tight check: pure-JAX mirror of the kernel's bf16/f32 arithmetic.
    y_mirror = _mirror_fused_forward(x_feat, fused)
    mirror_err = float(jnp.max(jnp.abs(y - y_mirror)))
    assert mirror_err < 2e-3, f"mirror max abs error {mirror_err}"

    # Accuracy check vs. the f32 PyTorch-faithful reference: bf16 MXU operands give
    # ~1e-2-level pre-sigmoid differences, so post-sigmoid max ~2e-2 / mean ~few e-3.
    y_ref = _reference_forward(x_feat, raw)
    err = jnp.abs(y - y_ref)
    max_err = float(jnp.max(err))
    mean_err = float(jnp.mean(err))
    assert max_err < 2e-2 and mean_err < 4e-3, (max_err, mean_err)

    print("KERNEL_OK")
</pallas_src>

<mosaic_0001>
module attributes {stable_mosaic.version = 11 : i64} {
  func.func @kernel(%arg0: i32, %arg1: i32, %arg2: memref<1x1x162x512xbf16, #tpu.memory_space<vmem>>, %arg3: memref<9x512x256xbf16, #tpu.memory_space<vmem>>, %arg4: memref<1x256xf32, #tpu.memory_space<vmem>>, %arg5: memref<1x256xf32, #tpu.memory_space<vmem>>, %arg6: memref<4x256x256xbf16, #tpu.memory_space<vmem>>, %arg7: memref<1x256xf32, #tpu.memory_space<vmem>>, %arg8: memref<1x256xf32, #tpu.memory_space<vmem>>, %arg9: memref<256x8xbf16, #tpu.memory_space<vmem>>, %arg10: memref<1x8xf32, #tpu.memory_space<vmem>>, %arg11: memref<1x1x108x32xf32, #tpu.memory_space<vmem>>) attributes {dimension_semantics = [#tpu.dimension_semantics<parallel>, #tpu.dimension_semantics<parallel>], iteration_bounds = array<i64: 2, 3>, scalar_prefetch = 0 : i64, scratch_operands = 0 : i64, tpu.core_type = #tpu.core_type<tc>, window_params = [{transform_indices = @transform_0, window_bounds = array<i64: 1, 1, 162, 512>}, {pipeline_mode = #tpu.pipeline_mode<synchronous>, transform_indices = @transform_1, window_bounds = array<i64: 9, 512, 256>}, {pipeline_mode = #tpu.pipeline_mode<synchronous>, transform_indices = @transform_2, window_bounds = array<i64: 1, 256>}, {pipeline_mode = #tpu.pipeline_mode<synchronous>, transform_indices = @transform_3, window_bounds = array<i64: 1, 256>}, {pipeline_mode = #tpu.pipeline_mode<synchronous>, transform_indices = @transform_4, window_bounds = array<i64: 4, 256, 256>}, {pipeline_mode = #tpu.pipeline_mode<synchronous>, transform_indices = @transform_5, window_bounds = array<i64: 1, 256>}, {pipeline_mode = #tpu.pipeline_mode<synchronous>, transform_indices = @transform_6, window_bounds = array<i64: 1, 256>}, {pipeline_mode = #tpu.pipeline_mode<synchronous>, transform_indices = @transform_7, window_bounds = array<i64: 256, 8>}, {pipeline_mode = #tpu.pipeline_mode<synchronous>, transform_indices = @transform_8, window_bounds = array<i64: 1, 8>}, {transform_indices = @transform_9, window_bounds = array<i64: 1, 1, 108, 32>}]} {
    %cst = arith.constant 0.000000e+00 : f32
    %0 = vector.broadcast %cst : f32 to vector<108x256xf32>
    %c0 = arith.constant 0 : index
    %c0_0 = arith.constant 0 : index
    %c0_1 = arith.constant 0 : index
    %c0_2 = arith.constant 0 : index
    %1 = vector.load %arg2[%c0, %c0_0, %c0_1, %c0_2] : memref<1x1x162x512xbf16, #tpu.memory_space<vmem>>, vector<1x1x108x512xbf16>
    %2 = vector.shape_cast %1 : vector<1x1x108x512xbf16> to vector<108x512xbf16>
    %c0_3 = arith.constant 0 : index
    %c0_4 = arith.constant 0 : index
    %c0_5 = arith.constant 0 : index
    %3 = vector.load %arg3[%c0_3, %c0_4, %c0_5] : memref<9x512x256xbf16, #tpu.memory_space<vmem>>, vector<1x512x256xbf16>
    %4 = vector.shape_cast %3 : vector<1x512x256xbf16> to vector<512x256xbf16>
    %cst_6 = arith.constant dense<0.000000e+00> : vector<108x256xf32>
    %5 = tpu.matmul %2, %4, %cst_6 {dimension_numbers = #tpu.dot_dimension_numbers<[1], [0], [0], [1], [0, 0, 1, 1], [], []>} : vector<108x512xbf16>, vector<512x256xbf16>, vector<108x256xf32> -> vector<108x256xf32>
    %6 = arith.addf %0, %5 : vector<108x256xf32>
    %c0_7 = arith.constant 0 : index
    %c0_8 = arith.constant 0 : index
    %c1 = arith.constant 1 : index
    %c0_9 = arith.constant 0 : index
    %7 = vector.load %arg2[%c0_7, %c0_8, %c1, %c0_9] : memref<1x1x162x512xbf16, #tpu.memory_space<vmem>>, vector<1x1x108x512xbf16>
    %8 = vector.shape_cast %7 : vector<1x1x108x512xbf16> to vector<108x512xbf16>
    %c1_10 = arith.constant 1 : index
    %c0_11 = arith.constant 0 : index
    %c0_12 = arith.constant 0 : index
    %9 = vector.load %arg3[%c1_10, %c0_11, %c0_12] : memref<9x512x256xbf16, #tpu.memory_space<vmem>>, vector<1x512x256xbf16>
    %10 = vector.shape_cast %9 : vector<1x512x256xbf16> to vector<512x256xbf16>
    %cst_13 = arith.constant dense<0.000000e+00> : vector<108x256xf32>
    %11 = tpu.matmul %8, %10, %cst_13 {dimension_numbers = #tpu.dot_dimension_numbers<[1], [0], [0], [1], [0, 0, 1, 1], [], []>} : vector<108x512xbf16>, vector<512x256xbf16>, vector<108x256xf32> -> vector<108x256xf32>
    %12 = arith.addf %6, %11 : vector<108x256xf32>
    %c0_14 = arith.constant 0 : index
    %c0_15 = arith.constant 0 : index
    %c2 = arith.constant 2 : index
    %c0_16 = arith.constant 0 : index
    %13 = vector.load %arg2[%c0_14, %c0_15, %c2, %c0_16] : memref<1x1x162x512xbf16, #tpu.memory_space<vmem>>, vector<1x1x108x512xbf16>
    %14 = vector.shape_cast %13 : vector<1x1x108x512xbf16> to vector<108x512xbf16>
    %c2_17 = arith.constant 2 : index
    %c0_18 = arith.constant 0 : index
    %c0_19 = arith.constant 0 : index
    %15 = vector.load %arg3[%c2_17, %c0_18, %c0_19] : memref<9x512x256xbf16, #tpu.memory_space<vmem>>, vector<1x512x256xbf16>
    %16 = vector.shape_cast %15 : vector<1x512x256xbf16> to vector<512x256xbf16>
    %cst_20 = arith.constant dense<0.000000e+00> : vector<108x256xf32>
    %17 = tpu.matmul %14, %16, %cst_20 {dimension_numbers = #tpu.dot_dimension_numbers<[1], [0], [0], [1], [0, 0, 1, 1], [], []>} : vector<108x512xbf16>, vector<512x256xbf16>, vector<108x256xf32> -> vector<108x256xf32>
    %18 = arith.addf %12, %17 : vector<108x256xf32>
    %c0_21 = arith.constant 0 : index
    %c0_22 = arith.constant 0 : index
    %c18 = arith.constant 18 : index
    %c0_23 = arith.constant 0 : index
    %19 = vector.load %arg2[%c0_21, %c0_22, %c18, %c0_23] : memref<1x1x162x512xbf16, #tpu.memory_space<vmem>>, vector<1x1x108x512xbf16>
    %20 = vector.shape_cast %19 : vector<1x1x108x512xbf16> to vector<108x512xbf16>
    %c3 = arith.constant 3 : index
    %c0_24 = arith.constant 0 : index
    %c0_25 = arith.constant 0 : index
    %21 = vector.load %arg3[%c3, %c0_24, %c0_25] : memref<9x512x256xbf16, #tpu.memory_space<vmem>>, vector<1x512x256xbf16>
    %22 = vector.shape_cast %21 : vector<1x512x256xbf16> to vector<512x256xbf16>
    %cst_26 = arith.constant dense<0.000000e+00> : vector<108x256xf32>
    %23 = tpu.matmul %20, %22, %cst_26 {dimension_numbers = #tpu.dot_dimension_numbers<[1], [0], [0], [1], [0, 0, 1, 1], [], []>} : vector<108x512xbf16>, vector<512x256xbf16>, vector<108x256xf32> -> vector<108x256xf32>
    %24 = arith.addf %18, %23 : vector<108x256xf32>
    %c0_27 = arith.constant 0 : index
    %c0_28 = arith.constant 0 : index
    %c19 = arith.constant 19 : index
    %c0_29 = arith.constant 0 : index
    %25 = vector.load %arg2[%c0_27, %c0_28, %c19, %c0_29] : memref<1x1x162x512xbf16, #tpu.memory_space<vmem>>, vector<1x1x108x512xbf16>
    %26 = vector.shape_cast %25 : vector<1x1x108x512xbf16> to vector<108x512xbf16>
    %c4 = arith.constant 4 : index
    %c0_30 = arith.constant 0 : index
    %c0_31 = arith.constant 0 : index
    %27 = vector.load %arg3[%c4, %c0_30, %c0_31] : memref<9x512x256xbf16, #tpu.memory_space<vmem>>, vector<1x512x256xbf16>
    %28 = vector.shape_cast %27 : vector<1x512x256xbf16> to vector<512x256xbf16>
    %cst_32 = arith.constant dense<0.000000e+00> : vector<108x256xf32>
    %29 = tpu.matmul %26, %28, %cst_32 {dimension_numbers = #tpu.dot_dimension_numbers<[1], [0], [0], [1], [0, 0, 1, 1], [], []>} : vector<108x512xbf16>, vector<512x256xbf16>, vector<108x256xf32> -> vector<108x256xf32>
    %30 = arith.addf %24, %29 : vector<108x256xf32>
    %c0_33 = arith.constant 0 : index
    %c0_34 = arith.constant 0 : index
    %c20 = arith.constant 20 : index
    %c0_35 = arith.constant 0 : index
    %31 = vector.load %arg2[%c0_33, %c0_34, %c20, %c0_35] : memref<1x1x162x512xbf16, #tpu.memory_space<vmem>>, vector<1x1x108x512xbf16>
    %32 = vector.shape_cast %31 : vector<1x1x108x512xbf16> to vector<108x512xbf16>
    %c5 = arith.constant 5 : index
    %c0_36 = arith.constant 0 : index
    %c0_37 = arith.constant 0 : index
    %33 = vector.load %arg3[%c5, %c0_36, %c0_37] : memref<9x512x256xbf16, #tpu.memory_space<vmem>>, vector<1x512x256xbf16>
    %34 = vector.shape_cast %33 : vector<1x512x256xbf16> to vector<512x256xbf16>
    %cst_38 = arith.constant dense<0.000000e+00> : vector<108x256xf32>
    %35 = tpu.matmul %32, %34, %cst_38 {dimension_numbers = #tpu.dot_dimension_numbers<[1], [0], [0], [1], [0, 0, 1, 1], [], []>} : vector<108x512xbf16>, vector<512x256xbf16>, vector<108x256xf32> -> vector<108x256xf32>
    %36 = arith.addf %30, %35 : vector<108x256xf32>
    %c0_39 = arith.constant 0 : index
    %c0_40 = arith.constant 0 : index
    %c36 = arith.constant 36 : index
    %c0_41 = arith.constant 0 : index
    %37 = vector.load %arg2[%c0_39, %c0_40, %c36, %c0_41] : memref<1x1x162x512xbf16, #tpu.memory_space<vmem>>, vector<1x1x108x512xbf16>
    %38 = vector.shape_cast %37 : vector<1x1x108x512xbf16> to vector<108x512xbf16>
    %c6 = arith.constant 6 : index
    %c0_42 = arith.constant 0 : index
    %c0_43 = arith.constant 0 : index
    %39 = vector.load %arg3[%c6, %c0_42, %c0_43] : memref<9x512x256xbf16, #tpu.memory_space<vmem>>, vector<1x512x256xbf16>
    %40 = vector.shape_cast %39 : vector<1x512x256xbf16> to vector<512x256xbf16>
    %cst_44 = arith.constant dense<0.000000e+00> : vector<108x256xf32>
    %41 = tpu.matmul %38, %40, %cst_44 {dimension_numbers = #tpu.dot_dimension_numbers<[1], [0], [0], [1], [0, 0, 1, 1], [], []>} : vector<108x512xbf16>, vector<512x256xbf16>, vector<108x256xf32> -> vector<108x256xf32>
    %42 = arith.addf %36, %41 : vector<108x256xf32>
    %c0_45 = arith.constant 0 : index
    %c0_46 = arith.constant 0 : index
    %c37 = arith.constant 37 : index
    %c0_47 = arith.constant 0 : index
    %43 = vector.load %arg2[%c0_45, %c0_46, %c37, %c0_47] : memref<1x1x162x512xbf16, #tpu.memory_space<vmem>>, vector<1x1x108x512xbf16>
    %44 = vector.shape_cast %43 : vector<1x1x108x512xbf16> to vector<108x512xbf16>
    %c7 = arith.constant 7 : index
    %c0_48 = arith.constant 0 : index
    %c0_49 = arith.constant 0 : index
    %45 = vector.load %arg3[%c7, %c0_48, %c0_49] : memref<9x512x256xbf16, #tpu.memory_space<vmem>>, vector<1x512x256xbf16>
    %46 = vector.shape_cast %45 : vector<1x512x256xbf16> to vector<512x256xbf16>
    %cst_50 = arith.constant dense<0.000000e+00> : vector<108x256xf32>
    %47 = tpu.matmul %44, %46, %cst_50 {dimension_numbers = #tpu.dot_dimension_numbers<[1], [0], [0], [1], [0, 0, 1, 1], [], []>} : vector<108x512xbf16>, vector<512x256xbf16>, vector<108x256xf32> -> vector<108x256xf32>
    %48 = arith.addf %42, %47 : vector<108x256xf32>
    %c0_51 = arith.constant 0 : index
    %c0_52 = arith.constant 0 : index
    %c38 = arith.constant 38 : index
    %c0_53 = arith.constant 0 : index
    %49 = vector.load %arg2[%c0_51, %c0_52, %c38, %c0_53] : memref<1x1x162x512xbf16, #tpu.memory_space<vmem>>, vector<1x1x108x512xbf16>
    %50 = vector.shape_cast %49 : vector<1x1x108x512xbf16> to vector<108x512xbf16>
    %c8 = arith.constant 8 : index
    %c0_54 = arith.constant 0 : index
    %c0_55 = arith.constant 0 : index
    %51 = vector.load %arg3[%c8, %c0_54, %c0_55] : memref<9x512x256xbf16, #tpu.memory_space<vmem>>, vector<1x512x256xbf16>
    %52 = vector.shape_cast %51 : vector<1x512x256xbf16> to vector<512x256xbf16>
    %cst_56 = arith.constant dense<0.000000e+00> : vector<108x256xf32>
    %53 = tpu.matmul %50, %52, %cst_56 {dimension_numbers = #tpu.dot_dimension_numbers<[1], [0], [0], [1], [0, 0, 1, 1], [], []>} : vector<108x512xbf16>, vector<512x256xbf16>, vector<108x256xf32> -> vector<108x256xf32>
    %54 = arith.addf %48, %53 : vector<108x256xf32>
    %c0_57 = arith.constant 0 : index
    %c0_58 = arith.constant 0 : index
    %55 = vector.load %arg4[%c0_57, %c0_58] : memref<1x256xf32, #tpu.memory_space<vmem>>, vector<1x256xf32>
    %56 = vector.broadcast %55 : vector<1x256xf32> to vector<108x256xf32>
    %57 = arith.mulf %54, %56 : vector<108x256xf32>
    %c0_59 = arith.constant 0 : index
    %c0_60 = arith.constant 0 : index
    %58 = vector.load %arg5[%c0_59, %c0_60] : memref<1x256xf32, #tpu.memory_space<vmem>>, vector<1x256xf32>
    %59 = vector.broadcast %58 : vector<1x256xf32> to vector<108x256xf32>
    %60 = arith.addf %57, %59 : vector<108x256xf32>
    %cst_61 = arith.constant 0.000000e+00 : f32
    %61 = vector.broadcast %cst_61 : f32 to vector<108x256xf32>
    %62 = arith.maximumf %60, %61 : vector<108x256xf32>
    %63 = arith.truncf %62 : vector<108x256xf32> to vector<108x256xbf16>
    %c0_62 = arith.constant 0 : index
    %c0_63 = arith.constant 0 : index
    %c0_64 = arith.constant 0 : index
    %64 = vector.load %arg6[%c0_62, %c0_63, %c0_64] : memref<4x256x256xbf16, #tpu.memory_space<vmem>>, vector<1x256x256xbf16>
    %65 = vector.shape_cast %64 : vector<1x256x256xbf16> to vector<256x256xbf16>
    %cst_65 = arith.constant dense<0.000000e+00> : vector<108x256xf32>
    %66 = tpu.matmul %63, %65, %cst_65 {dimension_numbers = #tpu.dot_dimension_numbers<[1], [0], [0], [1], [0, 0, 1, 1], [], []>} : vector<108x256xbf16>, vector<256x256xbf16>, vector<108x256xf32> -> vector<108x256xf32>
    %c0_66 = arith.constant 0 : index
    %c0_67 = arith.constant 0 : index
    %67 = vector.load %arg7[%c0_66, %c0_67] : memref<1x256xf32, #tpu.memory_space<vmem>>, vector<1x256xf32>
    %68 = vector.broadcast %67 : vector<1x256xf32> to vector<108x256xf32>
    %69 = arith.mulf %66, %68 : vector<108x256xf32>
    %c0_68 = arith.constant 0 : index
    %c0_69 = arith.constant 0 : index
    %70 = vector.load %arg8[%c0_68, %c0_69] : memref<1x256xf32, #tpu.memory_space<vmem>>, vector<1x256xf32>
    %71 = vector.broadcast %70 : vector<1x256xf32> to vector<108x256xf32>
    %72 = arith.addf %69, %71 : vector<108x256xf32>
    %cst_70 = arith.constant 0.000000e+00 : f32
    %73 = vector.broadcast %cst_70 : f32 to vector<108x256xf32>
    %74 = arith.maximumf %72, %73 : vector<108x256xf32>
    %75 = arith.truncf %74 : vector<108x256xf32> to vector<108x256xbf16>
    %c0_71 = arith.constant 0 : index
    %c0_72 = arith.constant 0 : index
    %76 = vector.load %arg9[%c0_71, %c0_72] : memref<256x8xbf16, #tpu.memory_space<vmem>>, vector<256x8xbf16>
    %cst_73 = arith.constant dense<0.000000e+00> : vector<108x8xf32>
    %77 = tpu.matmul %75, %76, %cst_73 {dimension_numbers = #tpu.dot_dimension_numbers<[1], [0], [0], [1], [0, 0, 1, 1], [], []>} : vector<108x256xbf16>, vector<256x8xbf16>, vector<108x8xf32> -> vector<108x8xf32>
    %c0_74 = arith.constant 0 : index
    %c0_75 = arith.constant 0 : index
    %78 = vector.load %arg10[%c0_74, %c0_75] : memref<1x8xf32, #tpu.memory_space<vmem>>, vector<1x8xf32>
    %79 = vector.broadcast %78 : vector<1x8xf32> to vector<108x8xf32>
    %80 = arith.addf %77, %79 : vector<108x8xf32>
    %81 = arith.negf %80 : vector<108x8xf32>
    %82 = math.exp %81 : vector<108x8xf32>
    %cst_76 = arith.constant 1.000000e+00 : f32
    %83 = vector.broadcast %cst_76 : f32 to vector<108x8xf32>
    %84 = arith.addf %83, %82 : vector<108x8xf32>
    %85 = arith.divf %83, %84 : vector<108x8xf32>
    %c1_77 = arith.constant 1 : index
    %c0_78 = arith.constant 0 : index
    %c0_79 = arith.constant 0 : index
    %86 = vector.load %arg6[%c1_77, %c0_78, %c0_79] : memref<4x256x256xbf16, #tpu.memory_space<vmem>>, vector<1x256x256xbf16>
    %87 = vector.shape_cast %86 : vector<1x256x256xbf16> to vector<256x256xbf16>
    %cst_80 = arith.constant dense<0.000000e+00> : vector<108x256xf32>
    %88 = tpu.matmul %63, %87, %cst_80 {dimension_numbers = #tpu.dot_dimension_numbers<[1], [0], [0], [1], [0, 0, 1, 1], [], []>} : vector<108x256xbf16>, vector<256x256xbf16>, vector<108x256xf32> -> vector<108x256xf32>
    %c0_81 = arith.constant 0 : index
    %c0_82 = arith.constant 0 : index
    %89 = vector.load %arg7[%c0_81, %c0_82] : memref<1x256xf32, #tpu.memory_space<vmem>>, vector<1x256xf32>
    %90 = vector.broadcast %89 : vector<1x256xf32> to vector<108x256xf32>
    %91 = arith.mulf %88, %90 : vector<108x256xf32>
    %c0_83 = arith.constant 0 : index
    %c0_84 = arith.constant 0 : index
    %92 = vector.load %arg8[%c0_83, %c0_84] : memref<1x256xf32, #tpu.memory_space<vmem>>, vector<1x256xf32>
    %93 = vector.broadcast %92 : vector<1x256xf32> to vector<108x256xf32>
    %94 = arith.addf %91, %93 : vector<108x256xf32>
    %cst_85 = arith.constant 0.000000e+00 : f32
    %95 = vector.broadcast %cst_85 : f32 to vector<108x256xf32>
    %96 = arith.maximumf %94, %95 : vector<108x256xf32>
    %97 = arith.truncf %96 : vector<108x256xf32> to vector<108x256xbf16>
    %c0_86 = arith.constant 0 : index
    %c0_87 = arith.constant 0 : index
    %98 = vector.load %arg9[%c0_86, %c0_87] : memref<256x8xbf16, #tpu.memory_space<vmem>>, vector<256x8xbf16>
    %cst_88 = arith.constant dense<0.000000e+00> : vector<108x8xf32>
    %99 = tpu.matmul %97, %98, %cst_88 {dimension_numbers = #tpu.dot_dimension_numbers<[1], [0], [0], [1], [0, 0, 1, 1], [], []>} : vector<108x256xbf16>, vector<256x8xbf16>, vector<108x8xf32> -> vector<108x8xf32>
    %c0_89 = arith.constant 0 : index
    %c0_90 = arith.constant 0 : index
    %100 = vector.load %arg10[%c0_89, %c0_90] : memref<1x8xf32, #tpu.memory_space<vmem>>, vector<1x8xf32>
    %101 = vector.broadcast %100 : vector<1x8xf32> to vector<108x8xf32>
    %102 = arith.addf %99, %101 : vector<108x8xf32>
    %103 = arith.negf %102 : vector<108x8xf32>
    %104 = math.exp %103 : vector<108x8xf32>
    %cst_91 = arith.constant 1.000000e+00 : f32
    %105 = vector.broadcast %cst_91 : f32 to vector<108x8xf32>
    %106 = arith.addf %105, %104 : vector<108x8xf32>
    %107 = arith.divf %105, %106 : vector<108x8xf32>
    %c2_92 = arith.constant 2 : index
    %c0_93 = arith.constant 0 : index
    %c0_94 = arith.constant 0 : index
    %108 = vector.load %arg6[%c2_92, %c0_93, %c0_94] : memref<4x256x256xbf16, #tpu.memory_space<vmem>>, vector<1x256x256xbf16>
    %109 = vector.shape_cast %108 : vector<1x256x256xbf16> to vector<256x256xbf16>
    %cst_95 = arith.constant dense<0.000000e+00> : vector<108x256xf32>
    %110 = tpu.matmul %63, %109, %cst_95 {dimension_numbers = #tpu.dot_dimension_numbers<[1], [0], [0], [1], [0, 0, 1, 1], [], []>} : vector<108x256xbf16>, vector<256x256xbf16>, vector<108x256xf32> -> vector<108x256xf32>
    %c0_96 = arith.constant 0 : index
    %c0_97 = arith.constant 0 : index
    %111 = vector.load %arg7[%c0_96, %c0_97] : memref<1x256xf32, #tpu.memory_space<vmem>>, vector<1x256xf32>
    %112 = vector.broadcast %111 : vector<1x256xf32> to vector<108x256xf32>
    %113 = arith.mulf %110, %112 : vector<108x256xf32>
    %c0_98 = arith.constant 0 : index
    %c0_99 = arith.constant 0 : index
    %114 = vector.load %arg8[%c0_98, %c0_99] : memref<1x256xf32, #tpu.memory_space<vmem>>, vector<1x256xf32>
    %115 = vector.broadcast %114 : vector<1x256xf32> to vector<108x256xf32>
    %116 = arith.addf %113, %115 : vector<108x256xf32>
    %cst_100 = arith.constant 0.000000e+00 : f32
    %117 = vector.broadcast %cst_100 : f32 to vector<108x256xf32>
    %118 = arith.maximumf %116, %117 : vector<108x256xf32>
    %119 = arith.truncf %118 : vector<108x256xf32> to vector<108x256xbf16>
    %c0_101 = arith.constant 0 : index
    %c0_102 = arith.constant 0 : index
    %120 = vector.load %arg9[%c0_101, %c0_102] : memref<256x8xbf16, #tpu.memory_space<vmem>>, vector<256x8xbf16>
    %cst_103 = arith.constant dense<0.000000e+00> : vector<108x8xf32>
    %121 = tpu.matmul %119, %120, %cst_103 {dimension_numbers = #tpu.dot_dimension_numbers<[1], [0], [0], [1], [0, 0, 1, 1], [], []>} : vector<108x256xbf16>, vector<256x8xbf16>, vector<108x8xf32> -> vector<108x8xf32>
    %c0_104 = arith.constant 0 : index
    %c0_105 = arith.constant 0 : index
    %122 = vector.load %arg10[%c0_104, %c0_105] : memref<1x8xf32, #tpu.memory_space<vmem>>, vector<1x8xf32>
    %123 = vector.broadcast %122 : vector<1x8xf32> to vector<108x8xf32>
    %124 = arith.addf %121, %123 : vector<108x8xf32>
    %125 = arith.negf %124 : vector<108x8xf32>
    %126 = math.exp %125 : vector<108x8xf32>
    %cst_106 = arith.constant 1.000000e+00 : f32
    %127 = vector.broadcast %cst_106 : f32 to vector<108x8xf32>
    %128 = arith.addf %127, %126 : vector<108x8xf32>
    %129 = arith.divf %127, %128 : vector<108x8xf32>
    %c3_107 = arith.constant 3 : index
    %c0_108 = arith.constant 0 : index
    %c0_109 = arith.constant 0 : index
    %130 = vector.load %arg6[%c3_107, %c0_108, %c0_109] : memref<4x256x256xbf16, #tpu.memory_space<vmem>>, vector<1x256x256xbf16>
    %131 = vector.shape_cast %130 : vector<1x256x256xbf16> to vector<256x256xbf16>
    %cst_110 = arith.constant dense<0.000000e+00> : vector<108x256xf32>
    %132 = tpu.matmul %63, %131, %cst_110 {dimension_numbers = #tpu.dot_dimension_numbers<[1], [0], [0], [1], [0, 0, 1, 1], [], []>} : vector<108x256xbf16>, vector<256x256xbf16>, vector<108x256xf32> -> vector<108x256xf32>
    %c0_111 = arith.constant 0 : index
    %c0_112 = arith.constant 0 : index
    %133 = vector.load %arg7[%c0_111, %c0_112] : memref<1x256xf32, #tpu.memory_space<vmem>>, vector<1x256xf32>
    %134 = vector.broadcast %133 : vector<1x256xf32> to vector<108x256xf32>
    %135 = arith.mulf %132, %134 : vector<108x256xf32>
    %c0_113 = arith.constant 0 : index
    %c0_114 = arith.constant 0 : index
    %136 = vector.load %arg8[%c0_113, %c0_114] : memref<1x256xf32, #tpu.memory_space<vmem>>, vector<1x256xf32>
    %137 = vector.broadcast %136 : vector<1x256xf32> to vector<108x256xf32>
    %138 = arith.addf %135, %137 : vector<108x256xf32>
    %cst_115 = arith.constant 0.000000e+00 : f32
    %139 = vector.broadcast %cst_115 : f32 to vector<108x256xf32>
    %140 = arith.maximumf %138, %139 : vector<108x256xf32>
    %141 = arith.truncf %140 : vector<108x256xf32> to vector<108x256xbf16>
    %c0_116 = arith.constant 0 : index
    %c0_117 = arith.constant 0 : index
    %142 = vector.load %arg9[%c0_116, %c0_117] : memref<256x8xbf16, #tpu.memory_space<vmem>>, vector<256x8xbf16>
    %cst_118 = arith.constant dense<0.000000e+00> : vector<108x8xf32>
    %143 = tpu.matmul %141, %142, %cst_118 {dimension_numbers = #tpu.dot_dimension_numbers<[1], [0], [0], [1], [0, 0, 1, 1], [], []>} : vector<108x256xbf16>, vector<256x8xbf16>, vector<108x8xf32> -> vector<108x8xf32>
    %c0_119 = arith.constant 0 : index
    %c0_120 = arith.constant 0 : index
    %144 = vector.load %arg10[%c0_119, %c0_120] : memref<1x8xf32, #tpu.memory_space<vmem>>, vector<1x8xf32>
    %145 = vector.broadcast %144 : vector<1x8xf32> to vector<108x8xf32>
    %146 = arith.addf %143, %145 : vector<108x8xf32>
    %147 = arith.negf %146 : vector<108x8xf32>
    %148 = math.exp %147 : vector<108x8xf32>
    %cst_121 = arith.constant 1.000000e+00 : f32
    %149 = vector.broadcast %cst_121 : f32 to vector<108x8xf32>
    %150 = arith.addf %149, %148 : vector<108x8xf32>
    %151 = arith.divf %149, %150 : vector<108x8xf32>
    %152 = tpu.concatenate %85, %107, %129, %151 in 1 : vector<108x8xf32>, vector<108x8xf32>, vector<108x8xf32>, vector<108x8xf32> -> vector<108x32xf32>
    %c0_122 = arith.constant 0 : index
    %c0_123 = arith.constant 0 : index
    %c0_124 = arith.constant 0 : index
    %c0_125 = arith.constant 0 : index
    %153 = vector.load %arg11[%c0_122, %c0_123, %c0_124, %c0_125] : memref<1x1x108x32xf32, #tpu.memory_space<vmem>>, vector<1x1x108x32xf32>
    %154 = vector.shape_cast %153 : vector<1x1x108x32xf32> to vector<108x32xf32>
    %155 = vector.shape_cast %152 : vector<108x32xf32> to vector<1x1x108x32xf32>
    tpu.vector_store %arg11[%c0_122, %c0_123, %c0_124, %c0_125], %155 {strides = array<i32>} : memref<1x1x108x32xf32, #tpu.memory_space<vmem>>, vector<1x1x108x32xf32>,
    return
  }
  func.func @transform_0(%arg0: i32, %arg1: i32) -> (i32, i32, i32, i32) {
    %c0_i32 = arith.constant 0 : i32
    %c0_i32_0 = arith.constant 0 : i32
    %c0_i32_1 = arith.constant 0 : i32
    return %arg0, %arg1, %c0_i32, %c0_i32_0 : i32, i32, i32, i32
  }
  func.func @transform_1(%arg0: i32, %arg1: i32) -> (i32, i32, i32) {
    %c0_i32 = arith.constant 0 : i32
    %c0_i32_0 = arith.constant 0 : i32
    %c0_i32_1 = arith.constant 0 : i32
    %c0_i32_2 = arith.constant 0 : i32
    return %c0_i32, %c0_i32_0, %c0_i32_1 : i32, i32, i32
  }
  func.func @transform_2(%arg0: i32, %arg1: i32) -> (i32, i32) {
    %c0_i32 = arith.constant 0 : i32
    %c0_i32_0 = arith.constant 0 : i32
    %c0_i32_1 = arith.constant 0 : i32
    return %c0_i32, %c0_i32_0 : i32, i32
  }
  func.func @transform_3(%arg0: i32, %arg1: i32) -> (i32, i32) {
    %c0_i32 = arith.constant 0 : i32
    %c0_i32_0 = arith.constant 0 : i32
    %c0_i32_1 = arith.constant 0 : i32
    return %c0_i32, %c0_i32_0 : i32, i32
  }
  func.func @transform_4(%arg0: i32, %arg1: i32) -> (i32, i32, i32) {
    %c0_i32 = arith.constant 0 : i32
    %c0_i32_0 = arith.constant 0 : i32
    %c0_i32_1 = arith.constant 0 : i32
    %c0_i32_2 = arith.constant 0 : i32
    return %c0_i32, %c0_i32_0, %c0_i32_1 : i32, i32, i32
  }
  func.func @transform_5(%arg0: i32, %arg1: i32) -> (i32, i32) {
    %c0_i32 = arith.constant 0 : i32
    %c0_i32_0 = arith.constant 0 : i32
    %c0_i32_1 = arith.constant 0 : i32
    return %c0_i32, %c0_i32_0 : i32, i32
  }
  func.func @transform_6(%arg0: i32, %arg1: i32) -> (i32, i32) {
    %c0_i32 = arith.constant 0 : i32
    %c0_i32_0 = arith.constant 0 : i32
    %c0_i32_1 = arith.constant 0 : i32
    return %c0_i32, %c0_i32_0 : i32, i32
  }
  func.func @transform_7(%arg0: i32, %arg1: i32) -> (i32, i32) {
    %c0_i32 = arith.constant 0 : i32
    %c0_i32_0 = arith.constant 0 : i32
    %c0_i32_1 = arith.constant 0 : i32
    return %c0_i32, %c0_i32_0 : i32, i32
  }
  func.func @transform_8(%arg0: i32, %arg1: i32) -> (i32, i32) {
    %c0_i32 = arith.constant 0 : i32
    %c0_i32_0 = arith.constant 0 : i32
    %c0_i32_1 = arith.constant 0 : i32
    return %c0_i32, %c0_i32_0 : i32, i32
  }
  func.func @transform_9(%arg0: i32, %arg1: i32) -> (i32, i32, i32, i32) {
    %c0_i32 = arith.constant 0 : i32
    %c0_i32_0 = arith.constant 0 : i32
    %c0_i32_1 = arith.constant 0 : i32
    return %arg0, %arg1, %c0_i32, %c0_i32_0 : i32, i32, i32, i32
  }
}

</mosaic_0001>

<bundles_post_ra>
// kernel: db_head_forward.1
= control target key start
LH: loop header
LB: loop body
LE: loop exit
PB: predicated region body
PF: predicated region fallthrough
CT: control target
= control target key end

     0   :  { %s14081_s30 = smov 0   ;;  %s14083_s10 = smov 0   ;;  %s19617_s0 = inlined_call_operand.vmem [shape: bf16[2,3,162,512], index: 0, kind: input, shape index: {}]   ;;  %s19618_s1 = inlined_call_operand.vmem [shape: bf16[9,512,256], index: 1, kind: input, shape index: {}]   ;;  %s19619_s2 = inlined_call_operand.vmem [shape: f32[1,256], index: 2, kind: input, shape index: {}]   ;;  %s19620_s3 = inlined_call_operand.vmem [shape: f32[1,256], index: 3, kind: input, shape index: {}]   ;;  %s19621_s4 = inlined_call_operand.vmem [shape: bf16[4,256,256], index: 4, kind: input, shape index: {}]   ;;  %s19622_s5 = inlined_call_operand.vmem [shape: f32[1,256], index: 5, kind: input, shape index: {}]   ;;  %s19623_s6 = inlined_call_operand.vmem [shape: f32[1,256], index: 6, kind: input, shape index: {}]   ;;  %s19624_s7 = inlined_call_operand.vmem [shape: bf16[256,8], index: 7, kind: input, shape index: {}]   ;;  %s19625_s8 = inlined_call_operand.vmem [shape: f32[1,8], index: 8, kind: input, shape index: {}]   ;;  %s19626_s9 = inlined_call_operand.vmem [shape: f32[2,3,108,32], index: 9, kind: output, shape index: {}]  }
   0x1   :  { %s14085_s11 = smov 0   ;;  %s14087_s12 = smov 0  }
   0x2   :  { %s14089_s13 = smov 0  }
   0x3 LB: > { %s28_s14 = sadd.s32 1, %s14018_s11  ;;  %s31_s15 = sadd.s32 1, %s14022_s12  ;;  %s14026_s13 = sphi %s14089_s13, %s19_s13   ;;  %s14022_s12 = sphi %s14087_s12, %s19985_s12   ;;  %s14018_s11 = sphi %s14085_s11, %s19984_s11   ;;  %s14014_s10 = sphi %s14083_s10, %s19983_s10   ;;  %s14010_s30 = sphi %s14081_s30, %s19982_s30  }
   0x4   : > { %p29_p0 = scmp.ge.s32.totalorder %s28_s14, 3  ;;  %p10654_p1 = scmp.ge.s32.totalorder %s14026_s13, 1 }
   0x5   : > { %p307_p2 = scmp.lt.s32.totalorder %s14026_s13, 7 }
   0x6   : > { %s19987_s14 = smov (%p29_p0, %s28_s14), 0  ;;  %s19989_s15 = smov (!%p29_p0, %s31_s15), %s14022_s12 }
   0x7   : > { %p308_p3 = pnand %p10654_p1, %p307_p2  ;;  %p33_p4 = scmp.ge.s32.totalorder %s19989_s15, 2 }
   0x9   : > { %s19991_s15 = smov (%p33_p4, %s19989_s15), 0  ;;  %311 = sbr.rel (%p308_p3) target bundleno = 2235 (0x8bb), region = 56 }
   0xe   : > { %v12459_v0 = vld [vmem:[%s19618_s1 + $0x274] ss:$8 sps:$4 sm:$0xff]   ;;  %v12463_v2 = vld [vmem:[%s19618_s1 + $0x270] ss:$8 sps:$4 sm:$0xff]   ;;  %v12465_v4 = vld [vmem:[%s19618_s1 + $0x264] ss:$8 sps:$4 sm:$0xff]  }
   0xf   : > { %v12461_v1 = vld [vmem:[%s19618_s1 + $0x374] ss:$8 sps:$4 sm:$0xff]   ;;  %1210 = vmatprep.subr.bf16.mxu0 %v12459_v0  ;;  %v12464_v3 = vld [vmem:[%s19618_s1 + $0x370] ss:$8 sps:$4 sm:$0xff]   ;;  %v12467_v5 = vld [vmem:[%s19618_s1 + $0x364] ss:$8 sps:$4 sm:$0xff]  }
  0x10   : > { %1313 = vmatprep.subr.bf16.mxu1 %v12461_v1  ;;  %1211 = vmatpush1.bf16.msra.mxu0 %v12463_v2  ;;  %v12469_v6 = vld [vmem:[%s19618_s1 + $0x260] ss:$8 sps:$4 sm:$0xff]   ;;  %v12471_v8 = vld [vmem:[%s19618_s1 + $0x254] ss:$8 sps:$4 sm:$0xff]   ;;  %v12475_v10 = vld [vmem:[%s19618_s1 + $0x250] ss:$8 sps:$4 sm:$0xff]  }
  0x11   : > { %1314 = vmatpush1.bf16.msra.mxu1 %v12464_v3  ;;  %1212 = vmatprep.subr.bf16.mxu0 %v12465_v4  ;;  %v12470_v7 = vld [vmem:[%s19618_s1 + $0x360] ss:$8 sps:$4 sm:$0xff]   ;;  %v12473_v9 = vld [vmem:[%s19618_s1 + $0x354] ss:$8 sps:$4 sm:$0xff]   ;;  %v12476_v11 = vld [vmem:[%s19618_s1 + $0x350] ss:$8 sps:$4 sm:$0xff]  }
  0x12   : > { %1315 = vmatprep.subr.bf16.mxu1 %v12467_v5  ;;  %v12477_v12 = vld [vmem:[%s19618_s1 + $0x244] ss:$8 sps:$4 sm:$0xff]   ;;  %v12481_v14 = vld [vmem:[%s19618_s1 + $0x240] ss:$8 sps:$4 sm:$0xff]   ;;  %v12483_v16 = vld [vmem:[%s19618_s1 + $0x234] ss:$8 sps:$4 sm:$0xff]  }
  0x13   : > { %v12479_v13 = vld [vmem:[%s19618_s1 + $0x344] ss:$8 sps:$4 sm:$0xff]   ;;  %v12482_v15 = vld [vmem:[%s19618_s1 + $0x340] ss:$8 sps:$4 sm:$0xff]   ;;  %v12485_v17 = vld [vmem:[%s19618_s1 + $0x334] ss:$8 sps:$4 sm:$0xff]  }
  0x14   : > { %1213 = vmatpush1.bf16.msra.mxu0 %v12469_v6  ;;  %v12487_v18 = vld [vmem:[%s19618_s1 + $0x230] ss:$8 sps:$4 sm:$0xff]   ;;  %v12489_v20 = vld [vmem:[%s19618_s1 + $0x224] ss:$8 sps:$4 sm:$0xff]   ;;  %v12493_v22 = vld [vmem:[%s19618_s1 + $0x220] ss:$8 sps:$4 sm:$0xff]  }
  0x15   : > { %1316 = vmatpush1.bf16.msra.mxu1 %v12470_v7  ;;  %1214 = vmatprep.subr.bf16.mxu0 %v12471_v8  ;;  %v12488_v19 = vld [vmem:[%s19618_s1 + $0x330] ss:$8 sps:$4 sm:$0xff]   ;;  %v12491_v21 = vld [vmem:[%s19618_s1 + $0x324] ss:$8 sps:$4 sm:$0xff]   ;;  %v12494_v23 = vld [vmem:[%s19618_s1 + $0x320] ss:$8 sps:$4 sm:$0xff]  }
  0x16   : > { %1317 = vmatprep.subr.bf16.mxu1 %v12473_v9  ;;  %v12495_v24 = vld [vmem:[%s19618_s1 + $0x214] ss:$8 sps:$4 sm:$0xff]   ;;  %p351_p5 = scmp.lt.s32.totalorder %s14014_s10, 1  ;;  %p353_p6 = scmp.lt.s32.totalorder %s14010_s30, 2  ;;  %v12499_v26 = vld [vmem:[%s19618_s1 + $0x210] ss:$8 sps:$4 sm:$0xff]  }
  0x17   : > { %v12497_v25 = vld [vmem:[%s19618_s1 + $0x314] ss:$8 sps:$4 sm:$0xff]   ;;  %v12500_v27 = vld [vmem:[%s19618_s1 + $0x310] ss:$8 sps:$4 sm:$0xff]   ;;  %v12501_v28 = vld [vmem:[%s19618_s1 + $0x204] ss:$8 sps:$4 sm:$0xff]  }
  0x18   : > { %1215 = vmatpush1.bf16.msra.mxu0 %v12475_v10  ;;  %s19993_s10 = smov (!%p351_p5, %s14014_s10), 1  ;;  %v12503_v29 = vld [vmem:[%s19618_s1 + $0x304] ss:$8 sps:$4 sm:$0xff]   ;;  %s19995_s30 = smov (!%p353_p6, %s14010_s30), 2  ;;  %v12505_v30 = vld [vmem:[%s19618_s1 + $0x200] ss:$8 sps:$4 sm:$0xff]  }
  0x19   : > { %1318 = vmatpush1.bf16.msra.mxu1 %v12476_v11  ;;  %1216 = vmatprep.subr.bf16.mxu0 %v12477_v12  ;;  %v12506_v31 = vld [vmem:[%s19618_s1 + $0x300] ss:$8 sps:$4 sm:$0xff]   ;;  %v12507_v32 = vld [vmem:[%s19618_s1 + $0x2f4] ss:$8 sps:$4 sm:$0xff]   ;;  %s12413_s26 = smul.u32 252, %s19993_s10  ;;  %vm2057_vm1 = vcmask 1046528  }
  0x1a   : > { %1319 = vmatprep.subr.bf16.mxu1 %v12479_v13  ;;  %v12509_v33 = vld [vmem:[%s19618_s1 + $0x3f4] ss:$8 sps:$4 sm:$0xff]   ;;  %s12412_s29 = smul.u32 84, %s19995_s30  ;;  %v12511_v34 = vld [vmem:[%s19618_s1 + $0x2f0] ss:$8 sps:$4 sm:$0xff]   ;;  %vm4516_vm3 = vcmask 1045504  }
  0x1b   : > { %v12512_v35 = vld [vmem:[%s19618_s1 + $0x3f0] ss:$8 sps:$4 sm:$0xff]   ;;  %v12513_v36 = vld [vmem:[%s19618_s1 + $0x2e4] ss:$8 sps:$4 sm:$0xff]   ;;  %v12517_v38 = vld [vmem:[%s19618_s1 + $0x2e0] ss:$8 sps:$4 sm:$0xff]  }
  0x1c   : > { %1217 = vmatpush1.bf16.msra.mxu0 %v12481_v14  ;;  %v12515_v37 = vld [vmem:[%s19618_s1 + $0x3e4] ss:$8 sps:$4 sm:$0xff]   ;;  %s357_s24 = sadd.s32 %s12413_s26, %s12412_s29  ;;  %v12518_v39 = vld [vmem:[%s19618_s1 + $0x3e0] ss:$8 sps:$4 sm:$0xff]   ;;  %v12519_v40 = vld [vmem:[%s19618_s1 + $0x2d4] ss:$8 sps:$4 sm:$0xff]  }
  0x1d   : > { %1320 = vmatpush1.bf16.msra.mxu1 %v12482_v15  ;;  %1218 = vmatprep.subr.bf16.mxu0 %v12483_v16  ;;  %s10655_s19 = sshll.u32 %s357_s24, 2  ;;  %v12521_v41 = vld [vmem:[%s19618_s1 + $0x3d4] ss:$8 sps:$4 sm:$0xff]   ;;  %v12523_v42 = vld [vmem:[%s19618_s1 + $0x2d0] ss:$8 sps:$4 sm:$0xff]   ;;  %vm7135_vm4 = vcmask 1044480  }
  0x1e   : > { %1321 = vmatprep.subr.bf16.mxu1 %v12485_v17  ;;  %v12524_v43 = vld [vmem:[%s19618_s1 + $0x3d0] ss:$8 sps:$4 sm:$0xff]   ;;  %s14260_s28 = scalar_lea.vmem %s19617_s0, %s10655_s19  ;;  %v12525_v44 = vld [vmem:[%s19618_s1 + $0x2c4] ss:$8 sps:$4 sm:$0xff]   ;;  %v12529_v46 = vld [vmem:[%s19618_s1 + $0x2c0] ss:$8 sps:$4 sm:$0xff]  }
  0x1f   : > { %v12527_v45 = vld [vmem:[%s19618_s1 + $0x3c4] ss:$8 sps:$4 sm:$0xff]   ;;  %v12530_v47 = vld [vmem:[%s19618_s1 + $0x3c0] ss:$8 sps:$4 sm:$0xff]   ;;  %v12531_v49 = vld [vmem:[%s19618_s1 + $0x2b4] ss:$8 sps:$4 sm:$0xff]  }
  0x20   : > { %1219 = vmatpush1.bf16.msra.mxu0 %v12487_v18  ;;  %v370_v48 = vld [vmem:[%s14260_s28] sm:$0xff]  ;;  %v12533_v50 = vld [vmem:[%s19618_s1 + $0x3b4] ss:$8 sps:$4 sm:$0xff]   ;;  %v371_v54 = vld [vmem:[%s14260_s28 + $0x8] sm:$0xff]  ;;  %vm641_vm0 = vsmask.f32 7424 }
  0x21   : > { %1322 = vmatpush1.bf16.msra.mxu1 %v12488_v19  ;;  %1220 = vmatprep.subr.bf16.mxu0 %v12489_v20  ;;  %v372_v51 = vld [vmem:[%s14260_s28 + $0x10] sm:$0xff]  ;;  %v373_v55 = vld [vmem:[%s14260_s28 + $0x18] sm:$0xff]  ;;  %v12537_v6 = vld [vmem:[%s19618_s1 + $0x2a4] ss:$8 sps:$4 sm:$0xff]   ;;  %vm3608_vm2 = vsmask.f32 6400 }
  0x22   : > { %1323 = vmatprep.subr.bf16.mxu1 %v12491_v21  ;;  %v14282_v52 = vcombine.high %v370_v48, %v372_v51  ;;  %v14285_v53 = vld [vmem:[%s14260_s28 + $0x24] ss:$16 sps:$4 sm:$0xff]   ;;  %v14289_v56 = vcombine.high %v371_v54, %v373_v55  ;;  %v14292_v57 = vld [vmem:[%s14260_s28 + $0x2c] ss:$16 sps:$4 sm:$0xff]   ;;  %v12535_v61 = vld [vmem:[%s19618_s1 + $0x2b0] ss:$8 sps:$4 sm:$0xff]   ;;  %v14308_v4 = vcombine.low %v370_v48, %v372_v51  ;;  %v14310_v5 = vcombine.low %v371_v54, %v373_v55 }
  0x23   : > { %v662_v60 = vshll.u32 %v14285_v53, 16  ;;  %v686_v0 = vshll.u32 %v14292_v57, 16  ;;  %v12536_v1 = vld [vmem:[%s19618_s1 + $0x3b0] ss:$8 sps:$4 sm:$0xff]   ;;  %v12539_v7 = vld [vmem:[%s19618_s1 + $0x3a4] ss:$8 sps:$4 sm:$0xff]  }
  0x24   : > { %1221 = vmatpush1.bf16.msra.mxu0 %v12493_v22  ;;  %v655_v58 = vshrl.u32 %v14282_v52, 16  ;;  %v657_v59 = vshll.u32 %v14282_v52, 16  ;;  %v679_v62 = vshrl.u32 %v14289_v56, 16  ;;  %v681_v63 = vshll.u32 %v14289_v56, 16  ;;  %v12541_v10 = vld [vmem:[%s19618_s1 + $0x2a0] ss:$8 sps:$4 sm:$0xff]  }
  0x25   : > { %1324 = vmatpush1.bf16.msra.mxu1 %v12494_v23  ;;  %1222 = vmatprep.subr.bf16.mxu0 %v12495_v24  ;;  %v14306_v3 = vrot.slane %v662_v60, 1  ;;  %v688_v9 = vrot.slane %v686_v0, 1  ;;  %v14322_v12 = vld [vmem:[%s14260_s28 + $0x20] ss:$16 sps:$4 sm:$0xff]   ;;  %v12543_v14 = vld [vmem:[%s19618_s1 + $0x294] ss:$8 sps:$4 sm:$0xff]  }
  0x26   : > { %1325 = vmatprep.subr.bf16.mxu1 %v12497_v25  ;;  %v659_v2 = vrot.slane %v657_v59, 1  ;;  %v683_v8 = vrot.slane %v681_v63, 1  ;;  %v12542_v13 = vld [vmem:[%s19618_s1 + $0x3a0] ss:$8 sps:$4 sm:$0xff]   ;;  %v645_v17 = vshll.u32 %v14308_v4, 16  ;;  %v669_v19 = vshll.u32 %v14310_v5, 16 }
  0x27   : > { %v14334_v18 = vld [vmem:[%s14260_s28 + $0x28] ss:$16 sps:$4 sm:$0xff]   ;;  %v12545_v20 = vld [vmem:[%s19618_s1 + $0x394] ss:$8 sps:$4 sm:$0xff]   ;;  %v650_v24 = vshll.u32 %v14322_v12, 16  ;;  %v690_v48 = vshrl.u32 %v14322_v12, 16 }
  0x28   : > { %1223 = vmatpush1.bf16.msra.mxu0 %v12499_v26  ;;  %v660_v11 = vor.u32 %v659_v2, %v655_v58  ;;  %v684_v15 = vor.u32 %v683_v8, %v679_v62  ;;  %v12547_v22 = vld [vmem:[%s19618_s1 + $0x290] ss:$8 sps:$4 sm:$0xff]   ;;  %v12549_v25 = vld [vmem:[%s19618_s1 + $0x284] ss:$8 sps:$4 sm:$0xff]   ;;  %v706_v63 = vshrl.u32 %v14334_v18, 16  ;;  %s14028_s27 = smov 8  }
  0x29   : > { %1326 = vmatpush1.bf16.msra.mxu1 %v12500_v27  ;;  %1224 = vmatprep.subr.bf16.mxu0 %v12501_v28  ;;  %v12548_v23 = vld [vmem:[%s19618_s1 + $0x390] ss:$8 sps:$4 sm:$0xff]   ;;  %v12551_v26 = vld [vmem:[%s19618_s1 + $0x384] ss:$8 sps:$4 sm:$0xff]   ;;  %v643_v27 = vshrl.u32 %v14308_v4, 16  ;;  %v647_v28 = vrot.slane %v645_v17, 1 }
  0x2a   : > { %1327 = vmatprep.subr.bf16.mxu1 %v12503_v29  ;;  %v665_v16 = vsel %vm641_vm0, %v660_v11, %v14306_v3  ;;  %v689_v21 = vsel %vm641_vm0, %v684_v15, %v688_v9  ;;  %v667_v29 = vshrl.u32 %v14310_v5, 16  ;;  %v12568_v51 = vld [vmem:[%s19618_s1 + $0x170] ss:$8 sps:$4 sm:$0xff]   ;;  %v12573_v62 = vld [vmem:[%s19618_s1 + $0x64] ss:$8 sps:$4 sm:$0xff]   ;;  %vm10494_vm6 = vcmask 64512  }
  0x2b   : > { %1242 = vmatprep.mubr.bf16.mxu0 %v665_v16  ;;  %1345 = vmatprep.mubr.bf16.mxu1 %v689_v21  ;;  %v12571_v2 = vld [vmem:[%s19618_s1 + $0x60] ss:$8 sps:$4 sm:$0xff]   ;;  %v14411_v8 = vld [vmem:[%s14260_s28 + $0x64] ss:$16 sps:$4 sm:$0xff]   ;;  %vm6207_vm5 = vsmask.f32 5376 }
  0x2c   : > { %1225 = vmatpush1.bf16.msra.mxu0 %v12505_v30  ;;  %v671_v30 = vrot.slane %v669_v19, 1  ;;  %v14421_v15 = vld [vmem:[%s14260_s28 + $0x60] ss:$16 sps:$4 sm:$0xff]   ;;  %v734_v19 = vshll.u32 %v14411_v8, 16  ;;  %v12579_v21 = vld [vmem:[%s19618_s1 + $0x54] ss:$8 sps:$4 sm:$0xff]  }
  0x2d   : > { %1328 = vmatpush1.bf16.msra.mxu1 %v12506_v31  ;;  %1226 = vmatprep.subr.bf16.mxu0 %v12507_v32  ;;  %v674_v31 = vshll.u32 %v14334_v18, 16  ;;  %v14358_v32 = vld [vmem:[%s14260_s28 + $0x44] ss:$16 sps:$4 sm:$0xff]   ;;  %s14030_s22 = smov 24   ;;  %s12414_s23 = smul.u32 14, %s19995_s30  ;;  %vm10509_vm7 = vcmask 130048  }
  0x2e   : > { %1329 = vmatprep.subr.bf16.mxu1 %v12509_v33  ;;  %v12553_v33 = vld [vmem:[%s19618_s1 + $0x280] ss:$8 sps:$4 sm:$0xff]   ;;  %v730_v11 = vshrl.u32 %v14358_v32, 16  ;;  %vm10524_vm8 = vcmask 195584   ;;  %vm10539_vm9 = vcmask 261120   ;;  %vm10553_vm10 = vcmask 257024  }
  0x30   : > { %1227 = vmatpush2.bf16.msra.mxu0 %v12511_v34  ;;  %v12554_v34 = vld [vmem:[%s19618_s1 + $0x380] ss:$8 sps:$4 sm:$0xff]  }
  0x31   : > { %1330 = vmatpush2.bf16.msra.mxu1 %v12512_v35  ;;  %1228 = vmatprep.subr.bf16.mxu0 %v12513_v36  ;;  %v652_v35 = vrot.slane %v650_v24, 1  ;;  %v14367_v36 = vld [vmem:[%s14260_s28 + $0x4c] ss:$16 sps:$4 sm:$0xff]   ;;  %v12577_v24 = vld [vmem:[%s19618_s1 + $0x50] ss:$8 sps:$4 sm:$0xff]  }
  0x32   : > { %1331 = vmatprep.subr.bf16.mxu1 %v12515_v37  ;;  %v12567_v37 = vld [vmem:[%s19618_s1 + $0x74] ss:$8 sps:$4 sm:$0xff]  }
  0x34   : > { %1229 = vmatpush2.bf16.msra.mxu0 %v12517_v38  ;;  %v12570_v38 = vld [vmem:[%s19618_s1 + $0x174] ss:$8 sps:$4 sm:$0xff]  }
  0x35   : > { %1332 = vmatpush2.bf16.msra.mxu1 %v12518_v39  ;;  %1230 = vmatprep.subr.bf16.mxu0 %v12519_v40  ;;  %v698_v39 = vshrl.u32 %v14285_v53, 16  ;;  %v702_v40 = vshll.u32 %v14358_v32, 16 }
  0x36   : > { %1333 = vmatprep.subr.bf16.mxu1 %v12521_v41  ;;  %v714_v41 = vshrl.u32 %v14292_v57, 16 }
  0x37   : > { %v700_v54 = vor.u32 %v698_v39, %v14306_v3  ;;  %v704_v55 = vrot.slane %v702_v40, 1  ;;  %v12574_v3 = vld [vmem:[%s19618_s1 + $0x160] ss:$8 sps:$4 sm:$0xff]   ;;  %v12594_v39 = vld [vmem:[%s19618_s1 + $0x144] ss:$8 sps:$4 sm:$0xff]  }
  0x38   : > { %1231 = vmatpush2.bf16.msra.mxu0 %v12523_v42  ;;  %v14379_v42 = vld [vmem:[%s14260_s28 + $0x40] ss:$16 sps:$4 sm:$0xff]   ;;  %v716_v58 = vor.u32 %v714_v41, %v688_v9 }
  0x39   : > { %1334 = vmatpush2.bf16.msra.mxu1 %v12524_v43  ;;  %1232 = vmatprep.subr.bf16.mxu0 %v12525_v44  ;;  %v648_v43 = vor.u32 %v647_v28, %v643_v27  ;;  %v672_v44 = vor.u32 %v671_v30, %v667_v29  ;;  %v705_v9 = vsel %vm641_vm0, %v700_v54, %v704_v55  ;;  %v736_v28 = vrot.slane %v734_v19, 1  ;;  %v12589_v40 = vld [vmem:[%s19618_s1 + $0x40] ss:$8 sps:$4 sm:$0xff]   ;;  %v12609_v19 = vld [vmem:[%s19618_s1 + $0x24] ss:$8 sps:$4 sm:$0xff]  }
  0x3a   : > { %1335 = vmatprep.subr.bf16.mxu1 %v12527_v45  ;;  %v676_v45 = vrot.slane %v674_v31, 1  ;;  %v732_v27 = vor.u32 %v730_v11, %v704_v55  ;;  %v12580_v31 = vld [vmem:[%s19618_s1 + $0x150] ss:$8 sps:$4 sm:$0xff]   ;;  %v12592_v41 = vld [vmem:[%s19618_s1 + $0x140] ss:$8 sps:$4 sm:$0xff]  }
  0x3b   : > { %v653_v60 = vsel %vm641_vm0, %v648_v43, %v652_v35 }
  0x3c   : > { %1233 = vmatpush2.bf16.msra.mxu0 %v12529_v46  ;;  %v718_v46 = vshll.u32 %v14367_v36, 16  ;;  %v708_v16 = vor.u32 %v706_v63, %v676_v45 }
  0x3d   : > { %1336 = vmatpush2.bf16.msra.mxu1 %v12530_v47  ;;  %1234 = vmatprep.subr.bf16.mxu0 %v12531_v49  ;;  %v14383_v47 = vld [vmem:[%s14260_s28 + $0x48] ss:$16 sps:$4 sm:$0xff]   ;;  %v694_v49 = vshll.u32 %v14379_v42, 16 }
  0x3e   : > { %1337 = vmatprep.subr.bf16.mxu1 %v12533_v50  ;;  %v12565_v50 = vld [vmem:[%s19618_s1 + $0x70] ss:$8 sps:$4 sm:$0xff]   ;;  %v720_v59 = vrot.slane %v718_v46, 1  ;;  %v710_v0 = vshll.u32 %v14383_v47, 16  ;;  %v737_v46 = vsel %vm641_vm0, %v732_v27, %v736_v28  ;;  %v12615_v27 = vld [vmem:[%s19618_s1 + $0x14] ss:$8 sps:$4 sm:$0xff]  }
  0x40   : > { %1235 = vmatpush2.bf16.msra.mxu0 %v12535_v61  ;;  %v677_v61 = vsel %vm641_vm0, %v672_v44, %v676_v45  ;;  %v712_v17 = vrot.slane %v710_v0, 1  ;;  %v14459_v44 = vld [vmem:[%s14260_s28 + $0x84] ss:$16 sps:$4 sm:$0xff]   ;;  %v762_v45 = vshrl.u32 %v14411_v8, 16  ;;  %v12595_v0 = vld [vmem:[%s19618_s1 + $0x30] ss:$8 sps:$4 sm:$0xff]  }
  0x41   : > { %1338 = vmatpush2.bf16.msra.mxu1 %v12536_v1  ;;  %1236 = vmatprep.subr.bf16.mxu0 %v12537_v6  ;;  %v12576_v1 = vld [vmem:[%s19618_s1 + $0x164] ss:$8 sps:$4 sm:$0xff]   ;;  %v692_v6 = vor.u32 %v690_v48, %v652_v35  ;;  %v738_v35 = vshrl.u32 %v14383_v47, 16 }
  0x42   : > { %1339 = vmatprep.subr.bf16.mxu1 %v12539_v7  ;;  %v696_v7 = vrot.slane %v694_v49, 1  ;;  %v14465_v49 = vld [vmem:[%s14260_s28 + $0x8c] ss:$16 sps:$4 sm:$0xff]  }
  0x43   : > { %v740_v55 = vor.u32 %v738_v35, %v712_v17  ;;  %v782_v63 = vshll.u32 %v14465_v49, 16 }
  0x44   : > { %1237 = vmatpush2.bf16.msra.mxu0 %v12541_v10  ;;  %v721_v10 = vsel %vm641_vm0, %v716_v58, %v720_v59 }
  0x45   : > { %1340 = vmatpush2.bf16.msra.mxu1 %v12542_v13  ;;  %1238 = vmatprep.subr.bf16.mxu0 %v12543_v14  ;;  %v14417_v13 = vld [vmem:[%s14260_s28 + $0x6c] ss:$16 sps:$4 sm:$0xff]   ;;  %v746_v14 = vshrl.u32 %v14367_v36, 16 }
  0x46   : > { %1341 = vmatprep.subr.bf16.mxu1 %v12545_v20  ;;  %v14425_v20 = vld [vmem:[%s14260_s28 + $0x68] ss:$16 sps:$4 sm:$0xff]  }
  0x47   : > { %v748_v29 = vor.u32 %v746_v14, %v720_v59  ;;  %v766_v59 = vshll.u32 %v14459_v44, 16 }
  0x48   : > { %1239 = vmatpush2.bf16.msra.mxu0 %v12547_v22  ;;  %v12582_v22 = vld [vmem:[%s19618_s1 + $0x154] ss:$8 sps:$4 sm:$0xff]  }
  0x49   : > { %1342 = vmatpush2.bf16.msra.mxu1 %v12548_v23  ;;  %1240 = vmatprep.subr.bf16.mxu0 %v12549_v25  ;;  %v750_v23 = vshll.u32 %v14417_v13, 16  ;;  %v697_v25 = vsel %vm641_vm0, %v692_v6, %v696_v7 }
  0x4a   : > { %1343 = vmatprep.subr.bf16.mxu1 %v12551_v26  ;;  %v726_v26 = vshll.u32 %v14421_v15, 16 }
  0x4b   : > { %v752_v30 = vrot.slane %v750_v23, 1  ;;  %v12610_v23 = vld [vmem:[%s19618_s1 + $0x120] ss:$8 sps:$4 sm:$0xff]  }
  0x4c   : > { %1241 = vmatpush2.bf16.msra.mxu0 %v12553_v33  ;;  %v713_v33 = vsel %vm641_vm0, %v708_v16, %v712_v17  ;;  %v728_v43 = vrot.slane %v726_v26, 1  ;;  %v754_v16 = vshrl.u32 %v14421_v15, 16  ;;  %v770_v17 = vshrl.u32 %v14425_v20, 16 }
  0x4d   : > { %1344 = vmatpush2.bf16.msra.mxu1 %v12554_v34  ;;  %1774 = vmatprep.subr.bf16.mxu0 %v12567_v37  ;;  %v722_v34 = vshrl.u32 %v14379_v42, 16  ;;  %v742_v37 = vshll.u32 %v14425_v20, 16  ;;  %v753_v48 = vsel %vm641_vm0, %v748_v29, %v752_v30  ;;  %v794_v26 = vshrl.u32 %v14459_v44, 16 }
  0x4e   : > { %1877 = vmatprep.subr.bf16.mxu1 %v12570_v38  ;;  %v12591_v38 = vld [vmem:[%s19618_s1 + $0x44] ss:$8 sps:$4 sm:$0xff]  }
  0x4f   : > { %1243 = vmatmul.mubr.bf16.vlgmr.msra.gmra.mxu0 %v653_v60  ;;  %v724_v54 = vor.u32 %v722_v34, %v696_v7  ;;  %v744_v58 = vrot.slane %v742_v37, 1  ;;  %v14473_v60 = vld [vmem:[%s14260_s28 + $0x88] ss:$16 sps:$4 sm:$0xff]   ;;  %v784_v7 = vrot.slane %v782_v63, 1  ;;  %v756_v34 = vor.u32 %v754_v16, %v728_v43 }
  0x50   : > { %1346 = vmatmul.mubr.bf16.vlgmr.msra.gmra.mxu1 %v677_v61  ;;  %1775 = vmatpush1.bf16.msra.mxu0 %v12565_v50  ;;  %v778_v50 = vshrl.u32 %v14417_v13, 16  ;;  %v12597_v61 = vld [vmem:[%s19618_s1 + $0x34] ss:$8 sps:$4 sm:$0xff]  }
  0x51   : > { %1878 = vmatpush1.bf16.msra.mxu1 %v12568_v51  ;;  %1776 = vmatprep.subr.bf16.mxu0 %v12573_v62  ;;  %v14469_v51 = vld [vmem:[%s14260_s28 + $0x80] ss:$16 sps:$4 sm:$0xff]   ;;  %v12600_v62 = vld [vmem:[%s19618_s1 + $0x134] ss:$8 sps:$4 sm:$0xff]   ;;  %v729_v11 = vsel %vm641_vm0, %v724_v54, %v728_v43  ;;  %v745_v14 = vsel %vm641_vm0, %v740_v55, %v744_v58  ;;  %v772_v35 = vor.u32 %v770_v17, %v744_v58 }
  0x52   : > { %1879 = vmatprep.subr.bf16.mxu1 %v12576_v1  ;;  %1252 = vmatprep.mubr.bf16.mxu0 %v705_v9  ;;  %v764_v1 = vor.u32 %v762_v45, %v736_v28  ;;  %v780_v6 = vor.u32 %v778_v50, %v752_v30  ;;  %v774_v9 = vshll.u32 %v14473_v60, 16  ;;  %v786_v45 = vshrl.u32 %v14469_v51, 16 }
  0x53   : > { %1355 = vmatprep.mubr.bf16.mxu1 %v721_v10  ;;  %v12598_v10 = vld [vmem:[%s19618_s1 + $0x130] ss:$8 sps:$4 sm:$0xff]  }
  0x54   : > { %1777 = vmatpush1.bf16.msra.mxu0 %v12571_v2  ;;  %v758_v2 = vshll.u32 %v14469_v51, 16  ;;  %v785_v29 = vsel %vm641_vm0, %v780_v6, %v784_v7  ;;  %v776_v30 = vrot.slane %v774_v9, 1 }
  0x55   : > { %1880 = vmatpush1.bf16.msra.mxu1 %v12574_v3  ;;  %1778 = vmatprep.subr.bf16.mxu0 %v12579_v21  ;;  %v768_v3 = vrot.slane %v766_v59, 1  ;;  %v12612_v21 = vld [vmem:[%s19618_s1 + $0x124] ss:$8 sps:$4 sm:$0xff]   ;;  %v12613_v59 = vld [vmem:[%s19618_s1 + $0x10] ss:$8 sps:$4 sm:$0xff]  }
  0x56   : > { %1881 = vmatprep.subr.bf16.mxu1 %v12582_v22  ;;  %v12607_v22 = vld [vmem:[%s19618_s1 + $0x20] ss:$8 sps:$4 sm:$0xff]   ;;  %v777_v63 = vsel %vm641_vm0, %v772_v35, %v776_v30 }
  0x57   : > { %1253 = vmatmul.mubr.bf16.gmra.mxu0 %v697_v25  ;;  %v14507_v25 = vld [vmem:[%s14260_s28 + $0xa4] ss:$16 sps:$4 sm:$0xff]   ;;  %v769_v28 = vsel %vm641_vm0, %v764_v1, %v768_v3  ;;  %v796_v43 = vor.u32 %v794_v26, %v768_v3  ;;  %v12625_v3 = vld [vmem:[%s19618_s1] ss:$8 sps:$4 sm:$0xff]  }
  0x58   : > { %1356 = vmatmul.mubr.bf16.gmra.mxu1 %v713_v33  ;;  %1779 = vmatpush1.bf16.msra.mxu0 %v12577_v24  ;;  %v760_v24 = vrot.slane %v758_v2, 1  ;;  %v810_v33 = vshrl.u32 %v14465_v49, 16  ;;  %v798_v37 = vshll.u32 %v14507_v25, 16  ;;  %v12630_v1 = vld [vmem:[%s19618_s1 + $0x104] ss:$8 sps:$4 sm:$0xff]  }
  0x59   : > { %1882 = vmatpush1.bf16.msra.mxu1 %v12580_v31  ;;  %1780 = vmatprep.subr.bf16.mxu0 %v12591_v38  ;;  %v14516_v31 = vld [vmem:[%s14260_s28 + $0xac] ss:$16 sps:$4 sm:$0xff]   ;;  %v14521_v38 = vld [vmem:[%s14260_s28 + $0xa0] ss:$16 sps:$4 sm:$0xff]  }
  0x5a   : > { %1883 = vmatprep.subr.bf16.mxu1 %v12594_v39  ;;  %1262 = vmatprep.mubr.bf16.mxu0 %v737_v46  ;;  %v14524_v39 = vld [vmem:[%s14260_s28 + $0xa8] ss:$16 sps:$4 sm:$0xff]   ;;  %v802_v46 = vshrl.u32 %v14473_v60, 16  ;;  %v790_v50 = vshll.u32 %v14521_v38, 16  ;;  %v812_v55 = vor.u32 %v810_v33, %v784_v7  ;;  %v788_v2 = vor.u32 %v786_v45, %v760_v24  ;;  %v12633_v26 = vld [vmem:[%s19618_s1 + $0xf4] ss:$8 sps:$4 sm:$0xff]  }
  0x5b   : > { %1365 = vmatprep.mubr.bf16.mxu1 %v753_v48  ;;  %v800_v48 = vrot.slane %v798_v37, 1  ;;  %v806_v54 = vshll.u32 %v14524_v39, 16  ;;  %v12645_v45 = vld [vmem:[%s19618_s1 + $0xe4] ss:$8 sps:$4 sm:$0xff]  }
  0x5c   : > { %1781 = vmatpush1.bf16.msra.mxu0 %v12589_v40  ;;  %v12618_v40 = vld [vmem:[%s19618_s1 + $0x114] ss:$8 sps:$4 sm:$0xff]   ;;  %v792_v7 = vrot.slane %v790_v50, 1  ;;  %v804_v9 = vor.u32 %v802_v46, %v776_v30 }
  0x5d   : > { %1884 = vmatpush1.bf16.msra.mxu1 %v12592_v41  ;;  %1782 = vmatprep.subr.bf16.mxu0 %v12597_v61  ;;  %v814_v41 = vshll.u32 %v14516_v31, 16  ;;  %v12616_v61 = vld [vmem:[%s19618_s1 + $0x110] ss:$8 sps:$4 sm:$0xff]   ;;  %v801_v6 = vsel %vm641_vm0, %v796_v43, %v800_v48 }
  0x5e   : > { %1885 = vmatprep.subr.bf16.mxu1 %v12600_v62  ;;  %v761_v62 = vsel %vm641_vm0, %v756_v34, %v760_v24  ;;  %v12628_v24 = vld [vmem:[%s19618_s1 + $0x100] ss:$8 sps:$4 sm:$0xff]   ;;  %v12631_v34 = vld [vmem:[%s19618_s1 + $0xf0] ss:$8 sps:$4 sm:$0xff]   ;;  %v793_v35 = vsel %vm641_vm0, %v788_v2, %v792_v7 }
  0x5f   : > { %1263 = vmatmul.mubr.bf16.gmra.mxu0 %v729_v11  ;;  %v816_v58 = vrot.slane %v814_v41, 1  ;;  %v14553_v11 = vld [vmem:[%s14260_s28 + $0xc0] sm:$0xff]  ;;  %v12634_v41 = vld [vmem:[%s19618_s1 + $0x1f0] ss:$8 sps:$4 sm:$0xff]  }
  0x60   : > { %1366 = vmatmul.mubr.bf16.gmra.mxu1 %v745_v14  ;;  %1783 = vmatpush1.bf16.msra.mxu0 %v12595_v0  ;;  %v12627_v0 = vld [vmem:[%s19618_s1 + $0x4] ss:$8 sps:$4 sm:$0xff]   ;;  %v462_v14 = vld [vmem:[%s14260_s28 + $0xd0] sm:$0x77] }
  0x61   : > { %1886 = vmatpush1.bf16.msra.mxu1 %v12598_v10  ;;  %1784 = vmatprep.subr.bf16.mxu0 %v12609_v19  ;;  %v808_v10 = vrot.slane %v806_v54, 1  ;;  %v817_v16 = vsel %vm641_vm0, %v812_v55, %v816_v58  ;;  %v14558_v17 = vcombine.high %v14553_v11, %v462_v14  ;;  %v826_v19 = vshrl.u32 %v14507_v25, 16 }
  0x62   : > { %1887 = vmatprep.subr.bf16.mxu1 %v12612_v21  ;;  %1272 = vmatprep.mubr.bf16.mxu0 %v769_v28  ;;  %v14562_v21 = vld [vmem:[%s14260_s28 + $0xc8] sm:$0xff]  ;;  %v14576_v28 = vcombine.low %v14553_v11, %v462_v14  ;;  %v818_v54 = vshrl.u32 %v14521_v38, 16  ;;  %v12651_v14 = vld [vmem:[%s19618_s1 + $0xd4] ss:$8 sps:$4 sm:$0xff]  }
  0x63   : > { %1375 = vmatprep.mubr.bf16.mxu1 %v785_v29  ;;  %v12636_v29 = vld [vmem:[%s19618_s1 + $0x1f4] ss:$8 sps:$4 sm:$0xff]   ;;  %v830_v30 = vshll.u32 %v14558_v17, 16  ;;  %v809_v37 = vsel %vm641_vm0, %v804_v9, %v808_v10  ;;  %v828_v46 = vor.u32 %v826_v19, %v800_v48  ;;  %v12643_v48 = vld [vmem:[%s19618_s1 + $0xe0] ss:$8 sps:$4 sm:$0xff]   ;;  %v853_v19 = vshrl.u32 %v14558_v17, 16 }
  0x64   : > { %1785 = vmatpush1.bf16.msra.mxu0 %v12607_v22  ;;  %v463_v22 = vld [vmem:[%s14260_s28 + $0xd8] sm:$0x77]  ;;  %v820_v2 = vor.u32 %v818_v54, %v792_v7 }
  0x65   : > { %1888 = vmatpush1.bf16.msra.mxu1 %v12610_v23  ;;  %1786 = vmatprep.subr.bf16.mxu0 %v12615_v27  ;;  %v842_v23 = vshrl.u32 %v14516_v31, 16  ;;  %v14573_v27 = vcombine.high %v14562_v21, %v463_v22  ;;  %v14583_v33 = vcombine.low %v14562_v21, %v463_v22  ;;  %v832_v43 = vrot.slane %v830_v30, 1  ;;  %v12649_v7 = vld [vmem:[%s19618_s1 + $0xd0] ss:$8 sps:$4 sm:$0xff]  }
  0x66   : > { %1889 = vmatprep.subr.bf16.mxu1 %v12618_v40 }
  0x67   : > { %1273 = vmatmul.mubr.bf16.gmra.mxu0 %v761_v62  ;;  %v846_v40 = vshll.u32 %v14573_v27, 16  ;;  %v844_v50 = vor.u32 %v842_v23, %v816_v58  ;;  %v838_v62 = vshll.u32 %v14583_v33, 16  ;;  %v833_v58 = vsel %vm641_vm0, %v828_v46, %v832_v43  ;;  %v12670_v46 = vld [vmem:[%s19618_s1 + $0x1b4] ss:$8 sps:$4 sm:$0xff]  }
  0x68   : > { %1376 = vmatmul.mubr.bf16.gmra.mxu1 %v777_v63  ;;  %1787 = vmatpush1.bf16.msra.mxu0 %v12613_v59  ;;  %v822_v59 = vshll.u32 %v14576_v28, 16  ;;  %v12648_v63 = vld [vmem:[%s19618_s1 + $0x1e4] ss:$8 sps:$4 sm:$0xff]   ;;  %v859_v22 = vshrl.u32 %v14573_v27, 16  ;;  %v855_v30 = vor.u32 %v853_v19, %v832_v43  ;;  %v12665_v43 = vld [vmem:[%s19618_s1 + $0xb0] ss:$8 sps:$4 sm:$0xff]  }
  0x69   : > { %1890 = vmatpush1.bf16.msra.mxu1 %v12616_v61  ;;  %1788 = vmatprep.subr.bf16.mxu0 %v12627_v0  ;;  %v848_v55 = vrot.slane %v846_v40, 1  ;;  %v834_v61 = vshrl.u32 %v14524_v39, 16  ;;  %v840_v9 = vrot.slane %v838_v62, 1  ;;  %v856_v40 = vshrl.u32 %v14583_v33, 16  ;;  %v12671_v62 = vld [vmem:[%s19618_s1 + $0xa0] ss:$8 sps:$4 sm:$0xff]  }
  0x6a   : > { %1891 = vmatprep.subr.bf16.mxu1 %v12630_v1  ;;  %1282 = vmatprep.mubr.bf16.mxu0 %v801_v6  ;;  %v12646_v1 = vld [vmem:[%s19618_s1 + $0x1e0] ss:$8 sps:$4 sm:$0xff]   ;;  %v12697_v19 = vld [vmem:[%s19618_s1 + $0x464] ss:$8 sps:$4 sm:$0xff]  }
  0x6b   : > { %1385 = vmatprep.mubr.bf16.mxu1 %v817_v16  ;;  %v849_v0 = vsel %vm641_vm0, %v844_v50, %v848_v55  ;;  %v836_v6 = vor.u32 %v834_v61, %v808_v10  ;;  %v12654_v16 = vld [vmem:[%s19618_s1 + $0x1d4] ss:$8 sps:$4 sm:$0xff]   ;;  %v12652_v10 = vld [vmem:[%s19618_s1 + $0x1d0] ss:$8 sps:$4 sm:$0xff]   ;;  %v858_v54 = vor.u32 %v856_v40, %v840_v9  ;;  %v12676_v61 = vld [vmem:[%s19618_s1 + $0x1a4] ss:$8 sps:$4 sm:$0xff]  }
  0x6c   : > { %1789 = vmatpush1.bf16.msra.mxu0 %v12625_v3  ;;  %v824_v3 = vrot.slane %v822_v59, 1  ;;  %v12673_v59 = vld [vmem:[%s19618_s1 + $0xa4] ss:$8 sps:$4 sm:$0xff]   ;;  %v12727_v40 = vld [vmem:[%s19618_s1 + $0x414] ss:$8 sps:$4 sm:$0xff]  }
  0x6d   : > { %1892 = vmatpush1.bf16.msra.mxu1 %v12628_v24  ;;  %1790 = vmatprep.subr.bf16.mxu0 %v12633_v26  ;;  %v841_v24 = vsel %vm641_vm0, %v836_v6, %v840_v9  ;;  %v12661_v26 = vld [vmem:[%s19618_s1 + $0xc4] ss:$8 sps:$4 sm:$0xff]   ;;  %v12691_v6 = vld [vmem:[%s19618_s1 + $0x474] ss:$8 sps:$4 sm:$0xff]  }
  0x6e   : > { %1893 = vmatprep.subr.bf16.mxu1 %v12636_v29  ;;  %v825_v23 = vsel %vm641_vm0, %v820_v2, %v824_v3  ;;  %v12664_v29 = vld [vmem:[%s19618_s1 + $0x1c4] ss:$8 sps:$4 sm:$0xff]   ;;  %v12694_v9 = vld [vmem:[%s19618_s1 + $0x574] ss:$8 sps:$4 sm:$0xff]  }
  0x6f   : > { %1283 = vmatmul.mubr.bf16.gmra.mxu0 %v793_v35  ;;  %v12659_v35 = vld [vmem:[%s19618_s1 + $0xc0] ss:$8 sps:$4 sm:$0xff]   ;;  %v12685_v2 = vld [vmem:[%s19618_s1 + $0x84] ss:$8 sps:$4 sm:$0xff]  }
  0x70   : > { %1386 = vmatmul.mubr.bf16.gmra.mxu1 %v809_v37  ;;  %1791 = vmatpush2.bf16.msra.mxu0 %v12631_v34  ;;  %v861_v34 = vor.u32 %v859_v22, %v848_v55  ;;  %v850_v37 = vshrl.u32 %v14576_v28, 16  ;;  %v12668_v55 = vld [vmem:[%s19618_s1 + $0x1b0] ss:$8 sps:$4 sm:$0xff]   ;;  %v12700_v22 = vld [vmem:[%s19618_s1 + $0x564] ss:$8 sps:$4 sm:$0xff]  }
  0x71   : > { %1894 = vmatpush2.bf16.msra.mxu1 %v12634_v41  ;;  %1792 = vmatprep.subr.bf16.mxu0 %v12645_v45  ;;  %v12662_v41 = vld [vmem:[%s19618_s1 + $0x1c0] ss:$8 sps:$4 sm:$0xff]   ;;  %v12667_v45 = vld [vmem:[%s19618_s1 + $0xb4] ss:$8 sps:$4 sm:$0xff]  }
  0x72   : > { %1895 = vmatprep.subr.bf16.mxu1 %v12648_v63  ;;  %1292 = vmatprep.mubr.bf16.mxu0 %v833_v58  ;;  %v852_v50 = vor.u32 %v850_v37, %v824_v3  ;;  %v12674_v63 = vld [vmem:[%s19618_s1 + $0x1a0] ss:$8 sps:$4 sm:$0xff]   ;;  %v12682_v58 = vld [vmem:[%s19618_s1 + $0x194] ss:$8 sps:$4 sm:$0xff]  }
  0x73   : > { %1395 = vmatprep.mubr.bf16.mxu1 %v849_v0  ;;  %v12677_v0 = vld [vmem:[%s19618_s1 + $0x90] ss:$8 sps:$4 sm:$0xff]   ;;  %v12686_v3 = vld [vmem:[%s19618_s1 + $0x180] ss:$8 sps:$4 sm:$0xff]  }
  0x74   : > { %1793 = vmatpush2.bf16.msra.mxu0 %v12643_v48  ;;  %v12679_v48 = vld [vmem:[%s19618_s1 + $0x94] ss:$8 sps:$4 sm:$0xff]   ;;  %v12722_v37 = vld [vmem:[%s19618_s1 + $0x520] ss:$8 sps:$4 sm:$0xff]  }
  0x75   : > { %1896 = vmatpush2.bf16.msra.mxu1 %v12646_v1  ;;  %1794 = vmatprep.subr.bf16.mxu0 %v12651_v14  ;;  %v12680_v1 = vld [vmem:[%s19618_s1 + $0x190] ss:$8 sps:$4 sm:$0xff]  }
  0x76   : > { %1897 = vmatprep.subr.bf16.mxu1 %v12654_v16  ;;  %v12689_v14 = vld [vmem:[%s19618_s1 + $0x470] ss:$8 sps:$4 sm:$0xff]  }
  0x77   : > { %1293 = vmatmul.mubr.bf16.gmra.mxu0 %v825_v23  ;;  %v12692_v16 = vld [vmem:[%s19618_s1 + $0x570] ss:$8 sps:$4 sm:$0xff]   ;;  %v12703_v23 = vld [vmem:[%s19618_s1 + $0x454] ss:$8 sps:$4 sm:$0xff]  }
  0x78   : > { %1396 = vmatmul.mubr.bf16.gmra.mxu1 %v841_v24  ;;  %1795 = vmatpush2.bf16.msra.mxu0 %v12649_v7  ;;  %v12695_v7 = vld [vmem:[%s19618_s1 + $0x460] ss:$8 sps:$4 sm:$0xff]   ;;  %v12704_v24 = vld [vmem:[%s19618_s1 + $0x550] ss:$8 sps:$4 sm:$0xff]  }
  0x79   : > { %1898 = vmatpush2.bf16.msra.mxu1 %v12652_v10  ;;  %1796 = vmatprep.subr.bf16.mxu0 %v12661_v26  ;;  %v12698_v10 = vld [vmem:[%s19618_s1 + $0x560] ss:$8 sps:$4 sm:$0xff]   ;;  %v12709_v26 = vld [vmem:[%s19618_s1 + $0x444] ss:$8 sps:$4 sm:$0xff]  }
  0x7a   : > { %1899 = vmatprep.subr.bf16.mxu1 %v12664_v29  ;;  %1302 = vmatprep.mubr.bf16.mxu0 %v855_v30  ;;  %v12710_v29 = vld [vmem:[%s19618_s1 + $0x540] ss:$8 sps:$4 sm:$0xff]   ;;  %v12715_v30 = vld [vmem:[%s19618_s1 + $0x434] ss:$8 sps:$4 sm:$0xff]  }
  0x7b   : > { %1405 = vmatprep.mubr.bf16.mxu1 %v861_v34  ;;  %v12716_v34 = vld [vmem:[%s19618_s1 + $0x530] ss:$8 sps:$4 sm:$0xff]  }
  0x7c   : > { %1797 = vmatpush2.bf16.msra.mxu0 %v12659_v35  ;;  %v12721_v35 = vld [vmem:[%s19618_s1 + $0x424] ss:$8 sps:$4 sm:$0xff]  }
  0x7d   : > { %1900 = vmatpush2.bf16.msra.mxu1 %v12662_v41  ;;  %1798 = vmatprep.subr.bf16.mxu0 %v12667_v45  ;;  %v12728_v41 = vld [vmem:[%s19618_s1 + $0x510] ss:$8 sps:$4 sm:$0xff]   ;;  %v12733_v45 = vld [vmem:[%s19618_s1 + $0x404] ss:$8 sps:$4 sm:$0xff]  }
  0x7e   : > { %1901 = vmatprep.subr.bf16.mxu1 %v12670_v46  ;;  %v12734_v46 = vld [vmem:[%s19618_s1 + $0x500] ss:$8 sps:$4 sm:$0xff]  }
  0x7f   : > { %1303 = vmatmul.mubr.bf16.gmra.mxu0 %v852_v50  ;;  %v12740_v50 = vld [vmem:[%s19618_s1 + $0x5f0] ss:$8 sps:$4 sm:$0xff]  }
  0x80   : > { %1406 = vmatmul.mubr.bf16.gmra.mxu1 %v858_v54  ;;  %1799 = vmatpush2.bf16.msra.mxu0 %v12665_v43  ;;  %v12739_v43 = vld [vmem:[%s19618_s1 + $0x4f4] ss:$8 sps:$4 sm:$0xff]   ;;  %v12745_v54 = vld [vmem:[%s19618_s1 + $0x4e4] ss:$8 sps:$4 sm:$0xff]  }
  0x81   : > { %1902 = vmatpush2.bf16.msra.mxu1 %v12668_v55  ;;  %1800 = vmatprep.subr.bf16.mxu0 %v12673_v59  ;;  %v12746_v55 = vld [vmem:[%s19618_s1 + $0x5e0] ss:$8 sps:$4 sm:$0xff]   ;;  %v12749_v59 = vld [vmem:[%s19618_s1 + $0x4d0] ss:$8 sps:$4 sm:$0xff]  }
  0x82   : > { %1903 = vmatprep.subr.bf16.mxu1 %v12676_v61  ;;  %1806 = vmatprep.mubr.bf16.mxu0 %v14282_v52  ;;  %v12688_v52 = vld [vmem:[%s19618_s1 + $0x184] ss:$8 sps:$4 sm:$0xff]   ;;  %v12752_v61 = vld [vmem:[%s19618_s1 + $0x5d0] ss:$8 sps:$4 sm:$0xff]  }
  0x83   : > { %1909 = vmatprep.mubr.bf16.mxu1 %v14289_v56  ;;  %v12683_v56 = vld [vmem:[%s19618_s1 + $0x80] ss:$8 sps:$4 sm:$0xff]  }
  0x84   : > { %1801 = vmatpush2.bf16.msra.mxu0 %v12671_v62  ;;  %v396_v62 = vld [vmem:[%s14260_s28 + $0xd0] sm:$0x33] }
  0x85   : > { %1904 = vmatpush2.bf16.msra.mxu1 %v12674_v63  ;;  %1802 = vmatprep.subr.bf16.mxu0 %v12679_v48  ;;  %v397_v63 = vld [vmem:[%s14260_s28 + $0xd8] sm:$0x33]  ;;  %v14847_v48 = vld [vmem:[%s14260_s28] sm:$0xee] }
  0x86   : > { %1905 = vmatprep.subr.bf16.mxu1 %v12682_v58  ;;  %v14850_v58 = vld [vmem:[%s14260_s28 + $0x8] sm:$0xee] }
  0x88   : > { %1803 = vmatpush2.bf16.msra.mxu0 %v12677_v0  ;;  %v12760_v0 = vld [vmem:[%s19618_s1 + $0x5c4] ss:$8 sps:$4 sm:$0xff]  }
  0x89   : > { %1906 = vmatpush2.bf16.msra.mxu1 %v12680_v1  ;;  %1804 = vmatprep.subr.bf16.mxu0 %v12685_v2  ;;  %v10816_v1 = vcombine.high %v14562_v21, %v397_v63  ;;  %v13911_v2 = vld [vmem:[%s14260_s28 + $0x10] sm:$0xff] }
  0x8a   : > { %1907 = vmatprep.subr.bf16.mxu1 %v12688_v52  ;;  %v10946_v52 = vcombine.high %v14847_v48, %v13911_v2 }
  0x8c   : > { %1805 = vmatpush2.bf16.msra.mxu0 %v12683_v56  ;;  %v13912_v56 = vld [vmem:[%s14260_s28 + $0x18] sm:$0xff] }
  0x8d   : > { %1908 = vmatpush2.bf16.msra.mxu1 %v12686_v3  ;;  %2458 = vmatprep.subr.bf16.mxu0 %v12691_v6  ;;  %v10948_v3 = vcombine.high %v14850_v58, %v13912_v56  ;;  %v12755_v6 = vld [vmem:[%s19618_s1 + $0x4c0] ss:$8 sps:$4 sm:$0xff]  }
  0x8e   : > { %2561 = vmatprep.subr.bf16.mxu1 %v12694_v9  ;;  %v12768_v9 = vld [vmem:[%s19618_s1 + $0x5b4] ss:$8 sps:$4 sm:$0xff]  }
  0x8f   : > { %1807 = vmatmul.mubr.bf16.vlgmr.msra.gmra.mxu0 %v14308_v4  ;;  %v12706_v4 = vld [vmem:[%s19618_s1 + $0x554] ss:$8 sps:$4 sm:$0xff]  }
  0x90   : > { %1910 = vmatmul.mubr.bf16.vlgmr.msra.gmra.mxu1 %v14310_v5  ;;  %2459 = vmatpush1.bf16.msra.mxu0 %v12689_v14  ;;  %v12701_v5 = vld [vmem:[%s19618_s1 + $0x450] ss:$8 sps:$4 sm:$0xff]   ;;  %v14879_v14 = vld [vmem:[%s14260_s28 + $0x24] ss:$16 sps:$4 sm:$0xff]  }
  0x91   : > { %2562 = vmatpush1.bf16.msra.mxu1 %v12692_v16  ;;  %2460 = vmatprep.subr.bf16.mxu0 %v12697_v19  ;;  %v2062_v16 = vrot.slane %v14879_v14, 1  ;;  %v14883_v19 = vld [vmem:[%s14260_s28 + $0x2c] ss:$16 sps:$4 sm:$0xff]  }
  0x92   : > { %2563 = vmatprep.subr.bf16.mxu1 %v12700_v22  ;;  %1816 = vmatprep.mubr.bf16.mxu0 %v14285_v53  ;;  %v12712_v53 = vld [vmem:[%s19618_s1 + $0x544] ss:$8 sps:$4 sm:$0xff]   ;;  %v2068_v22 = vrot.slane %v14883_v19, 1 }
  0x93   : > { %1919 = vmatprep.mubr.bf16.mxu1 %v14292_v57  ;;  %v12707_v57 = vld [vmem:[%s19618_s1 + $0x440] ss:$8 sps:$4 sm:$0xff]   ;;  %v12813_v19 = vld [vmem:[%s19618_s1 + $0x644] ss:$8 sps:$4 sm:$0xff]  }
  0x94   : > { %2461 = vmatpush1.bf16.msra.mxu0 %v12695_v7  ;;  %v10813_v7 = vcombine.low %v14553_v11, %v396_v62 }
  0x95   : > { %2564 = vmatpush1.bf16.msra.mxu1 %v12698_v10  ;;  %2462 = vmatprep.subr.bf16.mxu0 %v12703_v23  ;;  %v10815_v10 = vcombine.low %v14562_v21, %v397_v63  ;;  %v2061_v23 = vrot.slane %v10946_v52, 1  ;;  %v12776_v21 = vld [vmem:[%s19618_s1 + $0x5a4] ss:$8 sps:$4 sm:$0xff]   ;;  %v12810_v52 = vld [vmem:[%s19618_s1 + $0x754] ss:$8 sps:$4 sm:$0xff]  }
  0x96   : > { %2565 = vmatprep.subr.bf16.mxu1 %v12706_v4  ;;  %v2067_v4 = vrot.slane %v10948_v3, 1 }
  0x97   : > { %1817 = vmatmul.mubr.bf16.gmra.mxu0 %v14322_v12  ;;  %v12718_v12 = vld [vmem:[%s19618_s1 + $0x534] ss:$8 sps:$4 sm:$0xff]  }
  0x98   : > { %1920 = vmatmul.mubr.bf16.gmra.mxu1 %v14334_v18  ;;  %2463 = vmatpush1.bf16.msra.mxu0 %v12701_v5  ;;  %v12713_v18 = vld [vmem:[%s19618_s1 + $0x430] ss:$8 sps:$4 sm:$0xff]  }
  0x99   : > { %2566 = vmatpush1.bf16.msra.mxu1 %v12704_v24  ;;  %2464 = vmatprep.subr.bf16.mxu0 %v12709_v26  ;;  %v12763_v5 = vld [vmem:[%s19618_s1 + $0x4b0] ss:$8 sps:$4 sm:$0xff]   ;;  %v2063_v26 = vsel %vm2057_vm1, %v2061_v23, %v2062_v16 }
  0x9a   : > { %2567 = vmatprep.subr.bf16.mxu1 %v12712_v53  ;;  %1826 = vmatprep.mubr.bf16.mxu0 %v14358_v32  ;;  %v12724_v32 = vld [vmem:[%s19618_s1 + $0x524] ss:$8 sps:$4 sm:$0xff]   ;;  %v12766_v24 = vld [vmem:[%s19618_s1 + $0x5b0] ss:$8 sps:$4 sm:$0xff]   ;;  %v2069_v53 = vsel %vm2057_vm1, %v2067_v4, %v2068_v22 }
  0x9b   : > { %1929 = vmatprep.mubr.bf16.mxu1 %v14367_v36  ;;  %v12719_v36 = vld [vmem:[%s19618_s1 + $0x420] ss:$8 sps:$4 sm:$0xff]  }
  0x9c   : > { %2465 = vmatpush1.bf16.msra.mxu0 %v12707_v57  ;;  %v12771_v57 = vld [vmem:[%s19618_s1 + $0x4a0] ss:$8 sps:$4 sm:$0xff]  }
  0x9d   : > { %2568 = vmatpush1.bf16.msra.mxu1 %v12710_v29  ;;  %2466 = vmatprep.subr.bf16.mxu0 %v12715_v30  ;;  %v12774_v29 = vld [vmem:[%s19618_s1 + $0x5a0] ss:$8 sps:$4 sm:$0xff]   ;;  %v12779_v30 = vld [vmem:[%s19618_s1 + $0x494] ss:$8 sps:$4 sm:$0xff]  }
  0x9e   : > { %2569 = vmatprep.subr.bf16.mxu1 %v12718_v12  ;;  %v12782_v12 = vld [vmem:[%s19618_s1 + $0x594] ss:$8 sps:$4 sm:$0xff]   ;;  %v13923_v4 = vld [vmem:[%s14260_s28 + $0x60] ss:$16 sps:$4 sm:$0xff]  }
  0x9f   : > { %1827 = vmatmul.mubr.bf16.gmra.mxu0 %v14379_v42  ;;  %v12730_v42 = vld [vmem:[%s19618_s1 + $0x514] ss:$8 sps:$4 sm:$0xff]  }
  0xa0   : > { %1930 = vmatmul.mubr.bf16.gmra.mxu1 %v14383_v47  ;;  %2467 = vmatpush1.bf16.msra.mxu0 %v12713_v18  ;;  %v12725_v47 = vld [vmem:[%s19618_s1 + $0x410] ss:$8 sps:$4 sm:$0xff]  }
  0xa1   : > { %2570 = vmatpush1.bf16.msra.mxu1 %v12716_v34  ;;  %2468 = vmatprep.subr.bf16.mxu0 %v12721_v35  ;;  %v12777_v18 = vld [vmem:[%s19618_s1 + $0x490] ss:$8 sps:$4 sm:$0xff]   ;;  %v10945_v35 = vcombine.low %v14847_v48, %v13911_v2  ;;  %v12807_v2 = vld [vmem:[%s19618_s1 + $0x654] ss:$8 sps:$4 sm:$0xff]  }
  0xa2   : > { %2571 = vmatprep.subr.bf16.mxu1 %v12724_v32  ;;  %1836 = vmatprep.mubr.bf16.mxu0 %v14411_v8  ;;  %v12736_v8 = vld [vmem:[%s19618_s1 + $0x504] ss:$8 sps:$4 sm:$0xff]   ;;  %v12780_v34 = vld [vmem:[%s19618_s1 + $0x590] ss:$8 sps:$4 sm:$0xff]   ;;  %v10947_v32 = vcombine.low %v14850_v58, %v13912_v56 }
  0xa3   : > { %1939 = vmatprep.mubr.bf16.mxu1 %v14417_v13  ;;  %v12731_v13 = vld [vmem:[%s19618_s1 + $0x400] ss:$8 sps:$4 sm:$0xff]   ;;  %v13921_v56 = vld [vmem:[%s14260_s28 + $0x64] ss:$16 sps:$4 sm:$0xff]  }
  0xa4   : > { %2469 = vmatpush1.bf16.msra.mxu0 %v12719_v36  ;;  %v12785_v36 = vld [vmem:[%s19618_s1 + $0x484] ss:$8 sps:$4 sm:$0xff]   ;;  %v13919_v48 = vld [vmem:[%s14260_s28 + $0x40] ss:$16 sps:$4 sm:$0xff]   ;;  %v2080_v3 = vrot.slane %v13921_v56, 1 }
  0xa5   : > { %2572 = vmatpush1.bf16.msra.mxu1 %v12722_v37  ;;  %2470 = vmatprep.subr.bf16.mxu0 %v12727_v40  ;;  %v12788_v37 = vld [vmem:[%s19618_s1 + $0x584] ss:$8 sps:$4 sm:$0xff]   ;;  %v12783_v40 = vld [vmem:[%s19618_s1 + $0x480] ss:$8 sps:$4 sm:$0xff]   ;;  %v2070_v58 = vrot.slane %v13919_v48, 1 }
  0xa6   : > { %2573 = vmatprep.subr.bf16.mxu1 %v12730_v42  ;;  %v13915_v42 = vld [vmem:[%s14260_s28 + $0x20] ss:$16 sps:$4 sm:$0xff]  }
  0xa7   : > { %1837 = vmatmul.mubr.bf16.gmra.mxu0 %v14421_v15  ;;  %v12742_v15 = vld [vmem:[%s19618_s1 + $0x5f4] ss:$8 sps:$4 sm:$0xff]   ;;  %v12841_v56 = vld [vmem:[%s19618_s1 + $0x6f0] ss:$8 sps:$4 sm:$0xff]  }
  0xa8   : > { %1940 = vmatmul.mubr.bf16.gmra.mxu1 %v14425_v20  ;;  %2471 = vmatpush1.bf16.msra.mxu0 %v12725_v47  ;;  %v12737_v20 = vld [vmem:[%s19618_s1 + $0x4f0] ss:$8 sps:$4 sm:$0xff]   ;;  %v2059_v47 = vrot.slane %v13915_v42, 1 }
  0xa9   : > { %2574 = vmatpush1.bf16.msra.mxu1 %v12728_v41  ;;  %2472 = vmatprep.subr.bf16.mxu0 %v12733_v45  ;;  %v12786_v41 = vld [vmem:[%s19618_s1 + $0x580] ss:$8 sps:$4 sm:$0xff]   ;;  %v2058_v45 = vrot.slane %v10945_v35, 1 }
  0xaa   : > { %2575 = vmatprep.subr.bf16.mxu1 %v12736_v8  ;;  %1846 = vmatprep.mubr.bf16.mxu0 %v14459_v44  ;;  %v12748_v44 = vld [vmem:[%s19618_s1 + $0x5e4] ss:$8 sps:$4 sm:$0xff]   ;;  %v2064_v8 = vrot.slane %v10947_v32, 1  ;;  %v2071_v14 = vsel %vm2057_vm1, %v2059_v47, %v2070_v58  ;;  %v12820_v32 = vld [vmem:[%s19618_s1 + $0x730] ss:$8 sps:$4 sm:$0xff]  }
  0xab   : > { %1949 = vmatprep.mubr.bf16.mxu1 %v14465_v49  ;;  %v12743_v49 = vld [vmem:[%s19618_s1 + $0x4e0] ss:$8 sps:$4 sm:$0xff]  }
  0xac   : > { %2473 = vmatpush1.bf16.msra.mxu0 %v12731_v13  ;;  %v13916_v13 = vld [vmem:[%s14260_s28 + $0x28] ss:$16 sps:$4 sm:$0xff]  }
  0xad   : > { %2576 = vmatpush1.bf16.msra.mxu1 %v12734_v46  ;;  %2474 = vmatprep.subr.bf16.mxu0 %v12739_v43  ;;  %v2065_v46 = vrot.slane %v13916_v13, 1  ;;  %v12795_v43 = vld [vmem:[%s19618_s1 + $0x674] ss:$8 sps:$4 sm:$0xff]   ;;  %v13928_v13 = vld [vmem:[%s14260_s28 + $0x88] ss:$16 sps:$4 sm:$0xff]  }
  0xae   : > { %2577 = vmatprep.subr.bf16.mxu1 %v12742_v15  ;;  %v12798_v15 = vld [vmem:[%s19618_s1 + $0x774] ss:$8 sps:$4 sm:$0xff]  }
  0xaf   : > { %1847 = vmatmul.mubr.bf16.gmra.mxu0 %v14469_v51  ;;  %v12751_v51 = vld [vmem:[%s19618_s1 + $0x4d4] ss:$8 sps:$4 sm:$0xff]  }
  0xb0   : > { %1950 = vmatmul.mubr.bf16.gmra.mxu1 %v14473_v60  ;;  %2475 = vmatpush2.bf16.msra.mxu0 %v12737_v20  ;;  %v12754_v60 = vld [vmem:[%s19618_s1 + $0x5d4] ss:$8 sps:$4 sm:$0xff]  }
  0xb1   : > { %2578 = vmatpush2.bf16.msra.mxu1 %v12740_v50  ;;  %2476 = vmatprep.subr.bf16.mxu0 %v12745_v54  ;;  %v13917_v20 = vld [vmem:[%s14260_s28 + $0x44] ss:$16 sps:$4 sm:$0xff]   ;;  %v13918_v54 = vld [vmem:[%s14260_s28 + $0x4c] ss:$16 sps:$4 sm:$0xff]  }
  0xb2   : > { %2579 = vmatprep.subr.bf16.mxu1 %v12748_v44  ;;  %1856 = vmatprep.mubr.bf16.mxu0 %v14507_v25  ;;  %v12757_v25 = vld [vmem:[%s19618_s1 + $0x4c4] ss:$8 sps:$4 sm:$0xff]   ;;  %v2072_v50 = vrot.slane %v13917_v20, 1  ;;  %v2076_v44 = vrot.slane %v13918_v54, 1  ;;  %v12829_v20 = vld [vmem:[%s19618_s1 + $0x610] ss:$8 sps:$4 sm:$0xff]  }
  0xb3   : > { %1959 = vmatprep.mubr.bf16.mxu1 %v14516_v31  ;;  %v10814_v31 = vcombine.high %v14553_v11, %v396_v62  ;;  %v12773_v11 = vld [vmem:[%s19618_s1 + $0x4a4] ss:$8 sps:$4 sm:$0xff]  }
  0xb4   : > { %2477 = vmatpush2.bf16.msra.mxu0 %v12743_v49  ;;  %v2060_v49 = vsel %vm2057_vm1, %v2058_v45, %v2059_v47  ;;  %v2073_v62 = vsel %vm2057_vm1, %v2062_v16, %v2072_v50  ;;  %v2077_v63 = vsel %vm2057_vm1, %v2068_v22, %v2076_v44  ;;  %v12816_v22 = vld [vmem:[%s19618_s1 + $0x744] ss:$8 sps:$4 sm:$0xff]   ;;  %v13927_v45 = vld [vmem:[%s14260_s28 + $0x80] ss:$16 sps:$4 sm:$0xff]  }
  0xb5   : > { %2580 = vmatpush2.bf16.msra.mxu1 %v12746_v55  ;;  %2478 = vmatprep.subr.bf16.mxu0 %v12751_v51  ;;  %v2066_v55 = vsel %vm2057_vm1, %v2064_v8, %v2065_v46  ;;  %v12793_v51 = vld [vmem:[%s19618_s1 + $0x670] ss:$8 sps:$4 sm:$0xff]   ;;  %v2086_v8 = vrot.slane %v13927_v45, 1 }
  0xb6   : > { %2581 = vmatprep.subr.bf16.mxu1 %v12754_v60  ;;  %v12796_v60 = vld [vmem:[%s19618_s1 + $0x770] ss:$8 sps:$4 sm:$0xff]  }
  0xb7   : > { %1857 = vmatmul.mubr.bf16.gmra.mxu0 %v14521_v38  ;;  %v12758_v38 = vld [vmem:[%s19618_s1 + $0x5c0] ss:$8 sps:$4 sm:$0xff]   ;;  %v12865_v45 = vld [vmem:[%s19618_s1 + $0x6b0] ss:$8 sps:$4 sm:$0xff]  }
  0xb8   : > { %1960 = vmatmul.mubr.bf16.gmra.mxu1 %v14524_v39  ;;  %2479 = vmatpush2.bf16.msra.mxu0 %v12749_v59  ;;  %v12765_v39 = vld [vmem:[%s19618_s1 + $0x4b4] ss:$8 sps:$4 sm:$0xff]   ;;  %v12801_v59 = vld [vmem:[%s19618_s1 + $0x664] ss:$8 sps:$4 sm:$0xff]  }
  0xb9   : > { %2582 = vmatpush2.bf16.msra.mxu1 %v12752_v61  ;;  %2480 = vmatprep.subr.bf16.mxu0 %v12757_v25  ;;  %v12804_v61 = vld [vmem:[%s19618_s1 + $0x764] ss:$8 sps:$4 sm:$0xff]   ;;  %v13920_v25 = vld [vmem:[%s14260_s28 + $0x48] ss:$16 sps:$4 sm:$0xff]  }
  0xba   : > { %2583 = vmatprep.subr.bf16.mxu1 %v12760_v0  ;;  %1866 = vmatprep.mubr.bf16.mxu0 %v10814_v31  ;;  %v2074_v0 = vrot.slane %v13920_v25, 1  ;;  %v12799_v31 = vld [vmem:[%s19618_s1 + $0x660] ss:$8 sps:$4 sm:$0xff]  }
  0xbb   : > { %1969 = vmatprep.mubr.bf16.mxu1 %v10816_v1  ;;  %v12802_v1 = vld [vmem:[%s19618_s1 + $0x760] ss:$8 sps:$4 sm:$0xff]  }
  0xbc   : > { %2481 = vmatpush2.bf16.msra.mxu0 %v12755_v6  ;;  %v12805_v6 = vld [vmem:[%s19618_s1 + $0x650] ss:$8 sps:$4 sm:$0xff]   ;;  %v2075_v16 = vsel %vm2057_vm1, %v2065_v46, %v2074_v0  ;;  %v2090_v46 = vrot.slane %v13928_v13, 1  ;;  %v12873_v13 = vld [vmem:[%s19618_s1 + $0x6a4] ss:$8 sps:$4 sm:$0xff]  }
  0xbd   : > { %2584 = vmatpush2.bf16.msra.mxu1 %v12758_v38  ;;  %2482 = vmatprep.subr.bf16.mxu0 %v12765_v39  ;;  %v12808_v38 = vld [vmem:[%s19618_s1 + $0x750] ss:$8 sps:$4 sm:$0xff]   ;;  %v13922_v39 = vld [vmem:[%s14260_s28 + $0x6c] ss:$16 sps:$4 sm:$0xff]  }
  0xbe   : > { %2585 = vmatprep.subr.bf16.mxu1 %v12768_v9  ;;  %v2084_v9 = vrot.slane %v13922_v39, 1  ;;  %v13931_v25 = vld [vmem:[%s14260_s28 + $0xa0] ss:$16 sps:$4 sm:$0xff]  }
  0xbf   : > { %1867 = vmatmul.mubr.bf16.gmra.mxu0 %v10813_v7  ;;  %v12811_v7 = vld [vmem:[%s19618_s1 + $0x640] ss:$8 sps:$4 sm:$0xff]  }
  0xc0   : > { %1970 = vmatmul.mubr.bf16.gmra.mxu1 %v10815_v10  ;;  %2483 = vmatpush2.bf16.msra.mxu0 %v12763_v5  ;;  %v2081_v10 = vsel %vm2057_vm1, %v2072_v50, %v2080_v3  ;;  %v2085_v23 = vsel %vm2057_vm1, %v2076_v44, %v2084_v9  ;;  %v2078_v5 = vrot.slane %v13923_v4, 1  ;;  %v13929_v50 = vld [vmem:[%s14260_s28 + $0xa4] ss:$16 sps:$4 sm:$0xff]   ;;  %v13930_v44 = vld [vmem:[%s14260_s28 + $0xac] ss:$16 sps:$4 sm:$0xff]  }
  0xc1   : > { %2586 = vmatpush2.bf16.msra.mxu1 %v12766_v24  ;;  %2484 = vmatprep.subr.bf16.mxu0 %v12773_v11  ;;  %v12814_v24 = vld [vmem:[%s19618_s1 + $0x740] ss:$8 sps:$4 sm:$0xff]   ;;  %v2096_v54 = vrot.slane %v13929_v50, 1  ;;  %v12858_v4 = vld [vmem:[%s19618_s1 + $0x7d4] ss:$8 sps:$4 sm:$0xff]  }
  0xc2   : > { %2587 = vmatprep.subr.bf16.mxu1 %v12776_v21  ;;  %2490 = vmatprep.mubr.bf16.mxu0 %v2063_v26  ;;  %v13924_v11 = vld [vmem:[%s14260_s28 + $0x68] ss:$16 sps:$4 sm:$0xff]   ;;  %v12819_v26 = vld [vmem:[%s19618_s1 + $0x634] ss:$8 sps:$4 sm:$0xff]  }
  0xc3   : > { %2593 = vmatprep.mubr.bf16.mxu1 %v2069_v53  ;;  %v2082_v21 = vrot.slane %v13924_v11, 1  ;;  %v12822_v53 = vld [vmem:[%s19618_s1 + $0x734] ss:$8 sps:$4 sm:$0xff]   ;;  %v2693_v11 = vld [vmem:[%s14260_s28 + $0x28] sm:$0xee] }
  0xc4   : > { %2485 = vmatpush2.bf16.msra.mxu0 %v12771_v57  ;;  %v12817_v57 = vld [vmem:[%s19618_s1 + $0x630] ss:$8 sps:$4 sm:$0xff]   ;;  %v12874_v50 = vld [vmem:[%s19618_s1 + $0x7a0] ss:$8 sps:$4 sm:$0xff]  }
  0xc5   : > { %2588 = vmatpush2.bf16.msra.mxu1 %v12774_v29  ;;  %2486 = vmatprep.subr.bf16.mxu0 %v12779_v30  ;;  %v13925_v29 = vld [vmem:[%s14260_s28 + $0x84] ss:$16 sps:$4 sm:$0xff]   ;;  %v2083_v35 = vsel %vm2057_vm1, %v2074_v0, %v2082_v21  ;;  %v2094_v0 = vrot.slane %v13931_v25, 1 }
  0xc6   : > { %2589 = vmatprep.subr.bf16.mxu1 %v12782_v12  ;;  %v2088_v30 = vrot.slane %v13925_v29, 1  ;;  %v13926_v12 = vld [vmem:[%s14260_s28 + $0x8c] ss:$16 sps:$4 sm:$0xff]   ;;  %v15213_v25 = vld [vmem:[%s14260_s28 + $0x64] ss:$16 sps:$4 sm:$0xff]  }
  0xc7   : > { %v12864_v29 = vld [vmem:[%s19618_s1 + $0x7c4] ss:$8 sps:$4 sm:$0xff]  }
  0xc8   : > { %2487 = vmatpush2.bf16.msra.mxu0 %v12777_v18  ;;  %v2092_v18 = vrot.slane %v13926_v12, 1  ;;  %v2089_v42 = vsel %vm2057_vm1, %v2080_v3, %v2088_v30  ;;  %v2104_v3 = vrot.slane %v14558_v17, 1  ;;  %v12852_v17 = vld [vmem:[%s19618_s1 + $0x7e4] ss:$8 sps:$4 sm:$0xff]  }
  0xc9   : > { %2590 = vmatpush2.bf16.msra.mxu1 %v12780_v34  ;;  %2488 = vmatprep.subr.bf16.mxu0 %v12785_v36  ;;  %v2079_v34 = vsel %vm2057_vm1, %v2070_v58, %v2078_v5  ;;  %v12825_v36 = vld [vmem:[%s19618_s1 + $0x624] ss:$8 sps:$4 sm:$0xff]   ;;  %v12838_v58 = vld [vmem:[%s19618_s1 + $0x700] ss:$8 sps:$4 sm:$0xff]  }
  0xca   : > { %2591 = vmatprep.subr.bf16.mxu1 %v12788_v37  ;;  %v12828_v37 = vld [vmem:[%s19618_s1 + $0x724] ss:$8 sps:$4 sm:$0xff]   ;;  %v2093_v47 = vsel %vm2057_vm1, %v2084_v9, %v2092_v18  ;;  %v12844_v9 = vld [vmem:[%s19618_s1 + $0x7f0] ss:$8 sps:$4 sm:$0xff]  }
  0xcc   : > { %2489 = vmatpush2.bf16.msra.mxu0 %v12783_v40  ;;  %v12823_v40 = vld [vmem:[%s19618_s1 + $0x620] ss:$8 sps:$4 sm:$0xff]  }
  0xcd   : > { %2592 = vmatpush2.bf16.msra.mxu1 %v12786_v41  ;;  %3297 = vmatprep.subr.bf16.mxu0 %v12795_v43  ;;  %v12826_v41 = vld [vmem:[%s19618_s1 + $0x720] ss:$8 sps:$4 sm:$0xff]   ;;  %v12831_v43 = vld [vmem:[%s19618_s1 + $0x614] ss:$8 sps:$4 sm:$0xff]  }
  0xce   : > { %3400 = vmatprep.subr.bf16.mxu1 %v12798_v15  ;;  %v12834_v15 = vld [vmem:[%s19618_s1 + $0x714] ss:$8 sps:$4 sm:$0xff]  }
  0xcf   : > { %2491 = vmatmul.mubr.bf16.vlgmr.msra.gmra.mxu0 %v2060_v49  ;;  %v2100_v49 = vrot.slane %v13930_v44, 1  ;;  %v12882_v44 = vld [vmem:[%s19618_s1 + $0x794] ss:$8 sps:$4 sm:$0xff]  }
  0xd0   : > { %2594 = vmatmul.mubr.bf16.vlgmr.msra.gmra.mxu1 %v2066_v55  ;;  %3298 = vmatpush1.bf16.msra.mxu0 %v12793_v51  ;;  %v2087_v55 = vsel %vm2057_vm1, %v2078_v5, %v2086_v8  ;;  %v2091_v51 = vsel %vm2057_vm1, %v2082_v21, %v2090_v46  ;;  %v12853_v5 = vld [vmem:[%s19618_s1 + $0x6d0] ss:$8 sps:$4 sm:$0xff]  }
  0xd1   : > { %3401 = vmatpush1.bf16.msra.mxu1 %v12796_v60  ;;  %3299 = vmatprep.subr.bf16.mxu0 %v12801_v59  ;;  %v12832_v60 = vld [vmem:[%s19618_s1 + $0x710] ss:$8 sps:$4 sm:$0xff]   ;;  %v12837_v59 = vld [vmem:[%s19618_s1 + $0x604] ss:$8 sps:$4 sm:$0xff]   ;;  %v2101_v48 = vsel %vm2057_vm1, %v2092_v18, %v2100_v49 }
  0xd2   : > { %3402 = vmatprep.subr.bf16.mxu1 %v12804_v61  ;;  %2500 = vmatprep.mubr.bf16.mxu0 %v2073_v62  ;;  %v12840_v61 = vld [vmem:[%s19618_s1 + $0x704] ss:$8 sps:$4 sm:$0xff]   ;;  %v12835_v62 = vld [vmem:[%s19618_s1 + $0x600] ss:$8 sps:$4 sm:$0xff]  }
  0xd3   : > { %2603 = vmatprep.mubr.bf16.mxu1 %v2077_v63  ;;  %v2097_v63 = vsel %vm2057_vm1, %v2088_v30, %v2096_v54  ;;  %v12859_v30 = vld [vmem:[%s19618_s1 + $0x6c0] ss:$8 sps:$4 sm:$0xff]   ;;  %v15134_v18 = vld [vmem:[%s14260_s28 + $0x44] ss:$16 sps:$4 sm:$0xff]  }
  0xd4   : > { %3300 = vmatpush1.bf16.msra.mxu0 %v12799_v31  ;;  %v13932_v31 = vld [vmem:[%s14260_s28 + $0xa8] ss:$16 sps:$4 sm:$0xff]  }
  0xd5   : > { %3403 = vmatpush1.bf16.msra.mxu1 %v12802_v1  ;;  %3301 = vmatprep.subr.bf16.mxu0 %v12807_v2  ;;  %v2098_v1 = vrot.slane %v13932_v31, 1  ;;  %v12843_v2 = vld [vmem:[%s19618_s1 + $0x6f4] ss:$8 sps:$4 sm:$0xff]  }
  0xd6   : > { %3404 = vmatprep.subr.bf16.mxu1 %v12810_v52  ;;  %v12846_v52 = vld [vmem:[%s19618_s1 + $0x7f4] ss:$8 sps:$4 sm:$0xff]  }
  0xd7   : > { %2501 = vmatmul.mubr.bf16.gmra.mxu0 %v2071_v14  ;;  %v2099_v39 = vsel %vm2057_vm1, %v2090_v46, %v2098_v1  ;;  %v12849_v14 = vld [vmem:[%s19618_s1 + $0x6e4] ss:$8 sps:$4 sm:$0xff]  }
  0xd8   : > { %2604 = vmatmul.mubr.bf16.gmra.mxu1 %v2075_v16  ;;  %3302 = vmatpush1.bf16.msra.mxu0 %v12805_v6  ;;  %v2108_v6 = vrot.slane %v14573_v27, 1  ;;  %v12847_v27 = vld [vmem:[%s19618_s1 + $0x6e0] ss:$8 sps:$4 sm:$0xff]   ;;  %v2105_v16 = vsel %vm2057_vm1, %v2096_v54, %v2104_v3  ;;  %v12876_v46 = vld [vmem:[%s19618_s1 + $0x7a4] ss:$8 sps:$4 sm:$0xff]  }
  0xd9   : > { %3405 = vmatpush1.bf16.msra.mxu1 %v12808_v38  ;;  %3303 = vmatprep.subr.bf16.mxu0 %v12813_v19  ;;  %v2095_v38 = vsel %vm2057_vm1, %v2086_v8, %v2094_v0  ;;  %v12868_v8 = vld [vmem:[%s19618_s1 + $0x7b0] ss:$8 sps:$4 sm:$0xff]   ;;  %v12879_v54 = vld [vmem:[%s19618_s1 + $0x694] ss:$8 sps:$4 sm:$0xff]  }
  0xda   : > { %3406 = vmatprep.subr.bf16.mxu1 %v12816_v22  ;;  %2510 = vmatprep.mubr.bf16.mxu0 %v2081_v10  ;;  %v2109_v19 = vsel %vm2057_vm1, %v2100_v49, %v2108_v6  ;;  %v12850_v22 = vld [vmem:[%s19618_s1 + $0x7e0] ss:$8 sps:$4 sm:$0xff]   ;;  %v2106_v10 = vrot.slane %v14583_v33, 1  ;;  %v12877_v49 = vld [vmem:[%s19618_s1 + $0x690] ss:$8 sps:$4 sm:$0xff]  }
  0xdb   : > { %2613 = vmatprep.mubr.bf16.mxu1 %v2085_v23  ;;  %v12855_v23 = vld [vmem:[%s19618_s1 + $0x6d4] ss:$8 sps:$4 sm:$0xff]   ;;  %v2692_v33 = vld [vmem:[%s14260_s28 + $0x20] sm:$0xee] }
  0xdc   : > { %3304 = vmatpush1.bf16.msra.mxu0 %v12811_v7  ;;  %v2102_v7 = vrot.slane %v14576_v28, 1  ;;  %v12856_v28 = vld [vmem:[%s19618_s1 + $0x7d0] ss:$8 sps:$4 sm:$0xff]  }
  0xdd   : > { %3407 = vmatpush1.bf16.msra.mxu1 %v12814_v24  ;;  %3305 = vmatprep.subr.bf16.mxu0 %v12819_v26  ;;  %v2694_v24 = vld [vmem:[%s14260_s28 + $0x30] sm:$0xff]  ;;  %v2107_v26 = vsel %vm2057_vm1, %v2098_v1, %v2106_v10 }
  0xde   : > { %3408 = vmatprep.subr.bf16.mxu1 %v12822_v53  ;;  %v2103_v21 = vsel %vm2057_vm1, %v2094_v0, %v2102_v7  ;;  %v2695_v53 = vld [vmem:[%s14260_s28 + $0x38] sm:$0xff]  ;;  %v15131_v12 = vcombine.high %v2692_v33, %v2694_v24 }
  0xdf   : > { %2511 = vmatmul.mubr.bf16.gmra.mxu0 %v2079_v34  ;;  %v15136_v34 = vcombine.high %v2693_v11, %v2695_v53  ;;  %v15216_v0 = vld [vmem:[%s14260_s28 + $0x6c] ss:$16 sps:$4 sm:$0xff]  }
  0xe0   : > { %2614 = vmatmul.mubr.bf16.gmra.mxu1 %v2083_v35  ;;  %3306 = vmatpush1.bf16.msra.mxu0 %v12817_v57  ;;  %v12861_v57 = vld [vmem:[%s19618_s1 + $0x6c4] ss:$8 sps:$4 sm:$0xff]  }
  0xe1   : > { %3409 = vmatpush1.bf16.msra.mxu1 %v12820_v32  ;;  %3307 = vmatprep.subr.bf16.mxu0 %v12825_v36  ;;  %v15139_v35 = vld [vmem:[%s14260_s28 + $0x4c] ss:$16 sps:$4 sm:$0xff]   ;;  %v12862_v32 = vld [vmem:[%s19618_s1 + $0x7c0] ss:$8 sps:$4 sm:$0xff]  }
  0xe2   : > { %3410 = vmatprep.subr.bf16.mxu1 %v12828_v37  ;;  %2520 = vmatprep.mubr.bf16.mxu0 %v2089_v42  ;;  %v12867_v36 = vld [vmem:[%s19618_s1 + $0x6b4] ss:$8 sps:$4 sm:$0xff]   ;;  %v2901_v42 = vrot.slane %v15134_v18, 1 }
  0xe3   : > { %2623 = vmatprep.mubr.bf16.mxu1 %v2093_v47  ;;  %v12870_v37 = vld [vmem:[%s19618_s1 + $0x7b4] ss:$8 sps:$4 sm:$0xff]   ;;  %v2906_v47 = vrot.slane %v15136_v34, 1 }
  0xe4   : > { %3308 = vmatpush1.bf16.msra.mxu0 %v12823_v40  ;;  %v2900_v40 = vrot.slane %v15131_v12, 1 }
  0xe5   : > { %3411 = vmatpush1.bf16.msra.mxu1 %v12826_v41  ;;  %3309 = vmatprep.subr.bf16.mxu0 %v12831_v43  ;;  %v2907_v41 = vrot.slane %v15139_v35, 1  ;;  %v12871_v43 = vld [vmem:[%s19618_s1 + $0x6a0] ss:$8 sps:$4 sm:$0xff]  }
  0xe6   : > { %3412 = vmatprep.subr.bf16.mxu1 %v12834_v15  ;;  %v2902_v15 = vsel %vm2057_vm1, %v2900_v40, %v2901_v42 }
  0xe7   : > { %2521 = vmatmul.mubr.bf16.gmra.mxu0 %v2087_v55  ;;  %v12880_v55 = vld [vmem:[%s19618_s1 + $0x790] ss:$8 sps:$4 sm:$0xff]  }
  0xe8   : > { %2624 = vmatmul.mubr.bf16.gmra.mxu1 %v2091_v51  ;;  %3310 = vmatpush1.bf16.msra.mxu0 %v12829_v20  ;;  %v2908_v20 = vsel %vm2057_vm1, %v2906_v47, %v2907_v41  ;;  %v15191_v51 = vld [vmem:[%s14260_s28 + $0x40] ss:$16 sps:$4 sm:$0xff]  }
  0xe9   : > { %3413 = vmatpush1.bf16.msra.mxu1 %v12832_v60  ;;  %3311 = vmatprep.subr.bf16.mxu0 %v12837_v59  ;;  %v15193_v60 = vcombine.low %v2692_v33, %v2694_v24  ;;  %v15195_v59 = vcombine.low %v2693_v11, %v2695_v53  ;;  %v2898_v1 = vrot.slane %v15191_v51, 1  ;;  %v15267_v33 = vld [vmem:[%s14260_s28 + $0x8c] ss:$16 sps:$4 sm:$0xff]   ;;  %v12908_v11 = vld [vmem:[%s19618_s1 + $0x960] ss:$8 sps:$4 sm:$0xff]  }
  0xea   : > { %3414 = vmatprep.subr.bf16.mxu1 %v12840_v61  ;;  %2530 = vmatprep.mubr.bf16.mxu0 %v2097_v63  ;;  %v15198_v61 = vld [vmem:[%s14260_s28 + $0x48] ss:$16 sps:$4 sm:$0xff]   ;;  %v12888_v63 = vld [vmem:[%s19618_s1 + $0x784] ss:$8 sps:$4 sm:$0xff]  }
  0xeb   : > { %2633 = vmatprep.mubr.bf16.mxu1 %v2101_v48  ;;  %v12883_v48 = vld [vmem:[%s19618_s1 + $0x680] ss:$8 sps:$4 sm:$0xff]   ;;  %v2897_v31 = vrot.slane %v15193_v60, 1 }
  0xec   : > { %3312 = vmatpush1.bf16.msra.mxu0 %v12835_v62  ;;  %v12885_v62 = vld [vmem:[%s19618_s1 + $0x684] ss:$8 sps:$4 sm:$0xff]  }
  0xed   : > { %3415 = vmatpush1.bf16.msra.mxu1 %v12838_v58  ;;  %3313 = vmatprep.subr.bf16.mxu0 %v12843_v2  ;;  %v12886_v58 = vld [vmem:[%s19618_s1 + $0x780] ss:$8 sps:$4 sm:$0xff]   ;;  %v2903_v2 = vrot.slane %v15195_v59, 1 }
  0xee   : > { %3416 = vmatprep.subr.bf16.mxu1 %v12846_v52  ;;  %v2904_v52 = vrot.slane %v15198_v61, 1 }
  0xef   : > { %2531 = vmatmul.mubr.bf16.gmra.mxu0 %v2095_v38  ;;  %v12902_v38 = vld [vmem:[%s19618_s1 + $0x970] ss:$8 sps:$4 sm:$0xff]  }
  0xf0   : > { %2634 = vmatmul.mubr.bf16.gmra.mxu1 %v2099_v39  ;;  %3314 = vmatpush2.bf16.msra.mxu0 %v12841_v56  ;;  %v12901_v56 = vld [vmem:[%s19618_s1 + $0x874] ss:$8 sps:$4 sm:$0xff]   ;;  %v2911_v39 = vrot.slane %v15213_v25, 1 }
  0xf1   : > { %3417 = vmatpush2.bf16.msra.mxu1 %v12844_v9  ;;  %3315 = vmatprep.subr.bf16.mxu0 %v12849_v14  ;;  %v2915_v9 = vrot.slane %v15216_v0, 1  ;;  %v15237_v14 = vld [vmem:[%s14260_s28 + $0x60] ss:$16 sps:$4 sm:$0xff]  }
  0xf2   : > { %3418 = vmatprep.subr.bf16.mxu1 %v12852_v17  ;;  %2540 = vmatprep.mubr.bf16.mxu0 %v2105_v16  ;;  %v2899_v17 = vsel %vm2057_vm1, %v2897_v31, %v2898_v1  ;;  %v15242_v16 = vld [vmem:[%s14260_s28 + $0x68] ss:$16 sps:$4 sm:$0xff]   ;;  %v15331_v31 = vld [vmem:[%s14260_s28 + $0xac] ss:$16 sps:$4 sm:$0xff]  }
  0xf3   : > { %2643 = vmatprep.mubr.bf16.mxu1 %v2109_v19  ;;  %v12907_v19 = vld [vmem:[%s19618_s1 + $0x864] ss:$8 sps:$4 sm:$0xff]  }
  0xf4   : > { %3316 = vmatpush2.bf16.msra.mxu0 %v12847_v27  ;;  %v2905_v27 = vsel %vm2057_vm1, %v2903_v2, %v2904_v52  ;;  %v12926_v2 = vld [vmem:[%s19618_s1 + $0x940] ss:$8 sps:$4 sm:$0xff]  }
  0xf5   : > { %3419 = vmatpush2.bf16.msra.mxu1 %v12850_v22  ;;  %3317 = vmatprep.subr.bf16.mxu0 %v12855_v23  ;;  %v12910_v22 = vld [vmem:[%s19618_s1 + $0x964] ss:$8 sps:$4 sm:$0xff]  }
  0xf6   : > { %3420 = vmatprep.subr.bf16.mxu1 %v12858_v4 }
  0xf7   : > { %2541 = vmatmul.mubr.bf16.gmra.mxu0 %v2103_v21  ;;  %v2909_v21 = vrot.slane %v15237_v14, 1 }
  0xf8   : > { %2644 = vmatmul.mubr.bf16.gmra.mxu1 %v2107_v26  ;;  %3318 = vmatpush2.bf16.msra.mxu0 %v12853_v5  ;;  %v2912_v5 = vsel %vm2057_vm1, %v2901_v42, %v2911_v39  ;;  %v2913_v26 = vrot.slane %v15242_v16, 1 }
  0xf9   : > { %3421 = vmatpush2.bf16.msra.mxu1 %v12856_v28  ;;  %3319 = vmatprep.subr.bf16.mxu0 %v12861_v57  ;;  %v2916_v28 = vsel %vm2057_vm1, %v2907_v41, %v2915_v9  ;;  %v2923_v41 = vrot.slane %v15267_v33, 1 }
  0xfa   : > { %3422 = vmatprep.subr.bf16.mxu1 %v12864_v29  ;;  %2550 = vmatprep.mubr.bf16.mxu0 %v2104_v3  ;;  %v12904_v3 = vld [vmem:[%s19618_s1 + $0x974] ss:$8 sps:$4 sm:$0xff]  }
  0xfb   : > { %2653 = vmatprep.mubr.bf16.mxu1 %v2108_v6  ;;  %v12899_v6 = vld [vmem:[%s19618_s1 + $0x870] ss:$8 sps:$4 sm:$0xff]   ;;  %v12919_v29 = vld [vmem:[%s19618_s1 + $0x854] ss:$8 sps:$4 sm:$0xff]  }
  0xfc   : > { %3320 = vmatpush2.bf16.msra.mxu0 %v12859_v30  ;;  %v12922_v30 = vld [vmem:[%s19618_s1 + $0x954] ss:$8 sps:$4 sm:$0xff]  }
  0xfd   : > { %3423 = vmatpush2.bf16.msra.mxu1 %v12862_v32  ;;  %3321 = vmatprep.subr.bf16.mxu0 %v12867_v36  ;;  %v12917_v36 = vld [vmem:[%s19618_s1 + $0x850] ss:$8 sps:$4 sm:$0xff]  }
  0xfe   : > { %3424 = vmatprep.subr.bf16.mxu1 %v12870_v37  ;;  %v12920_v37 = vld [vmem:[%s19618_s1 + $0x950] ss:$8 sps:$4 sm:$0xff]  }
  0xff   : > { %2551 = vmatmul.mubr.bf16.gmra.mxu0 %v2102_v7  ;;  %v12905_v7 = vld [vmem:[%s19618_s1 + $0x860] ss:$8 sps:$4 sm:$0xff]  }
 0x100   : > { %2654 = vmatmul.mubr.bf16.gmra.mxu1 %v2106_v10  ;;  %3322 = vmatpush2.bf16.msra.mxu0 %v12865_v45  ;;  %v15254_v10 = vld [vmem:[%s14260_s28 + $0x84] ss:$16 sps:$4 sm:$0xff]   ;;  %v15293_v45 = vld [vmem:[%s14260_s28 + $0x80] ss:$16 sps:$4 sm:$0xff]  }
 0x101   : > { %3425 = vmatpush2.bf16.msra.mxu1 %v12868_v8  ;;  %3323 = vmatprep.subr.bf16.mxu0 %v12873_v13  ;;  %v2919_v47 = vrot.slane %v15254_v10, 1  ;;  %v2910_v13 = vsel %vm2057_vm1, %v2898_v1, %v2909_v21 }
 0x102   : > { %3426 = vmatprep.subr.bf16.mxu1 %v12876_v46  ;;  %3329 = vmatprep.mubr.bf16.mxu0 %v2902_v15  ;;  %v2914_v46 = vsel %vm2057_vm1, %v2904_v52, %v2913_v26  ;;  %v2917_v52 = vrot.slane %v15293_v45, 1 }
 0x103   : > { %3432 = vmatprep.mubr.bf16.mxu1 %v2908_v20 }
 0x104   : > { %3324 = vmatpush2.bf16.msra.mxu0 %v12871_v43  ;;  %v15304_v43 = vld [vmem:[%s14260_s28 + $0x88] ss:$16 sps:$4 sm:$0xff]  }
 0x105   : > { %3427 = vmatpush2.bf16.msra.mxu1 %v12874_v50  ;;  %3325 = vmatprep.subr.bf16.mxu0 %v12879_v54  ;;  %v12925_v50 = vld [vmem:[%s19618_s1 + $0x844] ss:$8 sps:$4 sm:$0xff]  }
 0x106   : > { %3428 = vmatprep.subr.bf16.mxu1 %v12882_v44  ;;  %v12928_v54 = vld [vmem:[%s19618_s1 + $0x944] ss:$8 sps:$4 sm:$0xff]  }
 0x108   : > { %3326 = vmatpush2.bf16.msra.mxu0 %v12877_v49  ;;  %v12923_v49 = vld [vmem:[%s19618_s1 + $0x840] ss:$8 sps:$4 sm:$0xff]  }
 0x109   : > { %3429 = vmatpush2.bf16.msra.mxu1 %v12880_v55  ;;  %3327 = vmatprep.subr.bf16.mxu0 %v12885_v62  ;;  %v15318_v55 = vld [vmem:[%s14260_s28 + $0xa4] ss:$16 sps:$4 sm:$0xff]  }
 0x10a   : > { %3430 = vmatprep.subr.bf16.mxu1 %v12888_v63 }
 0x10c   : > { %3328 = vmatpush2.bf16.msra.mxu0 %v12883_v48  ;;  %v2920_v48 = vsel %vm2057_vm1, %v2911_v39, %v2919_v47  ;;  %v12940_v39 = vld [vmem:[%s19618_s1 + $0x934] ss:$8 sps:$4 sm:$0xff]  }
 0x10d   : > { %3431 = vmatpush2.bf16.msra.mxu1 %v12886_v58  ;;  %4205 = vmatprep.subr.bf16.mxu0 %v12901_v56  ;;  %v2924_v58 = vsel %vm2057_vm1, %v2915_v9, %v2923_v41  ;;  %v2921_v56 = vrot.slane %v15304_v43, 1 }
 0x10e   : > { %4308 = vmatprep.subr.bf16.mxu1 %v12904_v3 }
 0x10f   : > { %v1244_v23 = vpop.f32.mrf.mxu0  ;;  %3330 = vmatmul.mubr.bf16.vlgmr.msra.gmra.mxu0 %v2899_v17  ;;  %v12935_v17 = vld [vmem:[%s19618_s1 + $0x830] ss:$8 sps:$4 sm:$0xff]  }
 0x110   : > { %v1347_v4 = vpop.f32.mrf.mxu1  ;;  %3433 = vmatmul.mubr.bf16.vlgmr.msra.gmra.mxu1 %v2905_v27  ;;  %4206 = vmatpush1.bf16.msra.mxu0 %v12899_v6  ;;  %v12938_v27 = vld [vmem:[%s19618_s1 + $0x930] ss:$8 sps:$4 sm:$0xff]  }
 0x111   : > { %v15269_v24 = vadd.f32 %v1347_v4, %v1244_v23  ;;  %4309 = vmatpush1.bf16.msra.mxu1 %v12902_v38  ;;  %v1246_v53 = vpop.f32.mrf.mxu0  ;;  %4207 = vmatprep.subr.bf16.mxu0 %v12907_v19  ;;  %v12937_v38 = vld [vmem:[%s19618_s1 + $0x834] ss:$8 sps:$4 sm:$0xff]   ;;  %v2931_v23 = vrot.slane %v15331_v31, 1  ;;  %v15357_v4 = vld [vmem:[%s14260_s28 + $0xa0] ss:$16 sps:$4 sm:$0xff]  }
 0x112   : > { %v1349_v57 = vpop.f32.mrf.mxu1  ;;  %4310 = vmatprep.subr.bf16.mxu1 %v12910_v22  ;;  %3339 = vmatprep.mubr.bf16.mxu0 %v2912_v5 }
 0x113   : > { %v15282_v32 = vadd.f32 %v1349_v57, %v1246_v53  ;;  %3442 = vmatprep.mubr.bf16.mxu1 %v2916_v28  ;;  %v1248_v40 = vpop.f32.mrf.mxu0  ;;  %v2918_v28 = vsel %vm2057_vm1, %v2909_v21, %v2917_v52  ;;  %v15372_v53 = vld [vmem:[%s14260_s28 + $0xa8] ss:$16 sps:$4 sm:$0xff]   ;;  %v12946_v21 = vld [vmem:[%s19618_s1 + $0x924] ss:$8 sps:$4 sm:$0xff]  }
 0x114   : > { %v1351_v42 = vpop.f32.mrf.mxu1  ;;  %4208 = vmatpush1.bf16.msra.mxu0 %v12905_v7  ;;  %v2927_v7 = vrot.slane %v15318_v55, 1 }
 0x115   : > { %v15295_v8 = vadd.f32 %v1351_v42, %v1248_v40  ;;  %4311 = vmatpush1.bf16.msra.mxu1 %v12908_v11  ;;  %v1250_v15 = vpop.f32.mrf.mxu0  ;;  %4209 = vmatprep.subr.bf16.mxu0 %v12919_v29  ;;  %v2922_v11 = vsel %vm2057_vm1, %v2913_v26, %v2921_v56  ;;  %v12941_v26 = vld [vmem:[%s19618_s1 + $0x820] ss:$8 sps:$4 sm:$0xff]   ;;  %v15389_v40 = vld [vmem:[%s14260_s28 + $0xc4] ss:$16 sps:$4 sm:$0xff]  }
 0x116   : > { %v1353_v20 = vpop.f32.mrf.mxu1  ;;  %4312 = vmatprep.subr.bf16.mxu1 %v12922_v30  ;;  %v12943_v30 = vld [vmem:[%s19618_s1 + $0x824] ss:$8 sps:$4 sm:$0xff]  }
 0x117   : > { %v15312_v44 = vadd.f32 %v1353_v20, %v1250_v15  ;;  %3340 = vmatmul.mubr.bf16.gmra.mxu0 %v2910_v13  ;;  %v1254_v62 = vpop.f32.mrf.mxu0  ;;  %v2932_v15 = vsel %vm2057_vm1, %v2923_v41, %v2931_v23  ;;  %v15402_v20 = vld [vmem:[%s14260_s28 + $0xcc] ss:$16 sps:$4 sm:$0xff]  }
 0x118   : > { %3443 = vmatmul.mubr.bf16.gmra.mxu1 %v2914_v46  ;;  %v1357_v63 = vpop.f32.mrf.mxu1  ;;  %4210 = vmatpush1.bf16.msra.mxu0 %v12917_v36  ;;  %v2928_v46 = vsel %vm2057_vm1, %v2919_v47, %v2927_v7  ;;  %v12955_v47 = vld [vmem:[%s19618_s1 + $0x814] ss:$8 sps:$4 sm:$0xff]  }
 0x119   : > { %4313 = vmatpush1.bf16.msra.mxu1 %v12920_v37  ;;  %v15333_v1 = vadd.f32 %v1357_v63, %v1254_v62  ;;  %4211 = vmatprep.subr.bf16.mxu0 %v12925_v50  ;;  %v1256_v3 = vpop.f32.mrf.mxu0  ;;  %v12944_v37 = vld [vmem:[%s19618_s1 + $0x920] ss:$8 sps:$4 sm:$0xff]   ;;  %v12958_v63 = vld [vmem:[%s19618_s1 + $0x914] ss:$8 sps:$4 sm:$0xff]  }
 0x11a   : > { %4314 = vmatprep.subr.bf16.mxu1 %v12928_v54  ;;  %v1359_v6 = vpop.f32.mrf.mxu1  ;;  %3349 = vmatprep.mubr.bf16.mxu0 %v2920_v48  ;;  %v2925_v54 = vrot.slane %v15357_v4, 1  ;;  %v15415_v48 = vld [vmem:[%s14260_s28 + $0xc0] ss:$16 sps:$4 sm:$0xff]  }
 0x11b   : > { %v15346_v9 = vadd.f32 %v1359_v6, %v1256_v3  ;;  %3452 = vmatprep.mubr.bf16.mxu1 %v2924_v58  ;;  %v1258_v19 = vpop.f32.mrf.mxu0  ;;  %v12956_v3 = vld [vmem:[%s19618_s1 + $0x910] ss:$8 sps:$4 sm:$0xff]   ;;  %v2935_v6 = vrot.slane %v15389_v40, 1 }
 0x11c   : > { %v1361_v22 = vpop.f32.mrf.mxu1  ;;  %4212 = vmatpush1.bf16.msra.mxu0 %v12923_v49  ;;  %v2929_v49 = vrot.slane %v15372_v53, 1 }
 0x11d   : > { %4315 = vmatpush1.bf16.msra.mxu1 %v12926_v2  ;;  %v15359_v5 = vadd.f32 %v1361_v22, %v1258_v19  ;;  %4213 = vmatprep.subr.bf16.mxu0 %v12937_v38  ;;  %v1260_v57 = vpop.f32.mrf.mxu0  ;;  %v12953_v2 = vld [vmem:[%s19618_s1 + $0x810] ss:$8 sps:$4 sm:$0xff]   ;;  %v2939_v19 = vrot.slane %v15402_v20, 1  ;;  %v15434_v22 = vld [vmem:[%s14260_s28 + $0xe0] sm:$0xff] }
 0x11e   : > { %4316 = vmatprep.subr.bf16.mxu1 %v12940_v39  ;;  %v1363_v29 = vpop.f32.mrf.mxu1  ;;  %v15427_v38 = vld [vmem:[%s14260_s28 + $0xc8] ss:$16 sps:$4 sm:$0xff]  }
 0x11f   : > { %v15380_v36 = vadd.f32 %v1363_v29, %v1260_v57  ;;  %3350 = vmatmul.mubr.bf16.gmra.mxu0 %v2918_v28  ;;  %v1264_v42 = vpop.f32.mrf.mxu0  ;;  %v15437_v28 = vld [vmem:[%s14260_s28 + $0xf0] sm:$0x77]  ;;  %v2926_v29 = vsel %vm2057_vm1, %v2917_v52, %v2925_v54  ;;  %v2936_v52 = vsel %vm2057_vm1, %v2927_v7, %v2935_v6 }
 0x120   : > { %3453 = vmatmul.mubr.bf16.gmra.mxu1 %v2922_v11  ;;  %v1367_v13 = vpop.f32.mrf.mxu1  ;;  %4214 = vmatpush1.bf16.msra.mxu0 %v12935_v17  ;;  %v15440_v11 = vld [vmem:[%s14260_s28 + $0xe8] sm:$0xff] }
 0x121   : > { %4317 = vmatpush1.bf16.msra.mxu1 %v12938_v27  ;;  %v15404_v50 = vadd.f32 %v1367_v13, %v1264_v42  ;;  %4215 = vmatprep.subr.bf16.mxu0 %v12943_v30  ;;  %v1266_v62 = vpop.f32.mrf.mxu0  ;;  %v12961_v27 = vld [vmem:[%s19618_s1 + $0x804] ss:$8 sps:$4 sm:$0xff]   ;;  %v2930_v30 = vsel %vm2057_vm1, %v2921_v56, %v2929_v49  ;;  %v19628_v56 = vrot.slane %v15415_v48, 1 }
 0x122   : > { %4318 = vmatprep.subr.bf16.mxu1 %v12946_v21  ;;  %v1369_v41 = vpop.f32.mrf.mxu1  ;;  %3359 = vmatprep.mubr.bf16.mxu0 %v2928_v46  ;;  %v15455_v21 = vld [vmem:[%s14260_s28 + $0xf8] sm:$0x77]  ;;  %v12964_v42 = vld [vmem:[%s19618_s1 + $0x904] ss:$8 sps:$4 sm:$0xff]  }
 0x123   : > { %v15417_v58 = vadd.f32 %v1369_v41, %v1266_v62  ;;  %3462 = vmatprep.mubr.bf16.mxu1 %v2932_v15  ;;  %v1268_v39 = vpop.f32.mrf.mxu0  ;;  %v19627_v62 = vrot.slane %v15427_v38, 1  ;;  %v11102_v41 = vcombine.high %v15434_v22, %v15437_v28  ;;  %v11104_v7 = vcombine.high %v15440_v11, %v15455_v21 }
 0x124   : > { %v1371_v17 = vpop.f32.mrf.mxu1  ;;  %4216 = vmatpush1.bf16.msra.mxu0 %v12941_v26 }
 0x125   : > { %4319 = vmatpush1.bf16.msra.mxu1 %v12944_v37  ;;  %v15442_v57 = vadd.f32 %v1371_v17, %v1268_v39  ;;  %4217 = vmatprep.subr.bf16.mxu0 %v12955_v47  ;;  %v1270_v26 = vpop.f32.mrf.mxu0  ;;  %v2940_v47 = vsel %vm2057_vm1, %v2931_v23, %v2939_v19  ;;  %v12959_v39 = vld [vmem:[%s19618_s1 + $0x800] ss:$8 sps:$4 sm:$0xff]  }
 0x126   : > { %4320 = vmatprep.subr.bf16.mxu1 %v12958_v63  ;;  %v1373_v37 = vpop.f32.mrf.mxu1  ;;  %v12962_v23 = vld [vmem:[%s19618_s1 + $0x900] ss:$8 sps:$4 sm:$0xff]  }
 0x127   : > { %19666 = vst [vmem:[#allocation2_spill] sm:$0xff] %v15442_v57  ;;  %v15460_v13 = vadd.f32 %v1373_v37, %v1270_v26  ;;  %3360 = vmatmul.mubr.bf16.gmra.mxu0 %v2926_v29  ;;  %v1274_v46 = vpop.f32.mrf.mxu0  ;;  %v3627_v26 = vshrl.u32 %v15131_v12, 16 }
 0x128   : > { %3463 = vmatmul.mubr.bf16.gmra.mxu1 %v2930_v30  ;;  %v1377_v15 = vpop.f32.mrf.mxu1  ;;  %4218 = vmatpush1.bf16.msra.mxu0 %v12953_v2  ;;  %v12973_v30 = vld [vmem:[%s19618_s1 + $0x8f4] ss:$8 sps:$4 sm:$0xff]  }
 0x129   : > { %19667 = vst [vmem:[#allocation3_spill] sm:$0xff] %v15460_v13  ;;  %4321 = vmatpush1.bf16.msra.mxu1 %v12956_v3  ;;  %v15478_v63 = vadd.f32 %v1377_v15, %v1274_v46  ;;  %4219 = vmatprep.subr.bf16.mxu0 %v12961_v27  ;;  %v1276_v17 = vpop.f32.mrf.mxu0  ;;  %v12976_v2 = vld [vmem:[%s19618_s1 + $0x9f4] ss:$8 sps:$4 sm:$0xff]   ;;  %v2934_v27 = vsel %vm2057_vm1, %v2925_v54, %v19628_v56  ;;  %v15505_v15 = vrot.slane %v11102_v41, 1  ;;  %v12974_v54 = vld [vmem:[%s19618_s1 + $0x9f0] ss:$8 sps:$4 sm:$0xff]  }
 0x12a   : > { %4322 = vmatprep.subr.bf16.mxu1 %v12964_v42  ;;  %v1379_v29 = vpop.f32.mrf.mxu1  ;;  %3369 = vmatprep.mubr.bf16.mxu0 %v2936_v52  ;;  %v2938_v42 = vsel %vm2057_vm1, %v2929_v49, %v19627_v62  ;;  %v15507_v52 = vrot.slane %v11104_v7, 1  ;;  %v11103_v49 = vcombine.low %v15440_v11, %v15455_v21  ;;  %v3635_v21 = vshrl.u32 %v15134_v18, 16  ;;  %v12977_v56 = vld [vmem:[%s19618_s1 + $0x8e0] ss:$8 sps:$4 sm:$0xff]  }
 0x12b   : > { %19668 = vst [vmem:[#allocation4_spill] sm:$0xff] %v15478_v63  ;;  %v15492_v3 = vadd.f32 %v1379_v29, %v1276_v17  ;;  %3472 = vmatprep.mubr.bf16.mxu1 %v2940_v47  ;;  %v1278_v37 = vpop.f32.mrf.mxu0  ;;  %v12971_v17 = vld [vmem:[%s19618_s1 + $0x8f0] ss:$8 sps:$4 sm:$0xff]   ;;  %v11101_v29 = vcombine.low %v15434_v22, %v15437_v28  ;;  %v15530_v28 = vrot.slane %v3627_v26, 1 }
 0x12c   : > { %v1381_v46 = vpop.f32.mrf.mxu1  ;;  %4220 = vmatpush1.bf16.msra.mxu0 %v12959_v39  ;;  %v12979_v39 = vld [vmem:[%s19618_s1 + $0x8e4] ss:$8 sps:$4 sm:$0xff]   ;;  %v2948_v26 = vsel %vm2057_vm1, %v2939_v19, %v15507_v52 }
 0x12d   : > { %19669 = vst [vmem:[#allocation5_spill] sm:$0xff] %v15492_v3  ;;  %4323 = vmatpush1.bf16.msra.mxu1 %v12962_v23  ;;  %v15509_v47 = vadd.f32 %v1381_v46, %v1278_v37  ;;  %4221 = vmatprep.subr.bf16.mxu0 %v12973_v30  ;;  %v1280_v41 = vpop.f32.mrf.mxu0  ;;  %v12982_v23 = vld [vmem:[%s19618_s1 + $0x9e4] ss:$8 sps:$4 sm:$0xff]   ;;  %v3630_v37 = vshll.u32 %v15131_v12, 16  ;;  %v3638_v30 = vshll.u32 %v15134_v18, 16  ;;  %v2944_v12 = vsel %vm2057_vm1, %v2935_v6, %v15505_v15 }
 0x12e   : > { %4324 = vmatprep.subr.bf16.mxu1 %v12976_v2  ;;  %v1383_v7 = vpop.f32.mrf.mxu1  ;;  %v3661_v18 = vshrl.u32 %v15136_v34, 16  ;;  %v15554_v6 = vrot.slane %v11103_v49, 1  ;;  %v3610_v49 = vshrl.u32 %v15193_v60, 16  ;;  %v3637_v3 = vrot.slane %v3635_v21, 1  ;;  %v12987_v21 = vld [vmem:[%s19618_s1 + $0x8d0] ss:$8 sps:$4 sm:$0xff]  }
 0x12f   : > { %19670 = vst [vmem:[#allocation6_spill] sm:$0xff] %v15509_v47  ;;  %v15528_v46 = vadd.f32 %v1383_v7, %v1280_v41  ;;  %3370 = vmatmul.mubr.bf16.gmra.mxu0 %v2934_v27  ;;  %v1284_v2 = vpop.f32.mrf.mxu0  ;;  %v3664_v27 = vshll.u32 %v15136_v34, 16  ;;  %v12980_v41 = vld [vmem:[%s19618_s1 + $0x9e0] ss:$8 sps:$4 sm:$0xff]   ;;  %v15552_v7 = vrot.slane %v11101_v29, 1  ;;  %v15566_v29 = vrot.slane %v3630_v37, 2 }
 0x130   : > { %3473 = vmatmul.mubr.bf16.gmra.mxu1 %v2938_v42  ;;  %v1387_v62 = vpop.f32.mrf.mxu1  ;;  %4222 = vmatpush2.bf16.msra.mxu0 %v12971_v17  ;;  %v12989_v34 = vld [vmem:[%s19618_s1 + $0x8d4] ss:$8 sps:$4 sm:$0xff]   ;;  %v3672_v17 = vshll.u32 %v15139_v35, 16  ;;  %v3640_v63 = vrot.slane %v3638_v30, 2  ;;  %v15573_v13 = vrot.slane %v3661_v18, 1 }
 0x131   : > { %19671 = vst [vmem:[#allocation7_spill] sm:$0xff] %v15528_v46  ;;  %4325 = vmatpush2.bf16.msra.mxu1 %v12974_v54  ;;  %v15547_v42 = vadd.f32 %v1387_v62, %v1284_v2  ;;  %v3669_v46 = vshrl.u32 %v15139_v35, 16  ;;  %4223 = vmatprep.subr.bf16.mxu0 %v12979_v39  ;;  %v1286_v19 = vpop.f32.mrf.mxu0  ;;  %v12992_v62 = vld [vmem:[%s19618_s1 + $0x9d4] ss:$8 sps:$4 sm:$0xff]   ;;  %v3613_v39 = vshll.u32 %v15193_v60, 16  ;;  %v15575_v57 = vrot.slane %v3664_v27, 2 }
 0x132   : > { %4326 = vmatprep.subr.bf16.mxu1 %v12982_v23  ;;  %v1389_v47 = vpop.f32.mrf.mxu1  ;;  %3379 = vmatprep.mubr.bf16.mxu0 %v2944_v12  ;;  %v15571_v23 = vld [vmem:[%s14260_s28 + $0xf0] sm:$0xff]  ;;  %v19676_v60 = vrot.slane %v15427_v38, 1  ;;  %v12995_v27 = vld [vmem:[%s19618_s1 + $0x8c4] ss:$8 sps:$4 sm:$0xff]  }
 0x133   : > { %19672 = vst [vmem:[#allocation8_spill] sm:$0xff] %v15547_v42  ;;  %v15564_v54 = vadd.f32 %v1389_v47, %v1286_v19  ;;  %3482 = vmatprep.mubr.bf16.mxu1 %v2948_v26  ;;  %v1288_v2 = vpop.f32.mrf.mxu0  ;;  %v19675_v47 = vrot.slane %v15415_v48, 1  ;;  %v3671_v30 = vrot.slane %v3669_v46, 1  ;;  %v15601_v19 = vcombine.low %v15434_v22, %v15571_v23 }
 0x134   : > { %v1391_v42 = vpop.f32.mrf.mxu1  ;;  %4224 = vmatpush2.bf16.msra.mxu0 %v12977_v56  ;;  %v2946_v12 = vsel %vm2057_vm1, %v19676_v60, %v15554_v6  ;;  %v12990_v56 = vld [vmem:[%s19618_s1 + $0x9d0] ss:$8 sps:$4 sm:$0xff]   ;;  %v15605_v46 = vrot.slane %v3610_v49, 1 }
 0x135   : > { %19673 = vst [vmem:[#allocation9_spill] sm:$0xff] %v15564_v54  ;;  %4327 = vmatpush2.bf16.msra.mxu1 %v12980_v41  ;;  %v15577_v35 = vadd.f32 %v1391_v42, %v1288_v2  ;;  %v2942_v37 = vsel %vm2057_vm1, %v19675_v47, %v15552_v7  ;;  %4225 = vmatprep.subr.bf16.mxu0 %v12989_v34  ;;  %v1290_v26 = vpop.f32.mrf.mxu0  ;;  %v12998_v42 = vld [vmem:[%s19618_s1 + $0x9c4] ss:$8 sps:$4 sm:$0xff]   ;;  %v3674_v41 = vrot.slane %v3672_v17, 2  ;;  %v15607_v34 = vrot.slane %v3613_v39, 2 }
 0x136   : > { %4328 = vmatprep.subr.bf16.mxu1 %v12992_v62  ;;  %v1393_v18 = vpop.f32.mrf.mxu1  ;;  %v3618_v62 = vshrl.u32 %v15191_v51, 16  ;;  %v12993_v17 = vld [vmem:[%s19618_s1 + $0x8c0] ss:$8 sps:$4 sm:$0xff]   ;;  %v3644_v54 = vshrl.u32 %v15195_v59, 16 }
 0x137   : > { %19674 = vst [vmem:[#allocation10_spill] sm:$0xff] %v15577_v35  ;;  %v15603_v2 = vadd.f32 %v1393_v18, %v1290_v26  ;;  %3380 = vmatmul.mubr.bf16.gmra.mxu0 %v2942_v37  ;;  %v1294_v47 = vpop.f32.mrf.mxu0  ;;  %v3621_v35 = vshll.u32 %v15191_v51, 16  ;;  %v12996_v39 = vld [vmem:[%s19618_s1 + $0x9c0] ss:$8 sps:$4 sm:$0xff]   ;;  %v3647_v37 = vshll.u32 %v15195_v59, 16 }
 0x138   : > { %3483 = vmatmul.mubr.bf16.gmra.mxu1 %v2946_v12  ;;  %v1397_v60 = vpop.f32.mrf.mxu1  ;;  %4226 = vmatpush2.bf16.msra.mxu0 %v12987_v21  ;;  %v19629_v12 = vrot.slane %v15415_v48, 2  ;;  %v13001_v26 = vld [vmem:[%s19618_s1 + $0x8b4] ss:$8 sps:$4 sm:$0xff]  }
 0x139   : > { %4329 = vmatpush2.bf16.msra.mxu1 %v12990_v56  ;;  %v15616_v49 = vadd.f32 %v1397_v60, %v1294_v47  ;;  %4227 = vmatprep.subr.bf16.mxu0 %v12995_v27  ;;  %v1296_v18 = vpop.f32.mrf.mxu0  ;;  %v13004_v21 = vld [vmem:[%s19618_s1 + $0x9b4] ss:$8 sps:$4 sm:$0xff]   ;;  %v3633_v56 = vor.u32 %v15566_v29, %v15530_v28  ;;  %v15631_v47 = vor.u32 %v3640_v63, %v3637_v3  ;;  %v3652_v27 = vshrl.u32 %v15198_v61, 16  ;;  %v12999_v28 = vld [vmem:[%s19618_s1 + $0x8b0] ss:$8 sps:$4 sm:$0xff]  }
 0x13a   : > { %4330 = vmatprep.subr.bf16.mxu1 %v12998_v42  ;;  %v1399_v51 = vpop.f32.mrf.mxu1  ;;  %3389 = vmatprep.mubr.bf16.mxu0 %v15505_v15  ;;  %v3655_v42 = vshll.u32 %v15198_v61, 16  ;;  %v19678_v60 = vrot.slane %v15601_v19, 2  ;;  %v3667_v15 = vor.u32 %v15575_v57, %v15573_v13  ;;  %v15653_v29 = vrot.slane %v3618_v62, 1 }
 0x13b   : > { %19677 = vst [vmem:[#allocation11_spill] sm:$0xff] %v15616_v49  ;;  %v15633_v59 = vadd.f32 %v1399_v51, %v1296_v18  ;;  %3492 = vmatprep.mubr.bf16.mxu1 %v15507_v52  ;;  %v1298_v63 = vpop.f32.mrf.mxu0  ;;  %v15651_v52 = vor.u32 %v3674_v41, %v3671_v30  ;;  %v15655_v61 = vrot.slane %v3621_v35, 2  ;;  %v13002_v51 = vld [vmem:[%s19618_s1 + $0x9b0] ss:$8 sps:$4 sm:$0xff]   ;;  %v13007_v35 = vld [vmem:[%s19618_s1 + $0x8a4] ss:$8 sps:$4 sm:$0xff]  }
 0x13c   : > { %v15644_v49 = vsel %vm4516_vm3, %v19629_v12, %v19678_v60  ;;  %v1401_v3 = vpop.f32.mrf.mxu1  ;;  %4228 = vmatpush2.bf16.msra.mxu0 %v12993_v17  ;;  %v15662_v60 = vrot.slane %v3644_v54, 1  ;;  %v3687_v12 = vshrl.u32 %v15213_v25, 16  ;;  %v13010_v30 = vld [vmem:[%s19618_s1 + $0x9a4] ss:$8 sps:$4 sm:$0xff]   ;;  %v3690_v41 = vshll.u32 %v15213_v25, 16 }
 0x13d   : > { %19679 = vst [vmem:[#allocation12_spill] sm:$0xff] %v15644_v49  ;;  %4331 = vmatpush2.bf16.msra.mxu1 %v12996_v39  ;;  %v15657_v18 = vadd.f32 %v1401_v3, %v1298_v63  ;;  %4229 = vmatprep.subr.bf16.mxu0 %v13001_v26  ;;  %v1300_v57 = vpop.f32.mrf.mxu0  ;;  %v15674_v54 = vrot.slane %v3647_v37, 2  ;;  %v3654_v17 = vrot.slane %v3652_v27, 1  ;;  %v3657_v39 = vrot.slane %v3655_v42, 2  ;;  %v13005_v63 = vld [vmem:[%s19618_s1 + $0x8a0] ss:$8 sps:$4 sm:$0xff]  }
 0x13e   : > { %4332 = vmatprep.subr.bf16.mxu1 %v13004_v21  ;;  %v1403_v13 = vpop.f32.mrf.mxu1  ;;  %v3642_v3 = vsel %vm3608_vm2, %v3633_v56, %v15631_v47  ;;  %v3676_v25 = vsel %vm3608_vm2, %v3667_v15, %v15651_v52  ;;  %v3705_v37 = vshrl.u32 %v15216_v0, 16  ;;  %v3708_v27 = vshll.u32 %v15216_v0, 16  ;;  %v13013_v15 = vld [vmem:[%s19618_s1 + $0x894] ss:$8 sps:$4 sm:$0xff]   ;;  %v13011_v49 = vld [vmem:[%s19618_s1 + $0x890] ss:$8 sps:$4 sm:$0xff]  }
 0x13f   : > { %v15672_v62 = vadd.f32 %v1403_v13, %v1300_v57  ;;  %3390 = vmatmul.mubr.bf16.gmra.mxu0 %v15552_v7  ;;  %v1304_v26 = vpop.f32.mrf.mxu0  ;;  %v3689_v42 = vrot.slane %v3687_v12, 1  ;;  %v3678_v57 = vshrl.u32 %v15237_v14, 16  ;;  %v13016_v0 = vld [vmem:[%s19618_s1 + $0x994] ss:$8 sps:$4 sm:$0xff]   ;;  %v3681_v12 = vshll.u32 %v15237_v14, 16 }
 0x140   : > { %3493 = vmatmul.mubr.bf16.gmra.mxu1 %v15554_v6  ;;  %v1407_v21 = vpop.f32.mrf.mxu1  ;;  %4230 = vmatpush2.bf16.msra.mxu0 %v12999_v28  ;;  %v13008_v6 = vld [vmem:[%s19618_s1 + $0x9a0] ss:$8 sps:$4 sm:$0xff]   ;;  %v3692_v28 = vrot.slane %v3690_v41, 2  ;;  %v13014_v14 = vld [vmem:[%s19618_s1 + $0x990] ss:$8 sps:$4 sm:$0xff]  }
 0x141   : > { %19680 = vst [vmem:[#allocation13_spill] sm:$0xff] %v15672_v62  ;;  %4333 = vmatpush2.bf16.msra.mxu1 %v13002_v51  ;;  %v15687_v7 = vadd.f32 %v1407_v21, %v1304_v26  ;;  %4231 = vmatprep.subr.bf16.mxu0 %v13007_v35  ;;  %v1306_v56 = vpop.f32.mrf.mxu0  ;;  %v3696_v35 = vshrl.u32 %v15242_v16, 16  ;;  %v3710_v62 = vrot.slane %v3708_v27, 2  ;;  %v3726_v27 = vshll.u32 %v15254_v10, 16 }
 0x142   : > { %4334 = vmatprep.subr.bf16.mxu1 %v13010_v30  ;;  %v1409_v13 = vpop.f32.mrf.mxu1  ;;  %4237 = vmatprep.mubr.bf16.mxu0 %v3642_v3  ;;  %v3699_v30 = vshll.u32 %v15242_v16, 16  ;;  %v3680_v3 = vrot.slane %v3678_v57, 1 }
 0x143   : > { %19681 = vst [vmem:[#allocation14_spill] sm:$0xff] %v15687_v7  ;;  %v15699_v51 = vadd.f32 %v1409_v13, %v1306_v56  ;;  %4340 = vmatprep.mubr.bf16.mxu1 %v3676_v25  ;;  %v1308_v26 = vpop.f32.mrf.mxu0  ;;  %v3707_v7 = vrot.slane %v3705_v37, 1  ;;  %v3723_v25 = vshrl.u32 %v15254_v10, 16  ;;  %v13019_v37 = vld [vmem:[%s19618_s1 + $0x884] ss:$8 sps:$4 sm:$0xff]   ;;  %v3683_v13 = vrot.slane %v3681_v12, 2 }
 0x144   : > { %v1411_v21 = vpop.f32.mrf.mxu1  ;;  %4232 = vmatpush2.bf16.msra.mxu0 %v13005_v63  ;;  %v13022_v63 = vld [vmem:[%s19618_s1 + $0x984] ss:$8 sps:$4 sm:$0xff]   ;;  %v3698_v57 = vrot.slane %v3696_v35, 1  ;;  %v13020_v10 = vld [vmem:[%s19618_s1 + $0x980] ss:$8 sps:$4 sm:$0xff]   ;;  %v3624_v12 = vor.u32 %v15655_v61, %v15653_v29  ;;  %v3650_v35 = vor.u32 %v15674_v54, %v15662_v60  ;;  %v3714_v29 = vshrl.u32 %v15293_v45, 16 }
 0x145   : > { %4335 = vmatpush2.bf16.msra.mxu1 %v13008_v6  ;;  %v15707_v41 = vadd.f32 %v1411_v21, %v1308_v26  ;;  %4233 = vmatprep.subr.bf16.mxu0 %v13013_v15  ;;  %v1310_v16 = vpop.f32.mrf.mxu0  ;;  %v3701_v26 = vrot.slane %v3699_v30, 2  ;;  %v13017_v15 = vld [vmem:[%s19618_s1 + $0x880] ss:$8 sps:$4 sm:$0xff]   ;;  %v3741_v21 = vshrl.u32 %v15267_v33, 16  ;;  %v3658_v30 = vor.u32 %v3657_v39, %v3654_v17  ;;  %v13023_v61 = vld [vmem:[%s19618_s1 + $0xa70] ss:$8 sps:$4 sm:$0xff]  }
 0x146   : > { %4336 = vmatprep.subr.bf16.mxu1 %v13016_v0  ;;  %v1413_v56 = vpop.f32.mrf.mxu1  ;;  %v3616_v0 = vor.u32 %v15607_v34, %v15605_v46  ;;  %v13028_v46 = vld [vmem:[%s19618_s1 + $0xb74] ss:$8 sps:$4 sm:$0xff]   ;;  %v3693_v34 = vor.u32 %v3692_v28, %v3689_v42  ;;  %v15748_v60 = vor.u32 %v3683_v13, %v3680_v3  ;;  %v3732_v28 = vshrl.u32 %v15304_v43, 16  ;;  %v13034_v3 = vld [vmem:[%s19618_s1 + $0xb64] ss:$8 sps:$4 sm:$0xff]  }
 0x147   : > { %19682 = vst [vmem:[#allocation15_spill] sm:$0xff] %v15707_v41  ;;  %v15720_v6 = vadd.f32 %v1413_v56, %v1310_v16  ;;  %v3744_v41 = vshll.u32 %v15267_v33, 16  ;;  %v3725_v16 = vrot.slane %v3723_v25, 1  ;;  %v13025_v33 = vld [vmem:[%s19618_s1 + $0xa74] ss:$8 sps:$4 sm:$0xff]   ;;  %v15750_v54 = vor.u32 %v3701_v26, %v3698_v57 }
 0x148   : > { %4234 = vmatpush2.bf16.msra.mxu0 %v13011_v49  ;;  %v3728_v49 = vrot.slane %v3726_v27, 2  ;;  %v3743_v17 = vrot.slane %v3741_v21, 1  ;;  %v3625_v25 = vsel %vm3608_vm2, %v3616_v0, %v3624_v12  ;;  %v3659_v42 = vsel %vm3608_vm2, %v3650_v35, %v3658_v30  ;;  %v13037_v35 = vld [vmem:[%s19618_s1 + $0xa54] ss:$8 sps:$4 sm:$0xff]  }
 0x149   : > { %4337 = vmatpush2.bf16.msra.mxu1 %v13014_v14  ;;  %4235 = vmatprep.subr.bf16.mxu0 %v13019_v37  ;;  %v15742_v14 = vor.u32 %v3710_v62, %v3707_v7  ;;  %v3746_v39 = vrot.slane %v3744_v41, 2  ;;  %v13026_v62 = vld [vmem:[%s19618_s1 + $0xb70] ss:$8 sps:$4 sm:$0xff]   ;;  %v3717_v7 = vshll.u32 %v15293_v45, 16  ;;  %v13031_v41 = vld [vmem:[%s19618_s1 + $0xa64] ss:$8 sps:$4 sm:$0xff]   ;;  %v3694_v56 = vsel %vm3608_vm2, %v15631_v47, %v3693_v34 }
 0x14a   : > { %4338 = vmatprep.subr.bf16.mxu1 %v13022_v63  ;;  %v15767_v37 = vor.u32 %v3728_v49, %v3725_v16  ;;  %v3735_v63 = vshll.u32 %v15304_v43, 16  ;;  %v13029_v45 = vld [vmem:[%s19618_s1 + $0xa60] ss:$8 sps:$4 sm:$0xff]   ;;  %v3716_v13 = vrot.slane %v3714_v29, 1  ;;  %v3759_v57 = vshrl.u32 %v15318_v55, 16 }
 0x14b   : > { %v3712_v27 = vsel %vm3608_vm2, %v15651_v52, %v15742_v14  ;;  %v3762_v26 = vshll.u32 %v15318_v55, 16  ;;  %v13032_v43 = vld [vmem:[%s19618_s1 + $0xb60] ss:$8 sps:$4 sm:$0xff]   ;;  %v3685_v47 = vsel %vm3608_vm2, %v3624_v12, %v15748_v60  ;;  %v3703_v21 = vsel %vm3608_vm2, %v3658_v30, %v15750_v54 }
 0x14c   : > { %4236 = vmatpush2.bf16.msra.mxu0 %v13017_v15  ;;  %v3777_v52 = vshrl.u32 %v15331_v31, 16  ;;  %v15791_v16 = vor.u32 %v3746_v39, %v3743_v17  ;;  %v3737_v30 = vrot.slane %v3735_v63, 2  ;;  %v3750_v29 = vshrl.u32 %v15357_v4, 16 }
 0x14d   : > { %4339 = vmatpush2.bf16.msra.mxu1 %v13020_v10  ;;  %4917 = vmatprep.subr.bf16.mxu0 %v13025_v33  ;;  %v3780_v10 = vshll.u32 %v15331_v31, 16  ;;  %v3719_v33 = vrot.slane %v3717_v7, 2  ;;  %v13040_v31 = vld [vmem:[%s19618_s1 + $0xb54] ss:$8 sps:$4 sm:$0xff]  }
 0x14e   : > { %5020 = vmatprep.subr.bf16.mxu1 %v13028_v46  ;;  %v3734_v46 = vrot.slane %v3732_v28, 1 }
 0x14f   : > { %v1808_v15 = vpop.f32.mrf.mxu0  ;;  %4238 = vmatmul.mubr.bf16.vlgmr.msra.gmra.mxu0 %v3625_v25  ;;  %v13035_v25 = vld [vmem:[%s19618_s1 + $0xa50] ss:$8 sps:$4 sm:$0xff]  }
 0x150   : > { %v1911_v0 = vpop.f32.mrf.mxu1  ;;  %4341 = vmatmul.mubr.bf16.vlgmr.msra.gmra.mxu1 %v3659_v42  ;;  %v1809_v55 = vadd.f32 %v1808_v15, %v15269_v24  ;;  %4918 = vmatpush1.bf16.msra.mxu0 %v13023_v61  ;;  %v15798_v24 = vsel %vm3608_vm2, %v3693_v34, %v15767_v37  ;;  %v3753_v61 = vshll.u32 %v15357_v4, 16  ;;  %v13038_v34 = vld [vmem:[%s19618_s1 + $0xb50] ss:$8 sps:$4 sm:$0xff]   ;;  %v3761_v42 = vrot.slane %v3759_v57, 1 }
 0x151   : > { %5021 = vmatpush1.bf16.msra.mxu1 %v13026_v62  ;;  %v1810_v12 = vpop.f32.mrf.mxu0  ;;  %4919 = vmatprep.subr.bf16.mxu0 %v13031_v41  ;;  %v3764_v62 = vrot.slane %v3762_v26, 2  ;;  %v3779_v41 = vrot.slane %v3777_v52, 1  ;;  %v3782_v4 = vrot.slane %v3780_v10, 2  ;;  %v3748_v57 = vsel %vm3608_vm2, %v15742_v14, %v15791_v16 }
 0x152   : > { %v1913_v49 = vpop.f32.mrf.mxu1  ;;  %5022 = vmatprep.subr.bf16.mxu1 %v13034_v3  ;;  %v15802_v17 = vadd.f32 %v1911_v0, %v1809_v55  ;;  %v1811_v39 = vadd.f32 %v1810_v12, %v15282_v32  ;;  %4247 = vmatprep.mubr.bf16.mxu0 %v3694_v56  ;;  %v3768_v3 = vshrl.u32 %v15372_v53, 16  ;;  %v3771_v32 = vshll.u32 %v15372_v53, 16  ;;  %v13046_v53 = vld [vmem:[%s19618_s1 + $0xb44] ss:$8 sps:$4 sm:$0xff]  }
 0x153   : > { %4350 = vmatprep.mubr.bf16.mxu1 %v3712_v27  ;;  %v1812_v7 = vpop.f32.mrf.mxu0  ;;  %v13043_v27 = vld [vmem:[%s19618_s1 + $0xa44] ss:$8 sps:$4 sm:$0xff]   ;;  %v15825_v0 = vor.u32 %v3719_v33, %v3716_v13  ;;  %v3795_v14 = vshrl.u32 %v15389_v40, 16  ;;  %v3798_v55 = vshll.u32 %v15389_v40, 16  ;;  %v13041_v13 = vld [vmem:[%s19618_s1 + $0xa40] ss:$8 sps:$4 sm:$0xff]   ;;  %v15837_v33 = vor.u32 %v3764_v62, %v3761_v42 }
 0x154   : > { %v1915_v28 = vpop.f32.mrf.mxu1  ;;  %v15813_v56 = vadd.f32 %v1913_v49, %v1811_v39  ;;  %v1813_v63 = vadd.f32 %v1812_v7, %v15295_v8  ;;  %4920 = vmatpush1.bf16.msra.mxu0 %v13029_v45  ;;  %v15827_v8 = vor.u32 %v3737_v30, %v3734_v46  ;;  %v3752_v45 = vrot.slane %v3750_v29, 1  ;;  %v13044_v40 = vld [vmem:[%s19618_s1 + $0xb40] ss:$8 sps:$4 sm:$0xff]   ;;  %v13050_v62 = vld [vmem:[%s19618_s1 + $0xb30] ss:$8 sps:$4 sm:$0xff]  }
 0x155   : > { %5023 = vmatpush1.bf16.msra.mxu1 %v13032_v43  ;;  %v1814_v26 = vpop.f32.mrf.mxu0  ;;  %4921 = vmatprep.subr.bf16.mxu0 %v13037_v35  ;;  %v3755_v43 = vrot.slane %v3753_v61, 2  ;;  %v15839_v46 = vor.u32 %v3782_v4, %v3779_v41  ;;  %v3770_v49 = vrot.slane %v3768_v3, 1  ;;  %v3721_v39 = vsel %vm3608_vm2, %v15748_v60, %v15825_v0  ;;  %v13047_v60 = vld [vmem:[%s19618_s1 + $0xa30] ss:$8 sps:$4 sm:$0xff]   ;;  %v13058_v3 = vld [vmem:[%s19618_s1 + $0xb24] ss:$8 sps:$4 sm:$0xff]  }
 0x156   : > { %v1917_v15 = vpop.f32.mrf.mxu1  ;;  %5024 = vmatprep.subr.bf16.mxu1 %v13040_v31  ;;  %v15829_v52 = vadd.f32 %v1915_v28, %v1813_v63  ;;  %v1815_v10 = vadd.f32 %v1814_v26, %v15312_v44  ;;  %v3773_v31 = vrot.slane %v3771_v32, 2  ;;  %v3797_v7 = vrot.slane %v3795_v14, 1 }
 0x157   : > { %v1818_v35 = vpop.f32.mrf.mxu0  ;;  %4248 = vmatmul.mubr.bf16.gmra.mxu0 %v3685_v47  ;;  %v3813_v47 = vshrl.u32 %v15402_v20, 16  ;;  %v3800_v28 = vrot.slane %v3798_v55, 2  ;;  %v3766_v32 = vsel %vm3608_vm2, %v15767_v37, %v15837_v33  ;;  %v3784_v63 = vsel %vm3608_vm2, %v15791_v16, %v15839_v46 }
 0x158   : > { %4351 = vmatmul.mubr.bf16.gmra.mxu1 %v3703_v21  ;;  %v1921_v12 = vpop.f32.mrf.mxu1  ;;  %v15841_v30 = vadd.f32 %v1917_v15, %v1815_v10  ;;  %v1819_v44 = vadd.f32 %v1818_v35, %v15333_v1  ;;  %4922 = vmatpush1.bf16.msra.mxu0 %v13035_v25  ;;  %v3816_v21 = vshll.u32 %v15402_v20, 16  ;;  %v13049_v1 = vld [vmem:[%s19618_s1 + $0xa34] ss:$8 sps:$4 sm:$0xff]   ;;  %v3786_v37 = vshrl.u32 %v15415_v48, 16  ;;  %v13053_v35 = vld [vmem:[%s19618_s1 + $0xa20] ss:$8 sps:$4 sm:$0xff]  }
 0x159   : > { %5025 = vmatpush1.bf16.msra.mxu1 %v13038_v34  ;;  %v1820_v29 = vpop.f32.mrf.mxu0  ;;  %4923 = vmatprep.subr.bf16.mxu0 %v13043_v27  ;;  %v13052_v25 = vld [vmem:[%s19618_s1 + $0xb34] ss:$8 sps:$4 sm:$0xff]   ;;  %v15858_v34 = vor.u32 %v3755_v43, %v3752_v45  ;;  %v15885_v27 = vor.u32 %v3773_v31, %v3770_v49  ;;  %v3815_v26 = vrot.slane %v3813_v47, 1  ;;  %v3789_v10 = vshll.u32 %v15415_v48, 16 }
 0x15a   : > { %v1923_v61 = vpop.f32.mrf.mxu1  ;;  %5026 = vmatprep.subr.bf16.mxu1 %v13046_v53  ;;  %v1821_v20 = vadd.f32 %v1820_v29, %v15346_v9  ;;  %v15861_v42 = vadd.f32 %v1921_v12, %v1819_v44  ;;  %4257 = vmatprep.mubr.bf16.mxu0 %v15798_v24  ;;  %v3739_v9 = vsel %vm3608_vm2, %v15750_v54, %v15827_v8  ;;  %v13055_v24 = vld [vmem:[%s19618_s1 + $0xa24] ss:$8 sps:$4 sm:$0xff]   ;;  %v3818_v15 = vrot.slane %v3816_v21, 2  ;;  %v3532_v53 = vld [vmem:[%s14260_s28 + $0xf8] sm:$0xff] }
 0x15b   : > { %4360 = vmatprep.mubr.bf16.mxu1 %v3748_v57  ;;  %v1822_v41 = vpop.f32.mrf.mxu0  ;;  %v3804_v16 = vshrl.u32 %v15427_v38, 16  ;;  %v3807_v14 = vshll.u32 %v15427_v38, 16  ;;  %v3757_v12 = vsel %vm3608_vm2, %v15825_v0, %v15858_v34  ;;  %v3775_v38 = vsel %vm3608_vm2, %v15827_v8, %v15885_v27  ;;  %v13061_v21 = vld [vmem:[%s19618_s1 + $0xa14] ss:$8 sps:$4 sm:$0xff]  }
 0x15c   : > { %v1925_v4 = vpop.f32.mrf.mxu1  ;;  %v1823_v54 = vadd.f32 %v1822_v41, %v15359_v5  ;;  %v15888_v57 = vadd.f32 %v1923_v61, %v1821_v20  ;;  %4924 = vmatpush1.bf16.msra.mxu0 %v13041_v13  ;;  %v15904_v13 = vor.u32 %v3800_v28, %v3797_v7  ;;  %v15914_v44 = vcombine.high %v15434_v22, %v15571_v23  ;;  %v13064_v22 = vld [vmem:[%s19618_s1 + $0xb14] ss:$8 sps:$4 sm:$0xff]   ;;  %v13059_v7 = vld [vmem:[%s19618_s1 + $0xa10] ss:$8 sps:$4 sm:$0xff]  }
 0x15d   : > { %5027 = vmatpush1.bf16.msra.mxu1 %v13044_v40  ;;  %v1824_v45 = vpop.f32.mrf.mxu0  ;;  %4925 = vmatprep.subr.bf16.mxu0 %v13049_v1  ;;  %v15917_v0 = vcombine.high %v15440_v11, %v3532_v53  ;;  %v15925_v29 = vor.u32 %v3818_v15, %v3815_v26  ;;  %v3788_v11 = vrot.slane %v3786_v37, 1  ;;  %v3806_v23 = vrot.slane %v3804_v16, 1  ;;  %v13067_v15 = vld [vmem:[%s19618_s1 + $0xa04] ss:$8 sps:$4 sm:$0xff]  }
 0x15e   : > { %v1927_v43 = vpop.f32.mrf.mxu1  ;;  %5028 = vmatprep.subr.bf16.mxu1 %v13052_v25  ;;  %v1825_v5 = vadd.f32 %v1824_v45, %v15380_v36  ;;  %v15896_v55 = vadd.f32 %v1925_v4, %v1823_v54  ;;  %v13056_v36 = vld [vmem:[%s19618_s1 + $0xb20] ss:$8 sps:$4 sm:$0xff]   ;;  %v3802_v20 = vsel %vm3608_vm2, %v15837_v33, %v15904_v13  ;;  %v3831_v28 = vshrl.u32 %v15914_v44, 16  ;;  %v13062_v33 = vld [vmem:[%s19618_s1 + $0xb10] ss:$8 sps:$4 sm:$0xff]  }
 0x15f   : > { %v1828_v49 = vpop.f32.mrf.mxu0  ;;  %4258 = vmatmul.mubr.bf16.gmra.mxu0 %v3721_v39  ;;  %v3809_v39 = vrot.slane %v3807_v14, 2  ;;  %v3834_v41 = vshll.u32 %v15914_v44, 16  ;;  %v3852_v4 = vshll.u32 %v15917_v0, 16  ;;  %v13070_v45 = vld [vmem:[%s19618_s1 + $0xb04] ss:$8 sps:$4 sm:$0xff]  }
 0x160   : > { %4361 = vmatmul.mubr.bf16.gmra.mxu1 %v3739_v9  ;;  %v1931_v31 = vpop.f32.mrf.mxu1  ;;  %v1829_v40 = vadd.f32 %v1828_v49, %v15404_v50  ;;  %v15920_v47 = vadd.f32 %v1927_v43, %v1825_v5  ;;  %4926 = vmatpush1.bf16.msra.mxu0 %v13047_v60  ;;  %v3791_v50 = vrot.slane %v3789_v10, 2  ;;  %v19683_v9 = vld [vmem:[#allocation2_spill] sm:$0xff]  ;;  %v3820_v43 = vsel %vm3608_vm2, %v15839_v46, %v15925_v29  ;;  %v19684_v10 = vld [vmem:[#allocation3_spill] sm:$0xff] }
 0x161   : > { %5029 = vmatpush1.bf16.msra.mxu1 %v13050_v62  ;;  %v1830_v8 = vpop.f32.mrf.mxu0  ;;  %4927 = vmatprep.subr.bf16.mxu0 %v13055_v24  ;;  %v13065_v5 = vld [vmem:[%s19618_s1 + $0xa00] ss:$8 sps:$4 sm:$0xff]   ;;  %v3825_v49 = vshll.u32 %v15601_v19, 16 }
 0x162   : > { %v1933_v61 = vpop.f32.mrf.mxu1  ;;  %5030 = vmatprep.subr.bf16.mxu1 %v13058_v3  ;;  %v1831_v1 = vadd.f32 %v1830_v8, %v15417_v58  ;;  %v15931_v25 = vadd.f32 %v1931_v31, %v1829_v40  ;;  %4267 = vmatprep.mubr.bf16.mxu0 %v3766_v32  ;;  %v3849_v58 = vshrl.u32 %v15917_v0, 16  ;;  %v13933_v32 = vld [vmem:[%s14260_s28 + $0xe8] sm:$0xff]  ;;  %v15961_v37 = vor.u32 %v3791_v50, %v3788_v11 }
 0x163   : > { %4370 = vmatprep.mubr.bf16.mxu1 %v3784_v63  ;;  %v1832_v60 = vpop.f32.mrf.mxu0  ;;  %v15950_v63 = vcombine.low %v13933_v32, %v3532_v53  ;;  %v15963_v53 = vor.u32 %v3809_v39, %v3806_v23  ;;  %v3836_v40 = vrot.slane %v3834_v41, 2  ;;  %v3854_v8 = vrot.slane %v3852_v4, 2  ;;  %v13068_v50 = vld [vmem:[%s19618_s1 + $0xb00] ss:$8 sps:$4 sm:$0xff]  }
 0x164   : > { %v1935_v62 = vpop.f32.mrf.mxu1  ;;  %v1833_v24 = vadd.f32 %v1832_v60, %v19683_v9  ;;  %v15944_v3 = vadd.f32 %v1933_v61, %v1831_v1  ;;  %4928 = vmatpush1.bf16.msra.mxu0 %v13053_v35  ;;  %v3822_v35 = vshrl.u32 %v15601_v19, 16  ;;  %v19685_v61 = vld [vmem:[#allocation4_spill] sm:$0xff]  ;;  %v3793_v1 = vsel %vm3608_vm2, %v15858_v34, %v15961_v37 }
 0x165   : > { %5031 = vmatpush1.bf16.msra.mxu1 %v13056_v36  ;;  %v1834_v54 = vpop.f32.mrf.mxu0  ;;  %4929 = vmatprep.subr.bf16.mxu0 %v13061_v21  ;;  %v3833_v36 = vrot.slane %v3831_v28, 1  ;;  %v3851_v21 = vrot.slane %v3849_v58, 1  ;;  %v3840_v23 = vshrl.u32 %v15950_v63, 16  ;;  %v13073_v60 = vld [vmem:[%s19618_s1 + $0xaf4] ss:$8 sps:$4 sm:$0xff]   ;;  %v3811_v58 = vsel %vm3608_vm2, %v15885_v27, %v15963_v53 }
 0x166   : > { %v1937_v26 = vpop.f32.mrf.mxu1  ;;  %5032 = vmatprep.subr.bf16.mxu1 %v13064_v22  ;;  %v1835_v16 = vadd.f32 %v1834_v54, %v19684_v10  ;;  %v15966_v14 = vadd.f32 %v1935_v62, %v1833_v24  ;;  %v13076_v62 = vld [vmem:[%s19618_s1 + $0xbf4] ss:$8 sps:$4 sm:$0xff]   ;;  %v13071_v9 = vld [vmem:[%s19618_s1 + $0xaf0] ss:$8 sps:$4 sm:$0xff]   ;;  %v3824_v32 = vrot.slane %v3822_v35, 1  ;;  %v3827_v54 = vrot.slane %v3825_v49, 2 }
 0x167   : > { %v1838_v31 = vpop.f32.mrf.mxu0  ;;  %4268 = vmatmul.mubr.bf16.gmra.mxu0 %v3757_v12  ;;  %v3843_v12 = vshll.u32 %v15950_v63, 16  ;;  %v15999_v24 = vor.u32 %v3836_v40, %v3833_v36  ;;  %v13074_v27 = vld [vmem:[%s19618_s1 + $0xbf0] ss:$8 sps:$4 sm:$0xff]   ;;  %v13079_v35 = vld [vmem:[%s19618_s1 + $0xae4] ss:$8 sps:$4 sm:$0xff]  }
 0x168   : > { %4371 = vmatmul.mubr.bf16.gmra.mxu1 %v3775_v38  ;;  %v1941_v46 = vpop.f32.mrf.mxu1  ;;  %v1839_v22 = vadd.f32 %v1838_v31, %v19685_v61  ;;  %v15974_v11 = vadd.f32 %v1937_v26, %v1835_v16  ;;  %4930 = vmatpush1.bf16.msra.mxu0 %v13059_v7  ;;  %v19686_v7 = vld [vmem:[#allocation5_spill] sm:$0xff]  ;;  %v19687_v26 = vld [vmem:[#allocation6_spill] sm:$0xff] }
 0x169   : > { %5033 = vmatpush1.bf16.msra.mxu1 %v13062_v33  ;;  %v1840_v38 = vpop.f32.mrf.mxu0  ;;  %4931 = vmatprep.subr.bf16.mxu0 %v13067_v15  ;;  %v16001_v33 = vor.u32 %v3854_v8, %v3851_v21  ;;  %v13082_v49 = vld [vmem:[%s19618_s1 + $0xbe4] ss:$8 sps:$4 sm:$0xff]   ;;  %v13077_v21 = vld [vmem:[%s19618_s1 + $0xae0] ss:$8 sps:$4 sm:$0xff]   ;;  %v3838_v61 = vsel %vm3608_vm2, %v15904_v13, %v15999_v24 }
 0x16a   : > { %v1943_v39 = vpop.f32.mrf.mxu1  ;;  %5034 = vmatprep.subr.bf16.mxu1 %v13070_v45  ;;  %v1841_v28 = vadd.f32 %v1840_v38, %v19686_v7  ;;  %v15991_v41 = vadd.f32 %v1941_v46, %v1839_v22  ;;  %4277 = vmatprep.mubr.bf16.mxu0 %v3802_v20  ;;  %v3842_v45 = vrot.slane %v3840_v23, 1  ;;  %v13080_v8 = vld [vmem:[%s19618_s1 + $0xbe0] ss:$8 sps:$4 sm:$0xff]   ;;  %v19689_v23 = vld [vmem:[#allocation8_spill] sm:$0xff] }
 0x16b   : > { %4380 = vmatprep.mubr.bf16.mxu1 %v3820_v43  ;;  %v1842_v4 = vpop.f32.mrf.mxu0  ;;  %v3845_v43 = vrot.slane %v3843_v12, 2  ;;  %v3856_v22 = vsel %vm3608_vm2, %v15925_v29, %v16001_v33  ;;  %v13092_v29 = vld [vmem:[%s19618_s1 + $0xbd4] ss:$8 sps:$4 sm:$0xff]  }
 0x16c   : > { %v1945_v34 = vpop.f32.mrf.mxu1  ;;  %v1843_v15 = vadd.f32 %v1842_v4, %v19687_v26  ;;  %v16004_v20 = vadd.f32 %v1943_v39, %v1841_v28  ;;  %4932 = vmatpush1.bf16.msra.mxu0 %v13065_v5  ;;  %v19688_v5 = vld [vmem:[#allocation7_spill] sm:$0xff]  ;;  %v13090_v4 = vld [vmem:[%s19618_s1 + $0xbd0] ss:$8 sps:$4 sm:$0xff]   ;;  %v16059_v26 = vld [vmem:[%s14260_s28 + $0x20] sm:$0xcc] }
 0x16d   : > { %5035 = vmatpush1.bf16.msra.mxu1 %v13068_v50  ;;  %v1844_v10 = vpop.f32.mrf.mxu0  ;;  %4933 = vmatprep.subr.bf16.mxu0 %v13073_v60  ;;  %v16030_v50 = vor.u32 %v3827_v54, %v3824_v32  ;;  %v16035_v39 = vor.u32 %v3845_v43, %v3842_v45  ;;  %v13095_v54 = vld [vmem:[%s19618_s1 + $0xac4] ss:$8 sps:$4 sm:$0xff]  }
 0x16e   : > { %v1947_v16 = vpop.f32.mrf.mxu1  ;;  %5036 = vmatprep.subr.bf16.mxu1 %v13076_v62  ;;  %v1845_v31 = vadd.f32 %v1844_v10, %v19688_v5  ;;  %v16016_v46 = vadd.f32 %v1945_v34, %v1843_v15  ;;  %v19690_v62 = vld [vmem:[#allocation9_spill] sm:$0xff]  ;;  %v19691_v15 = vld [vmem:[#allocation10_spill] sm:$0xff]  ;;  %v16068_v10 = vld [vmem:[%s14260_s28 + $0x28] sm:$0xcc] }
 0x16f   : > { %v1848_v36 = vpop.f32.mrf.mxu0  ;;  %4278 = vmatmul.mubr.bf16.gmra.mxu0 %v3793_v1  ;;  %v13089_v1 = vld [vmem:[%s19618_s1 + $0xad4] ss:$8 sps:$4 sm:$0xff]   ;;  %v3829_v32 = vsel %vm3608_vm2, %v15961_v37, %v16030_v50  ;;  %v3847_v43 = vsel %vm3608_vm2, %v15963_v53, %v16035_v39  ;;  %v13093_v53 = vld [vmem:[%s19618_s1 + $0xac0] ss:$8 sps:$4 sm:$0xff]  }
 0x170   : > { %4381 = vmatmul.mubr.bf16.gmra.mxu1 %v3811_v58  ;;  %v1951_v40 = vpop.f32.mrf.mxu1  ;;  %v1849_v12 = vadd.f32 %v1848_v36, %v19689_v23  ;;  %v16033_v38 = vadd.f32 %v1947_v16, %v1845_v31  ;;  %4934 = vmatpush2.bf16.msra.mxu0 %v13071_v9  ;;  %v13087_v58 = vld [vmem:[%s19618_s1 + $0xad0] ss:$8 sps:$4 sm:$0xff]  }
 0x171   : > { %5037 = vmatpush2.bf16.msra.mxu1 %v13074_v27  ;;  %v1850_v13 = vpop.f32.mrf.mxu0  ;;  %4935 = vmatprep.subr.bf16.mxu0 %v13079_v35  ;;  %v13098_v35 = vld [vmem:[%s19618_s1 + $0xbc4] ss:$8 sps:$4 sm:$0xff]  }
 0x172   : > { %v1953_v60 = vpop.f32.mrf.mxu1  ;;  %5038 = vmatprep.subr.bf16.mxu1 %v13082_v49  ;;  %v1851_v7 = vadd.f32 %v1850_v13, %v19690_v62  ;;  %v16044_v28 = vadd.f32 %v1951_v40, %v1849_v12  ;;  %4287 = vmatprep.mubr.bf16.mxu0 %v3838_v61  ;;  %v13096_v40 = vld [vmem:[%s19618_s1 + $0xbc0] ss:$8 sps:$4 sm:$0xff]  }
 0x173   : > { %4390 = vmatprep.mubr.bf16.mxu1 %v3856_v22  ;;  %v1852_v34 = vpop.f32.mrf.mxu0  ;;  %v19692_v22 = vld [vmem:[#allocation11_spill] sm:$0xff] }
 0x174   : > { %v1955_v9 = vpop.f32.mrf.mxu1  ;;  %v1853_v27 = vadd.f32 %v1852_v34, %v19691_v15  ;;  %v16062_v45 = vadd.f32 %v1953_v60, %v1851_v7  ;;  %4936 = vmatpush2.bf16.msra.mxu0 %v13077_v21  ;;  %v16083_v21 = vld [vmem:[%s14260_s28 + $0x30] sm:$0xff]  ;;  %v16111_v15 = vld [vmem:[%s14260_s28 + $0x4c] ss:$16 sps:$4 sm:$0xff]  }
 0x175   : > { %5039 = vmatpush2.bf16.msra.mxu1 %v13080_v8  ;;  %v1854_v37 = vpop.f32.mrf.mxu0  ;;  %4937 = vmatprep.subr.bf16.mxu0 %v13089_v1  ;;  %v11366_v8 = vcombine.high %v16059_v26, %v16083_v21  ;;  %v13101_v1 = vld [vmem:[%s19618_s1 + $0xab4] ss:$8 sps:$4 sm:$0xff]  }
 0x176   : > { %v1957_v16 = vpop.f32.mrf.mxu1  ;;  %5040 = vmatprep.subr.bf16.mxu1 %v13092_v29  ;;  %v1855_v49 = vadd.f32 %v1854_v37, %v15603_v2  ;;  %v16074_v5 = vadd.f32 %v1955_v9, %v1853_v27  ;;  %v16088_v2 = vld [vmem:[%s14260_s28 + $0x38] sm:$0xff]  ;;  %v16107_v9 = vld [vmem:[%s14260_s28 + $0x44] ss:$16 sps:$4 sm:$0xff]   ;;  %v4527_v27 = vrot.slane %v16111_v15, 2 }
 0x177   : > { %v1858_v31 = vpop.f32.mrf.mxu0  ;;  %4288 = vmatmul.mubr.bf16.gmra.mxu0 %v3829_v32  ;;  %v11368_v61 = vcombine.high %v16068_v10, %v16088_v2  ;;  %v13104_v29 = vld [vmem:[%s19618_s1 + $0xbb4] ss:$8 sps:$4 sm:$0xff]   ;;  %v4520_v34 = vrot.slane %v11366_v8, 2  ;;  %v4521_v32 = vrot.slane %v16107_v9, 2  ;;  %v13107_v37 = vld [vmem:[%s19618_s1 + $0xaa4] ss:$8 sps:$4 sm:$0xff]  }
 0x178   : > { %4391 = vmatmul.mubr.bf16.gmra.mxu1 %v3847_v43  ;;  %v1961_v36 = vpop.f32.mrf.mxu1  ;;  %v1859_v23 = vadd.f32 %v1858_v31, %v19692_v22  ;;  %v16093_v12 = vadd.f32 %v1957_v16, %v1855_v49  ;;  %4938 = vmatpush2.bf16.msra.mxu0 %v13087_v58  ;;  %v19693_v49 = vld [vmem:[#allocation13_spill] sm:$0xff]  ;;  %v13105_v8 = vld [vmem:[%s19618_s1 + $0xaa0] ss:$8 sps:$4 sm:$0xff]  }
 0x179   : > { %5041 = vmatpush2.bf16.msra.mxu1 %v13090_v4  ;;  %v1860_v13 = vpop.f32.mrf.mxu0  ;;  %4939 = vmatprep.subr.bf16.mxu0 %v13095_v54  ;;  %v4526_v54 = vrot.slane %v11368_v61, 2  ;;  %v4522_v61 = vsel %vm4516_vm3, %v4520_v34, %v4521_v32  ;;  %v16244_v9 = vld [vmem:[%s14260_s28 + $0x68] ss:$16 sps:$4 sm:$0xff]  }
 0x17a   : > { %v1963_v60 = vpop.f32.mrf.mxu1  ;;  %5042 = vmatprep.subr.bf16.mxu1 %v13098_v35  ;;  %v1861_v62 = vadd.f32 %v1860_v13, %v15633_v59  ;;  %v16102_v7 = vadd.f32 %v1961_v36, %v1859_v23  ;;  %4297 = vmatprep.mubr.bf16.mxu0 %v15999_v24  ;;  %v13099_v24 = vld [vmem:[%s19618_s1 + $0xab0] ss:$8 sps:$4 sm:$0xff]   ;;  %v19694_v23 = vld [vmem:[#allocation14_spill] sm:$0xff] }
 0x17b   : > { %4400 = vmatprep.mubr.bf16.mxu1 %v16001_v33  ;;  %v1862_v58 = vpop.f32.mrf.mxu0  ;;  %v13102_v33 = vld [vmem:[%s19618_s1 + $0xbb0] ss:$8 sps:$4 sm:$0xff]   ;;  %v4528_v22 = vsel %vm4516_vm3, %v4526_v54, %v4527_v27 }
 0x17c   : > { %v1965_v4 = vpop.f32.mrf.mxu1  ;;  %v1863_v59 = vadd.f32 %v1862_v58, %v15657_v18  ;;  %v16115_v43 = vadd.f32 %v1963_v60, %v1861_v62  ;;  %4940 = vmatpush2.bf16.msra.mxu0 %v13093_v53  ;;  %v13110_v18 = vld [vmem:[%s19618_s1 + $0xba4] ss:$8 sps:$4 sm:$0xff]   ;;  %v13116_v62 = vld [vmem:[%s19618_s1 + $0xb94] ss:$8 sps:$4 sm:$0xff]  }
 0x17d   : > { %5043 = vmatpush2.bf16.msra.mxu1 %v13096_v40  ;;  %v1864_v16 = vpop.f32.mrf.mxu0  ;;  %4941 = vmatprep.subr.bf16.mxu0 %v13101_v1 }
 0x17e   : > { %v1967_v35 = vpop.f32.mrf.mxu1  ;;  %5044 = vmatprep.subr.bf16.mxu1 %v13104_v29  ;;  %v1865_v31 = vadd.f32 %v1864_v16, %v19693_v49  ;;  %v16130_v36 = vadd.f32 %v1965_v4, %v1863_v59  ;;  %v13113_v29 = vld [vmem:[%s19618_s1 + $0xa94] ss:$8 sps:$4 sm:$0xff]   ;;  %v13111_v59 = vld [vmem:[%s19618_s1 + $0xa90] ss:$8 sps:$4 sm:$0xff]   ;;  %v13122_v49 = vld [vmem:[%s19618_s1 + $0xb84] ss:$8 sps:$4 sm:$0xff]  }
 0x17f   : > { %v1868_v53 = vpop.f32.mrf.mxu0  ;;  %4298 = vmatmul.mubr.bf16.gmra.mxu0 %v16030_v50  ;;  %v13108_v50 = vld [vmem:[%s19618_s1 + $0xba0] ss:$8 sps:$4 sm:$0xff]  }
 0x180   : > { %4401 = vmatmul.mubr.bf16.gmra.mxu1 %v16035_v39  ;;  %v1971_v40 = vpop.f32.mrf.mxu1  ;;  %v1869_v1 = vadd.f32 %v1868_v53, %v19694_v23  ;;  %v16144_v13 = vadd.f32 %v1967_v35, %v1865_v31  ;;  %4942 = vmatpush2.bf16.msra.mxu0 %v13099_v24  ;;  %v11365_v24 = vcombine.low %v16059_v26, %v16083_v21  ;;  %v13119_v35 = vld [vmem:[%s19618_s1 + $0xa84] ss:$8 sps:$4 sm:$0xff]  }
 0x181   : > { %5045 = vmatpush2.bf16.msra.mxu1 %v13102_v33  ;;  %v1870_v39 = vpop.f32.mrf.mxu0  ;;  %4943 = vmatprep.subr.bf16.mxu0 %v13107_v37  ;;  %v19695_v33 = vld [vmem:[#allocation15_spill] sm:$0xff] }
 0x182   : > { %v1973_v60 = vpop.f32.mrf.mxu1  ;;  %5046 = vmatprep.subr.bf16.mxu1 %v13110_v18  ;;  %v1871_v58 = vadd.f32 %v1870_v39, %v15699_v51  ;;  %v16156_v4 = vadd.f32 %v1971_v40, %v1869_v1  ;;  %4949 = vmatprep.mubr.bf16.mxu0 %v4522_v61  ;;  %v13114_v51 = vld [vmem:[%s19618_s1 + $0xb90] ss:$8 sps:$4 sm:$0xff]   ;;  %v11367_v18 = vcombine.low %v16068_v10, %v16088_v2  ;;  %v13117_v40 = vld [vmem:[%s19618_s1 + $0xa80] ss:$8 sps:$4 sm:$0xff]   ;;  %v4517_v23 = vrot.slane %v11365_v24, 2 }
 0x183   : > { %5052 = vmatprep.mubr.bf16.mxu1 %v4528_v22  ;;  %v1872_v34 = vpop.f32.mrf.mxu0  ;;  %v16185_v10 = vld [vmem:[%s14260_s28 + $0x48] ss:$16 sps:$4 sm:$0xff]   ;;  %v13132_v39 = vld [vmem:[%s19618_s1 + $0xd74] ss:$8 sps:$4 sm:$0xff]  }
 0x184   : > { %v1975_v54 = vpop.f32.mrf.mxu1  ;;  %v1873_v37 = vadd.f32 %v1872_v34, %v19695_v33  ;;  %v16164_v16 = vadd.f32 %v1973_v60, %v1871_v58  ;;  %4944 = vmatpush2.bf16.msra.mxu0 %v13105_v8  ;;  %v13938_v8 = vld [vmem:[%s14260_s28 + $0x40] ss:$16 sps:$4 sm:$0xff]   ;;  %v4524_v2 = vrot.slane %v16185_v10, 2  ;;  %v4523_v1 = vrot.slane %v11367_v18, 2  ;;  %v16207_v58 = vld [vmem:[%s14260_s28 + $0x6c] ss:$16 sps:$4 sm:$0xff]  }
 0x185   : > { %5047 = vmatpush2.bf16.msra.mxu1 %v13108_v50  ;;  %v1874_v26 = vpop.f32.mrf.mxu0  ;;  %4945 = vmatprep.subr.bf16.mxu0 %v13113_v29  ;;  %v4518_v61 = vrot.slane %v13938_v8, 2  ;;  %v13129_v50 = vld [vmem:[%s19618_s1 + $0xc74] ss:$8 sps:$4 sm:$0xff]   ;;  %v13127_v60 = vld [vmem:[%s19618_s1 + $0xc70] ss:$8 sps:$4 sm:$0xff]   ;;  %v4535_v34 = vrot.slane %v16207_v58, 2 }
 0x186   : > { %v1977_v21 = vpop.f32.mrf.mxu1  ;;  %5048 = vmatprep.subr.bf16.mxu1 %v13116_v62  ;;  %v1875_v31 = vadd.f32 %v1874_v26, %v15720_v6  ;;  %v16178_v53 = vadd.f32 %v1975_v54, %v1873_v37  ;;  %v13120_v6 = vld [vmem:[%s19618_s1 + $0xb80] ss:$8 sps:$4 sm:$0xff]   ;;  %v16203_v29 = vld [vmem:[%s14260_s28 + $0x64] ss:$16 sps:$4 sm:$0xff]   ;;  %v13130_v24 = vld [vmem:[%s19618_s1 + $0xd70] ss:$8 sps:$4 sm:$0xff]  }
 0x187   : > { %v4531_v62 = vrot.slane %v16203_v29, 2  ;;  %v4519_v54 = vsel %vm4516_vm3, %v4517_v23, %v4518_v61  ;;  %v13135_v33 = vld [vmem:[%s19618_s1 + $0xc64] ss:$8 sps:$4 sm:$0xff]   ;;  %v13133_v18 = vld [vmem:[%s19618_s1 + $0xc60] ss:$8 sps:$4 sm:$0xff]  }
 0x188   : > { %v16188_v22 = vadd.f32 %v1977_v21, %v1875_v31  ;;  %4946 = vmatpush2.bf16.msra.mxu0 %v13111_v59  ;;  %v4525_v59 = vsel %vm4516_vm3, %v4523_v1, %v4524_v2  ;;  %v13138_v37 = vld [vmem:[%s19618_s1 + $0xd64] ss:$8 sps:$4 sm:$0xff]   ;;  %v4536_v21 = vsel %vm4516_vm3, %v4527_v27, %v4535_v34  ;;  %v13136_v8 = vld [vmem:[%s19618_s1 + $0xd60] ss:$8 sps:$4 sm:$0xff]   ;;  %v13141_v27 = vld [vmem:[%s19618_s1 + $0xc54] ss:$8 sps:$4 sm:$0xff]  }
 0x189   : > { %5049 = vmatpush2.bf16.msra.mxu1 %v13114_v51  ;;  %4947 = vmatprep.subr.bf16.mxu0 %v13119_v35  ;;  %v4532_v26 = vsel %vm4516_vm3, %v4521_v32, %v4531_v62  ;;  %v4533_v32 = vrot.slane %v16244_v9, 2  ;;  %v13144_v23 = vld [vmem:[%s19618_s1 + $0xd54] ss:$8 sps:$4 sm:$0xff]   ;;  %v13148_v29 = vld [vmem:[%s19618_s1 + $0xd40] ss:$8 sps:$4 sm:$0xff]  }
 0x18a   : > { %5050 = vmatprep.subr.bf16.mxu1 %v13122_v49  ;;  %v16237_v49 = vld [vmem:[%s14260_s28 + $0x60] ss:$16 sps:$4 sm:$0xff]  }
 0x18b   : > { %v4529_v31 = vrot.slane %v16237_v49, 2 }
 0x18c   : > { %4948 = vmatpush2.bf16.msra.mxu0 %v13117_v40 }
 0x18d   : > { %5051 = vmatpush2.bf16.msra.mxu1 %v13120_v6  ;;  %5756 = vmatprep.subr.bf16.mxu0 %v13129_v50 }
 0x18e   : > { %5859 = vmatprep.subr.bf16.mxu1 %v13132_v39 }
 0x18f   : > { %v2492_v51 = vpop.f32.mrf.mxu0  ;;  %4950 = vmatmul.mubr.bf16.vlgmr.msra.gmra.mxu0 %v4519_v54  ;;  %v4530_v54 = vsel %vm4516_vm3, %v4518_v61, %v4529_v31  ;;  %v4534_v61 = vsel %vm4516_vm3, %v4524_v2, %v4533_v32 }
 0x190   : > { %v2595_v35 = vpop.f32.mrf.mxu1  ;;  %5053 = vmatmul.mubr.bf16.vlgmr.msra.gmra.mxu1 %v4525_v59  ;;  %5757 = vmatpush1.bf16.msra.mxu0 %v13127_v60  ;;  %v13139_v59 = vld [vmem:[%s19618_s1 + $0xc50] ss:$8 sps:$4 sm:$0xff]  }
 0x191   : > { %v2596_v40 = vadd.f32 %v2595_v35, %v2492_v51  ;;  %5860 = vmatpush1.bf16.msra.mxu1 %v13130_v24  ;;  %v2494_v6 = vpop.f32.mrf.mxu0  ;;  %5758 = vmatprep.subr.bf16.mxu0 %v13135_v33  ;;  %v16263_v24 = vld [vmem:[%s14260_s28 + $0x84] ss:$16 sps:$4 sm:$0xff]  }
 0x192   : > { %v2597_v15 = vpop.f32.mrf.mxu1  ;;  %5861 = vmatprep.subr.bf16.mxu1 %v13138_v37  ;;  %4959 = vmatprep.mubr.bf16.mxu0 %v4532_v26  ;;  %v4539_v33 = vrot.slane %v16263_v24, 2  ;;  %v16267_v37 = vld [vmem:[%s14260_s28 + $0x8c] ss:$16 sps:$4 sm:$0xff]   ;;  %v13142_v26 = vld [vmem:[%s19618_s1 + $0xd50] ss:$8 sps:$4 sm:$0xff]  }
 0x193   : > { %v16254_v1 = vadd.f32 %v2596_v40, %v15802_v17  ;;  %v2598_v50 = vadd.f32 %v2597_v15, %v2494_v6  ;;  %5062 = vmatprep.mubr.bf16.mxu1 %v4536_v21  ;;  %v2496_v39 = vpop.f32.mrf.mxu0  ;;  %v4543_v17 = vrot.slane %v16267_v37, 2  ;;  %v13145_v15 = vld [vmem:[%s19618_s1 + $0xc40] ss:$8 sps:$4 sm:$0xff]  }
 0x194   : > { %v2599_v60 = vpop.f32.mrf.mxu1  ;;  %5759 = vmatpush1.bf16.msra.mxu0 %v13133_v18  ;;  %v13150_v18 = vld [vmem:[%s19618_s1 + $0xd44] ss:$8 sps:$4 sm:$0xff]   ;;  %v13160_v24 = vld [vmem:[%s19618_s1 + $0xd20] ss:$8 sps:$4 sm:$0xff]  }
 0x195   : > { %v16271_v51 = vadd.f32 %v2598_v50, %v15813_v56  ;;  %v2600_v35 = vadd.f32 %v2599_v60, %v2496_v39  ;;  %5862 = vmatpush1.bf16.msra.mxu1 %v13136_v8  ;;  %v2498_v21 = vpop.f32.mrf.mxu0  ;;  %5760 = vmatprep.subr.bf16.mxu0 %v13141_v27  ;;  %v13147_v56 = vld [vmem:[%s19618_s1 + $0xc44] ss:$8 sps:$4 sm:$0xff]   ;;  %v4540_v27 = vsel %vm4516_vm3, %v4531_v62, %v4539_v33  ;;  %v16314_v62 = vld [vmem:[%s14260_s28 + $0x88] ss:$16 sps:$4 sm:$0xff]  }
 0x196   : > { %v2601_v40 = vpop.f32.mrf.mxu1  ;;  %5863 = vmatprep.subr.bf16.mxu1 %v13144_v23  ;;  %v16304_v23 = vld [vmem:[%s14260_s28 + $0x80] ss:$16 sps:$4 sm:$0xff]   ;;  %v4541_v58 = vrot.slane %v16314_v62, 2 }
 0x197   : > { %v16288_v10 = vadd.f32 %v2600_v35, %v15829_v52  ;;  %v2602_v2 = vadd.f32 %v2601_v40, %v2498_v21  ;;  %v2502_v8 = vpop.f32.mrf.mxu0  ;;  %4960 = vmatmul.mubr.bf16.gmra.mxu0 %v4530_v54  ;;  %v4544_v52 = vsel %vm4516_vm3, %v4535_v34, %v4543_v17  ;;  %v4537_v50 = vrot.slane %v16304_v23, 2 }
 0x198   : > { %v2605_v6 = vpop.f32.mrf.mxu1  ;;  %5063 = vmatmul.mubr.bf16.gmra.mxu1 %v4534_v61  ;;  %5761 = vmatpush1.bf16.msra.mxu0 %v13139_v59  ;;  %v13156_v59 = vld [vmem:[%s19618_s1 + $0xd34] ss:$8 sps:$4 sm:$0xff]   ;;  %v4542_v49 = vsel %vm4516_vm3, %v4533_v32, %v4541_v58 }
 0x199   : > { %v16308_v39 = vadd.f32 %v2602_v2, %v15841_v30  ;;  %v2606_v60 = vadd.f32 %v2605_v6, %v2502_v8  ;;  %5864 = vmatpush1.bf16.msra.mxu1 %v13142_v26  ;;  %v2504_v34 = vpop.f32.mrf.mxu0  ;;  %5762 = vmatprep.subr.bf16.mxu0 %v13147_v56  ;;  %v13153_v30 = vld [vmem:[%s19618_s1 + $0xc34] ss:$8 sps:$4 sm:$0xff]   ;;  %v4538_v40 = vsel %vm4516_vm3, %v4529_v31, %v4537_v50  ;;  %v13151_v56 = vld [vmem:[%s19618_s1 + $0xc30] ss:$8 sps:$4 sm:$0xff]  }
 0x19a   : > { %v2607_v54 = vpop.f32.mrf.mxu1  ;;  %5865 = vmatprep.subr.bf16.mxu1 %v13150_v18  ;;  %4969 = vmatprep.mubr.bf16.mxu0 %v4540_v27  ;;  %v16335_v18 = vld [vmem:[%s14260_s28 + $0xa4] ss:$16 sps:$4 sm:$0xff]   ;;  %v16339_v2 = vld [vmem:[%s14260_s28 + $0xac] ss:$16 sps:$4 sm:$0xff]   ;;  %v13154_v31 = vld [vmem:[%s19618_s1 + $0xd30] ss:$8 sps:$4 sm:$0xff]  }
 0x19b   : > { %v16324_v35 = vadd.f32 %v2606_v60, %v15861_v42  ;;  %v2608_v61 = vadd.f32 %v2607_v54, %v2504_v34  ;;  %5072 = vmatprep.mubr.bf16.mxu1 %v4544_v52  ;;  %v2506_v26 = vpop.f32.mrf.mxu0  ;;  %v4547_v42 = vrot.slane %v16335_v18, 2  ;;  %v4551_v8 = vrot.slane %v16339_v2, 2  ;;  %v13157_v54 = vld [vmem:[%s19618_s1 + $0xc20] ss:$8 sps:$4 sm:$0xff]  }
 0x19c   : > { %v2609_v21 = vpop.f32.mrf.mxu1  ;;  %5763 = vmatpush1.bf16.msra.mxu0 %v13145_v15  ;;  %v13162_v15 = vld [vmem:[%s19618_s1 + $0xd24] ss:$8 sps:$4 sm:$0xff]  }
 0x19d   : > { %v16343_v6 = vadd.f32 %v2608_v61, %v15888_v57  ;;  %v2610_v27 = vadd.f32 %v2609_v21, %v2506_v26  ;;  %5866 = vmatpush1.bf16.msra.mxu1 %v13148_v29  ;;  %v2508_v52 = vpop.f32.mrf.mxu0  ;;  %5764 = vmatprep.subr.bf16.mxu0 %v13153_v30  ;;  %v13159_v57 = vld [vmem:[%s19618_s1 + $0xc24] ss:$8 sps:$4 sm:$0xff]   ;;  %v4548_v30 = vsel %vm4516_vm3, %v4539_v33, %v4547_v42  ;;  %v16386_v33 = vld [vmem:[%s14260_s28 + $0xa8] ss:$16 sps:$4 sm:$0xff]  }
 0x19e   : > { %v2611_v60 = vpop.f32.mrf.mxu1  ;;  %5867 = vmatprep.subr.bf16.mxu1 %v13156_v59  ;;  %v16376_v59 = vld [vmem:[%s14260_s28 + $0xa0] ss:$16 sps:$4 sm:$0xff]   ;;  %v4549_v37 = vrot.slane %v16386_v33, 2 }
 0x19f   : > { %v16360_v9 = vadd.f32 %v2610_v27, %v15896_v55  ;;  %v2612_v32 = vadd.f32 %v2611_v60, %v2508_v52  ;;  %v2512_v29 = vpop.f32.mrf.mxu0  ;;  %4970 = vmatmul.mubr.bf16.gmra.mxu0 %v4538_v40  ;;  %v4552_v55 = vsel %vm4516_vm3, %v4543_v17, %v4551_v8  ;;  %v4545_v61 = vrot.slane %v16376_v59, 2  ;;  %v13178_v59 = vld [vmem:[%s19618_s1 + $0xdf0] ss:$8 sps:$4 sm:$0xff]  }
 0x1a0   : > { %v2615_v34 = vpop.f32.mrf.mxu1  ;;  %5073 = vmatmul.mubr.bf16.gmra.mxu1 %v4542_v49  ;;  %5765 = vmatpush1.bf16.msra.mxu0 %v13151_v56  ;;  %v13168_v56 = vld [vmem:[%s19618_s1 + $0xd14] ss:$8 sps:$4 sm:$0xff]  }
 0x1a1   : > { %v16380_v26 = vadd.f32 %v2612_v32, %v15920_v47  ;;  %v2616_v21 = vadd.f32 %v2615_v34, %v2512_v29  ;;  %5868 = vmatpush1.bf16.msra.mxu1 %v13154_v31  ;;  %v2514_v17 = vpop.f32.mrf.mxu0  ;;  %5766 = vmatprep.subr.bf16.mxu0 %v13159_v57  ;;  %v13165_v47 = vld [vmem:[%s19618_s1 + $0xc14] ss:$8 sps:$4 sm:$0xff]   ;;  %v4546_v60 = vsel %vm4516_vm3, %v4537_v50, %v4545_v61  ;;  %v13163_v57 = vld [vmem:[%s19618_s1 + $0xc10] ss:$8 sps:$4 sm:$0xff]  }
 0x1a2   : > { %v2617_v40 = vpop.f32.mrf.mxu1  ;;  %5869 = vmatprep.subr.bf16.mxu1 %v13162_v15  ;;  %4979 = vmatprep.mubr.bf16.mxu0 %v4548_v30  ;;  %v16410_v15 = vld [vmem:[%s14260_s28 + $0xc4] ss:$16 sps:$4 sm:$0xff]   ;;  %v16414_v29 = vld [vmem:[%s14260_s28 + $0xcc] ss:$16 sps:$4 sm:$0xff]   ;;  %v4550_v30 = vsel %vm4516_vm3, %v4541_v58, %v4549_v37  ;;  %v13169_v58 = vld [vmem:[%s19618_s1 + $0xc00] ss:$8 sps:$4 sm:$0xff]  }
 0x1a3   : > { %v16396_v27 = vadd.f32 %v2616_v21, %v15931_v25  ;;  %v2618_v49 = vadd.f32 %v2617_v40, %v2514_v17  ;;  %5082 = vmatprep.mubr.bf16.mxu1 %v4552_v55  ;;  %v2516_v31 = vpop.f32.mrf.mxu0  ;;  %v13166_v25 = vld [vmem:[%s19618_s1 + $0xd10] ss:$8 sps:$4 sm:$0xff]   ;;  %v4555_v32 = vrot.slane %v16410_v15, 2  ;;  %v4559_v34 = vrot.slane %v16414_v29, 2  ;;  %v13171_v55 = vld [vmem:[%s19618_s1 + $0xc04] ss:$8 sps:$4 sm:$0xff]  }
 0x1a4   : > { %v2619_v52 = vpop.f32.mrf.mxu1  ;;  %5767 = vmatpush1.bf16.msra.mxu0 %v13157_v54  ;;  %v13181_v15 = vld [vmem:[%s19618_s1 + $0xce0] ss:$8 sps:$4 sm:$0xff]   ;;  %v13189_v29 = vld [vmem:[%s19618_s1 + $0xcd4] ss:$8 sps:$4 sm:$0xff]  }
 0x1a5   : > { %v16418_v23 = vadd.f32 %v2618_v49, %v15944_v3  ;;  %v2620_v50 = vadd.f32 %v2619_v52, %v2516_v31  ;;  %5870 = vmatpush1.bf16.msra.mxu1 %v13160_v24  ;;  %v2518_v21 = vpop.f32.mrf.mxu0  ;;  %5768 = vmatprep.subr.bf16.mxu0 %v13165_v47  ;;  %v13174_v3 = vld [vmem:[%s19618_s1 + $0xd04] ss:$8 sps:$4 sm:$0xff]   ;;  %v4556_v47 = vsel %vm4516_vm3, %v4547_v42, %v4555_v32  ;;  %v13172_v31 = vld [vmem:[%s19618_s1 + $0xd00] ss:$8 sps:$4 sm:$0xff]   ;;  %v13177_v42 = vld [vmem:[%s19618_s1 + $0xcf4] ss:$8 sps:$4 sm:$0xff]  }
 0x1a6   : > { %v2621_v17 = vpop.f32.mrf.mxu1  ;;  %5871 = vmatprep.subr.bf16.mxu1 %v13168_v56  ;;  %v16454_v52 = vld [vmem:[%s14260_s28 + $0xc8] ss:$16 sps:$4 sm:$0xff]  }
 0x1a7   : > { %v16432_v54 = vadd.f32 %v2620_v50, %v15966_v14  ;;  %v2622_v24 = vadd.f32 %v2621_v17, %v2518_v21  ;;  %v2522_v62 = vpop.f32.mrf.mxu0  ;;  %4980 = vmatmul.mubr.bf16.gmra.mxu0 %v4546_v60  ;;  %v4560_v14 = vsel %vm4516_vm3, %v4551_v8, %v4559_v34  ;;  %v4557_v18 = vrot.slane %v16454_v52, 2  ;;  %v13193_v52 = vld [vmem:[%s19618_s1 + $0xcc0] ss:$8 sps:$4 sm:$0xff]  }
 0x1a8   : > { %v2625_v40 = vpop.f32.mrf.mxu1  ;;  %5083 = vmatmul.mubr.bf16.gmra.mxu1 %v4550_v30  ;;  %5769 = vmatpush1.bf16.msra.mxu0 %v13163_v57  ;;  %v19696_v30 = vrot.slane %v15415_v48, 2  ;;  %v4563_v17 = vrot.slane %v15914_v44, 2  ;;  %v13199_v44 = vld [vmem:[%s19618_s1 + $0xcb0] ss:$8 sps:$4 sm:$0xff]  }
 0x1a9   : > { %v16448_v56 = vadd.f32 %v2622_v24, %v15974_v11  ;;  %v2626_v49 = vadd.f32 %v2625_v40, %v2522_v62  ;;  %5872 = vmatpush1.bf16.msra.mxu1 %v13166_v25  ;;  %v2524_v2 = vpop.f32.mrf.mxu0  ;;  %5770 = vmatprep.subr.bf16.mxu0 %v13171_v55  ;;  %v13180_v11 = vld [vmem:[%s19618_s1 + $0xdf4] ss:$8 sps:$4 sm:$0xff]   ;;  %v13175_v55 = vld [vmem:[%s19618_s1 + $0xcf0] ss:$8 sps:$4 sm:$0xff]   ;;  %v4558_v48 = vsel %vm4516_vm3, %v4549_v37, %v4557_v18  ;;  %v13186_v40 = vld [vmem:[%s19618_s1 + $0xde4] ss:$8 sps:$4 sm:$0xff]  }
 0x1aa   : > { %v2627_v8 = vpop.f32.mrf.mxu1  ;;  %5873 = vmatprep.subr.bf16.mxu1 %v13174_v3  ;;  %4989 = vmatprep.mubr.bf16.mxu0 %v4556_v47  ;;  %v4554_v21 = vsel %vm4516_vm3, %v4545_v61, %v19696_v30 }
 0x1ab   : > { %v16464_v60 = vadd.f32 %v2626_v49, %v15991_v41  ;;  %v2628_v57 = vadd.f32 %v2627_v8, %v2524_v2  ;;  %5092 = vmatprep.mubr.bf16.mxu1 %v4560_v14  ;;  %v2526_v25 = vpop.f32.mrf.mxu0  ;;  %v4567_v41 = vrot.slane %v15917_v0, 2  ;;  %v4564_v14 = vsel %vm4516_vm3, %v4555_v32, %v4563_v17  ;;  %v13184_v32 = vld [vmem:[%s19618_s1 + $0xde0] ss:$8 sps:$4 sm:$0xff]   ;;  %v13192_v2 = vld [vmem:[%s19618_s1 + $0xdd4] ss:$8 sps:$4 sm:$0xff]  }
 0x1ac   : > { %v2629_v50 = vpop.f32.mrf.mxu1  ;;  %5771 = vmatpush1.bf16.msra.mxu0 %v13169_v58  ;;  %v13202_v0 = vld [vmem:[%s19618_s1 + $0xdb0] ss:$8 sps:$4 sm:$0xff]  }
 0x1ad   : > { %v16477_v3 = vadd.f32 %v2628_v57, %v16004_v20  ;;  %v2630_v24 = vadd.f32 %v2629_v50, %v2526_v25  ;;  %5874 = vmatpush1.bf16.msra.mxu1 %v13172_v31  ;;  %v2528_v61 = vpop.f32.mrf.mxu0  ;;  %5772 = vmatprep.subr.bf16.mxu0 %v13177_v42  ;;  %v13183_v20 = vld [vmem:[%s19618_s1 + $0xce4] ss:$8 sps:$4 sm:$0xff]   ;;  %v4568_v49 = vsel %vm4516_vm3, %v4559_v34, %v4567_v41  ;;  %v13187_v57 = vld [vmem:[%s19618_s1 + $0xcd0] ss:$8 sps:$4 sm:$0xff]  }
 0x1ae   : > { %v2631_v62 = vpop.f32.mrf.mxu1  ;;  %5875 = vmatprep.subr.bf16.mxu1 %v13180_v11  ;;  %v13190_v25 = vld [vmem:[%s19618_s1 + $0xdd0] ss:$8 sps:$4 sm:$0xff]   ;;  %v16532_v50 = vld [vmem:[%s14260_s28 + $0x40] sm:$0xcc] }
 0x1af   : > { %v16494_v33 = vadd.f32 %v2630_v24, %v16016_v46  ;;  %v2632_v37 = vadd.f32 %v2631_v62, %v2528_v61  ;;  %v2532_v58 = vpop.f32.mrf.mxu0  ;;  %4990 = vmatmul.mubr.bf16.gmra.mxu0 %v4554_v21  ;;  %v19630_v46 = vrot.slane %v15950_v63, 2  ;;  %v16541_v24 = vld [vmem:[%s14260_s28 + $0x50] sm:$0xff] }
 0x1b0   : > { %v2635_v47 = vpop.f32.mrf.mxu1  ;;  %5093 = vmatmul.mubr.bf16.gmra.mxu1 %v4558_v48  ;;  %5773 = vmatpush2.bf16.msra.mxu0 %v13175_v55  ;;  %v13198_v55 = vld [vmem:[%s19618_s1 + $0xdc4] ss:$8 sps:$4 sm:$0xff]  }
 0x1b1   : > { %v16508_v31 = vadd.f32 %v2632_v37, %v16033_v38  ;;  %v2636_v42 = vadd.f32 %v2635_v47, %v2532_v58  ;;  %5876 = vmatpush2.bf16.msra.mxu1 %v13178_v59  ;;  %v2534_v34 = vpop.f32.mrf.mxu0  ;;  %5774 = vmatprep.subr.bf16.mxu0 %v13183_v20  ;;  %v16544_v48 = vld [vmem:[%s14260_s28 + $0x48] sm:$0xcc]  ;;  %v16547_v59 = vld [vmem:[%s14260_s28 + $0x58] sm:$0xff]  ;;  %v4566_v20 = vsel %vm4516_vm3, %v4557_v18, %v19630_v46  ;;  %v16561_v47 = vld [vmem:[%s14260_s28 + $0x64] ss:$16 sps:$4 sm:$0xff]  }
 0x1b2   : > { %v2637_v38 = vpop.f32.mrf.mxu1  ;;  %5877 = vmatprep.subr.bf16.mxu1 %v13186_v40  ;;  %4999 = vmatprep.mubr.bf16.mxu0 %v4564_v14  ;;  %v16558_v40 = vld [vmem:[%s14260_s28 + $0xc0] sm:$0xff]  ;;  %v16573_v18 = vld [vmem:[%s14260_s28 + $0xc8] sm:$0xff] }
 0x1b3   : > { %v16523_v8 = vadd.f32 %v2636_v42, %v16044_v28  ;;  %v2638_v11 = vadd.f32 %v2637_v38, %v2534_v34  ;;  %5102 = vmatprep.mubr.bf16.mxu1 %v4568_v49  ;;  %v2536_v30 = vpop.f32.mrf.mxu0  ;;  %v13195_v28 = vld [vmem:[%s19618_s1 + $0xcc4] ss:$8 sps:$4 sm:$0xff]   ;;  %v16576_v42 = vld [vmem:[%s14260_s28 + $0xd8] sm:$0xff]  ;;  %v19698_v34 = vld [vmem:[#allocation12_spill] sm:$0xff]  ;;  %v11500_v38 = vcombine.high %v16544_v48, %v16547_v59 }
 0x1b4   : > { %v2639_v21 = vpop.f32.mrf.mxu1  ;;  %5775 = vmatpush2.bf16.msra.mxu0 %v13181_v15 }
 0x1b5   : > { %v16550_v61 = vadd.f32 %v2638_v11, %v16062_v45  ;;  %v2640_v62 = vadd.f32 %v2639_v21, %v2536_v30  ;;  %5878 = vmatpush2.bf16.msra.mxu1 %v13184_v32  ;;  %v2538_v37 = vpop.f32.mrf.mxu0  ;;  %5776 = vmatprep.subr.bf16.mxu0 %v13189_v29  ;;  %v16564_v45 = vld [vmem:[%s14260_s28 + $0xd0] sm:$0xff]  ;;  %v16592_v11 = vcombine.low %v16573_v18, %v16576_v42 }
 0x1b6   : > { %v2641_v58 = vpop.f32.mrf.mxu1  ;;  %5879 = vmatprep.subr.bf16.mxu1 %v13192_v2  ;;  %v16580_v15 = vcombine.low %v16558_v40, %v16564_v45  ;;  %v16588_v2 = vld [vmem:[%s14260_s28 + $0x6c] ss:$16 sps:$4 sm:$0xff]  }
 0x1b7   : > { %v16567_v14 = vadd.f32 %v2640_v62, %v16074_v5  ;;  %v2642_v49 = vadd.f32 %v2641_v58, %v2538_v37  ;;  %v2542_v32 = vpop.f32.mrf.mxu0  ;;  %5000 = vmatmul.mubr.bf16.gmra.mxu0 %v19698_v34  ;;  %v11498_v5 = vcombine.high %v16532_v50, %v16541_v24  ;;  %19699 = vst [vmem:[#allocation3_spill] sm:$0xff] %v16592_v11  ;;  %v13196_v62 = vld [vmem:[%s19618_s1 + $0xdc0] ss:$8 sps:$4 sm:$0xff]   ;;  %v13201_v58 = vld [vmem:[%s19618_s1 + $0xcb4] ss:$8 sps:$4 sm:$0xff]   ;;  %v5366_v34 = vrot.slane %v16588_v2, 2 }
 0x1b8   : > { %19697 = vst [vmem:[#allocation2_spill] sm:$0xff] %v16580_v15  ;;  %v2645_v29 = vpop.f32.mrf.mxu1  ;;  %5103 = vmatmul.mubr.bf16.gmra.mxu1 %v4566_v20  ;;  %5777 = vmatpush2.bf16.msra.mxu0 %v13187_v57 }
 0x1b9   : > { %v16595_v30 = vadd.f32 %v2642_v49, %v16093_v12  ;;  %v2646_v21 = vadd.f32 %v2645_v29, %v2542_v32  ;;  %5880 = vmatpush2.bf16.msra.mxu1 %v13190_v25  ;;  %v2544_v20 = vpop.f32.mrf.mxu0  ;;  %5778 = vmatprep.subr.bf16.mxu0 %v13195_v28  ;;  %v13204_v12 = vld [vmem:[%s19618_s1 + $0xdb4] ss:$8 sps:$4 sm:$0xff]   ;;  %v5360_v32 = vrot.slane %v16561_v47, 2  ;;  %v5365_v29 = vrot.slane %v11500_v38, 2 }
 0x1ba   : > { %v2647_v37 = vpop.f32.mrf.mxu1  ;;  %5881 = vmatprep.subr.bf16.mxu1 %v13198_v55  ;;  %5009 = vmatprep.mubr.bf16.mxu0 %v4563_v17  ;;  %v5359_v55 = vrot.slane %v11498_v5, 2 }
 0x1bb   : > { %v16607_v49 = vadd.f32 %v2646_v21, %v16102_v7  ;;  %v2648_v57 = vadd.f32 %v2647_v37, %v2544_v20  ;;  %5112 = vmatprep.mubr.bf16.mxu1 %v4567_v41  ;;  %v2546_v25 = vpop.f32.mrf.mxu0  ;;  %v19700_v20 = vrot.slane %v15601_v19, 2  ;;  %v19701_v37 = vrot.slane %v15950_v63, 2 }
 0x1bc   : > { %v2649_v28 = vpop.f32.mrf.mxu1  ;;  %5779 = vmatpush2.bf16.msra.mxu0 %v13193_v52  ;;  %v13210_v52 = vld [vmem:[%s19618_s1 + $0xda4] ss:$8 sps:$4 sm:$0xff]   ;;  %v5367_v19 = vsel %vm4516_vm3, %v5365_v29, %v5366_v34 }
 0x1bd   : > { %v16616_v46 = vadd.f32 %v2648_v57, %v16115_v43  ;;  %v2650_v7 = vadd.f32 %v2649_v28, %v2546_v25  ;;  %5882 = vmatpush2.bf16.msra.mxu1 %v13196_v62  ;;  %v2548_v17 = vpop.f32.mrf.mxu0  ;;  %5780 = vmatprep.subr.bf16.mxu0 %v13201_v58  ;;  %v13207_v43 = vld [vmem:[%s19618_s1 + $0xca4] ss:$8 sps:$4 sm:$0xff]   ;;  %v13205_v58 = vld [vmem:[%s19618_s1 + $0xca0] ss:$8 sps:$4 sm:$0xff]   ;;  %v13213_v25 = vld [vmem:[%s19618_s1 + $0xc94] ss:$8 sps:$4 sm:$0xff]  }
 0x1be   : > { %v2651_v41 = vpop.f32.mrf.mxu1  ;;  %5883 = vmatprep.subr.bf16.mxu1 %v13204_v12  ;;  %v13208_v12 = vld [vmem:[%s19618_s1 + $0xda0] ss:$8 sps:$4 sm:$0xff]   ;;  %v13216_v28 = vld [vmem:[%s19618_s1 + $0xd94] ss:$8 sps:$4 sm:$0xff]  }
 0x1bf   : > { %v16631_v5 = vadd.f32 %v2650_v7, %v16130_v36  ;;  %v2652_v38 = vadd.f32 %v2651_v41, %v2548_v17  ;;  %v2552_v21 = vpop.f32.mrf.mxu0  ;;  %5010 = vmatmul.mubr.bf16.gmra.mxu0 %v19700_v20  ;;  %v5361_v36 = vsel %vm4516_vm3, %v5359_v55, %v5360_v32  ;;  %v13211_v17 = vld [vmem:[%s19618_s1 + $0xc90] ss:$8 sps:$4 sm:$0xff]  }
 0x1c0   : > { %v2655_v62 = vpop.f32.mrf.mxu1  ;;  %5113 = vmatmul.mubr.bf16.gmra.mxu1 %v19701_v37  ;;  %5781 = vmatpush2.bf16.msra.mxu0 %v13199_v44  ;;  %v13214_v41 = vld [vmem:[%s19618_s1 + $0xd90] ss:$8 sps:$4 sm:$0xff]  }
 0x1c1   : > { %v16650_v57 = vadd.f32 %v2652_v38, %v16144_v13  ;;  %v2656_v63 = vadd.f32 %v2655_v62, %v2552_v21  ;;  %5884 = vmatpush2.bf16.msra.mxu1 %v13202_v0  ;;  %v2554_v7 = vpop.f32.mrf.mxu0  ;;  %5782 = vmatprep.subr.bf16.mxu0 %v13207_v43  ;;  %v11497_v43 = vcombine.low %v16532_v50, %v16541_v24  ;;  %v16673_v38 = vld [vmem:[%s14260_s28 + $0x60] ss:$16 sps:$4 sm:$0xff]   ;;  %v16678_v62 = vld [vmem:[%s14260_s28 + $0x68] ss:$16 sps:$4 sm:$0xff]   ;;  %v13222_v50 = vld [vmem:[%s19618_s1 + $0xd84] ss:$8 sps:$4 sm:$0xff]  }
 0x1c2   : > { %v2657_v55 = vpop.f32.mrf.mxu1  ;;  %5885 = vmatprep.subr.bf16.mxu1 %v13210_v52  ;;  %5788 = vmatprep.mubr.bf16.mxu0 %v5361_v36  ;;  %v11499_v21 = vcombine.low %v16544_v48, %v16547_v59  ;;  %v13217_v48 = vld [vmem:[%s19618_s1 + $0xc80] ss:$8 sps:$4 sm:$0xff]  }
 0x1c3   : > { %v16659_v13 = vadd.f32 %v2656_v63, %v16156_v4  ;;  %v2658_v29 = vadd.f32 %v2657_v55, %v2554_v7  ;;  %5891 = vmatprep.mubr.bf16.mxu1 %v5367_v19  ;;  %v2556_v44 = vpop.f32.mrf.mxu0  ;;  %v13220_v36 = vld [vmem:[%s19618_s1 + $0xd80] ss:$8 sps:$4 sm:$0xff]   ;;  %v5356_v19 = vrot.slane %v11497_v43, 2  ;;  %v16696_v63 = vld [vmem:[%s14260_s28 + $0x84] ss:$16 sps:$4 sm:$0xff]   ;;  %v5363_v55 = vrot.slane %v16678_v62, 2 }
 0x1c4   : > { %v2659_v0 = vpop.f32.mrf.mxu1  ;;  %5783 = vmatpush2.bf16.msra.mxu0 %v13205_v58  ;;  %v5362_v7 = vrot.slane %v11499_v21, 2  ;;  %v16721_v43 = vld [vmem:[%s14260_s28 + $0x80] ss:$16 sps:$4 sm:$0xff]  }
 0x1c5   : > { %v16670_v52 = vadd.f32 %v2658_v29, %v16164_v16  ;;  %v2660_v4 = vadd.f32 %v2659_v0, %v2556_v44  ;;  %5886 = vmatpush2.bf16.msra.mxu1 %v13208_v12  ;;  %v2558_v20 = vpop.f32.mrf.mxu0  ;;  %5784 = vmatprep.subr.bf16.mxu0 %v13213_v25  ;;  %v13219_v16 = vld [vmem:[%s19618_s1 + $0xc84] ss:$8 sps:$4 sm:$0xff]   ;;  %v13235_v29 = vld [vmem:[%s19618_s1 + $0xe74] ss:$8 sps:$4 sm:$0xff]   ;;  %v13236_v0 = vld [vmem:[%s19618_s1 + $0xf70] ss:$8 sps:$4 sm:$0xff]  }
 0x1c6   : > { %v2661_v37 = vpop.f32.mrf.mxu1  ;;  %5887 = vmatprep.subr.bf16.mxu1 %v13216_v28  ;;  %v16699_v25 = vld [vmem:[%s14260_s28 + $0x8c] ss:$16 sps:$4 sm:$0xff]   ;;  %v5364_v21 = vsel %vm4516_vm3, %v5362_v7, %v5363_v55 }
 0x1c7   : > { %19702 = vst [vmem:[#allocation4_spill] sm:$0xff] %v16670_v52  ;;  %v16687_v58 = vadd.f32 %v2660_v4, %v16178_v53  ;;  %v2662_v12 = vadd.f32 %v2661_v37, %v2558_v20  ;;  %v5357_v53 = vrot.slane %v16673_v38, 2  ;;  %v13238_v44 = vld [vmem:[%s19618_s1 + $0xf74] ss:$8 sps:$4 sm:$0xff]   ;;  %v13241_v20 = vld [vmem:[%s19618_s1 + $0xe64] ss:$8 sps:$4 sm:$0xff]  }
 0x1c8   : > { %5785 = vmatpush2.bf16.msra.mxu0 %v13211_v17  ;;  %v19631_v17 = vrot.slane %v16696_v63, 2  ;;  %v16729_v37 = vld [vmem:[%s14260_s28 + $0x88] ss:$16 sps:$4 sm:$0xff]  }
 0x1c9   : > { %19703 = vst [vmem:[#allocation5_spill] sm:$0xff] %v16687_v58  ;;  %v16702_v28 = vadd.f32 %v2662_v12, %v16188_v22  ;;  %5888 = vmatpush2.bf16.msra.mxu1 %v13214_v41  ;;  %5786 = vmatprep.subr.bf16.mxu0 %v13219_v16  ;;  %v13233_v22 = vld [vmem:[%s19618_s1 + $0xe70] ss:$8 sps:$4 sm:$0xff]   ;;  %v19632_v41 = vrot.slane %v16699_v25, 2  ;;  %v5358_v4 = vsel %vm4516_vm3, %v5356_v19, %v5357_v53  ;;  %v13244_v16 = vld [vmem:[%s19618_s1 + $0xf64] ss:$8 sps:$4 sm:$0xff]  }
 0x1ca   : > { %5889 = vmatprep.subr.bf16.mxu1 %v13222_v50  ;;  %v13239_v50 = vld [vmem:[%s19618_s1 + $0xe60] ss:$8 sps:$4 sm:$0xff]  }
 0x1cb   : > { %19704 = vst [vmem:[#allocation6_spill] sm:$0xff] %v16702_v28  ;;  %v5375_v19 = vsel %vm4516_vm3, %v5366_v34, %v19632_v41 }
 0x1cc   : > { %5787 = vmatpush2.bf16.msra.mxu0 %v13217_v48 }
 0x1cd   : > { %5890 = vmatpush2.bf16.msra.mxu1 %v13220_v36  ;;  %6824 = vmatprep.subr.bf16.mxu0 %v13235_v29  ;;  %v5371_v36 = vsel %vm4516_vm3, %v5360_v32, %v19631_v17  ;;  %v16749_v29 = vld [vmem:[%s14260_s28 + $0xa4] ss:$16 sps:$4 sm:$0xff]  }
 0x1ce   : > { %6927 = vmatprep.subr.bf16.mxu1 %v13238_v44  ;;  %v16752_v44 = vld [vmem:[%s14260_s28 + $0xac] ss:$16 sps:$4 sm:$0xff]   ;;  %v19633_v28 = vrot.slane %v16749_v29, 2 }
 0x1cf   : > { %v3331_v12 = vpop.f32.mrf.mxu0  ;;  %5789 = vmatmul.mubr.bf16.vlgmr.msra.gmra.mxu0 %v5358_v4  ;;  %v13253_v17 = vld [vmem:[%s19618_s1 + $0xe54] ss:$8 sps:$4 sm:$0xff]  }
 0x1d0   : > { %v3434_v48 = vpop.f32.mrf.mxu1  ;;  %5892 = vmatmul.mubr.bf16.vlgmr.msra.gmra.mxu1 %v5364_v21  ;;  %6825 = vmatpush1.bf16.msra.mxu0 %v13233_v22  ;;  %v13242_v21 = vld [vmem:[%s19618_s1 + $0xf60] ss:$8 sps:$4 sm:$0xff]   ;;  %v13256_v22 = vld [vmem:[%s19618_s1 + $0xf54] ss:$8 sps:$4 sm:$0xff]  }
 0x1d1   : > { %v3435_v4 = vadd.f32 %v3434_v48, %v3331_v12  ;;  %6928 = vmatpush1.bf16.msra.mxu1 %v13236_v0  ;;  %v3333_v34 = vpop.f32.mrf.mxu0  ;;  %6826 = vmatprep.subr.bf16.mxu0 %v13241_v20  ;;  %v13251_v48 = vld [vmem:[%s19618_s1 + $0xe50] ss:$8 sps:$4 sm:$0xff]   ;;  %v19706_v20 = vrot.slane %v16721_v43, 2 }
 0x1d2   : > { %v3436_v41 = vpop.f32.mrf.mxu1  ;;  %6929 = vmatprep.subr.bf16.mxu1 %v13244_v16  ;;  %5798 = vmatprep.mubr.bf16.mxu0 %v5371_v36 }
 0x1d3   : > { %v16765_v0 = vadd.f32 %v3435_v4, %v16254_v1  ;;  %v3437_v12 = vadd.f32 %v3436_v41, %v3333_v34  ;;  %5901 = vmatprep.mubr.bf16.mxu1 %v5375_v19  ;;  %v3335_v32 = vpop.f32.mrf.mxu0  ;;  %v5369_v16 = vsel %vm4516_vm3, %v5357_v53, %v19706_v20  ;;  %v16776_v1 = vld [vmem:[%s14260_s28 + $0xa0] ss:$16 sps:$4 sm:$0xff]   ;;  %v19708_v19 = vrot.slane %v16729_v37, 2  ;;  %v16788_v34 = vld [vmem:[%s14260_s28 + $0xa8] ss:$16 sps:$4 sm:$0xff]  }
 0x1d4   : > { %v3438_v7 = vpop.f32.mrf.mxu1  ;;  %6827 = vmatpush1.bf16.msra.mxu0 %v13239_v50  ;;  %v13254_v53 = vld [vmem:[%s19618_s1 + $0xf50] ss:$8 sps:$4 sm:$0xff]   ;;  %v13262_v50 = vld [vmem:[%s19618_s1 + $0xf44] ss:$8 sps:$4 sm:$0xff]  }
 0x1d5   : > { %19705 = vst [vmem:[#allocation7_spill] sm:$0xff] %v16765_v0  ;;  %v16779_v41 = vadd.f32 %v3437_v12, %v16271_v51  ;;  %v3439_v36 = vadd.f32 %v3438_v7, %v3335_v32  ;;  %6930 = vmatpush1.bf16.msra.mxu1 %v13242_v21  ;;  %v5373_v4 = vsel %vm4516_vm3, %v5363_v55, %v19708_v19  ;;  %v3337_v20 = vpop.f32.mrf.mxu0  ;;  %v13259_v51 = vld [vmem:[%s19618_s1 + $0xe44] ss:$8 sps:$4 sm:$0xff]   ;;  %v13260_v32 = vld [vmem:[%s19618_s1 + $0xf40] ss:$8 sps:$4 sm:$0xff]   ;;  %v19634_v19 = vrot.slane %v16788_v34, 2 }
 0x1d6   : > { %v3440_v58 = vpop.f32.mrf.mxu1  ;;  %6828 = vmatprep.subr.bf16.mxu0 %v13253_v17  ;;  %6931 = vmatprep.subr.bf16.mxu1 %v13256_v22  ;;  %v16798_v55 = vcombine.high %v16558_v40, %v16564_v45  ;;  %v13257_v17 = vld [vmem:[%s19618_s1 + $0xe40] ss:$8 sps:$4 sm:$0xff]   ;;  %v19712_v45 = vrot.slane %v16752_v44, 2 }
 0x1d7   : > { %19707 = vst [vmem:[#allocation8_spill] sm:$0xff] %v16779_v41  ;;  %v16801_v7 = vadd.f32 %v3439_v36, %v16288_v10  ;;  %v3441_v21 = vadd.f32 %v3440_v58, %v3337_v20  ;;  %v3341_v22 = vpop.f32.mrf.mxu0  ;;  %5799 = vmatmul.mubr.bf16.gmra.mxu0 %v5369_v16  ;;  %v19711_v10 = vrot.slane %v16696_v63, 2  ;;  %v19713_v58 = vrot.slane %v16699_v25, 2  ;;  %v13271_v16 = vld [vmem:[%s19618_s1 + $0xe34] ss:$8 sps:$4 sm:$0xff]  }
 0x1d8   : > { %19709 = vst [vmem:[#allocation9_spill] sm:$0xff] %v16798_v55  ;;  %v3444_v12 = vpop.f32.mrf.mxu1  ;;  %5902 = vmatmul.mubr.bf16.gmra.mxu1 %v5373_v4  ;;  %v13274_v4 = vld [vmem:[%s19618_s1 + $0xf34] ss:$8 sps:$4 sm:$0xff]   ;;  %v16828_v20 = vcombine.high %v16573_v18, %v16576_v42  ;;  %6829 = vmatpush1.bf16.msra.mxu0 %v13251_v48  ;;  %v16844_v41 = vld [vmem:[%s14260_s28 + $0xe8] ss:$16 sps:$4 sm:$0xff]  }
 0x1d9   : > { %19710 = vst [vmem:[#allocation10_spill] sm:$0xff] %v16801_v7  ;;  %v5379_v40 = vsel %vm4516_vm3, %v19711_v10, %v19633_v28  ;;  %v5383_v36 = vsel %vm4516_vm3, %v19713_v58, %v19712_v45  ;;  %v16831_v10 = vld [vmem:[%s14260_s28 + $0xe4] ss:$16 sps:$4 sm:$0xff]   ;;  %v16834_v28 = vld [vmem:[%s14260_s28 + $0xec] ss:$16 sps:$4 sm:$0xff]   ;;  %v16837_v45 = vadd.f32 %v3441_v21, %v16308_v39  ;;  %v3445_v58 = vadd.f32 %v3444_v12, %v3341_v22  ;;  %v3343_v0 = vpop.f32.mrf.mxu0 }
 0x1da   : > { %19714 = vst [vmem:[#allocation11_spill] sm:$0xff] %v16828_v20  ;;  %6932 = vmatpush1.bf16.msra.mxu1 %v13254_v53  ;;  %v16841_v7 = vld [vmem:[%s14260_s28 + $0xe0] ss:$16 sps:$4 sm:$0xff]   ;;  %v3446_v18 = vpop.f32.mrf.mxu1  ;;  %6830 = vmatprep.subr.bf16.mxu0 %v13259_v51  ;;  %v16857_v21 = vld [vmem:[%s14260_s28 + $0x104] ss:$16 sps:$4 sm:$0xff]   ;;  %v19717_v22 = vrot.slane %v16776_v1, 2 }
 0x1db   : > { %19715 = vst [vmem:[#allocation13_spill] sm:$0xff] %v16837_v45  ;;  %6933 = vmatprep.subr.bf16.mxu1 %v13262_v50  ;;  %v16848_v52 = vadd.f32 %v3445_v58, %v16324_v35  ;;  %v3447_v39 = vadd.f32 %v3446_v18, %v3343_v0  ;;  %5808 = vmatprep.mubr.bf16.mxu0 %v5379_v40  ;;  %v13269_v48 = vld [vmem:[%s19618_s1 + $0xe30] ss:$8 sps:$4 sm:$0xff]   ;;  %v3345_v51 = vpop.f32.mrf.mxu0  ;;  %v19718_v35 = vrot.slane %v16721_v43, 2  ;;  %v13277_v12 = vld [vmem:[%s19618_s1 + $0xe24] ss:$8 sps:$4 sm:$0xff]  }
 0x1dc   : > { %5911 = vmatprep.mubr.bf16.mxu1 %v5383_v36  ;;  %v13272_v53 = vld [vmem:[%s19618_s1 + $0xf30] ss:$8 sps:$4 sm:$0xff]   ;;  %v3448_v50 = vpop.f32.mrf.mxu1  ;;  %v13280_v40 = vld [vmem:[%s19618_s1 + $0xf24] ss:$8 sps:$4 sm:$0xff]   ;;  %v6234_v58 = vshrl.u32 %v16561_v47, 16  ;;  %v6237_v18 = vshll.u32 %v16561_v47, 16  ;;  %6831 = vmatpush1.bf16.msra.mxu0 %v13257_v17 }
 0x1dd   : > { %19716 = vst [vmem:[#allocation14_spill] sm:$0xff] %v16848_v52  ;;  %v5377_v0 = vsel %vm4516_vm3, %v19718_v35, %v19717_v22  ;;  %v16874_v43 = vadd.f32 %v3447_v39, %v16343_v6  ;;  %v3449_v22 = vadd.f32 %v3448_v50, %v3345_v51  ;;  %v19719_v35 = vrot.slane %v16729_v37, 2  ;;  %v3347_v52 = vpop.f32.mrf.mxu0  ;;  %6832 = vmatprep.subr.bf16.mxu0 %v13271_v16  ;;  %v16891_v51 = vld [vmem:[%s14260_s28 + $0x10c] ss:$16 sps:$4 sm:$0xff]   ;;  %v16894_v50 = vld [vmem:[%s14260_s28 + $0x100] ss:$16 sps:$4 sm:$0xff]  }
 0x1de   : > { %6934 = vmatpush1.bf16.msra.mxu1 %v13260_v32  ;;  %v3450_v45 = vpop.f32.mrf.mxu1  ;;  %v19720_v47 = vrot.slane %v16798_v55, 2  ;;  %v19721_v6 = vrot.slane %v16749_v29, 2  ;;  %v13275_v29 = vld [vmem:[%s19618_s1 + $0xe20] ss:$8 sps:$4 sm:$0xff]   ;;  %v16923_v32 = vrot.slane %v6237_v18, 3 }
 0x1df   : > { %v5381_v42 = vsel %vm4516_vm3, %v19719_v35, %v19634_v19  ;;  %6935 = vmatprep.subr.bf16.mxu1 %v13274_v4  ;;  %v16897_v35 = vadd.f32 %v3449_v22, %v16360_v9  ;;  %v3451_v16 = vadd.f32 %v3450_v45, %v3347_v52  ;;  %v13278_v4 = vld [vmem:[%s19618_s1 + $0xf20] ss:$8 sps:$4 sm:$0xff]   ;;  %v3351_v39 = vpop.f32.mrf.mxu0  ;;  %5809 = vmatmul.mubr.bf16.gmra.mxu0 %v5377_v0  ;;  %v19723_v9 = vrot.slane %v16828_v20, 2  ;;  %v13287_v22 = vld [vmem:[%s19618_s1 + $0xe14] ss:$8 sps:$4 sm:$0xff]  }
 0x1e0   : > { %v5387_v17 = vsel %vm4516_vm3, %v19721_v6, %v19720_v47  ;;  %v16908_v37 = vld [vmem:[%s14260_s28 + $0x108] ss:$16 sps:$4 sm:$0xff]   ;;  %v3454_v19 = vpop.f32.mrf.mxu1  ;;  %5912 = vmatmul.mubr.bf16.gmra.mxu1 %v5381_v42  ;;  %v19724_v52 = vrot.slane %v16752_v44, 2  ;;  %v13290_v6 = vld [vmem:[%s19618_s1 + $0xf14] ss:$8 sps:$4 sm:$0xff]   ;;  %v16921_v47 = vrot.slane %v6234_v58, 2  ;;  %6833 = vmatpush1.bf16.msra.mxu0 %v13269_v48 }
 0x1e1   : > { %19722 = vst [vmem:[#allocation15_spill] sm:$0xff] %v16897_v35  ;;  %v16927_v0 = vadd.f32 %v3451_v16, %v16380_v26  ;;  %v3455_v44 = vadd.f32 %v3454_v19, %v3351_v39  ;;  %v3353_v36 = vpop.f32.mrf.mxu0  ;;  %6834 = vmatprep.subr.bf16.mxu0 %v13277_v12  ;;  %5818 = vmatprep.mubr.bf16.mxu0 %v5387_v17  ;;  %v13285_v26 = vld [vmem:[%s19618_s1 + $0xe10] ss:$8 sps:$4 sm:$0xff]   ;;  %v19725_v39 = vrot.slane %v16580_v15, 2  ;;  %v19726_v12 = vrot.slane %v16776_v1, 2 }
 0x1e2   : > { %v5391_v45 = vsel %vm4516_vm3, %v19724_v52, %v19723_v9  ;;  %6936 = vmatpush1.bf16.msra.mxu1 %v13272_v53  ;;  %v19635_v9 = vrot.slane %v16857_v21, 2  ;;  %v3456_v35 = vpop.f32.mrf.mxu1  ;;  %v13288_v19 = vld [vmem:[%s19618_s1 + $0xf10] ss:$8 sps:$4 sm:$0xff]   ;;  %v13296_v16 = vld [vmem:[%s19618_s1 + $0xf04] ss:$8 sps:$4 sm:$0xff]   ;;  %v19736_v1 = vrot.slane %v16841_v7, 2 }
 0x1e3   : > { %6937 = vmatprep.subr.bf16.mxu1 %v13280_v40  ;;  %v16932_v58 = vadd.f32 %v3455_v44, %v16396_v27  ;;  %v3457_v18 = vadd.f32 %v3456_v35, %v3353_v36  ;;  %5921 = vmatprep.mubr.bf16.mxu1 %v5391_v45  ;;  %v3355_v48 = vpop.f32.mrf.mxu0  ;;  %v5385_v27 = vsel %vm4516_vm3, %v19726_v12, %v19725_v39  ;;  %v19727_v40 = vrot.slane %v16592_v11, 2  ;;  %v13293_v35 = vld [vmem:[%s19618_s1 + $0xe04] ss:$8 sps:$4 sm:$0xff]  }
 0x1e4   : > { %v3458_v53 = vpop.f32.mrf.mxu1  ;;  %v19728_v36 = vrot.slane %v16788_v34, 2  ;;  %6835 = vmatpush1.bf16.msra.mxu0 %v13275_v29  ;;  %v13294_v29 = vld [vmem:[%s19618_s1 + $0xf00] ss:$8 sps:$4 sm:$0xff]  }
 0x1e5   : > { %v16959_v44 = vadd.f32 %v3457_v18, %v16418_v23  ;;  %v3459_v39 = vadd.f32 %v3458_v53, %v3355_v48  ;;  %6836 = vmatprep.subr.bf16.mxu0 %v13287_v22  ;;  %v13291_v23 = vld [vmem:[%s19618_s1 + $0xe00] ss:$8 sps:$4 sm:$0xff]   ;;  %v19733_v48 = vrot.slane %v16834_v28, 2  ;;  %v19734_v53 = vrot.slane %v16828_v20, 2 }
 0x1e6   : > { %v5389_v17 = vsel %vm4516_vm3, %v19728_v36, %v19727_v40  ;;  %6938 = vmatpush1.bf16.msra.mxu1 %v13278_v4  ;;  %v3357_v40 = vpop.f32.mrf.mxu0  ;;  %v3460_v36 = vpop.f32.mrf.mxu1  ;;  %v16998_v34 = vld [vmem:[%s14260_s28 + $0xe0] ss:$16 sps:$4 sm:$0xff]  }
 0x1e7   : > { %19729 = vst [vmem:[#allocation12_spill] sm:$0xff] %v16959_v44  ;;  %6939 = vmatprep.subr.bf16.mxu1 %v13290_v6  ;;  %v16964_v52 = vadd.f32 %v3459_v39, %v16432_v54  ;;  %v3461_v42 = vadd.f32 %v3460_v36, %v3357_v40  ;;  %5819 = vmatmul.mubr.bf16.gmra.mxu0 %v5385_v27  ;;  %v19731_v54 = vrot.slane %v16831_v10, 2  ;;  %v19732_v6 = vrot.slane %v16798_v55, 2  ;;  %v13305_v40 = vld [vmem:[%s19618_s1 + $0xef4] ss:$8 sps:$4 sm:$0xff]  }
 0x1e8   : > { %v3361_v4 = vpop.f32.mrf.mxu0  ;;  %v3464_v18 = vpop.f32.mrf.mxu1  ;;  %5922 = vmatmul.mubr.bf16.gmra.mxu1 %v5389_v17  ;;  %v5399_v39 = vsel %vm4516_vm3, %v19734_v53, %v19733_v48  ;;  %v13308_v27 = vld [vmem:[%s19618_s1 + $0xff4] ss:$8 sps:$4 sm:$0xff]   ;;  %6837 = vmatpush1.bf16.msra.mxu0 %v13285_v26  ;;  %v17001_v48 = vld [vmem:[%s14260_s28 + $0xe8] ss:$16 sps:$4 sm:$0xff]  }
 0x1e9   : > { %19730 = vst [vmem:[#allocation16_spill] sm:$0xff] %v16964_v52  ;;  %v5395_v22 = vsel %vm4516_vm3, %v19732_v6, %v19731_v54  ;;  %v16989_v17 = vadd.f32 %v3461_v42, %v16448_v56  ;;  %v3465_v36 = vadd.f32 %v3464_v18, %v3361_v4  ;;  %v16992_v54 = vld [vmem:[%s14260_s28 + $0x40] sm:$0xcc]  ;;  %v16995_v6 = vld [vmem:[%s14260_s28 + $0x48] sm:$0xcc]  ;;  %6838 = vmatprep.subr.bf16.mxu0 %v13293_v35  ;;  %v19737_v56 = vrot.slane %v16580_v15, 2 }
 0x1ea   : > { %6940 = vmatpush1.bf16.msra.mxu1 %v13288_v19  ;;  %v3363_v53 = vpop.f32.mrf.mxu0  ;;  %v3466_v12 = vpop.f32.mrf.mxu1  ;;  %5828 = vmatprep.mubr.bf16.mxu0 %v5395_v22  ;;  %v19739_v4 = vrot.slane %v16844_v41, 2  ;;  %v19740_v18 = vrot.slane %v16592_v11, 2  ;;  %v13303_v35 = vld [vmem:[%s19618_s1 + $0xef0] ss:$8 sps:$4 sm:$0xff]   ;;  %v13314_v22 = vld [vmem:[%s19618_s1 + $0xfe4] ss:$8 sps:$4 sm:$0xff]  }
 0x1eb   : > { %19735 = vst [vmem:[#allocation17_spill] sm:$0xff] %v16989_v17  ;;  %6941 = vmatprep.subr.bf16.mxu1 %v13296_v16  ;;  %v5393_v42 = vsel %vm4516_vm3, %v19737_v56, %v19736_v1  ;;  %v17009_v26 = vadd.f32 %v3465_v36, %v16464_v60  ;;  %v3467_v19 = vadd.f32 %v3466_v12, %v3363_v53  ;;  %v13306_v16 = vld [vmem:[%s19618_s1 + $0xff0] ss:$8 sps:$4 sm:$0xff]   ;;  %v13311_v12 = vld [vmem:[%s19618_s1 + $0xee4] ss:$8 sps:$4 sm:$0xff]   ;;  %v19636_v56 = vrot.slane %v16580_v15, 3 }
 0x1ec   : > { %5931 = vmatprep.mubr.bf16.mxu1 %v5399_v39  ;;  %v5397_v45 = vsel %vm4516_vm3, %v19740_v18, %v19739_v4  ;;  %v3365_v1 = vpop.f32.mrf.mxu0  ;;  %v3468_v60 = vpop.f32.mrf.mxu1  ;;  %v19741_v39 = vrot.slane %v16831_v10, 2  ;;  %v17035_v53 = vor.u32 %v16923_v32, %v16921_v47  ;;  %6839 = vmatpush1.bf16.msra.mxu0 %v13291_v23  ;;  %v19638_v17 = vrot.slane %v16998_v34, 3 }
 0x1ed   : > { %19738 = vst [vmem:[#allocation18_spill] sm:$0xff] %v17009_v26  ;;  %v17040_v18 = vadd.f32 %v3467_v19, %v16477_v3  ;;  %v3469_v26 = vadd.f32 %v3468_v60, %v3365_v1  ;;  %v19637_v10 = vrot.slane %v17001_v48, 3  ;;  %6840 = vmatprep.subr.bf16.mxu0 %v13305_v40  ;;  %v19743_v32 = vrot.slane %v16891_v51, 2 }
 0x1ee   : > { %v5403_v36 = vsel %vm4516_vm3, %v19741_v39, %v19635_v9  ;;  %6942 = vmatpush1.bf16.msra.mxu1 %v13294_v29  ;;  %v3367_v39 = vpop.f32.mrf.mxu0  ;;  %v3470_v9 = vpop.f32.mrf.mxu1  ;;  %v19744_v47 = vrot.slane %v16834_v28, 2  ;;  %v17051_v3 = vcombine.high %v16992_v54, %v16541_v24  ;;  %v17055_v23 = vcombine.high %v16995_v6, %v16547_v59  ;;  %v13309_v28 = vld [vmem:[%s19618_s1 + $0xee0] ss:$8 sps:$4 sm:$0xff]  }
 0x1ef   : > { %19742 = vst [vmem:[#allocation19_spill] sm:$0xff] %v17040_v18  ;;  %6943 = vmatprep.subr.bf16.mxu1 %v13308_v27  ;;  %v17058_v29 = vadd.f32 %v3469_v26, %v16494_v33  ;;  %v3471_v40 = vadd.f32 %v3470_v9, %v3367_v39  ;;  %v13312_v24 = vld [vmem:[%s19618_s1 + $0xfe0] ss:$8 sps:$4 sm:$0xff]   ;;  %v17067_v27 = vld [vmem:[%s14260_s28 + $0xe4] ss:$16 sps:$4 sm:$0xff]   ;;  %v17074_v33 = vsel %vm7135_vm4, %v19636_v56, %v19638_v17  ;;  %v19748_v59 = vrot.slane %v16592_v11, 3 }
 0x1f0   : > { %v5407_v4 = vsel %vm4516_vm3, %v19744_v47, %v19743_v32  ;;  %19746 = vst [vmem:[#allocation21_spill] sm:$0xff] %v17067_v27  ;;  %19747 = vst [vmem:[#allocation22_spill] sm:$0xff] %v17074_v33  ;;  %v3371_v26 = vpop.f32.mrf.mxu0  ;;  %v3474_v19 = vpop.f32.mrf.mxu1  ;;  %5829 = vmatmul.mubr.bf16.gmra.mxu0 %v5393_v42  ;;  %5932 = vmatmul.mubr.bf16.gmra.mxu1 %v5397_v45  ;;  %v19750_v1 = vrot.slane %v16894_v50, 2  ;;  %v19751_v60 = vrot.slane %v16841_v7, 2  ;;  %v13323_v32 = vld [vmem:[%s19618_s1 + $0xed4] ss:$8 sps:$4 sm:$0xff]  }
 0x1f1   : > { %19745 = vst [vmem:[#allocation20_spill] sm:$0xff] %v17058_v29  ;;  %v17081_v9 = vsel %vm7135_vm4, %v19748_v59, %v19637_v10  ;;  %v13326_v47 = vld [vmem:[%s19618_s1 + $0xfd4] ss:$8 sps:$4 sm:$0xff]   ;;  %v19752_v42 = vshrl.u32 %v16588_v2, 16  ;;  %v19753_v59 = vshll.u32 %v16588_v2, 16  ;;  %v6220_v7 = vshll.u32 %v16673_v38, 16  ;;  %6841 = vmatpush2.bf16.msra.mxu0 %v13303_v35  ;;  %5838 = vmatprep.mubr.bf16.mxu0 %v5403_v36 }
 0x1f2   : > { %19749 = vst [vmem:[#allocation23_spill] sm:$0xff] %v17081_v9  ;;  %v17088_v39 = vsel %vm4516_vm3, %v19751_v60, %v19750_v1  ;;  %v17102_v10 = vld [vmem:[%s14260_s28 + $0xec] ss:$16 sps:$4 sm:$0xff]   ;;  %v17105_v1 = vld [vmem:[%s14260_s28 + $0x104] ss:$16 sps:$4 sm:$0xff]   ;;  %v17111_v17 = vadd.f32 %v3471_v40, %v16508_v31  ;;  %v3475_v9 = vadd.f32 %v3474_v19, %v3371_v26  ;;  %6944 = vmatpush2.bf16.msra.mxu1 %v13306_v16  ;;  %v19756_v33 = vshrl.u32 %v16673_v38, 16  ;;  %v3373_v18 = vpop.f32.mrf.mxu0  ;;  %v3476_v52 = vpop.f32.mrf.mxu1 }
 0x1f3   : > { %v6270_v45 = vrot.slane %v19752_v42, 2  ;;  %v6273_v56 = vrot.slane %v19753_v59, 3  ;;  %19754 = vst [vmem:[#allocation24_spill] sm:$0xff] %v17102_v10  ;;  %v17108_v60 = vld [vmem:[%s14260_s28 + $0x10c] ss:$16 sps:$4 sm:$0xff]   ;;  %6842 = vmatprep.subr.bf16.mxu0 %v13311_v12  ;;  %6945 = vmatprep.subr.bf16.mxu1 %v13314_v22  ;;  %v19757_v31 = vrot.slane %v16908_v37, 2  ;;  %v3477_v19 = vadd.f32 %v3476_v52, %v3373_v18 }
 0x1f4   : > { %19755 = vst [vmem:[#allocation25_spill] sm:$0xff] %v17111_v17  ;;  %v17115_v42 = vrot.slane %v19756_v33, 2  ;;  %v17119_v59 = vld [vmem:[%s14260_s28 + $0x100] ss:$16 sps:$4 sm:$0xff]   ;;  %v17122_v29 = vld [vmem:[%s14260_s28 + $0x108] ss:$16 sps:$4 sm:$0xff]   ;;  %v17133_v26 = vadd.f32 %v3475_v9, %v16523_v8  ;;  %5941 = vmatprep.mubr.bf16.mxu1 %v5407_v4  ;;  %v3478_v8 = vpop.f32.mrf.mxu1 }
 0x1f5   : > { %v19758_v40 = vrot.slane %v16844_v41, 2  ;;  %v6226_v38 = vshrl.u32 %v17051_v3, 16  ;;  %v6229_v16 = vshll.u32 %v17051_v3, 16  ;;  %v6260_v33 = vshrl.u32 %v17055_v23, 16  ;;  %v13321_v12 = vld [vmem:[%s19618_s1 + $0xed0] ss:$8 sps:$4 sm:$0xff]   ;;  %6843 = vmatpush2.bf16.msra.mxu0 %v13309_v28 }
 0x1f6   : > { %19759 = vst [vmem:[#allocation26_spill] sm:$0xff] %v17133_v26  ;;  %v13324_v41 = vld [vmem:[%s19618_s1 + $0xfd0] ss:$8 sps:$4 sm:$0xff]   ;;  %v6263_v22 = vshll.u32 %v17055_v23, 16  ;;  %v13329_v52 = vld [vmem:[%s19618_s1 + $0xec4] ss:$8 sps:$4 sm:$0xff]   ;;  %v17149_v4 = vor.u32 %v6273_v56, %v6270_v45  ;;  %6946 = vmatpush2.bf16.msra.mxu1 %v13312_v24  ;;  %v3480_v44 = vpop.f32.mrf.mxu1  ;;  %6844 = vmatprep.subr.bf16.mxu0 %v13323_v32 }
 0x1f7   : > { %v5405_v35 = vsel %vm4516_vm3, %v19758_v40, %v19757_v31  ;;  %v3375_v31 = vpop.f32.mrf.mxu0  ;;  %v13332_v36 = vld [vmem:[%s19618_s1 + $0xfc4] ss:$8 sps:$4 sm:$0xff]   ;;  %v19641_v9 = vrot.slane %v17105_v1, 3  ;;  %v17155_v40 = vadd.f32 %v3477_v19, %v16550_v61  ;;  %v19640_v17 = vrot.slane %v17119_v59, 3  ;;  %6947 = vmatprep.subr.bf16.mxu1 %v13326_v47 }
 0x1f8   : > { %v3479_v2 = vadd.f32 %v3478_v8, %v3375_v31  ;;  %v6018_v3 = vld [vmem:[%s14260_s28 + $0x120] sm:$0x11]  ;;  %v6019_v26 = vld [vmem:[%s14260_s28 + $0x128] sm:$0x11]  ;;  %v19639_v56 = vrot.slane %v17122_v29, 3  ;;  %v17161_v18 = vrot.slane %v6226_v38, 2  ;;  %5839 = vmatmul.mubr.bf16.gmra.mxu0 %v17088_v39  ;;  %5942 = vmatmul.mubr.bf16.gmra.mxu1 %v5405_v35 }
 0x1f9   : > { %v3377_v45 = vpop.f32.mrf.mxu0  ;;  %v17163_v23 = vrot.slane %v6220_v7, 3  ;;  %v19760_v61 = vrot.slane %v17067_v27, 3  ;;  %v19762_v24 = vrot.slane %v17108_v60, 3  ;;  %v19763_v19 = vrot.slane %v17102_v10, 3  ;;  %v13327_v7 = vld [vmem:[%s19618_s1 + $0xec0] ss:$8 sps:$4 sm:$0xff]   ;;  %6845 = vmatpush2.bf16.msra.mxu0 %v13321_v12 }
 0x1fa   : > { %v17180_v32 = vadd.f32 %v3479_v2, %v16567_v14  ;;  %v3481_v47 = vadd.f32 %v3480_v44, %v3377_v45  ;;  %v13330_v38 = vld [vmem:[%s19618_s1 + $0xfc0] ss:$8 sps:$4 sm:$0xff]   ;;  %v19765_v8 = vrot.slane %v16998_v34, 3  ;;  %v19767_v14 = vrot.slane %v17001_v48, 3  ;;  %v3484_v45 = vpop.f32.mrf.mxu1  ;;  %6948 = vmatpush2.bf16.msra.mxu1 %v13324_v41  ;;  %6846 = vmatprep.subr.bf16.mxu0 %v13329_v52 }
 0x1fb   : > { %v17170_v28 = vsel %vm7135_vm4, %v19760_v61, %v19641_v9  ;;  %v17177_v31 = vsel %vm7135_vm4, %v19763_v19, %v19762_v24  ;;  %v3381_v2 = vpop.f32.mrf.mxu0  ;;  %v13335_v24 = vld [vmem:[%s19618_s1 + $0xeb4] ss:$8 sps:$4 sm:$0xff]   ;;  %v17220_v39 = vrot.slane %v6263_v22, 3  ;;  %6949 = vmatprep.subr.bf16.mxu1 %v13332_v36  ;;  %v17239_v12 = vcombine.high %v6019_v26, %v6019_v26  ;;  %v13333_v36 = vld [vmem:[%s19618_s1 + $0xeb0] ss:$8 sps:$4 sm:$0xff]  }
 0x1fc   : > { %19761 = vst [vmem:[#allocation27_spill] sm:$0xff] %v17170_v28  ;;  %19764 = vst [vmem:[#allocation28_spill] sm:$0xff] %v17177_v31  ;;  %v17193_v61 = vsel %vm7135_vm4, %v19765_v8, %v19640_v17  ;;  %v17200_v44 = vsel %vm7135_vm4, %v19767_v14, %v19639_v56  ;;  %v13338_v19 = vld [vmem:[%s19618_s1 + $0xfb4] ss:$8 sps:$4 sm:$0xff]   ;;  %v17216_v56 = vrot.slane %v6229_v16, 3  ;;  %v17218_v17 = vrot.slane %v6260_v33, 2  ;;  %v3486_v31 = vpop.f32.mrf.mxu1 }
 0x1fd   : > { %19766 = vst [vmem:[#allocation29_spill] sm:$0xff] %v17193_v61  ;;  %19768 = vst [vmem:[#allocation30_spill] sm:$0xff] %v17200_v44  ;;  %v17210_v8 = vld [vmem:[%s14260_s28 + $0x50] sm:$0xff]  ;;  %v17223_v35 = vadd.f32 %v3481_v47, %v16595_v30  ;;  %v3485_v9 = vadd.f32 %v3484_v45, %v3381_v2  ;;  %v17226_v44 = vld [vmem:[%s14260_s28 + $0x58] sm:$0xff]  ;;  %v3383_v16 = vpop.f32.mrf.mxu0  ;;  %v19771_v33 = vshrl.u32 %v16678_v62, 16  ;;  %v17237_v30 = vcombine.high %v6018_v3, %v6018_v3 }
 0x1fe   : > { %v17214_v14 = vcombine.low %v16992_v54, %v17210_v8  ;;  %19770 = vst [vmem:[#allocation32_spill] sm:$0xff] %v17226_v44  ;;  %v17230_v61 = vcombine.low %v16995_v6, %v17226_v44  ;;  %v17241_v41 = vcombine.low %v6018_v3, %v6018_v3  ;;  %v3487_v6 = vadd.f32 %v3486_v31, %v3383_v16  ;;  %v13336_v45 = vld [vmem:[%s19618_s1 + $0xfb0] ss:$8 sps:$4 sm:$0xff]  }
 0x1ff   : > { %19769 = vst [vmem:[#allocation31_spill] sm:$0xff] %v17223_v35  ;;  %v17235_v22 = vrot.slane %v19771_v33, 2  ;;  %v17244_v47 = vadd.f32 %v3485_v9, %v16607_v49  ;;  %v19773_v2 = vrot.slane %v16857_v21, 2  ;;  %v19774_v52 = vrot.slane %v16891_v51, 2  ;;  %v3385_v49 = vpop.f32.mrf.mxu0  ;;  %v3488_v9 = vpop.f32.mrf.mxu1  ;;  %v13341_v21 = vld [vmem:[%s19618_s1 + $0xea4] ss:$8 sps:$4 sm:$0xff]   ;;  %6847 = vmatpush2.bf16.msra.mxu0 %v13327_v7  ;;  %6950 = vmatpush2.bf16.msra.mxu1 %v13330_v38 }
 0x200   : > { %v6286_v3 = vshrl.u32 %v16696_v63, 16  ;;  %v17257_v33 = vcombine.low %v6019_v26, %v6019_v26  ;;  %v13344_v51 = vld [vmem:[%s19618_s1 + $0xfa4] ss:$8 sps:$4 sm:$0xff]   ;;  %v6232_v31 = vor.u32 %v17216_v56, %v17161_v18  ;;  %v6266_v16 = vor.u32 %v17220_v39, %v17218_v17  ;;  %6848 = vmatprep.subr.bf16.mxu0 %v13335_v24  ;;  %6951 = vmatprep.subr.bf16.mxu1 %v13338_v19 }
 0x201   : > { %19772 = vst [vmem:[#allocation33_spill] sm:$0xff] %v17244_v47  ;;  %5848 = vmatprep.mubr.bf16.mxu0 %v19773_v2  ;;  %5951 = vmatprep.mubr.bf16.mxu1 %v19774_v52  ;;  %v7190_v2 = vrot.slane %v17237_v30, 3  ;;  %v7194_v26 = vrot.slane %v17239_v12, 3  ;;  %v17272_v52 = vadd.f32 %v3487_v6, %v16616_v46  ;;  %v3489_v54 = vadd.f32 %v3488_v9, %v3385_v49  ;;  %v3387_v35 = vpop.f32.mrf.mxu0  ;;  %v3490_v44 = vpop.f32.mrf.mxu1 }
 0x202   : > { %v7188_v28 = vrot.slane %v17241_v41, 3  ;;  %v7192_v47 = vrot.slane %v17257_v33, 3  ;;  %v6289_v17 = vshll.u32 %v16696_v63, 16  ;;  %v6304_v18 = vshrl.u32 %v16699_v25, 16  ;;  %v13339_v63 = vld [vmem:[%s19618_s1 + $0xea0] ss:$8 sps:$4 sm:$0xff]  }
 0x203   : > { %v19775_v56 = vrot.slane %v17105_v1, 3  ;;  %v19777_v7 = vrot.slane %v17108_v60, 3  ;;  %v17289_v39 = vadd.f32 %v3489_v54, %v16631_v5  ;;  %v3491_v6 = vadd.f32 %v3490_v44, %v3387_v35  ;;  %v13342_v25 = vld [vmem:[%s19618_s1 + $0xfa0] ss:$8 sps:$4 sm:$0xff]   ;;  %v3391_v5 = vpop.f32.mrf.mxu0  ;;  %v3494_v44 = vpop.f32.mrf.mxu1  ;;  %6849 = vmatpush2.bf16.msra.mxu0 %v13333_v36  ;;  %6952 = vmatpush2.bf16.msra.mxu1 %v13336_v45 }
 0x204   : > { %v19779_v24 = vrot.slane %v17119_v59, 3  ;;  %v19781_v49 = vrot.slane %v17122_v29, 3  ;;  %v19783_v35 = vrot.slane %v16894_v50, 2  ;;  %v19784_v54 = vrot.slane %v16908_v37, 2  ;;  %6850 = vmatprep.subr.bf16.mxu0 %v13341_v21  ;;  %6953 = vmatprep.subr.bf16.mxu1 %v13344_v51  ;;  %v13348_v21 = vld [vmem:[%s19618_s1 + $0xf90] ss:$8 sps:$4 sm:$0xff]  }
 0x205   : > { %v17281_v46 = vsel %vm7135_vm4, %v19775_v56, %v7190_v2  ;;  %v17286_v38 = vsel %vm7135_vm4, %v19777_v7, %v7194_v26  ;;  %v13347_v2 = vld [vmem:[%s19618_s1 + $0xe94] ss:$8 sps:$4 sm:$0xff]   ;;  %v6209_v26 = vshrl.u32 %v17214_v14, 16  ;;  %v6241_v50 = vsel %vm6207_vm5, %v6232_v31, %v17035_v53 }
 0x206   : > { %19776 = vst [vmem:[#allocation34_spill] sm:$0xff] %v17281_v46  ;;  %19778 = vst [vmem:[#allocation35_spill] sm:$0xff] %v17286_v38  ;;  %v17300_v19 = vsel %vm7135_vm4, %v19779_v24, %v7188_v28  ;;  %v17305_v9 = vsel %vm7135_vm4, %v19781_v49, %v7192_v47  ;;  %5849 = vmatmul.mubr.bf16.gmra.mxu0 %v19783_v35  ;;  %5952 = vmatmul.mubr.bf16.gmra.mxu1 %v19784_v54  ;;  %v13350_v28 = vld [vmem:[%s19618_s1 + $0xf94] ss:$8 sps:$4 sm:$0xff]   ;;  %v6212_v47 = vshll.u32 %v17214_v14, 16  ;;  %v3393_v35 = vpop.f32.mrf.mxu0  ;;  %v3496_v54 = vpop.f32.mrf.mxu1 }
 0x207   : > { %19780 = vst [vmem:[#allocation36_spill] sm:$0xff] %v17300_v19  ;;  %19782 = vst [vmem:[#allocation37_spill] sm:$0xff] %v17305_v9  ;;  %v6275_v37 = vsel %vm6207_vm5, %v6266_v16, %v17149_v4  ;;  %v17324_v56 = vadd.f32 %v3491_v6, %v16650_v57  ;;  %v3495_v7 = vadd.f32 %v3494_v44, %v3391_v5  ;;  %v6243_v24 = vshrl.u32 %v17230_v61, 16  ;;  %v17331_v19 = vld [vmem:[%s14260_s28 + $0x8c] ss:$16 sps:$4 sm:$0xff]  }
 0x208   : > { %v6246_v49 = vshll.u32 %v17230_v61, 16  ;;  %v19785_v14 = vshll.u32 %v16678_v62, 16  ;;  %v6288_v9 = vrot.slane %v6286_v3, 2  ;;  %19786 = vst [vmem:[#allocation38_spill] sm:$0xff] %v17331_v19  ;;  %v6307_v57 = vshll.u32 %v17331_v19, 16  ;;  %6856 = vmatprep.mubr.bf16.mxu0 %v6241_v50  ;;  %6959 = vmatprep.mubr.bf16.mxu1 %v6275_v37  ;;  %v3395_v51 = vpop.f32.mrf.mxu0  ;;  %v3498_v16 = vpop.f32.mrf.mxu1 }
 0x209   : > { %v17335_v36 = vadd.f32 %v3495_v7, %v16659_v13  ;;  %v3497_v45 = vadd.f32 %v3496_v54, %v3393_v35  ;;  %v13345_v61 = vld [vmem:[%s19618_s1 + $0xe90] ss:$8 sps:$4 sm:$0xff]   ;;  %v6291_v62 = vrot.slane %v6289_v17, 3  ;;  %v6306_v3 = vrot.slane %v6304_v18, 2  ;;  %v13353_v13 = vld [vmem:[%s19618_s1 + $0xe84] ss:$8 sps:$4 sm:$0xff]   ;;  %6851 = vmatpush2.bf16.msra.mxu0 %v13339_v63  ;;  %6954 = vmatpush2.bf16.msra.mxu1 %v13342_v25 }
 0x20a   : > { %v6256_v31 = vrot.slane %v19785_v14, 3  ;;  %v13356_v6 = vld [vmem:[%s19618_s1 + $0xf84] ss:$8 sps:$4 sm:$0xff]   ;;  %v6211_v5 = vrot.slane %v6209_v26, 2  ;;  %v6214_v44 = vrot.slane %v6212_v47, 3  ;;  %v17351_v7 = vor.u32 %v17163_v23, %v17115_v42  ;;  %v19788_v18 = vld [vmem:[#allocation4_spill] sm:$0xff]  ;;  %v3397_v26 = vpop.f32.mrf.mxu0  ;;  %v3500_v47 = vpop.f32.mrf.mxu1  ;;  %6852 = vmatprep.subr.bf16.mxu0 %v13347_v2  ;;  %6955 = vmatprep.subr.bf16.mxu1 %v13350_v28 }
 0x20b   : > { %v17354_v50 = vld [vmem:[%s14260_s28 + $0x80] ss:$16 sps:$4 sm:$0xff]   ;;  %v17358_v37 = vadd.f32 %v3497_v45, %v19788_v18  ;;  %v3499_v35 = vadd.f32 %v3498_v16, %v3395_v51  ;;  %v6245_v54 = vrot.slane %v6243_v24, 2  ;;  %v6248_v14 = vrot.slane %v6246_v49, 3  ;;  %v17365_v46 = vld [vmem:[%s14260_s28 + $0x88] ss:$16 sps:$4 sm:$0xff]  }
 0x20c   : > { %19787 = vst [vmem:[#allocation39_spill] sm:$0xff] %v17354_v50  ;;  %v6277_v17 = vshrl.u32 %v17354_v50, 16  ;;  %v17361_v42 = vor.u32 %v6256_v31, %v17235_v22  ;;  %v6309_v23 = vrot.slane %v6307_v57, 3  ;;  %v6280_v38 = vshll.u32 %v17354_v50, 16  ;;  %19790 = vst [vmem:[#allocation40_spill] sm:$0xff] %v17365_v46  ;;  %v19791_v63 = vld [vmem:[#allocation5_spill] sm:$0xff] }
 0x20d   : > { %19789 = vst [vmem:[#allocation4_spill] sm:$0xff] %v17358_v37  ;;  %v6295_v45 = vshrl.u32 %v17365_v46, 16  ;;  %v17369_v25 = vadd.f32 %v3499_v35, %v19791_v63  ;;  %v3501_v24 = vadd.f32 %v3500_v47, %v3397_v26  ;;  %v13351_v2 = vld [vmem:[%s19618_s1 + $0xe80] ss:$8 sps:$4 sm:$0xff]   ;;  %v6298_v28 = vshll.u32 %v17365_v46, 16  ;;  %6853 = vmatpush2.bf16.msra.mxu0 %v13345_v61  ;;  %6956 = vmatpush2.bf16.msra.mxu1 %v13348_v21 }
 0x20e   : > { %v13354_v22 = vld [vmem:[%s19618_s1 + $0xf80] ss:$8 sps:$4 sm:$0xff]   ;;  %v17379_v49 = vld [vmem:[%s14260_s28 + $0xa4] ss:$16 sps:$4 sm:$0xff]   ;;  %v6215_v57 = vor.u32 %v6214_v44, %v6211_v5  ;;  %v17390_v35 = vld [vmem:[%s14260_s28 + $0xac] ss:$16 sps:$4 sm:$0xff]   ;;  %v6249_v5 = vor.u32 %v6248_v14, %v6245_v54  ;;  %6854 = vmatprep.subr.bf16.mxu0 %v13353_v13  ;;  %6957 = vmatprep.subr.bf16.mxu1 %v13356_v6  ;;  %v6310_v61 = vor.u32 %v6309_v23, %v6306_v3 }
 0x20f   : > { %19792 = vst [vmem:[#allocation5_spill] sm:$0xff] %v17369_v25  ;;  %19793 = vst [vmem:[#allocation41_spill] sm:$0xff] %v17379_v49  ;;  %v6322_v31 = vshrl.u32 %v17379_v49, 16  ;;  %v13363_v51 = vld [vmem:[%s19618_s1 + $0x1074] ss:$8 sps:$4 sm:$0xff]   ;;  %v6325_v18 = vshll.u32 %v17379_v49, 16  ;;  %v17402_v49 = vor.u32 %v6291_v62, %v6288_v9 }
 0x210   : > { %v13366_v16 = vld [vmem:[%s19618_s1 + $0x1174] ss:$8 sps:$4 sm:$0xff]   ;;  %19794 = vst [vmem:[#allocation42_spill] sm:$0xff] %v17390_v35  ;;  %v6340_v26 = vshrl.u32 %v17390_v35, 16  ;;  %v6343_v47 = vshll.u32 %v17390_v35, 16  ;;  %v19795_v63 = vld [vmem:[#allocation6_spill] sm:$0xff] }
 0x211   : > { %v17395_v46 = vadd.f32 %v3501_v24, %v19795_v63  ;;  %v17398_v44 = vld [vmem:[%s14260_s28 + $0xa0] ss:$16 sps:$4 sm:$0xff]   ;;  %v6279_v25 = vrot.slane %v6277_v17, 2  ;;  %v6282_v37 = vrot.slane %v6280_v38, 3  ;;  %v6297_v21 = vrot.slane %v6295_v45, 2  ;;  %6855 = vmatpush2.bf16.msra.mxu0 %v13351_v2  ;;  %6958 = vmatpush2.bf16.msra.mxu1 %v13354_v22 }
 0x212   : > { %19796 = vst [vmem:[#allocation6_spill] sm:$0xff] %v17398_v44  ;;  %v6313_v50 = vshrl.u32 %v17398_v44, 16  ;;  %v6316_v19 = vshll.u32 %v17398_v44, 16  ;;  %v13361_v24 = vld [vmem:[%s19618_s1 + $0x1070] ss:$8 sps:$4 sm:$0xff]   ;;  %v6300_v54 = vrot.slane %v6298_v28, 3  ;;  %v6224_v63 = vsel %vm6207_vm5, %v6215_v57, %v17351_v7  ;;  %7544 = vmatprep.subr.bf16.mxu0 %v13363_v51  ;;  %7647 = vmatprep.subr.bf16.mxu1 %v13366_v16  ;;  %v4239_v28 = vpop.f32.mrf.mxu0 }
 0x213   : > { %v6324_v14 = vrot.slane %v6322_v31, 2  ;;  %v6327_v35 = vrot.slane %v6325_v18, 3  ;;  %v6342_v44 = vrot.slane %v6340_v26, 2  ;;  %v6345_v13 = vrot.slane %v6343_v47, 3  ;;  %v13364_v9 = vld [vmem:[%s19618_s1 + $0x1170] ss:$8 sps:$4 sm:$0xff]   ;;  %v4342_v31 = vpop.f32.mrf.mxu1 }
 0x214   : > { %v6258_v38 = vsel %vm6207_vm5, %v6249_v5, %v17361_v42  ;;  %v6315_v62 = vrot.slane %v6313_v50, 2  ;;  %v6318_v3 = vrot.slane %v6316_v19, 3  ;;  %v17415_v6 = vld [vmem:[%s14260_s28 + $0xa8] ss:$16 sps:$4 sm:$0xff]   ;;  %v13369_v23 = vld [vmem:[%s19618_s1 + $0x1064] ss:$8 sps:$4 sm:$0xff]   ;;  %v6293_v19 = vsel %vm6207_vm5, %v17035_v53, %v17402_v49  ;;  %6857 = vmatmul.mubr.bf16.vlgmr.msra.gmra.mxu0 %v6224_v63 }
 0x215   : > { %v6331_v17 = vshrl.u32 %v17415_v6, 16  ;;  %v13372_v45 = vld [vmem:[%s19618_s1 + $0x1164] ss:$8 sps:$4 sm:$0xff]   ;;  %v6334_v2 = vshll.u32 %v17415_v6, 16  ;;  %v6311_v50 = vsel %vm6207_vm5, %v17149_v4, %v6310_v61  ;;  %v6283_v22 = vor.u32 %v6282_v37, %v6279_v25  ;;  %6960 = vmatmul.mubr.bf16.vlgmr.msra.gmra.mxu1 %v6258_v38  ;;  %v13367_v57 = vld [vmem:[%s19618_s1 + $0x1060] ss:$8 sps:$4 sm:$0xff]   ;;  %7545 = vmatpush1.bf16.msra.mxu0 %v13361_v24  ;;  %v4344_v5 = vpop.f32.mrf.mxu1 }
 0x216   : > { %v17433_v51 = vor.u32 %v6300_v54, %v6297_v21  ;;  %v17435_v16 = vor.u32 %v6327_v35, %v6324_v14  ;;  %v17437_v18 = vor.u32 %v6345_v13, %v6342_v44  ;;  %v4343_v26 = vadd.f32 %v4342_v31, %v4239_v28  ;;  %7648 = vmatpush1.bf16.msra.mxu1 %v13364_v9  ;;  %v13370_v53 = vld [vmem:[%s19618_s1 + $0x1160] ss:$8 sps:$4 sm:$0xff]   ;;  %v13375_v4 = vld [vmem:[%s19618_s1 + $0x1054] ss:$8 sps:$4 sm:$0xff]   ;;  %v4241_v35 = vpop.f32.mrf.mxu0 }
 0x217   : > { %v17445_v37 = vor.u32 %v6318_v3, %v6315_v62  ;;  %v6333_v25 = vrot.slane %v6331_v17, 2  ;;  %v6358_v47 = vshrl.u32 %v16798_v55, 16  ;;  %7546 = vmatprep.subr.bf16.mxu0 %v13369_v23  ;;  %7649 = vmatprep.subr.bf16.mxu1 %v13372_v45  ;;  %v13378_v44 = vld [vmem:[%s19618_s1 + $0x1154] ss:$8 sps:$4 sm:$0xff]   ;;  %v6336_v24 = vrot.slane %v6334_v2, 3  ;;  %v19797_v63 = vld [vmem:[#allocation7_spill] sm:$0xff]  ;;  %v4346_v62 = vpop.f32.mrf.mxu1 }
 0x218   : > { %v6361_v21 = vshll.u32 %v16798_v55, 16  ;;  %v6376_v54 = vshrl.u32 %v16828_v20, 16  ;;  %v6379_v14 = vshll.u32 %v16828_v20, 16  ;;  %v17455_v13 = vadd.f32 %v4343_v26, %v19797_v63  ;;  %6866 = vmatprep.mubr.bf16.mxu0 %v6293_v19  ;;  %6969 = vmatprep.mubr.bf16.mxu1 %v6311_v50  ;;  %v4243_v9 = vpop.f32.mrf.mxu0  ;;  %v13373_v23 = vld [vmem:[%s19618_s1 + $0x1050] ss:$8 sps:$4 sm:$0xff]  }
 0x219   : > { %v4345_v38 = vadd.f32 %v4344_v5, %v4241_v35  ;;  %v6284_v3 = vsel %vm6207_vm5, %v17351_v7, %v6283_v22  ;;  %v6302_v17 = vsel %vm6207_vm5, %v17361_v42, %v17433_v51  ;;  %v6329_v45 = vsel %vm6207_vm5, %v17402_v49, %v17435_v16  ;;  %v19798_v19 = vld [vmem:[#allocation8_spill] sm:$0xff]  ;;  %7547 = vmatpush1.bf16.msra.mxu0 %v13367_v57  ;;  %v13381_v42 = vld [vmem:[%s19618_s1 + $0x1044] ss:$8 sps:$4 sm:$0xff]   ;;  %v4348_v26 = vpop.f32.mrf.mxu1 }
 0x21a   : > { %v6347_v2 = vsel %vm6207_vm5, %v6310_v61, %v17437_v18  ;;  %v4347_v28 = vadd.f32 %v4346_v62, %v4243_v9  ;;  %7650 = vmatpush1.bf16.msra.mxu1 %v13370_v53  ;;  %v13376_v7 = vld [vmem:[%s19618_s1 + $0x1150] ss:$8 sps:$4 sm:$0xff]   ;;  %v17481_v49 = vsel %vm6207_vm5, %v6283_v22, %v17445_v37  ;;  %v6360_v31 = vrot.slane %v6358_v47, 2  ;;  %v4245_v61 = vpop.f32.mrf.mxu0  ;;  %7548 = vmatprep.subr.bf16.mxu0 %v13375_v4  ;;  %v13384_v57 = vld [vmem:[%s19618_s1 + $0x1144] ss:$8 sps:$4 sm:$0xff]  }
 0x21b   : > { %v17471_v50 = vadd.f32 %v4345_v38, %v19798_v19  ;;  %7651 = vmatprep.subr.bf16.mxu1 %v13378_v44  ;;  %v17486_v53 = vor.u32 %v6336_v24, %v6333_v25  ;;  %v6363_v35 = vrot.slane %v6361_v21, 3  ;;  %v6378_v5 = vrot.slane %v6376_v54, 2  ;;  %v19799_v38 = vld [vmem:[#allocation10_spill] sm:$0xff]  ;;  %v4352_v4 = vpop.f32.mrf.mxu1  ;;  %v19800_v54 = vld [vmem:[#allocation13_spill] sm:$0xff] }
 0x21c   : > { %v6381_v63 = vrot.slane %v6379_v14, 3  ;;  %v17489_v9 = vadd.f32 %v4347_v28, %v19799_v38  ;;  %v4349_v62 = vadd.f32 %v4348_v26, %v4245_v61  ;;  %v6349_v22 = vshrl.u32 %v16580_v15, 16  ;;  %v4249_v19 = vpop.f32.mrf.mxu0  ;;  %6867 = vmatmul.mubr.bf16.gmra.mxu0 %v6284_v3  ;;  %v13379_v61 = vld [vmem:[%s19618_s1 + $0x1040] ss:$8 sps:$4 sm:$0xff]  }
 0x21d   : > { %v6352_v47 = vshll.u32 %v16580_v15, 16  ;;  %6970 = vmatmul.mubr.bf16.gmra.mxu1 %v6302_v17  ;;  %v6367_v44 = vshrl.u32 %v16592_v11, 16  ;;  %v6370_v25 = vshll.u32 %v16592_v11, 16  ;;  %v6394_v24 = vshrl.u32 %v17067_v27, 16  ;;  %7549 = vmatpush1.bf16.msra.mxu0 %v13373_v23  ;;  %v13382_v3 = vld [vmem:[%s19618_s1 + $0x1140] ss:$8 sps:$4 sm:$0xff]  }
 0x21e   : > { %v6397_v21 = vshll.u32 %v17067_v27, 16  ;;  %v17498_v14 = vadd.f32 %v4349_v62, %v19800_v54  ;;  %v4353_v28 = vadd.f32 %v4352_v4, %v4249_v19  ;;  %7652 = vmatpush1.bf16.msra.mxu1 %v13376_v7  ;;  %v6412_v17 = vshrl.u32 %v17102_v10, 16  ;;  %v4251_v38 = vpop.f32.mrf.mxu0  ;;  %v4354_v27 = vpop.f32.mrf.mxu1  ;;  %7550 = vmatprep.subr.bf16.mxu0 %v13381_v42  ;;  %v13387_v7 = vld [vmem:[%s19618_s1 + $0x1034] ss:$8 sps:$4 sm:$0xff]   ;;  %v19802_v54 = vld [vmem:[#allocation14_spill] sm:$0xff] }
 0x21f   : > { %v6415_v26 = vshll.u32 %v17102_v10, 16  ;;  %7653 = vmatprep.subr.bf16.mxu1 %v13384_v57  ;;  %v6338_v23 = vsel %vm6207_vm5, %v17433_v51, %v17486_v53  ;;  %v13390_v62 = vld [vmem:[%s19618_s1 + $0x1134] ss:$8 sps:$4 sm:$0xff]   ;;  %v17517_v19 = vor.u32 %v6363_v35, %v6360_v31  ;;  %v17519_v4 = vor.u32 %v6381_v63, %v6378_v5  ;;  %6876 = vmatprep.mubr.bf16.mxu0 %v6329_v45  ;;  %v13385_v15 = vld [vmem:[%s19618_s1 + $0x1030] ss:$8 sps:$4 sm:$0xff]  }
 0x220   : > { %19801 = vst [vmem:[#allocation7_spill] sm:$0xff] %v17498_v14  ;;  %v17522_v14 = vadd.f32 %v4353_v28, %v19802_v54  ;;  %v4355_v42 = vadd.f32 %v4354_v27, %v4251_v38  ;;  %6979 = vmatprep.mubr.bf16.mxu1 %v6347_v2  ;;  %v6351_v57 = vrot.slane %v6349_v22, 2  ;;  %v6354_v51 = vrot.slane %v6352_v47, 3  ;;  %v4253_v10 = vpop.f32.mrf.mxu0  ;;  %v4356_v11 = vpop.f32.mrf.mxu1  ;;  %v13388_v27 = vld [vmem:[%s19618_s1 + $0x1130] ss:$8 sps:$4 sm:$0xff]  }
 0x221   : > { %v6369_v20 = vrot.slane %v6367_v44, 2  ;;  %v6372_v55 = vrot.slane %v6370_v25, 3  ;;  %v6396_v31 = vrot.slane %v6394_v24, 2  ;;  %v6399_v35 = vrot.slane %v6397_v21, 3  ;;  %7551 = vmatpush1.bf16.msra.mxu0 %v13379_v61  ;;  %v13393_v45 = vld [vmem:[%s19618_s1 + $0x1024] ss:$8 sps:$4 sm:$0xff]  }
 0x222   : > { %v17528_v5 = vadd.f32 %v4355_v42, %v16874_v43  ;;  %v4357_v63 = vadd.f32 %v4356_v11, %v4253_v10  ;;  %7654 = vmatpush1.bf16.msra.mxu1 %v13382_v3  ;;  %v6414_v2 = vrot.slane %v6412_v17, 2  ;;  %v6417_v22 = vrot.slane %v6415_v26, 3  ;;  %v4255_v47 = vpop.f32.mrf.mxu0  ;;  %v4358_v44 = vpop.f32.mrf.mxu1  ;;  %7552 = vmatprep.subr.bf16.mxu0 %v13387_v7  ;;  %v13396_v11 = vld [vmem:[%s19618_s1 + $0x1124] ss:$8 sps:$4 sm:$0xff]  }
 0x223   : > { %7655 = vmatprep.subr.bf16.mxu1 %v13390_v62  ;;  %v6385_v43 = vshrl.u32 %v16998_v34, 16  ;;  %v6388_v10 = vshll.u32 %v16998_v34, 16  ;;  %v6403_v25 = vshrl.u32 %v17001_v48, 16  ;;  %v6406_v24 = vshll.u32 %v17001_v48, 16  ;;  %v19803_v21 = vld [vmem:[#allocation15_spill] sm:$0xff] }
 0x224   : > { %v17544_v28 = vadd.f32 %v4357_v63, %v19803_v21  ;;  %v4359_v61 = vadd.f32 %v4358_v44, %v4255_v47  ;;  %v6365_v3 = vsel %vm6207_vm5, %v17435_v16, %v17517_v19  ;;  %v6383_v17 = vsel %vm6207_vm5, %v17437_v18, %v17519_v4  ;;  %v4259_v26 = vpop.f32.mrf.mxu0  ;;  %v4362_v38 = vpop.f32.mrf.mxu1  ;;  %6877 = vmatmul.mubr.bf16.gmra.mxu0 %v17481_v49  ;;  %v13391_v16 = vld [vmem:[%s19618_s1 + $0x1020] ss:$8 sps:$4 sm:$0xff]   ;;  %v13410_v21 = vld [vmem:[%s19618_s1 + $0x1104] ss:$8 sps:$4 sm:$0xff]  }
 0x225   : > { %6980 = vmatmul.mubr.bf16.gmra.mxu1 %v6338_v23  ;;  %v17553_v34 = vor.u32 %v6354_v51, %v6351_v57  ;;  %v17555_v48 = vor.u32 %v6372_v55, %v6369_v20  ;;  %v17557_v7 = vor.u32 %v6399_v35, %v6396_v31  ;;  %v4363_v54 = vadd.f32 %v4362_v38, %v4259_v26  ;;  %v13394_v18 = vld [vmem:[%s19618_s1 + $0x1120] ss:$8 sps:$4 sm:$0xff]   ;;  %v13401_v55 = vld [vmem:[%s19618_s1 + $0x1014] ss:$8 sps:$4 sm:$0xff]  }
 0x226   : > { %v17560_v62 = vadd.f32 %v4359_v61, %v16927_v0  ;;  %7553 = vmatpush1.bf16.msra.mxu0 %v13385_v15  ;;  %7656 = vmatpush1.bf16.msra.mxu1 %v13388_v27  ;;  %v17571_v20 = vor.u32 %v6417_v22, %v6414_v2  ;;  %v4261_v49 = vpop.f32.mrf.mxu0  ;;  %v4364_v0 = vpop.f32.mrf.mxu1  ;;  %v13404_v15 = vld [vmem:[%s19618_s1 + $0x1114] ss:$8 sps:$4 sm:$0xff]   ;;  %v6387_v23 = vrot.slane %v6385_v43, 2  ;;  %v6390_v42 = vrot.slane %v6388_v10, 3 }
 0x227   : > { %7554 = vmatprep.subr.bf16.mxu0 %v13393_v45  ;;  %7657 = vmatprep.subr.bf16.mxu1 %v13396_v11  ;;  %v6405_v57 = vrot.slane %v6403_v25, 2  ;;  %v6408_v51 = vrot.slane %v6406_v24, 3  ;;  %v17577_v31 = vadd.f32 %v4363_v54, %v16932_v58  ;;  %v4365_v35 = vadd.f32 %v4364_v0, %v4261_v49  ;;  %v19804_v11 = vld [vmem:[#allocation12_spill] sm:$0xff]  ;;  %v13407_v24 = vld [vmem:[%s19618_s1 + $0x1004] ss:$8 sps:$4 sm:$0xff]  }
 0x228   : > { %6886 = vmatprep.mubr.bf16.mxu0 %v6365_v3  ;;  %6989 = vmatprep.mubr.bf16.mxu1 %v6383_v17  ;;  %v6430_v63 = vshrl.u32 %v17105_v1, 16  ;;  %v6433_v27 = vshll.u32 %v17105_v1, 16  ;;  %v4263_v45 = vpop.f32.mrf.mxu0  ;;  %v4366_v2 = vpop.f32.mrf.mxu1  ;;  %v6356_v22 = vsel %vm6207_vm5, %v17445_v37, %v17553_v34  ;;  %v6374_v47 = vsel %vm6207_vm5, %v17486_v53, %v17555_v48  ;;  %v13399_v1 = vld [vmem:[%s19618_s1 + $0x1010] ss:$8 sps:$4 sm:$0xff]  }
 0x229   : > { %v6448_v58 = vshrl.u32 %v17108_v60, 16  ;;  %v6451_v44 = vshll.u32 %v17108_v60, 16  ;;  %v17590_v43 = vadd.f32 %v4365_v35, %v19804_v11  ;;  %v4367_v10 = vadd.f32 %v4366_v2, %v4263_v45  ;;  %v13402_v37 = vld [vmem:[%s19618_s1 + $0x1110] ss:$8 sps:$4 sm:$0xff]   ;;  %v13408_v35 = vld [vmem:[%s19618_s1 + $0x1100] ss:$8 sps:$4 sm:$0xff]  }
 0x22a   : > { %7555 = vmatpush1.bf16.msra.mxu0 %v13391_v16  ;;  %7658 = vmatpush1.bf16.msra.mxu1 %v13394_v18  ;;  %v6401_v53 = vsel %vm6207_vm5, %v17517_v19, %v17557_v7  ;;  %v4265_v25 = vpop.f32.mrf.mxu0  ;;  %v4368_v60 = vpop.f32.mrf.mxu1  ;;  %v6419_v61 = vsel %vm6207_vm5, %v17519_v4, %v17571_v20  ;;  %v17610_v3 = vor.u32 %v6390_v42, %v6387_v23  ;;  %v19805_v19 = vld [vmem:[#allocation16_spill] sm:$0xff]  ;;  %v6432_v54 = vrot.slane %v6430_v63, 2  ;;  %v19806_v23 = vld [vmem:[#allocation17_spill] sm:$0xff] }
 0x22b   : > { %7556 = vmatprep.subr.bf16.mxu0 %v13401_v55  ;;  %7659 = vmatprep.subr.bf16.mxu1 %v13404_v15  ;;  %v17612_v17 = vor.u32 %v6408_v51, %v6405_v57  ;;  %v17615_v26 = vadd.f32 %v4367_v10, %v19805_v19  ;;  %v4369_v38 = vadd.f32 %v4368_v60, %v4265_v25  ;;  %v6435_v16 = vrot.slane %v6433_v27, 3  ;;  %v13405_v51 = vld [vmem:[%s19618_s1 + $0x1000] ss:$8 sps:$4 sm:$0xff]  }
 0x22c   : > { %v4269_v18 = vpop.f32.mrf.mxu0  ;;  %v4372_v55 = vpop.f32.mrf.mxu1  ;;  %6887 = vmatmul.mubr.bf16.gmra.mxu0 %v6356_v22  ;;  %v6450_v49 = vrot.slane %v6448_v58, 2  ;;  %v6453_v0 = vrot.slane %v6451_v44, 3  ;;  %v6421_v15 = vshrl.u32 %v17119_v59, 16  ;;  %v6424_v4 = vshll.u32 %v17119_v59, 16  ;;  %v13419_v22 = vld [vmem:[%s19618_s1 + $0x10f4] ss:$8 sps:$4 sm:$0xff]  }
 0x22d   : > { %6990 = vmatmul.mubr.bf16.gmra.mxu1 %v6374_v47  ;;  %v17620_v42 = vadd.f32 %v4369_v38, %v19806_v23  ;;  %v4373_v57 = vadd.f32 %v4372_v55, %v4269_v18  ;;  %v6439_v63 = vshrl.u32 %v17122_v29, 16  ;;  %v6442_v27 = vshll.u32 %v17122_v29, 16  ;;  %v13422_v47 = vld [vmem:[%s19618_s1 + $0x11f4] ss:$8 sps:$4 sm:$0xff]   ;;  %v19807_v58 = vld [vmem:[#allocation18_spill] sm:$0xff]  ;;  %6896 = vmatprep.mubr.bf16.mxu0 %v6401_v53 }
 0x22e   : > { %7557 = vmatpush1.bf16.msra.mxu0 %v13399_v1  ;;  %7660 = vmatpush1.bf16.msra.mxu1 %v13402_v37  ;;  %v4271_v45 = vpop.f32.mrf.mxu0  ;;  %v4374_v59 = vpop.f32.mrf.mxu1  ;;  %v6392_v2 = vsel %vm6207_vm5, %v17553_v34, %v17610_v3  ;;  %v6410_v11 = vsel %vm6207_vm5, %v17555_v48, %v17612_v17  ;;  %v17645_v1 = vor.u32 %v6435_v16, %v6432_v54  ;;  %v6423_v25 = vrot.slane %v6421_v15, 2  ;;  %v13417_v53 = vld [vmem:[%s19618_s1 + $0x10f0] ss:$8 sps:$4 sm:$0xff]   ;;  %v13425_v18 = vld [vmem:[%s19618_s1 + $0x10e4] ss:$8 sps:$4 sm:$0xff]  }
 0x22f   : > { %7558 = vmatprep.subr.bf16.mxu0 %v13407_v24  ;;  %7661 = vmatprep.subr.bf16.mxu1 %v13410_v21  ;;  %v17640_v44 = vadd.f32 %v4373_v57, %v19807_v58  ;;  %v4375_v29 = vadd.f32 %v4374_v59, %v4271_v45  ;;  %v17647_v37 = vor.u32 %v6453_v0, %v6450_v49  ;;  %v6426_v60 = vrot.slane %v6424_v4, 3  ;;  %v19808_v24 = vld [vmem:[#allocation19_spill] sm:$0xff]  ;;  %v13420_v48 = vld [vmem:[%s19618_s1 + $0x11f0] ss:$8 sps:$4 sm:$0xff]   ;;  %v13440_v58 = vld [vmem:[%s19618_s1 + $0x11d4] ss:$8 sps:$4 sm:$0xff]  }
 0x230   : > { %6999 = vmatprep.mubr.bf16.mxu1 %v6419_v61  ;;  %v4273_v10 = vpop.f32.mrf.mxu0  ;;  %v4376_v34 = vpop.f32.mrf.mxu1  ;;  %v6441_v61 = vrot.slane %v6439_v63, 2  ;;  %v6444_v38 = vrot.slane %v6442_v27, 3  ;;  %v13428_v55 = vld [vmem:[%s19618_s1 + $0x11e4] ss:$8 sps:$4 sm:$0xff]   ;;  %v19809_v49 = vld [vmem:[#allocation20_spill] sm:$0xff]  ;;  %v6462_v4 = vshll.u32 %v17237_v30, 16 }
 0x231   : > { %v17650_v21 = vadd.f32 %v4375_v29, %v19808_v24  ;;  %v4377_v19 = vadd.f32 %v4376_v34, %v4273_v10  ;;  %v17674_v63 = vor.u32 %v6426_v60, %v6423_v25  ;;  %v6472_v27 = vshll.u32 %v17239_v12, 16  ;;  %v19810_v45 = vld [vmem:[#allocation25_spill] sm:$0xff]  ;;  %v19811_v29 = vld [vmem:[#allocation26_spill] sm:$0xff] }
 0x232   : > { %7559 = vmatpush1.bf16.msra.mxu0 %v13405_v51  ;;  %7662 = vmatpush1.bf16.msra.mxu1 %v13408_v35  ;;  %v4275_v54 = vpop.f32.mrf.mxu0  ;;  %v4378_v16 = vpop.f32.mrf.mxu1  ;;  %v6437_v51 = vsel %vm6207_vm5, %v17557_v7, %v17645_v1  ;;  %v6455_v35 = vsel %vm6207_vm5, %v17571_v20, %v17647_v37  ;;  %v13426_v7 = vld [vmem:[%s19618_s1 + $0x11e0] ss:$8 sps:$4 sm:$0xff]   ;;  %v13437_v12 = vld [vmem:[%s19618_s1 + $0x10d4] ss:$8 sps:$4 sm:$0xff]   ;;  %v6464_v34 = vrot.slane %v6462_v4, 3  ;;  %v6457_v25 = vshll.u32 %v17241_v41, 16 }
 0x233   : > { %7560 = vmatprep.subr.bf16.mxu0 %v13419_v22  ;;  %7663 = vmatprep.subr.bf16.mxu1 %v13422_v47  ;;  %v17665_v0 = vadd.f32 %v4377_v19, %v19809_v49  ;;  %v4379_v15 = vadd.f32 %v4378_v16, %v4275_v54  ;;  %v17686_v22 = vor.u32 %v6444_v38, %v6441_v61  ;;  %v6474_v61 = vrot.slane %v6472_v27, 3  ;;  %v17715_v16 = vld [vmem:[%s14260_s28 + $0x40] sm:$0x88] }
 0x234   : > { %v4279_v23 = vpop.f32.mrf.mxu0  ;;  %v4382_v57 = vpop.f32.mrf.mxu1  ;;  %6897 = vmatmul.mubr.bf16.gmra.mxu0 %v6392_v2  ;;  %v13423_v2 = vld [vmem:[%s19618_s1 + $0x10e0] ss:$8 sps:$4 sm:$0xff]   ;;  %v6428_v19 = vsel %vm6207_vm5, %v17610_v3, %v17674_v63  ;;  %v6467_v3 = vshll.u32 %v17257_v33, 16  ;;  %v6465_v4 = vsel %vm6207_vm5, %v17645_v1, %v6464_v34  ;;  %v11814_v27 = vcombine.high %v17715_v16, %v17210_v8 }
 0x235   : > { %7000 = vmatmul.mubr.bf16.gmra.mxu1 %v6410_v11  ;;  %v17678_v59 = vadd.f32 %v4379_v15, %v19810_v45  ;;  %v4383_v30 = vadd.f32 %v4382_v57, %v4279_v23  ;;  %6906 = vmatprep.mubr.bf16.mxu0 %v6437_v51  ;;  %v6446_v41 = vsel %vm6207_vm5, %v17612_v17, %v17686_v22  ;;  %v13446_v15 = vld [vmem:[%s19618_s1 + $0x11c4] ss:$8 sps:$4 sm:$0xff]   ;;  %v6459_v23 = vrot.slane %v6457_v25, 3  ;;  %v19812_v45 = vld [vmem:[#allocation32_spill] sm:$0xff]  ;;  %v13441_v1 = vld [vmem:[%s19618_s1 + $0x10c0] ss:$8 sps:$4 sm:$0xff]  }
 0x236   : > { %7561 = vmatpush2.bf16.msra.mxu0 %v13417_v53  ;;  %7664 = vmatpush2.bf16.msra.mxu1 %v13420_v48  ;;  %v4281_v20 = vpop.f32.mrf.mxu0  ;;  %v4384_v47 = vpop.f32.mrf.mxu1  ;;  %v13435_v53 = vld [vmem:[%s19618_s1 + $0x10d0] ss:$8 sps:$4 sm:$0xff]  }
 0x237   : > { %7562 = vmatprep.subr.bf16.mxu0 %v13425_v18  ;;  %7665 = vmatprep.subr.bf16.mxu1 %v13428_v55  ;;  %v17695_v11 = vadd.f32 %v4383_v30, %v19811_v29  ;;  %v4385_v10 = vadd.f32 %v4384_v47, %v4281_v20  ;;  %v13438_v48 = vld [vmem:[%s19618_s1 + $0x11d0] ss:$8 sps:$4 sm:$0xff]   ;;  %v17718_v18 = vld [vmem:[%s14260_s28 + $0x48] sm:$0x88]  ;;  %v6469_v20 = vrot.slane %v6467_v3, 3  ;;  %v6460_v25 = vsel %vm6207_vm5, %v17674_v63, %v6459_v23 }
 0x238   : > { %7009 = vmatprep.mubr.bf16.mxu1 %v6455_v35  ;;  %v4283_v60 = vpop.f32.mrf.mxu0  ;;  %v4386_v24 = vpop.f32.mrf.mxu1  ;;  %v6475_v35 = vsel %vm6207_vm5, %v17647_v37, %v6474_v61  ;;  %v11816_v30 = vcombine.high %v17718_v18, %v19812_v45  ;;  %v13444_v37 = vld [vmem:[%s19618_s1 + $0x11c0] ss:$8 sps:$4 sm:$0xff]   ;;  %v19814_v29 = vld [vmem:[#allocation33_spill] sm:$0xff] }
 0x239   : > { %v17708_v38 = vadd.f32 %v4385_v10, %v17155_v40  ;;  %v4387_v54 = vadd.f32 %v4386_v24, %v4283_v60  ;;  %v13443_v40 = vld [vmem:[%s19618_s1 + $0x10c4] ss:$8 sps:$4 sm:$0xff]   ;;  %v6470_v63 = vsel %vm6207_vm5, %v17686_v22, %v6469_v20 }
 0x23a   : > { %7563 = vmatpush2.bf16.msra.mxu0 %v13423_v2  ;;  %7666 = vmatpush2.bf16.msra.mxu1 %v13426_v7  ;;  %v4285_v55 = vpop.f32.mrf.mxu0  ;;  %v4388_v49 = vpop.f32.mrf.mxu1  ;;  %v7145_v61 = vrot.slane %v11816_v30, 3  ;;  %v13462_v22 = vld [vmem:[%s19618_s1 + $0x11a4] ss:$8 sps:$4 sm:$0xff]  }
 0x23b   : > { %7564 = vmatprep.subr.bf16.mxu0 %v13437_v12  ;;  %7667 = vmatprep.subr.bf16.mxu1 %v13440_v58  ;;  %v17727_v17 = vadd.f32 %v4387_v54, %v17180_v32  ;;  %v4389_v33 = vadd.f32 %v4388_v49, %v4285_v55  ;;  %v19813_v32 = vld [vmem:[#allocation31_spill] sm:$0xff]  ;;  %v13453_v12 = vld [vmem:[%s19618_s1 + $0x10b4] ss:$8 sps:$4 sm:$0xff]   ;;  %v13451_v49 = vld [vmem:[%s19618_s1 + $0x10b0] ss:$8 sps:$4 sm:$0xff]  }
 0x23c   : > { %v4289_v57 = vpop.f32.mrf.mxu0  ;;  %v4392_v51 = vpop.f32.mrf.mxu1  ;;  %6907 = vmatmul.mubr.bf16.gmra.mxu0 %v6428_v19  ;;  %v13456_v58 = vld [vmem:[%s19618_s1 + $0x11b4] ss:$8 sps:$4 sm:$0xff]   ;;  %v7139_v19 = vrot.slane %v11814_v27, 3 }
 0x23d   : > { %7010 = vmatmul.mubr.bf16.gmra.mxu1 %v6446_v41  ;;  %v17738_v2 = vadd.f32 %v4389_v33, %v19813_v32  ;;  %v4393_v7 = vadd.f32 %v4392_v51, %v4289_v57  ;;  %6916 = vmatprep.mubr.bf16.mxu0 %v6465_v4  ;;  %v17762_v54 = vld [vmem:[%s14260_s28 + $0x6c] ss:$16 sps:$4 sm:$0xff]   ;;  %v13460_v32 = vld [vmem:[%s19618_s1 + $0x11a0] ss:$8 sps:$4 sm:$0xff]  }
 0x23e   : > { %7565 = vmatpush2.bf16.msra.mxu0 %v13435_v53  ;;  %7668 = vmatpush2.bf16.msra.mxu1 %v13438_v48  ;;  %v4291_v8 = vpop.f32.mrf.mxu0  ;;  %v4394_v47 = vpop.f32.mrf.mxu1  ;;  %v17758_v53 = vld [vmem:[%s14260_s28 + $0x64] ss:$16 sps:$4 sm:$0xff]   ;;  %v7146_v41 = vrot.slane %v17762_v54, 3 }
 0x23f   : > { %7566 = vmatprep.subr.bf16.mxu0 %v13443_v40  ;;  %7669 = vmatprep.subr.bf16.mxu1 %v13446_v15  ;;  %v17753_v10 = vadd.f32 %v4393_v7, %v19814_v29  ;;  %v4395_v34 = vadd.f32 %v4394_v47, %v4291_v8  ;;  %v7140_v48 = vrot.slane %v17758_v53, 3  ;;  %v13454_v40 = vld [vmem:[%s19618_s1 + $0x11b0] ss:$8 sps:$4 sm:$0xff]  }
 0x240   : > { %7019 = vmatprep.mubr.bf16.mxu1 %v6475_v35  ;;  %v4293_v60 = vpop.f32.mrf.mxu0  ;;  %v4396_v24 = vpop.f32.mrf.mxu1  ;;  %v7147_v27 = vsel %vm7135_vm4, %v7145_v61, %v7146_v41  ;;  %v19821_v53 = vld [vmem:[#allocation41_spill] sm:$0xff] }
 0x241   : > { %v17766_v3 = vadd.f32 %v4395_v34, %v17272_v52  ;;  %v4397_v55 = vadd.f32 %v4396_v24, %v4293_v60  ;;  %v13459_v52 = vld [vmem:[%s19618_s1 + $0x10a4] ss:$8 sps:$4 sm:$0xff]   ;;  %v7141_v35 = vsel %vm7135_vm4, %v7139_v19, %v7140_v48  ;;  %v19815_v34 = vld [vmem:[#allocation4_spill] sm:$0xff]  ;;  %v13967_v19 = vld [vmem:[%s14260_s28 + $0x58] sm:$0xff] }
 0x242   : > { %7567 = vmatpush2.bf16.msra.mxu0 %v13441_v1  ;;  %7670 = vmatpush2.bf16.msra.mxu1 %v13444_v37  ;;  %v4295_v15 = vpop.f32.mrf.mxu0  ;;  %v4398_v33 = vpop.f32.mrf.mxu1  ;;  %v13468_v37 = vld [vmem:[%s19618_s1 + $0x1194] ss:$8 sps:$4 sm:$0xff]   ;;  %v13466_v24 = vld [vmem:[%s19618_s1 + $0x1190] ss:$8 sps:$4 sm:$0xff]   ;;  %v11815_v61 = vcombine.low %v17718_v18, %v13967_v19  ;;  %v13469_v18 = vld [vmem:[%s19618_s1 + $0x1080] ss:$8 sps:$4 sm:$0xff]  }
 0x243   : > { %7568 = vmatprep.subr.bf16.mxu0 %v13453_v12  ;;  %7671 = vmatprep.subr.bf16.mxu1 %v13456_v58  ;;  %v17783_v4 = vadd.f32 %v4397_v55, %v17289_v39  ;;  %v4399_v23 = vadd.f32 %v4398_v33, %v4295_v15  ;;  %v13457_v39 = vld [vmem:[%s19618_s1 + $0x10a0] ss:$8 sps:$4 sm:$0xff]   ;;  %v13966_v58 = vld [vmem:[%s14260_s28 + $0x50] sm:$0xff] }
 0x244   : > { %v4299_v57 = vpop.f32.mrf.mxu0  ;;  %v4402_v51 = vpop.f32.mrf.mxu1  ;;  %6917 = vmatmul.mubr.bf16.gmra.mxu0 %v6460_v25  ;;  %v11813_v29 = vcombine.low %v17715_v16, %v13966_v58 }
 0x245   : > { %7020 = vmatmul.mubr.bf16.gmra.mxu1 %v6470_v63  ;;  %v17792_v45 = vadd.f32 %v4399_v23, %v17324_v56  ;;  %v4403_v30 = vadd.f32 %v4402_v51, %v4299_v57  ;;  %v13465_v56 = vld [vmem:[%s19618_s1 + $0x1094] ss:$8 sps:$4 sm:$0xff]   ;;  %7576 = vmatprep.mubr.bf16.mxu0 %v7141_v35  ;;  %v13471_v63 = vld [vmem:[%s19618_s1 + $0x1084] ss:$8 sps:$4 sm:$0xff]   ;;  %v13472_v57 = vld [vmem:[%s19618_s1 + $0x1180] ss:$8 sps:$4 sm:$0xff]  }
 0x246   : > { %7569 = vmatpush2.bf16.msra.mxu0 %v13451_v49  ;;  %7672 = vmatpush2.bf16.msra.mxu1 %v13454_v40  ;;  %v4301_v7 = vpop.f32.mrf.mxu0  ;;  %v4404_v1 = vpop.f32.mrf.mxu1  ;;  %v13474_v49 = vld [vmem:[%s19618_s1 + $0x1184] ss:$8 sps:$4 sm:$0xff]   ;;  %v19816_v40 = vld [vmem:[#allocation5_spill] sm:$0xff]  ;;  %v7136_v51 = vrot.slane %v11813_v29, 3  ;;  %v7142_v35 = vrot.slane %v11815_v61, 3  ;;  %v7158_v61 = vrot.slane %v19821_v53, 3 }
 0x247   : > { %7570 = vmatprep.subr.bf16.mxu0 %v13459_v52  ;;  %7673 = vmatprep.subr.bf16.mxu1 %v13462_v22  ;;  %v17807_v20 = vadd.f32 %v4403_v30, %v17335_v36  ;;  %v4405_v8 = vadd.f32 %v4404_v1, %v4301_v7  ;;  %v13463_v36 = vld [vmem:[%s19618_s1 + $0x1090] ss:$8 sps:$4 sm:$0xff]   ;;  %v19818_v7 = vld [vmem:[#allocation38_spill] sm:$0xff]  ;;  %v19819_v29 = vld [vmem:[#allocation39_spill] sm:$0xff] }
 0x248   : > { %7679 = vmatprep.mubr.bf16.mxu1 %v7147_v27  ;;  %v4303_v47 = vpop.f32.mrf.mxu0  ;;  %v4406_v12 = vpop.f32.mrf.mxu1  ;;  %v13968_v52 = vld [vmem:[%s14260_s28 + $0x60] ss:$16 sps:$4 sm:$0xff]   ;;  %v13969_v27 = vld [vmem:[%s14260_s28 + $0x68] ss:$16 sps:$4 sm:$0xff]   ;;  %v7154_v1 = vrot.slane %v19818_v7, 3  ;;  %v7160_v7 = vrot.slane %v17415_v6, 3 }
 0x249   : > { %v17812_v25 = vadd.f32 %v4405_v8, %v19815_v34  ;;  %v4407_v60 = vadd.f32 %v4406_v12, %v4303_v47  ;;  %v7137_v22 = vrot.slane %v13968_v52, 3  ;;  %v7143_v30 = vrot.slane %v13969_v27, 3 }
 0x24a   : > { %7571 = vmatpush2.bf16.msra.mxu0 %v13457_v39  ;;  %7674 = vmatpush2.bf16.msra.mxu1 %v13460_v32  ;;  %v4305_v55 = vpop.f32.mrf.mxu0  ;;  %v4408_v16 = vpop.f32.mrf.mxu1  ;;  %v13970_v39 = vld [vmem:[%s14260_s28 + $0x84] ss:$16 sps:$4 sm:$0xff]   ;;  %v7155_v8 = vsel %vm7135_vm4, %v7146_v41, %v7154_v1  ;;  %v7148_v34 = vrot.slane %v19819_v29, 3  ;;  %s12415_s28 = smul.u32 42, %s19993_s10 }
 0x24b   : > { %7572 = vmatprep.subr.bf16.mxu0 %v13465_v56  ;;  %7675 = vmatprep.subr.bf16.mxu1 %v13468_v37  ;;  %v17829_v15 = vadd.f32 %v4407_v60, %v19816_v40  ;;  %v4409_v33 = vadd.f32 %v4408_v16, %v4305_v55  ;;  %v7150_v32 = vrot.slane %v13970_v39, 3  ;;  %v7144_v56 = vsel %vm7135_vm4, %v7142_v35, %v7143_v30  ;;  %v19820_v60 = vld [vmem:[#allocation40_spill] sm:$0xff] }
 0x24c   : > { %s366_s25 = sadd.s32 %s12415_s28, %s12414_s23 }
 0x24d   : > { %v17836_v23 = vadd.f32 %v4409_v33, %v17395_v46  ;;  %v7138_v46 = vsel %vm7135_vm4, %v7136_v51, %v7137_v22  ;;  %v7151_v37 = vsel %vm7135_vm4, %v7140_v48, %v7150_v32  ;;  %v19822_v48 = vld [vmem:[#allocation42_spill] sm:$0xff]  ;;  %v7149_v33 = vsel %vm7135_vm4, %v7137_v22, %v7148_v34  ;;  %s10656_s24 = sshll.u32 %s366_s25, 3 }
 0x24e   : > { %7573 = vmatpush2.bf16.msra.mxu0 %v13463_v36  ;;  %7676 = vmatpush2.bf16.msra.mxu1 %v13466_v24  ;;  %v7152_v36 = vrot.slane %v19820_v60, 3  ;;  %v7162_v55 = vrot.slane %v19822_v48, 3  ;;  %v7159_v51 = vsel %vm7135_vm4, %v7150_v32, %v7158_v61  ;;  %v19823_v22 = vld [vmem:[#allocation6_spill] sm:$0xff]  ;;  %s19508_s16 = scalar_lea.vmem %s19626_s9, %s10656_s24 }
 0x24f   : > { %19817 = vst [vmem:[#allocation8_spill] sm:$0xff] %v17836_v23  ;;  %7574 = vmatprep.subr.bf16.mxu0 %v13471_v63  ;;  %7677 = vmatprep.subr.bf16.mxu1 %v13474_v49  ;;  %v4951_v47 = vpop.f32.mrf.mxu0 }
 0x250   : > { %v5054_v12 = vpop.f32.mrf.mxu1  ;;  %v7161_v6 = vsel %vm7135_vm4, %v7152_v36, %v7160_v7 }
 0x251   : > { %v5055_v58 = vadd.f32 %v5054_v12, %v4951_v47  ;;  %v4953_v24 = vpop.f32.mrf.mxu0 }
 0x252   : > { %7575 = vmatpush2.bf16.msra.mxu0 %v13469_v18  ;;  %7678 = vmatpush2.bf16.msra.mxu1 %v13472_v57  ;;  %v5056_v19 = vpop.f32.mrf.mxu1  ;;  %v7153_v18 = vsel %vm7135_vm4, %v7143_v30, %v7152_v36  ;;  %v7156_v30 = vrot.slane %v19823_v22, 3  ;;  %v19828_v22 = vld [vmem:[#allocation3_spill] sm:$0xff] }
 0x253   : > { %v17857_v54 = vadd.f32 %v5055_v58, %v17455_v13  ;;  %v5057_v41 = vadd.f32 %v5056_v19, %v4953_v24  ;;  %v4955_v16 = vpop.f32.mrf.mxu0  ;;  %v7163_v13 = vsel %vm7135_vm4, %v7154_v1, %v7162_v55 }
 0x254   : > { %v5058_v63 = vpop.f32.mrf.mxu1  ;;  %v7157_v24 = vsel %vm7135_vm4, %v7148_v34, %v7156_v30 }
 0x255   : > { %7577 = vmatmul.mubr.bf16.vlgmr.msra.gmra.mxu0 %v7138_v46  ;;  %7680 = vmatmul.mubr.bf16.vlgmr.msra.gmra.mxu1 %v7144_v56  ;;  %v17860_v49 = vadd.f32 %v5057_v41, %v17471_v50  ;;  %v5059_v40 = vadd.f32 %v5058_v63, %v4955_v16  ;;  %v17864_v52 = vpop.f32.mrf.mxu0 }
 0x256   : > { %7586 = vmatprep.mubr.bf16.mxu0 %v7151_v37  ;;  %7689 = vmatprep.mubr.bf16.mxu1 %v7155_v8  ;;  %v17866_v57 = vpop.f32.mrf.mxu1  ;;  %v19824_v37 = vld [vmem:[#allocation9_spill] sm:$0xff]  ;;  %v19825_v8 = vld [vmem:[#allocation11_spill] sm:$0xff] }
 0x257   : > { %v17871_v35 = vadd.f32 %v5059_v40, %v17489_v9  ;;  %v4961_v27 = vpop.f32.mrf.mxu0  ;;  %v7166_v32 = vrot.slane %v19824_v37, 3  ;;  %v7170_v1 = vrot.slane %v19825_v8, 3  ;;  %v13481_v40 = vld [vmem:[%s19621_s4 + $0x74] ss:$8 sps:$4 sm:$0xff]  }
 0x258   : > { %v5064_v39 = vpop.f32.mrf.mxu1  ;;  %8092 = vmatprep.subr.bf16.mxu0 %v13481_v40  ;;  %v19830_v8 = vld [vmem:[#allocation21_spill] sm:$0xff] }
 0x259   : > { %v5065_v50 = vadd.f32 %v5064_v39, %v4961_v27  ;;  %v4963_v46 = vpop.f32.mrf.mxu0  ;;  %v7167_v48 = vsel %vm7135_vm4, %v7158_v61, %v7166_v32  ;;  %v19826_v27 = vld [vmem:[#allocation2_spill] sm:$0xff] }
 0x25a   : > { %v5066_v56 = vpop.f32.mrf.mxu1  ;;  %v19827_v39 = vrot.slane %v19826_v27, 3 }
 0x25b   : > { %v17878_v9 = vadd.f32 %v5065_v50, %v17522_v14  ;;  %v5067_v47 = vadd.f32 %v5066_v56, %v4963_v46  ;;  %v4965_v12 = vpop.f32.mrf.mxu0  ;;  %v7171_v14 = vsel %vm7135_vm4, %v7162_v55, %v7170_v1  ;;  %v19829_v46 = vrot.slane %v19828_v22, 3 }
 0x25c   : > { %v5068_v58 = vpop.f32.mrf.mxu1  ;;  %v7165_v50 = vsel %vm7135_vm4, %v7156_v30, %v19827_v39  ;;  %v13484_v30 = vld [vmem:[%s19621_s4 + $0x64] ss:$8 sps:$4 sm:$0xff]  }
 0x25d   : > { %7587 = vmatmul.mubr.bf16.gmra.mxu0 %v7149_v33  ;;  %7690 = vmatmul.mubr.bf16.gmra.mxu1 %v7153_v18  ;;  %v17881_v29 = vadd.f32 %v5067_v47, %v17528_v5  ;;  %v5069_v60 = vadd.f32 %v5068_v58, %v4965_v12  ;;  %v17885_v19 = vpop.f32.mrf.mxu0  ;;  %v19831_v47 = vrot.slane %v19830_v8, 3  ;;  %v19834_v39 = vld [vmem:[#allocation22_spill] sm:$0xff] }
 0x25e   : > { %7596 = vmatprep.mubr.bf16.mxu0 %v7159_v51  ;;  %7699 = vmatprep.mubr.bf16.mxu1 %v7163_v13  ;;  %v17887_v53 = vpop.f32.mrf.mxu1 }
 0x25f   : > { %v17892_v41 = vadd.f32 %v5069_v60, %v17544_v28  ;;  %v4971_v16 = vpop.f32.mrf.mxu0  ;;  %v13479_v28 = vld [vmem:[%s19621_s4 + $0x70] ss:$8 sps:$4 sm:$0xff]   ;;  %v7175_v12 = vsel %vm7135_vm4, %v7166_v32, %v19831_v47 }
 0x260   : > { %v5074_v63 = vpop.f32.mrf.mxu1  ;;  %8093 = vmatpush1.bf16.msra.mxu0 %v13479_v28 }
 0x261   : > { %v5075_v5 = vadd.f32 %v5074_v63, %v4971_v16  ;;  %v4973_v34 = vpop.f32.mrf.mxu0  ;;  %8094 = vmatprep.subr.bf16.mxu0 %v13484_v30  ;;  %v13487_v16 = vld [vmem:[%s19621_s4 + $0x54] ss:$8 sps:$4 sm:$0xff]  }
 0x262   : > { %v5076_v36 = vpop.f32.mrf.mxu1 }
 0x263   : > { %v17898_v61 = vadd.f32 %v5075_v5, %v17577_v31  ;;  %v5077_v55 = vadd.f32 %v5076_v36, %v4973_v34  ;;  %v4975_v33 = vpop.f32.mrf.mxu0  ;;  %v7169_v31 = vsel %vm7135_vm4, %v7160_v7, %v19829_v46  ;;  %v13482_v7 = vld [vmem:[%s19621_s4 + $0x60] ss:$8 sps:$4 sm:$0xff]   ;;  %v13485_v5 = vld [vmem:[%s19621_s4 + $0x50] ss:$8 sps:$4 sm:$0xff]  }
 0x264   : > { %v5078_v18 = vpop.f32.mrf.mxu1  ;;  %8095 = vmatpush1.bf16.msra.mxu0 %v13482_v7  ;;  %v19836_v46 = vld [vmem:[#allocation27_spill] sm:$0xff] }
 0x265   : > { %7597 = vmatmul.mubr.bf16.gmra.mxu0 %v7157_v24  ;;  %7700 = vmatmul.mubr.bf16.gmra.mxu1 %v7161_v6  ;;  %v17904_v51 = vadd.f32 %v5077_v55, %v17590_v43  ;;  %v5079_v13 = vadd.f32 %v5078_v18, %v4975_v33  ;;  %v17912_v56 = vpop.f32.mrf.mxu0  ;;  %v19832_v43 = vld [vmem:[#allocation24_spill] sm:$0xff] }
 0x266   : > { %7606 = vmatprep.mubr.bf16.mxu0 %v7167_v48  ;;  %7709 = vmatprep.mubr.bf16.mxu1 %v7171_v14  ;;  %v17914_v37 = vpop.f32.mrf.mxu1  ;;  %v19833_v58 = vrot.slane %v19832_v43, 3 }
 0x267   : > { %v17926_v24 = vadd.f32 %v5079_v13, %v17615_v26  ;;  %v4981_v6 = vpop.f32.mrf.mxu0  ;;  %8096 = vmatprep.subr.bf16.mxu0 %v13487_v16  ;;  %v13488_v13 = vld [vmem:[%s19621_s4 + $0x40] ss:$8 sps:$4 sm:$0xff]  }
 0x268   : > { %v7179_v60 = vsel %vm7135_vm4, %v7170_v1, %v19833_v58  ;;  %v5084_v48 = vpop.f32.mrf.mxu1  ;;  %8097 = vmatpush1.bf16.msra.mxu0 %v13485_v5  ;;  %v13491_v58 = vld [vmem:[%s19621_s4 + $0x30] ss:$8 sps:$4 sm:$0xff]   ;;  %v19839_v5 = vld [vmem:[#allocation30_spill] sm:$0xff] }
 0x269   : > { %v5085_v32 = vadd.f32 %v5084_v48, %v4981_v6  ;;  %v4983_v14 = vpop.f32.mrf.mxu0 }
 0x26a   : > { %v5086_v1 = vpop.f32.mrf.mxu1 }
 0x26b   : > { %v17935_v26 = vadd.f32 %v5085_v32, %v17640_v44  ;;  %v5087_v63 = vadd.f32 %v5086_v1, %v4983_v14  ;;  %v4985_v34 = vpop.f32.mrf.mxu0  ;;  %v13490_v44 = vld [vmem:[%s19621_s4 + $0x44] ss:$8 sps:$4 sm:$0xff]   ;;  %v13494_v1 = vld [vmem:[%s19621_s4 + $0x20] ss:$8 sps:$4 sm:$0xff]  }
 0x26c   : > { %v5088_v36 = vpop.f32.mrf.mxu1  ;;  %8098 = vmatprep.subr.bf16.mxu0 %v13490_v44 }
 0x26d   : > { %7607 = vmatmul.mubr.bf16.gmra.mxu0 %v7165_v50  ;;  %7710 = vmatmul.mubr.bf16.gmra.mxu1 %v7169_v31  ;;  %v17941_v40 = vadd.f32 %v5087_v63, %v17650_v21  ;;  %v5089_v55 = vadd.f32 %v5088_v36, %v4985_v34  ;;  %v17943_v28 = vpop.f32.mrf.mxu0  ;;  %v19835_v50 = vld [vmem:[#allocation23_spill] sm:$0xff]  ;;  %v19837_v31 = vld [vmem:[#allocation28_spill] sm:$0xff]  ;;  %v19838_v63 = vld [vmem:[#allocation29_spill] sm:$0xff] }
 0x26e   : > { %7616 = vmatprep.mubr.bf16.mxu0 %v7175_v12  ;;  %7719 = vmatprep.mubr.bf16.mxu1 %v7179_v60  ;;  %v17945_v33 = vpop.f32.mrf.mxu1  ;;  %v19840_v36 = vld [vmem:[#allocation34_spill] sm:$0xff] }
 0x26f   : > { %v17951_v18 = vadd.f32 %v5089_v55, %v17665_v0  ;;  %v4991_v27 = vpop.f32.mrf.mxu0  ;;  %v13493_v0 = vld [vmem:[%s19621_s4 + $0x34] ss:$8 sps:$4 sm:$0xff]   ;;  %8099 = vmatpush1.bf16.msra.mxu0 %v13488_v13  ;;  %v19841_v55 = vld [vmem:[#allocation35_spill] sm:$0xff] }
 0x270   : > { %v5094_v21 = vpop.f32.mrf.mxu1  ;;  %8100 = vmatprep.subr.bf16.mxu0 %v13493_v0 }
 0x271   : > { %v5095_v22 = vadd.f32 %v5094_v21, %v4991_v27  ;;  %v4993_v8 = vpop.f32.mrf.mxu0 }
 0x272   : > { %v5096_v47 = vpop.f32.mrf.mxu1 }
 0x273   : > { %v17964_v12 = vadd.f32 %v5095_v22, %v17695_v11  ;;  %v5097_v43 = vadd.f32 %v5096_v47, %v4993_v8  ;;  %v4995_v60 = vpop.f32.mrf.mxu0  ;;  %v13496_v11 = vld [vmem:[%s19621_s4 + $0x24] ss:$8 sps:$4 sm:$0xff]   ;;  %8101 = vmatpush1.bf16.msra.mxu0 %v13491_v58 }
 0x274   : > { %v5098_v30 = vpop.f32.mrf.mxu1  ;;  %8102 = vmatprep.subr.bf16.mxu0 %v13496_v11 }
 0x275   : > { %7617 = vmatmul.mubr.bf16.gmra.mxu0 %v19834_v39  ;;  %7720 = vmatmul.mubr.bf16.gmra.mxu1 %v19835_v50  ;;  %v17970_v7 = vadd.f32 %v5097_v43, %v17708_v38  ;;  %v5099_v6 = vadd.f32 %v5098_v30, %v4995_v60  ;;  %v17972_v48 = vpop.f32.mrf.mxu0  ;;  %v13497_v39 = vld [vmem:[%s19621_s4 + $0x10] ss:$8 sps:$4 sm:$0xff]   ;;  %v13500_v43 = vld [vmem:[%s19621_s4] ss:$8 sps:$4 sm:$0xff]  }
 0x276   : > { %7626 = vmatprep.mubr.bf16.mxu0 %v19836_v46  ;;  %7729 = vmatprep.mubr.bf16.mxu1 %v19837_v31  ;;  %v17974_v32 = vpop.f32.mrf.mxu1  ;;  %v19842_v60 = vld [vmem:[#allocation36_spill] sm:$0xff]  ;;  %v19843_v30 = vld [vmem:[#allocation37_spill] sm:$0xff] }
 0x277   : > { %v17980_v14 = vadd.f32 %v5099_v6, %v17727_v17  ;;  %v5001_v16 = vpop.f32.mrf.mxu0  ;;  %v13499_v17 = vld [vmem:[%s19621_s4 + $0x14] ss:$8 sps:$4 sm:$0xff]   ;;  %8103 = vmatpush1.bf16.msra.mxu0 %v13494_v1 }
 0x278   : > { %v5104_v38 = vpop.f32.mrf.mxu1  ;;  %8104 = vmatprep.subr.bf16.mxu0 %v13499_v17  ;;  %v13511_v17 = vld [vmem:[%s19621_s4 + $0xd4] ss:$8 sps:$4 sm:$0xff]  }
 0x279   : > { %v5105_v34 = vadd.f32 %v5104_v38, %v5001_v16  ;;  %v5003_v44 = vpop.f32.mrf.mxu0 }
 0x27a   : > { %v5106_v13 = vpop.f32.mrf.mxu1 }
 0x27b   : > { %v17993_v27 = vadd.f32 %v5105_v34, %v17753_v10  ;;  %v5107_v21 = vadd.f32 %v5106_v13, %v5003_v44  ;;  %v5005_v50 = vpop.f32.mrf.mxu0  ;;  %v13502_v10 = vld [vmem:[%s19621_s4 + $0x4] ss:$8 sps:$4 sm:$0xff]   ;;  %8105 = vmatpush1.bf16.msra.mxu0 %v13497_v39  ;;  %v13506_v13 = vld [vmem:[%s19621_s4 + $0xe0] ss:$8 sps:$4 sm:$0xff]  }
 0x27c   : > { %v5108_v22 = vpop.f32.mrf.mxu1  ;;  %8106 = vmatprep.subr.bf16.mxu0 %v13502_v10  ;;  %v13508_v44 = vld [vmem:[%s19621_s4 + $0xe4] ss:$8 sps:$4 sm:$0xff]  }
 0x27d   : > { %7627 = vmatmul.mubr.bf16.gmra.mxu0 %v19838_v63  ;;  %7730 = vmatmul.mubr.bf16.gmra.mxu1 %v19839_v5  ;;  %v17999_v46 = vadd.f32 %v5107_v21, %v17766_v3  ;;  %v5109_v31 = vadd.f32 %v5108_v22, %v5005_v50  ;;  %v18001_v8 = vpop.f32.mrf.mxu0  ;;  %v13503_v63 = vld [vmem:[%s19621_s4 + $0xf0] ss:$8 sps:$4 sm:$0xff]   ;;  %v13514_v39 = vld [vmem:[%s19621_s4 + $0xc4] ss:$8 sps:$4 sm:$0xff]   ;;  %v13512_v50 = vld [vmem:[%s19621_s4 + $0xc0] ss:$8 sps:$4 sm:$0xff]  }
 0x27e   : > { %7636 = vmatprep.mubr.bf16.mxu0 %v19840_v36  ;;  %7739 = vmatprep.mubr.bf16.mxu1 %v19841_v55  ;;  %v18003_v47 = vpop.f32.mrf.mxu1 }
 0x27f   : > { %v18009_v0 = vadd.f32 %v5109_v31, %v17783_v4  ;;  %v5011_v58 = vpop.f32.mrf.mxu0  ;;  %v13505_v4 = vld [vmem:[%s19621_s4 + $0xf4] ss:$8 sps:$4 sm:$0xff]   ;;  %8107 = vmatpush1.bf16.msra.mxu0 %v13500_v43 }
 0x280   : > { %v5114_v3 = vpop.f32.mrf.mxu1  ;;  %8108 = vmatprep.subr.bf16.mxu0 %v13505_v4 }
 0x281   : > { %v5115_v6 = vadd.f32 %v5114_v3, %v5011_v58  ;;  %v5013_v11 = vpop.f32.mrf.mxu0  ;;  %v13517_v3 = vld [vmem:[%s19621_s4 + $0xb4] ss:$8 sps:$4 sm:$0xff]  }
 0x282   : > { %v5116_v1 = vpop.f32.mrf.mxu1 }
 0x283   : > { %v18020_v16 = vadd.f32 %v5115_v6, %v17807_v20  ;;  %v5117_v38 = vadd.f32 %v5116_v1, %v5013_v11  ;;  %v5015_v5 = vpop.f32.mrf.mxu0  ;;  %8109 = vmatpush2.bf16.msra.mxu0 %v13503_v63  ;;  %v13515_v6 = vld [vmem:[%s19621_s4 + $0xb0] ss:$8 sps:$4 sm:$0xff]  }
 0x284   : > { %v5118_v34 = vpop.f32.mrf.mxu1  ;;  %8110 = vmatprep.subr.bf16.mxu0 %v13508_v44 }
 0x285   : > { %7637 = vmatmul.mubr.bf16.gmra.mxu0 %v19842_v60  ;;  %7740 = vmatmul.mubr.bf16.gmra.mxu1 %v19843_v30  ;;  %v18026_v36 = vadd.f32 %v5117_v38, %v17812_v25  ;;  %v5119_v55 = vadd.f32 %v5118_v34, %v5015_v5  ;;  %v13509_v25 = vld [vmem:[%s19621_s4 + $0xd0] ss:$8 sps:$4 sm:$0xff]   ;;  %v18043_v21 = vpop.f32.mrf.mxu0  ;;  %v13520_v34 = vld [vmem:[%s19621_s4 + $0xa4] ss:$8 sps:$4 sm:$0xff]  }
 0x286   : > { %19844 = vst [vmem:[#allocation10_spill] sm:$0xff] %v18043_v21 }
 0x287   : > { %v18032_v20 = vadd.f32 %v5119_v55, %v17829_v15  ;;  %8111 = vmatpush2.bf16.msra.mxu0 %v13506_v13  ;;  %v18045_v15 = vpop.f32.mrf.mxu1 }
 0x288   : > { %8112 = vmatprep.subr.bf16.mxu0 %v13511_v17  ;;  %19845 = vst [vmem:[#allocation13_spill] sm:$0xff] %v18045_v15 }
 0x28b   : > { %8113 = vmatpush2.bf16.msra.mxu0 %v13509_v25 }
 0x28c   : > { %8114 = vmatprep.subr.bf16.mxu0 %v13514_v39 }
 0x28f   : > { %v5790_v22 = vpop.f32.mrf.mxu0  ;;  %8115 = vmatpush2.bf16.msra.mxu0 %v13512_v50  ;;  %v13523_v50 = vld [vmem:[%s19621_s4 + $0x94] ss:$8 sps:$4 sm:$0xff]  }
 0x290   : > { %v5893_v31 = vpop.f32.mrf.mxu1  ;;  %8116 = vmatprep.subr.bf16.mxu0 %v13517_v3 }
 0x291   : > { %v5894_v10 = vadd.f32 %v5893_v31, %v5790_v22  ;;  %v5792_v43 = vpop.f32.mrf.mxu0 }
 0x292   : > { %v5895_v58 = vpop.f32.mrf.mxu1 }
 0x293   : > { %v18057_v60 = vadd.f32 %v5894_v10, %v17857_v54  ;;  %v5896_v30 = vadd.f32 %v5895_v58, %v5792_v43  ;;  %v5794_v11 = vpop.f32.mrf.mxu0  ;;  %8117 = vmatpush2.bf16.msra.mxu0 %v13515_v6  ;;  %v13521_v10 = vld [vmem:[%s19621_s4 + $0x90] ss:$8 sps:$4 sm:$0xff]   ;;  %v13526_v6 = vld [vmem:[%s19621_s4 + $0x84] ss:$8 sps:$4 sm:$0xff]  }
 0x294   : > { %v5897_v1 = vpop.f32.mrf.mxu1  ;;  %8118 = vmatprep.subr.bf16.mxu0 %v13520_v34 }
 0x295   : > { %v18063_v4 = vadd.f32 %v5896_v30, %v17860_v49  ;;  %v5898_v38 = vadd.f32 %v5897_v1, %v5794_v11  ;;  %v18065_v63 = vpop.f32.mrf.mxu0  ;;  %v13518_v49 = vld [vmem:[%s19621_s4 + $0xa0] ss:$8 sps:$4 sm:$0xff]  }
 0x296   : > { %v18067_v5 = vpop.f32.mrf.mxu1 }
 0x297   : > { %v18070_v54 = vadd.f32 %v5898_v38, %v17871_v35  ;;  %v5800_v55 = vpop.f32.mrf.mxu0  ;;  %8119 = vmatpush2.bf16.msra.mxu0 %v13518_v49 }
 0x298   : > { %v5903_v44 = vpop.f32.mrf.mxu1  ;;  %8120 = vmatprep.subr.bf16.mxu0 %v13523_v50 }
 0x299   : > { %v5904_v13 = vadd.f32 %v5903_v44, %v5800_v55  ;;  %v5802_v17 = vpop.f32.mrf.mxu0 }
 0x29a   : > { %v5905_v25 = vpop.f32.mrf.mxu1 }
 0x29b   : > { %v18079_v39 = vadd.f32 %v5904_v13, %v17878_v9  ;;  %v5906_v35 = vadd.f32 %v5905_v25, %v5802_v17  ;;  %v5804_v22 = vpop.f32.mrf.mxu0  ;;  %8121 = vmatpush2.bf16.msra.mxu0 %v13521_v10 }
 0x29c   : > { %v5907_v31 = vpop.f32.mrf.mxu1  ;;  %8122 = vmatprep.subr.bf16.mxu0 %v13526_v6 }
 0x29d   : > { %v18088_v43 = vadd.f32 %v5906_v35, %v17881_v29  ;;  %v5908_v58 = vadd.f32 %v5907_v31, %v5804_v22  ;;  %v18090_v3 = vpop.f32.mrf.mxu0  ;;  %v13524_v29 = vld [vmem:[%s19621_s4 + $0x80] ss:$8 sps:$4 sm:$0xff]  }
 0x29e   : > { %v18092_v9 = vpop.f32.mrf.mxu1 }
 0x29f   : > { %v18095_v30 = vadd.f32 %v5908_v58, %v17892_v41  ;;  %v5810_v11 = vpop.f32.mrf.mxu0  ;;  %8123 = vmatpush2.bf16.msra.mxu0 %v13524_v29 }
 0x2a0   : > { %v5913_v1 = vpop.f32.mrf.mxu1 }
 0x2a1   : > { %v5914_v38 = vadd.f32 %v5913_v1, %v5810_v11  ;;  %v5812_v34 = vpop.f32.mrf.mxu0 }
 0x2a2   : > { %v5915_v55 = vpop.f32.mrf.mxu1 }
 0x2a3   : > { %v18104_v44 = vadd.f32 %v5914_v38, %v17898_v61  ;;  %v5916_v41 = vadd.f32 %v5915_v55, %v5812_v34  ;;  %v5814_v49 = vpop.f32.mrf.mxu0 }
 0x2a4   : > { %v5917_v13 = vpop.f32.mrf.mxu1 }
 0x2a5   : > { %v18107_v17 = vadd.f32 %v5916_v41, %v17904_v51  ;;  %v5918_v25 = vadd.f32 %v5917_v13, %v5814_v49  ;;  %v18109_v35 = vpop.f32.mrf.mxu0 }
 0x2a6   : > { %v18111_v50 = vpop.f32.mrf.mxu1 }
 0x2a7   : > { %19846 = vst [vmem:[#allocation14_spill] sm:$0xff] %v18107_v17  ;;  %v18114_v22 = vadd.f32 %v5918_v25, %v17926_v24  ;;  %v5820_v31 = vpop.f32.mrf.mxu0 }
 0x2a8   : > { %v5923_v10 = vpop.f32.mrf.mxu1 }
 0x2a9   : > { %19847 = vst [vmem:[#allocation15_spill] sm:$0xff] %v18114_v22  ;;  %v5924_v58 = vadd.f32 %v5923_v10, %v5820_v31  ;;  %v5822_v61 = vpop.f32.mrf.mxu0 }
 0x2aa   : > { %v5925_v6 = vpop.f32.mrf.mxu1 }
 0x2ab   : > { %v18117_v11 = vadd.f32 %v5924_v58, %v17935_v26  ;;  %v5926_v1 = vadd.f32 %v5925_v6, %v5822_v61  ;;  %v5824_v29 = vpop.f32.mrf.mxu0 }
 0x2ac   : > { %v5927_v51 = vpop.f32.mrf.mxu1 }
 0x2ad   : > { %19848 = vst [vmem:[#allocation12_spill] sm:$0xff] %v18117_v11  ;;  %v18120_v38 = vadd.f32 %v5926_v1, %v17941_v40  ;;  %v5928_v34 = vadd.f32 %v5927_v51, %v5824_v29  ;;  %v18122_v55 = vpop.f32.mrf.mxu0 }
 0x2ae   : > { %19850 = vst [vmem:[#allocation17_spill] sm:$0xff] %v18122_v55  ;;  %v18124_v41 = vpop.f32.mrf.mxu1 }
 0x2af   : > { %19849 = vst [vmem:[#allocation16_spill] sm:$0xff] %v18120_v38  ;;  %19851 = vst [vmem:[#allocation18_spill] sm:$0xff] %v18124_v41  ;;  %v18127_v24 = vadd.f32 %v5928_v34, %v17951_v18 }
 0x2b0   : > { %v5830_v49 = vpop.f32.mrf.mxu0  ;;  %v5933_v13 = vpop.f32.mrf.mxu1 }
 0x2b1   : > { %19852 = vst [vmem:[#allocation19_spill] sm:$0xff] %v18127_v24  ;;  %v5934_v25 = vadd.f32 %v5933_v13, %v5830_v49 }
 0x2b2   : > { %v5832_v31 = vpop.f32.mrf.mxu0  ;;  %v5935_v26 = vpop.f32.mrf.mxu1 }
 0x2b3   : > { %v18130_v10 = vadd.f32 %v5934_v25, %v17964_v12  ;;  %v5936_v58 = vadd.f32 %v5935_v26, %v5832_v31 }
 0x2b4   : > { %v5834_v61 = vpop.f32.mrf.mxu0  ;;  %v5937_v40 = vpop.f32.mrf.mxu1 }
 0x2b5   : > { %19853 = vst [vmem:[#allocation20_spill] sm:$0xff] %v18130_v10  ;;  %v18133_v6 = vadd.f32 %v5936_v58, %v17970_v7  ;;  %v5938_v1 = vadd.f32 %v5937_v40, %v5834_v61  ;;  %v18245_v10 = vld [vmem:[%s19624_s7 + $0x20] sm:$0xff]  }
 0x2b6   : > { %v18135_v29 = vpop.f32.mrf.mxu0  ;;  %v18137_v51 = vpop.f32.mrf.mxu1  ;;  %19874 = vst [vmem:[#allocation23_spill] sm:$0xff] %v18245_v10 }
 0x2b7   : > { %19854 = vst [vmem:[#allocation25_spill] sm:$0xff] %v18133_v6  ;;  %19855 = vst [vmem:[#allocation26_spill] sm:$0xff] %v18135_v29  ;;  %v18140_v18 = vadd.f32 %v5938_v1, %v17980_v14 }
 0x2b8   : > { %19856 = vst [vmem:[#allocation32_spill] sm:$0xff] %v18137_v51  ;;  %v5840_v34 = vpop.f32.mrf.mxu0  ;;  %v5943_v49 = vpop.f32.mrf.mxu1  ;;  %v18251_v51 = vld [vmem:[%s19624_s7 + $0x58] sm:$0xff]  }
 0x2b9   : > { %19857 = vst [vmem:[#allocation31_spill] sm:$0xff] %v18140_v18  ;;  %v5944_v13 = vadd.f32 %v5943_v49, %v5840_v34  ;;  %19875 = vst [vmem:[#allocation27_spill] sm:$0xff] %v18251_v51 }
 0x2ba   : > { %v5842_v23 = vpop.f32.mrf.mxu0  ;;  %v5945_v12 = vpop.f32.mrf.mxu1 }
 0x2bb   : > { %v18143_v25 = vadd.f32 %v5944_v13, %v17993_v27  ;;  %v5946_v31 = vadd.f32 %v5945_v12, %v5842_v23 }
 0x2bc   : > { %v5844_v26 = vpop.f32.mrf.mxu0  ;;  %v5947_v7 = vpop.f32.mrf.mxu1 }
 0x2bd   : > { %19858 = vst [vmem:[#allocation33_spill] sm:$0xff] %v18143_v25  ;;  %v18146_v58 = vadd.f32 %v5946_v31, %v17999_v46  ;;  %v5948_v61 = vadd.f32 %v5947_v7, %v5844_v26  ;;  %v18231_v25 = vld [vmem:[%s19624_s7 + $0x60] sm:$0xff]  }
 0x2be   : > { %v18148_v40 = vpop.f32.mrf.mxu0  ;;  %v18150_v15 = vpop.f32.mrf.mxu1  ;;  %19873 = vst [vmem:[#allocation22_spill] sm:$0xff] %v18231_v25 }
 0x2bf   : > { %19859 = vst [vmem:[#allocation4_spill] sm:$0xff] %v18146_v58  ;;  %19860 = vst [vmem:[#allocation5_spill] sm:$0xff] %v18148_v40  ;;  %v18153_v14 = vadd.f32 %v5948_v61, %v18009_v0  ;;  %v18225_v58 = vld [vmem:[%s19624_s7 + $0x28] sm:$0xff]  }
 0x2c0   : > { %19861 = vst [vmem:[#allocation38_spill] sm:$0xff] %v18150_v15  ;;  %19872 = vst [vmem:[#allocation24_spill] sm:$0xff] %v18225_v58 }
 0x2c1   : > { %19862 = vst [vmem:[#allocation39_spill] sm:$0xff] %v18153_v14 }
 0x2c6   : > { %v5850_v1 = vpop.f32.mrf.mxu0  ;;  %v5953_v34 = vpop.f32.mrf.mxu1 }
 0x2c7   : > { %v5954_v49 = vadd.f32 %v5953_v34, %v5850_v1 }
 0x2c8   : > { %v5852_v21 = vpop.f32.mrf.mxu0  ;;  %v5955_v27 = vpop.f32.mrf.mxu1 }
 0x2c9   : > { %v18156_v23 = vadd.f32 %v5954_v49, %v18020_v16  ;;  %v5956_v13 = vadd.f32 %v5955_v27, %v5852_v21  ;;  %v18186_v27 = vld [vmem:[%s19624_s7 + $0x38] sm:$0xff]  }
 0x2ca   : > { %v5854_v12 = vpop.f32.mrf.mxu0  ;;  %v5957_v46 = vpop.f32.mrf.mxu1  ;;  %19868 = vst [vmem:[#allocation11_spill] sm:$0xff] %v18186_v27 }
 0x2cb   : > { %19863 = vst [vmem:[#allocation40_spill] sm:$0xff] %v18156_v23  ;;  %v18159_v31 = vadd.f32 %v5956_v13, %v18026_v36  ;;  %v5958_v26 = vadd.f32 %v5957_v46, %v5854_v12  ;;  %v18191_v13 = vld [vmem:[%s19624_s7 + $0x70] sm:$0xff]   ;;  %v18211_v23 = vld [vmem:[%s19624_s7 + $0x68] sm:$0xff]  }
 0x2cc   : > { %v18164_v0 = vpop.f32.mrf.mxu0  ;;  %v18166_v61 = vpop.f32.mrf.mxu1  ;;  %19869 = vst [vmem:[#allocation2_spill] sm:$0xff] %v18191_v13  ;;  %19871 = vst [vmem:[#allocation21_spill] sm:$0xff] %v18211_v23 }
 0x2cd   : > { %19864 = vst [vmem:[#allocation41_spill] sm:$0xff] %v18159_v31  ;;  %v18162_v7 = vadd.f32 %v5958_v26, %v18032_v20  ;;  %19866 = vst [vmem:[#allocation6_spill] sm:$0xff] %v18164_v0  ;;  %v13527_v20 = vld [vmem:[%s19624_s7 + $0x78] sm:$0xff]   ;;  %v18205_v31 = vld [vmem:[%s19624_s7 + $0x30] sm:$0xff]  }
 0x2ce   : > { %19867 = vst [vmem:[#allocation9_spill] sm:$0xff] %v18166_v61  ;;  %12180 = vmatprep.subr.bf16.mxu1 %v13527_v20  ;;  %12238 = vmatprep.subr.bf16.mxu0 %v13527_v20  ;;  %19870 = vst [vmem:[#allocation3_spill] sm:$0xff] %v18205_v31 }
 0x2cf   : > { %19865 = vst [vmem:[#allocation42_spill] sm:$0xff] %v18162_v7  ;;  %12181 = vmatpush3.bf16.msra.mxu1 %v18186_v27 }
 0x2d0   : > { %12182 = vmatprep.subr.bf16.mxu1 %v18191_v13 }
 0x2d3   : > { %12183 = vmatpush3.bf16.msra.mxu1 %v18205_v31 }
 0x2d4   : > { %v18168_v1 = vpop.f32.mrf.mxu0  ;;  %12184 = vmatprep.subr.bf16.mxu1 %v18211_v23 }
 0x2d5   : > { %v18170_v34 = vpop.f32.mrf.mxu1 }
 0x2d6   : > { %v18172_v16 = vpop.f32.mrf.mxu0 }
 0x2d7   : > { %v18174_v21 = vpop.f32.mrf.mxu1  ;;  %12185 = vmatpush3.bf16.msra.mxu1 %v18225_v58  ;;  %v18265_v58 = vld [vmem:[%s19624_s7 + $0x18] sm:$0xff]  }
 0x2d8   : > { %v18176_v49 = vpop.f32.mrf.mxu0  ;;  %12186 = vmatprep.subr.bf16.mxu1 %v18231_v25  ;;  %19876 = vst [vmem:[#allocation28_spill] sm:$0xff] %v18265_v58  ;;  %v18271_v25 = vld [vmem:[%s19624_s7 + $0x50] sm:$0xff]  }
 0x2d9   : > { %v18178_v36 = vpop.f32.mrf.mxu1  ;;  %19877 = vst [vmem:[#allocation29_spill] sm:$0xff] %v18271_v25 }
 0x2da   : > { %v18193_v12 = vpop.f32.mrf.mxu0 }
 0x2db   : > { %v18195_v46 = vpop.f32.mrf.mxu1  ;;  %12187 = vmatpush3.bf16.msra.mxu1 %v18245_v10  ;;  %v18285_v10 = vld [vmem:[%s19624_s7 + $0x10] sm:$0xff]  }
 0x2dc   : > { %v18197_v26 = vpop.f32.mrf.mxu0  ;;  %12188 = vmatprep.subr.bf16.mxu1 %v18251_v51  ;;  %19882 = vst [vmem:[#allocation37_spill] sm:$0xff] %v18285_v10 }
 0x2dd   : > { %v18199_v7 = vpop.f32.mrf.mxu1 }
 0x2de   : > { %v18213_v61 = vpop.f32.mrf.mxu0 }
 0x2df   : > { %v18215_v20 = vpop.f32.mrf.mxu1  ;;  %12189 = vmatpush3.bf16.msra.mxu1 %v18265_v58 }
 0x2e0   : > { %v18217_v0 = vpop.f32.mrf.mxu0  ;;  %12190 = vmatprep.subr.bf16.mxu1 %v18271_v25 }
 0x2e1   : > { %v18219_v14 = vpop.f32.mrf.mxu1 }
 0x2e2   : > { %v18233_v18 = vpop.f32.mrf.mxu0 }
 0x2e3   : > { %v18235_v6 = vpop.f32.mrf.mxu1  ;;  %12191 = vmatpush3.bf16.msra.mxu1 %v18285_v10 }
 0x2e4   : > { %v18237_v15 = vpop.f32.mrf.mxu0 }
 0x2e5   : > { %v18239_v40 = vpop.f32.mrf.mxu1 }
 0x2e6   : > { %v18253_v29 = vpop.f32.mrf.mxu0 }
 0x2e7   : > { %v18255_v24 = vpop.f32.mrf.mxu1 }
 0x2e8   : > { %v18257_v38 = vpop.f32.mrf.mxu0 }
 0x2e9   : > { %v18259_v23 = vpop.f32.mrf.mxu1 }
 0x2ea   : > { %v18273_v31 = vpop.f32.mrf.mxu0 }
 0x2eb   : > { %19878 = vst [vmem:[#allocation30_spill] sm:$0xff] %v18273_v31  ;;  %v18275_v11 = vpop.f32.mrf.mxu1 }
 0x2ec   : > { %19879 = vst [vmem:[#allocation34_spill] sm:$0xff] %v18275_v11  ;;  %v18277_v13 = vpop.f32.mrf.mxu0 }
 0x2ed   : > { %19880 = vst [vmem:[#allocation35_spill] sm:$0xff] %v18277_v13  ;;  %v18279_v27 = vpop.f32.mrf.mxu1 }
 0x2ee   : > { %19881 = vst [vmem:[#allocation36_spill] sm:$0xff] %v18279_v27  ;;  %v18288_v51 = vpop.f32.mrf.mxu0 }
 0x2ef   : > { %19883 = vst [vmem:[#allocation43_spill] sm:$0xff] %v18288_v51  ;;  %v18290_v22 = vpop.f32.mrf.mxu1 }
 0x2f0   : > { %19884 = vst [vmem:[#allocation44_spill] sm:$0xff] %v18290_v22  ;;  %v18292_v41 = vpop.f32.mrf.mxu0 }
 0x2f1   : > { %19885 = vst [vmem:[#allocation45_spill] sm:$0xff] %v18292_v41  ;;  %v18294_v55 = vpop.f32.mrf.mxu1 }
 0x2f2   : > { %19886 = vst [vmem:[#allocation46_spill] sm:$0xff] %v18294_v55  ;;  %v18297_v27 = vpop.f32.mrf.mxu0 }
 0x2f3   : > { %19887 = vst [vmem:[#allocation47_spill] sm:$0xff] %v18297_v27  ;;  %v18299_v58 = vpop.f32.mrf.mxu1 }
 0x2f4   : > { %19888 = vst [vmem:[#allocation48_spill] sm:$0xff] %v18299_v58  ;;  %v18301_v13 = vpop.f32.mrf.mxu0 }
 0x2f5   : > { %19889 = vst [vmem:[#allocation49_spill] sm:$0xff] %v18301_v13  ;;  %v18303_v17 = vpop.f32.mrf.mxu1 }
 0x2f6   : > { %19890 = vst [vmem:[#allocation50_spill] sm:$0xff] %v18303_v17  ;;  %v18305_v11 = vpop.f32.mrf.mxu0 }
 0x2f7   : > { %19891 = vst [vmem:[#allocation51_spill] sm:$0xff] %v18305_v11  ;;  %v18307_v25 = vpop.f32.mrf.mxu1 }
 0x2f8   : > { %19892 = vst [vmem:[#allocation52_spill] sm:$0xff] %v18307_v25  ;;  %v18309_v51 = vpop.f32.mrf.mxu0 }
 0x2f9   : > { %19893 = vst [vmem:[#allocation53_spill] sm:$0xff] %v18309_v51  ;;  %v18311_v22 = vpop.f32.mrf.mxu1 }
 0x2fa   : > { %19894 = vst [vmem:[#allocation54_spill] sm:$0xff] %v18311_v22  ;;  %v18313_v41 = vpop.f32.mrf.mxu0 }
 0x2fb   : > { %19895 = vst [vmem:[#allocation55_spill] sm:$0xff] %v18313_v41  ;;  %v18315_v55 = vpop.f32.mrf.mxu1 }
 0x2fc   : > { %19896 = vst [vmem:[#allocation56_spill] sm:$0xff] %v18315_v55  ;;  %v18317_v10 = vpop.f32.mrf.mxu0  ;;  %v7780_v55 = vlaneseq }
 0x2fd   : > { %19897 = vst [vmem:[#allocation57_spill] sm:$0xff] %v18317_v10  ;;  %v18319_v27 = vpop.f32.mrf.mxu1 }
 0x2fe   : > { %19898 = vst [vmem:[#allocation58_spill] sm:$0xff] %v18319_v27  ;;  %v18321_v58 = vpop.f32.mrf.mxu0 }
 0x2ff   : > { %19899 = vst [vmem:[#allocation59_spill] sm:$0xff] %v18321_v58  ;;  %v18323_v13 = vpop.f32.mrf.mxu1  ;;  %v7781_v58 = vshrl.u32 %v7780_v55, 7  ;;  %v7778_v55 = vld [vmem:[%s19619_s2] sm:$0x3] }
 0x300   : > { %19900 = vst [vmem:[#allocation60_spill] sm:$0xff] %v18323_v13  ;;  %v18325_v17 = vpop.f32.mrf.mxu0 }
 0x301   : > { %v18327_v11 = vpop.f32.mrf.mxu1 }
 0x302   : > { %19901 = vst [vmem:[#allocation61_spill] sm:$0xff] %v18327_v11  ;;  %v18329_v25 = vpop.f32.mrf.mxu0  ;;  %v5061_v11 = vadd.f32 %v17866_v57, %v17864_v52  ;;  %v6964_v52 = vadd.f32 %v18174_v21, %v18172_v16  ;;  %v19912_v57 = vld [vmem:[#allocation7_spill] sm:$0xff]  ;;  %v6968_v21 = vadd.f32 %v18195_v46, %v18193_v12 }
 0x303   : > { %19902 = vst [vmem:[#allocation62_spill] sm:$0xff] %v18329_v25  ;;  %v18331_v51 = vpop.f32.mrf.mxu1  ;;  %v18349_v25 = vsub.s32 0, %v7781_v58 }
 0x304   : > { %19903 = vst [vmem:[#allocation63_spill] sm:$0xff] %v18331_v51  ;;  %v18333_v22 = vpop.f32.mrf.mxu0  ;;  %v6962_v51 = vadd.f32 %v18170_v34, %v18168_v1  ;;  %v5126_v1 = vadd.f32 %v5061_v11, %v19912_v57  ;;  %v5900_v34 = vadd.f32 %v18067_v5, %v18065_v63  ;;  %v5081_v63 = vadd.f32 %v17914_v37, %v17912_v56 }
 0x305   : > { %19904 = vst [vmem:[#allocation64_spill] sm:$0xff] %v18333_v22  ;;  %v18335_v41 = vpop.f32.mrf.mxu1  ;;  %v5091_v5 = vadd.f32 %v17945_v33, %v17943_v28  ;;  %v5111_v56 = vadd.f32 %v18003_v47, %v18001_v8 }
 0x306   : > { %19905 = vst [vmem:[#allocation65_spill] sm:$0xff] %v18335_v41  ;;  %v18337_v10 = vpop.f32.mrf.mxu0  ;;  %v5071_v41 = vadd.f32 %v17887_v53, %v17885_v19  ;;  %v7030_v53 = vadd.f32 %v6962_v51, %v18057_v60  ;;  %v5965_v37 = vadd.f32 %v5900_v34, %v5126_v1  ;;  %v5134_v34 = vadd.f32 %v5081_v63, %v17620_v42 }
 0x307   : > { %19906 = vst [vmem:[#allocation66_spill] sm:$0xff] %v18337_v10  ;;  %v18339_v27 = vpop.f32.mrf.mxu1 }
 0x308   : > { %19907 = vst [vmem:[#allocation67_spill] sm:$0xff] %v18339_v27  ;;  %v18341_v31 = vpop.f32.mrf.mxu0  ;;  %v18371_v27 = vrot.slane %v7778_v55, %v18349_v25  ;;  %v5130_v11 = vadd.f32 %v5071_v41, %v17560_v62  ;;  %v5101_v62 = vadd.f32 %v17974_v32, %v17972_v48  ;;  %v6974_v48 = vadd.f32 %v18215_v20, %v18213_v61 }
 0x309   : > { %19908 = vst [vmem:[#allocation68_spill] sm:$0xff] %v18341_v31  ;;  %v18343_v13 = vpop.f32.mrf.mxu1  ;;  %v6976_v32 = vadd.f32 %v18219_v14, %v18217_v0  ;;  %v7033_v57 = vadd.f32 %v6968_v21, %v5965_v37  ;;  %v18415_v20 = vadd.f32 %v5111_v56, %v17792_v45 }
 0x30a   : > { %19909 = vst [vmem:[#allocation69_spill] sm:$0xff] %v18343_v13  ;;  %v18353_v22 = vpop.f32.mrf.mxu0  ;;  %v18360_v13 = vsub.s32 1, %v7781_v58  ;;  %v7818_v58 = vld [vmem:[%s19620_s3] sm:$0x3]  ;;  %v18411_v61 = vadd.f32 %v5101_v62, %v17738_v2 }
 0x30b   : > { %19910 = vst [vmem:[#allocation70_spill] sm:$0xff] %v18353_v22  ;;  %v18355_v10 = vpop.f32.mrf.mxu1  ;;  %v18392_v28 = vrot.slane %v7818_v58, %v18349_v25  ;;  %v7036_v2 = vadd.f32 %v6976_v32, %v18095_v30 }
 0x30c   : > { %19911 = vst [vmem:[#allocation71_spill] sm:$0xff] %v18355_v10  ;;  %v6966_v10 = vadd.f32 %v18178_v36, %v18176_v49  ;;  %v18382_v16 = vrot.slane %v7778_v55, %v18360_v13  ;;  %v18403_v8 = vrot.slane %v7818_v58, %v18360_v13 }
 0x30e   : > { %v7032_v55 = vadd.f32 %v6966_v10, %v18070_v54 }
 0x315   : > { %v7578_v31 = vpop.f32.mrf.mxu0  ;;  %v7681_v19 = vpop.f32.mrf.mxu1 }
 0x316   : > { %v7682_v22 = vadd.f32 %v7681_v19, %v7578_v31  ;;  %v7031_v31 = vadd.f32 %v6964_v52, %v18063_v4  ;;  %v5910_v19 = vadd.f32 %v18092_v9, %v18090_v3  ;;  %v6978_v3 = vadd.f32 %v18235_v6, %v18233_v18 }
 0x317   : > { %v7580_v60 = vpop.f32.mrf.mxu0  ;;  %v7683_v51 = vpop.f32.mrf.mxu1 }
 0x318   : > { %v7750_v49 = vadd.f32 %v7682_v22, %v7030_v53  ;;  %v7684_v36 = vadd.f32 %v7683_v51, %v7580_v60  ;;  %v6972_v22 = vadd.f32 %v18199_v7, %v18197_v26  ;;  %v18408_v7 = vadd.f32 %v5091_v5, %v17678_v59 }
 0x319   : > { %v7582_v33 = vpop.f32.mrf.mxu0  ;;  %v7685_v41 = vpop.f32.mrf.mxu1  ;;  %v7035_v59 = vadd.f32 %v6974_v48, %v18088_v43  ;;  %v6986_v48 = vadd.f32 %v18259_v23, %v18257_v38 }
 0x31a   : > { %v7790_v4 = vmul.f32 %v18371_v27, %v7750_v49  ;;  %v7751_v52 = vadd.f32 %v7684_v36, %v7031_v31  ;;  %v7686_v12 = vadd.f32 %v7685_v41, %v7582_v33  ;;  %v7034_v42 = vadd.f32 %v6972_v22, %v18079_v39 }
 0x31b   : > { %v7584_v47 = vpop.f32.mrf.mxu0  ;;  %v7687_v46 = vpop.f32.mrf.mxu1  ;;  %v6982_v39 = vadd.f32 %v18239_v40, %v18237_v15  ;;  %v5969_v33 = vadd.f32 %v5910_v19, %v5130_v11  ;;  %v5920_v41 = vadd.f32 %v18111_v50, %v18109_v35 }
 0x31c   : > { %v7791_v54 = vmul.f32 %v18382_v16, %v7751_v52  ;;  %v7752_v10 = vadd.f32 %v7686_v12, %v7032_v55  ;;  %v7688_v1 = vadd.f32 %v7687_v46, %v7584_v47  ;;  %v7830_v14 = vadd.f32 %v18392_v28, %v7790_v4 }
 0x31d   : > { %v7588_v0 = vpop.f32.mrf.mxu0  ;;  %v7691_v26 = vpop.f32.mrf.mxu1  ;;  %v6984_v55 = vadd.f32 %v18255_v24, %v18253_v29  ;;  %v7037_v22 = vadd.f32 %v6978_v3, %v5969_v33  ;;  %v7038_v24 = vadd.f32 %v6982_v39, %v18104_v44 }
 0x31e   : > { %v7792_v53 = vmul.f32 %v18371_v27, %v7752_v10  ;;  %v7753_v58 = vadd.f32 %v7688_v1, %v7033_v57  ;;  %v7692_v63 = vadd.f32 %v7691_v26, %v7588_v0  ;;  %v7831_v51 = vadd.f32 %v18403_v8, %v7791_v54  ;;  %v19913_v54 = vld [vmem:[#allocation30_spill] sm:$0xff] }
 0x31f   : > { %v7590_v5 = vpop.f32.mrf.mxu0  ;;  %v7693_v60 = vpop.f32.mrf.mxu1  ;;  %v7858_v9 = vmax.f32 %v7830_v14, 0.0  ;;  %v5973_v57 = vadd.f32 %v5920_v41, %v5134_v34  ;;  %v19914_v10 = vld [vmem:[#allocation34_spill] sm:$0xff]  ;;  %v19918_v34 = vld [vmem:[#allocation15_spill] sm:$0xff] }
 0x320   : > { %v7832_v45 = vadd.f32 %v18392_v28, %v7792_v53  ;;  %v7793_v31 = vmul.f32 %v18382_v16, %v7753_v58  ;;  %v7694_v21 = vadd.f32 %v7693_v60, %v7590_v5  ;;  %v7754_v43 = vadd.f32 %v7692_v63, %v7034_v42  ;;  %v19915_v26 = vld [vmem:[#allocation14_spill] sm:$0xff]  ;;  %v19916_v42 = vld [vmem:[#allocation17_spill] sm:$0xff] }
 0x321   : > { %v7592_v49 = vpop.f32.mrf.mxu0  ;;  %v7695_v30 = vpop.f32.mrf.mxu1  ;;  %v7859_v40 = vmax.f32 %v7831_v51, 0.0  ;;  %v6988_v1 = vadd.f32 %v19914_v10, %v19913_v54  ;;  %v7039_v19 = vadd.f32 %v6984_v55, %v19915_v26  ;;  %v7040_v63 = vadd.f32 %v6986_v48, %v19918_v34  ;;  %v19922_v41 = vld [vmem:[#allocation2_spill] sm:$0xff]  ;;  %v19923_v55 = vld [vmem:[#allocation43_spill] sm:$0xff] }
 0x322   : > { %v7860_v36 = vmax.f32 %v7832_v45, 0.0  ;;  %v7833_v62 = vadd.f32 %v18403_v8, %v7793_v31  ;;  %v7755_v56 = vadd.f32 %v7694_v21, %v7035_v59  ;;  %v7696_v37 = vadd.f32 %v7695_v30, %v7592_v49  ;;  %v19917_v59 = vld [vmem:[#allocation18_spill] sm:$0xff]  ;;  %v19919_v31 = vld [vmem:[#allocation35_spill] sm:$0xff]  ;;  %v19920_v21 = vld [vmem:[#allocation36_spill] sm:$0xff] }
 0x323   : > { %v7794_v6 = vmul.f32 %v18371_v27, %v7754_v43  ;;  %v7594_v18 = vpop.f32.mrf.mxu0  ;;  %v7697_v15 = vpop.f32.mrf.mxu1  ;;  %v6992_v3 = vadd.f32 %v19920_v21, %v19919_v31  ;;  %v19921_v49 = vld [vmem:[#allocation11_spill] sm:$0xff]  ;;  %v7041_v30 = vadd.f32 %v6988_v1, %v5973_v57 }
 0x324   : > { %v18436_v4 = vpack.c.bf16 %v7860_v36, %v7858_v9  ;;  %v7861_v52 = vmax.f32 %v7833_v62, 0.0  ;;  %v7756_v12 = vadd.f32 %v7696_v37, %v7036_v2  ;;  %v7795_v11 = vmul.f32 %v18382_v16, %v7755_v56  ;;  %v19928_v1 = vld [vmem:[#allocation3_spill] sm:$0xff] }
 0x325   : > { %v7698_v32 = vadd.f32 %v7697_v15, %v7594_v18  ;;  %v7598_v35 = vpop.f32.mrf.mxu0  ;;  %v7701_v50 = vpop.f32.mrf.mxu1  ;;  %v7834_v14 = vadd.f32 %v18392_v28, %v7794_v6  ;;  %v5930_v2 = vadd.f32 %v19917_v59, %v19916_v42  ;;  %v19924_v6 = vld [vmem:[#allocation44_spill] sm:$0xff]  ;;  %v19925_v15 = vld [vmem:[#allocation45_spill] sm:$0xff] }
 0x326   : > { %v7796_v29 = vmul.f32 %v18371_v27, %v7756_v12  ;;  %v7702_v47 = vadd.f32 %v7701_v50, %v7598_v35  ;;  %v18443_v46 = vpack.c.bf16 %v7861_v52, %v7859_v40  ;;  %v7835_v5 = vadd.f32 %v18403_v8, %v7795_v11  ;;  %v19926_v40 = vld [vmem:[#allocation46_spill] sm:$0xff] }
 0x327   : > { %v7757_v0 = vadd.f32 %v7698_v32, %v7037_v22  ;;  %v7600_v38 = vpop.f32.mrf.mxu0  ;;  %v7703_v23 = vpop.f32.mrf.mxu1  ;;  %v7862_v36 = vmax.f32 %v7834_v14, 0.0  ;;  %v6994_v18 = vadd.f32 %v19924_v6, %v19923_v55  ;;  %v6996_v52 = vadd.f32 %v19926_v40, %v19925_v15  ;;  %v19929_v14 = vld [vmem:[#allocation47_spill] sm:$0xff]  ;;  %v19940_v40 = vld [vmem:[#allocation52_spill] sm:$0xff] }
 0x328   : > { %v7836_v53 = vadd.f32 %v18392_v28, %v7796_v29  ;;  %v7758_v58 = vadd.f32 %v7702_v47, %v7038_v24  ;;  %v7704_v44 = vadd.f32 %v7703_v23, %v7600_v38  ;;  %8124 = vmatprep.mubr.bf16.mxu0 %v18443_v46  ;;  %v7863_v48 = vmax.f32 %v7835_v5, 0.0  ;;  %v19927_v47 = vld [vmem:[#allocation12_spill] sm:$0xff]  ;;  %v19939_v15 = vld [vmem:[#allocation51_spill] sm:$0xff] }
 0x329   : > { %v7797_v60 = vmul.f32 %v18382_v16, %v7757_v0  ;;  %v7602_v51 = vpop.f32.mrf.mxu0  ;;  %v7705_v45 = vpop.f32.mrf.mxu1  ;;  %8125 = vmatmul.mubr.bf16.vlgmr.msra.gmra.mxu0 %v18436_v4  ;;  %v5977_v29 = vadd.f32 %v5930_v2, %v18408_v7  ;;  %v7042_v57 = vadd.f32 %v6992_v3, %v19927_v47  ;;  %v19930_v0 = vld [vmem:[#allocation48_spill] sm:$0xff] }
 0x32a   : > { %v7864_v39 = vmax.f32 %v7836_v53, 0.0  ;;  %v7759_v9 = vadd.f32 %v7704_v44, %v7039_v19  ;;  %v7706_v43 = vadd.f32 %v7705_v45, %v7602_v51  ;;  %12239 = vmatpush3.bf16.msra.mxu0 %v19921_v49  ;;  %v7798_v56 = vmul.f32 %v18371_v27, %v7758_v58  ;;  %v19931_v44 = vld [vmem:[#allocation21_spill] sm:$0xff]  ;;  %v19932_v7 = vld [vmem:[#allocation16_spill] sm:$0xff]  ;;  %v19935_v51 = vld [vmem:[#allocation50_spill] sm:$0xff] }
 0x32b   : > { %v7837_v62 = vadd.f32 %v18403_v8, %v7797_v60  ;;  %v7604_v37 = vpop.f32.mrf.mxu0  ;;  %v7707_v33 = vpop.f32.mrf.mxu1  ;;  %12240 = vmatprep.subr.bf16.mxu0 %v19922_v41  ;;  %v6998_v38 = vadd.f32 %v19930_v0, %v19929_v14  ;;  %v7043_v42 = vadd.f32 %v6994_v18, %v19932_v7  ;;  %v19934_v60 = vld [vmem:[#allocation49_spill] sm:$0xff]  ;;  %v19938_v18 = vld [vmem:[#allocation24_spill] sm:$0xff] }
 0x32c   : > { %v7760_v12 = vadd.f32 %v7706_v43, %v7040_v63  ;;  %v7708_v22 = vadd.f32 %v7707_v33, %v7604_v37  ;;  %v7799_v32 = vmul.f32 %v18382_v16, %v7759_v9  ;;  %v18468_v24 = vpack.c.bf16 %v7864_v39, %v7862_v36  ;;  %v19933_v63 = vld [vmem:[#allocation19_spill] sm:$0xff]  ;;  %v19936_v36 = vld [vmem:[#allocation26_spill] sm:$0xff] }
 0x32d   : > { %v7865_v11 = vmax.f32 %v7837_v62, 0.0  ;;  %v7608_v35 = vpop.f32.mrf.mxu0  ;;  %v7711_v50 = vpop.f32.mrf.mxu1  ;;  %v7838_v23 = vadd.f32 %v18392_v28, %v7798_v56  ;;  %v7044_v5 = vadd.f32 %v6996_v52, %v19933_v63  ;;  %v7002_v45 = vadd.f32 %v19935_v51, %v19934_v60  ;;  %v19937_v62 = vld [vmem:[#allocation32_spill] sm:$0xff]  ;;  %v19948_v63 = vld [vmem:[#allocation55_spill] sm:$0xff] }
 0x32e   : > { %v7800_v54 = vmul.f32 %v18371_v27, %v7760_v12  ;;  %v7761_v10 = vadd.f32 %v7708_v22, %v7041_v30  ;;  %12241 = vmatpush3.bf16.msra.mxu0 %v19928_v1  ;;  %v7712_v26 = vadd.f32 %v7711_v50, %v7608_v35  ;;  %v7839_v31 = vadd.f32 %v18403_v8, %v7799_v32  ;;  %v19942_v32 = vld [vmem:[#allocation53_spill] sm:$0xff]  ;;  %v19943_v35 = vld [vmem:[#allocation54_spill] sm:$0xff]  ;;  %v19944_v1 = vld [vmem:[#allocation20_spill] sm:$0xff] }
 0x32f   : > { %v7610_v19 = vpop.f32.mrf.mxu0  ;;  %v7713_v53 = vpop.f32.mrf.mxu1  ;;  %v18477_v58 = vpack.c.bf16 %v7865_v11, %v7863_v48  ;;  %12242 = vmatprep.subr.bf16.mxu0 %v19931_v44  ;;  %v5940_v56 = vadd.f32 %v19937_v62, %v19936_v36  ;;  %v7045_v37 = vadd.f32 %v6998_v38, %v5977_v29  ;;  %v7866_v33 = vmax.f32 %v7838_v23, 0.0  ;;  %v19941_v11 = vld [vmem:[#allocation22_spill] sm:$0xff]  ;;  %v19953_v62 = vld [vmem:[#allocation57_spill] sm:$0xff] }
 0x330   : > { %v7840_v59 = vadd.f32 %v18392_v28, %v7800_v54  ;;  %v7801_v2 = vmul.f32 %v18382_v16, %v7761_v10  ;;  %v7714_v34 = vadd.f32 %v7713_v53, %v7610_v19  ;;  %v7762_v21 = vadd.f32 %v7712_v26, %v7042_v57  ;;  %v19945_v19 = vld [vmem:[#allocation5_spill] sm:$0xff]  ;;  %v19946_v53 = vld [vmem:[#allocation38_spill] sm:$0xff] }
 0x331   : > { %8134 = vmatprep.mubr.bf16.mxu0 %v18477_v58  ;;  %v7612_v3 = vpop.f32.mrf.mxu0  ;;  %v7715_v39 = vpop.f32.mrf.mxu1  ;;  %v7004_v52 = vadd.f32 %v19940_v40, %v19939_v15  ;;  %v7006_v50 = vadd.f32 %v19943_v35, %v19942_v32  ;;  %v7867_v47 = vmax.f32 %v7839_v31, 0.0  ;;  %v7046_v14 = vadd.f32 %v7002_v45, %v19944_v1 }
 0x332   : > { %v7868_v9 = vmax.f32 %v7840_v59, 0.0  ;;  %v7841_v43 = vadd.f32 %v18403_v8, %v7801_v2  ;;  %v7763_v49 = vadd.f32 %v7714_v34, %v7043_v42  ;;  %v7716_v30 = vadd.f32 %v7715_v39, %v7612_v3  ;;  %8135 = vmatmul.mubr.bf16.gmra.mxu0 %v18468_v24  ;;  %v19947_v34 = vld [vmem:[#allocation23_spill] sm:$0xff] }
 0x333   : > { %v7802_v41 = vmul.f32 %v18371_v27, %v7762_v21  ;;  %v7614_v55 = vpop.f32.mrf.mxu0  ;;  %v7717_v6 = vpop.f32.mrf.mxu1  ;;  %12243 = vmatpush3.bf16.msra.mxu0 %v19938_v18  ;;  %v5981_v26 = vadd.f32 %v5940_v56, %v18411_v61  ;;  %v5950_v44 = vadd.f32 %v19946_v53, %v19945_v19  ;;  %v19950_v61 = vld [vmem:[#allocation27_spill] sm:$0xff]  ;;  %v19951_v21 = vld [vmem:[#allocation25_spill] sm:$0xff]  ;;  %v19954_v56 = vld [vmem:[#allocation58_spill] sm:$0xff] }
 0x334   : > { %v7869_v12 = vmax.f32 %v7841_v43, 0.0  ;;  %v7764_v22 = vadd.f32 %v7716_v30, %v7044_v5  ;;  %v7718_v48 = vadd.f32 %v7717_v6, %v7614_v55  ;;  %12244 = vmatprep.subr.bf16.mxu0 %v19941_v11  ;;  %v7803_v29 = vmul.f32 %v18382_v16, %v7763_v49  ;;  %v19949_v5 = vld [vmem:[#allocation56_spill] sm:$0xff]  ;;  %v19952_v39 = vld [vmem:[#allocation31_spill] sm:$0xff]  ;;  %v19960_v19 = vld [vmem:[#allocation33_spill] sm:$0xff] }
 0x335   : > { %v7618_v57 = vpop.f32.mrf.mxu0  ;;  %v7721_v54 = vpop.f32.mrf.mxu1  ;;  %v18500_v10 = vpack.c.bf16 %v7868_v9, %v7866_v33  ;;  %v7842_v7 = vadd.f32 %v18392_v28, %v7802_v41  ;;  %v7008_v60 = vadd.f32 %v19949_v5, %v19948_v63  ;;  %v7047_v3 = vadd.f32 %v7004_v52, %v19951_v21  ;;  %v19955_v6 = vld [vmem:[#allocation59_spill] sm:$0xff]  ;;  %v19956_v18 = vld [vmem:[#allocation60_spill] sm:$0xff]  ;;  %v19962_v63 = vld [vmem:[#allocation62_spill] sm:$0xff] }
 0x336   : > { %v7804_v0 = vmul.f32 %v18371_v27, %v7764_v22  ;;  %v7765_v38 = vadd.f32 %v7718_v48, %v7045_v37  ;;  %v7722_v23 = vadd.f32 %v7721_v54, %v7618_v57  ;;  %v18508_v2 = vpack.c.bf16 %v7869_v12, %v7867_v47  ;;  %v19957_v11 = vld [vmem:[#allocation28_spill] sm:$0xff]  ;;  %v19959_v57 = vld [vmem:[#allocation61_spill] sm:$0xff]  ;;  %v19963_v5 = vld [vmem:[#allocation63_spill] sm:$0xff] }
 0x337   : > { %v7620_v42 = vpop.f32.mrf.mxu0  ;;  %v7723_v59 = vpop.f32.mrf.mxu1  ;;  %12245 = vmatpush3.bf16.msra.mxu0 %v19947_v34  ;;  %v7048_v9 = vadd.f32 %v7006_v50, %v19952_v39  ;;  %v7843_v43 = vadd.f32 %v18403_v8, %v7803_v29  ;;  %v7012_v37 = vadd.f32 %v19954_v56, %v19953_v62  ;;  %v7014_v15 = vadd.f32 %v19956_v18, %v19955_v6  ;;  %v19958_v29 = vld [vmem:[#allocation29_spill] sm:$0xff]  ;;  %v19967_v62 = vld [vmem:[#allocation39_spill] sm:$0xff] }
 0x338   : > { %v7844_v51 = vadd.f32 %v18392_v28, %v7804_v0  ;;  %v7805_v45 = vmul.f32 %v18382_v16, %v7765_v38  ;;  %v7766_v31 = vadd.f32 %v7722_v23, %v7046_v14  ;;  %12246 = vmatprep.subr.bf16.mxu0 %v19950_v61  ;;  %v7724_v49 = vadd.f32 %v7723_v59, %v7620_v42  ;;  %v19961_v59 = vld [vmem:[#allocation4_spill] sm:$0xff]  ;;  %v19964_v61 = vld [vmem:[#allocation37_spill] sm:$0xff] }
 0x339   : > { %8144 = vmatprep.mubr.bf16.mxu0 %v18508_v2  ;;  %v7622_v30 = vpop.f32.mrf.mxu0  ;;  %v7725_v36 = vpop.f32.mrf.mxu1  ;;  %v7870_v40 = vmax.f32 %v7842_v7, 0.0  ;;  %v7049_v32 = vadd.f32 %v7008_v60, %v5981_v26  ;;  %v7016_v54 = vadd.f32 %v19959_v57, %v18325_v17  ;;  %v7871_v1 = vmax.f32 %v7843_v43, 0.0  ;;  %v19965_v43 = vld [vmem:[#allocation10_spill] sm:$0xff]  ;;  %v19969_v6 = vld [vmem:[#allocation65_spill] sm:$0xff] }
 0x33a   : > { %v7872_v33 = vmax.f32 %v7844_v51, 0.0  ;;  %v7845_v41 = vadd.f32 %v18403_v8, %v7805_v45  ;;  %v7726_v55 = vadd.f32 %v7725_v36, %v7622_v30  ;;  %8145 = vmatmul.mubr.bf16.gmra.mxu0 %v18500_v10  ;;  %v7806_v52 = vmul.f32 %v18371_v27, %v7766_v31 }
 0x33b   : > { %v7767_v12 = vadd.f32 %v7724_v49, %v7047_v3  ;;  %v7624_v22 = vpop.f32.mrf.mxu0  ;;  %v7727_v48 = vpop.f32.mrf.mxu1  ;;  %12247 = vmatpush3.bf16.msra.mxu0 %v19957_v11  ;;  %v7050_v53 = vadd.f32 %v7012_v37, %v19960_v19  ;;  %v7051_v34 = vadd.f32 %v7014_v15, %v19961_v59  ;;  %v7018_v60 = vadd.f32 %v19963_v5, %v19962_v63  ;;  %v19966_v49 = vld [vmem:[#allocation13_spill] sm:$0xff] }
 0x33c   : > { %v7873_v35 = vmax.f32 %v7845_v41, 0.0  ;;  %v7768_v50 = vadd.f32 %v7726_v55, %v7048_v9  ;;  %v7728_v47 = vadd.f32 %v7727_v48, %v7624_v22  ;;  %12248 = vmatprep.subr.bf16.mxu0 %v19958_v29  ;;  %v18532_v23 = vpack.c.bf16 %v7872_v33, %v7870_v40  ;;  %v19968_v55 = vld [vmem:[#allocation64_spill] sm:$0xff]  ;;  %v19971_v22 = vld [vmem:[#allocation67_spill] sm:$0xff] }
 0x33d   : > { %v7807_v14 = vmul.f32 %v18382_v16, %v7767_v12  ;;  %v7628_v0 = vpop.f32.mrf.mxu0  ;;  %v7731_v38 = vpop.f32.mrf.mxu1  ;;  %v7846_v17 = vadd.f32 %v18392_v28, %v7806_v52  ;;  %v5121_v30 = vadd.f32 %v19966_v49, %v19965_v43  ;;  %v5985_v36 = vadd.f32 %v5950_v44, %v18415_v20  ;;  %v19970_v12 = vld [vmem:[#allocation66_spill] sm:$0xff] }
 0x33e   : > { %v7808_v7 = vmul.f32 %v18371_v27, %v7768_v50  ;;  %v7769_v26 = vadd.f32 %v7728_v47, %v7049_v32  ;;  %v7732_v42 = vadd.f32 %v7731_v38, %v7628_v0  ;;  %v18540_v31 = vpack.c.bf16 %v7873_v35, %v7871_v1  ;;  %v19973_v1 = vld [vmem:[#allocation69_spill] sm:$0xff] }
 0x33f   : > { %v7630_v51 = vpop.f32.mrf.mxu0  ;;  %v7733_v45 = vpop.f32.mrf.mxu1  ;;  %12249 = vmatpush3.bf16.msra.mxu0 %v19964_v61  ;;  %v7052_v56 = vadd.f32 %v7016_v54, %v19967_v62  ;;  %v7847_v37 = vadd.f32 %v18403_v8, %v7807_v14  ;;  %v7022_v18 = vadd.f32 %v19969_v6, %v19968_v55  ;;  %v7024_v20 = vadd.f32 %v19971_v22, %v19970_v12  ;;  %v19972_v54 = vld [vmem:[#allocation68_spill] sm:$0xff]  ;;  %v19981_v55 = vld [vmem:[#allocation71_spill] sm:$0xff] }
 0x340   : > { %v7848_v21 = vadd.f32 %v18392_v28, %v7808_v7  ;;  %v7809_v3 = vmul.f32 %v18382_v16, %v7769_v26  ;;  %v7770_v39 = vadd.f32 %v7732_v42, %v7050_v53  ;;  %v7734_v9 = vadd.f32 %v7733_v45, %v7630_v51  ;;  %8154 = vmatprep.mubr.bf16.mxu0 %v18540_v31  ;;  %v19974_v26 = vld [vmem:[#allocation6_spill] sm:$0xff]  ;;  %v19975_v42 = vld [vmem:[#allocation9_spill] sm:$0xff]  ;;  %v19978_v62 = vld [vmem:[#allocation8_spill] sm:$0xff] }
 0x341   : > { %v7632_v33 = vpop.f32.mrf.mxu0  ;;  %v7735_v41 = vpop.f32.mrf.mxu1  ;;  %v7874_v44 = vmax.f32 %v7846_v17, 0.0  ;;  %v7053_v50 = vadd.f32 %v7018_v60, %v5985_v36  ;;  %v7026_v14 = vadd.f32 %v19973_v1, %v19972_v54  ;;  %v7875_v0 = vmax.f32 %v7847_v37, 0.0  ;;  %v19977_v17 = vld [vmem:[#allocation41_spill] sm:$0xff]  ;;  %v19979_v37 = vld [vmem:[#allocation42_spill] sm:$0xff] }
 0x342   : > { %v7876_v15 = vmax.f32 %v7848_v21, 0.0  ;;  %v7849_v40 = vadd.f32 %v18403_v8, %v7809_v3  ;;  %v7771_v52 = vadd.f32 %v7734_v9, %v7051_v34  ;;  %8155 = vmatmul.mubr.bf16.gmra.mxu0 %v18532_v23  ;;  %v7810_v48 = vmul.f32 %v18371_v27, %v7770_v39  ;;  %v19976_v34 = vld [vmem:[#allocation40_spill] sm:$0xff] }
 0x343   : > { %v7736_v11 = vadd.f32 %v7735_v41, %v7632_v33  ;;  %v7634_v32 = vpop.f32.mrf.mxu0  ;;  %v7737_v35 = vpop.f32.mrf.mxu1  ;;  %v5960_v59 = vadd.f32 %v19975_v42, %v19974_v26  ;;  %v7054_v63 = vadd.f32 %v7022_v18, %v19976_v34  ;;  %v7055_v51 = vadd.f32 %v7024_v20, %v19977_v17  ;;  %v19980_v41 = vld [vmem:[#allocation70_spill] sm:$0xff] }
 0x344   : > { %v7877_v47 = vmax.f32 %v7849_v40, 0.0  ;;  %v7811_v29 = vmul.f32 %v18382_v16, %v7771_v52  ;;  %v7738_v57 = vadd.f32 %v7737_v35, %v7634_v32  ;;  %v18561_v7 = vpack.c.bf16 %v7876_v15, %v7874_v44 }
 0x345   : > { %v7772_v38 = vadd.f32 %v7736_v11, %v7052_v56  ;;  %v7638_v19 = vpop.f32.mrf.mxu0  ;;  %v7741_v53 = vpop.f32.mrf.mxu1  ;;  %v7850_v45 = vadd.f32 %v18392_v28, %v7810_v48  ;;  %v5150_v56 = vadd.f32 %v5121_v30, %v19978_v62  ;;  %v7056_v33 = vadd.f32 %v7026_v14, %v19979_v37 }
 0x346   : > { %v7773_v5 = vadd.f32 %v7738_v57, %v7053_v50  ;;  %v7742_v60 = vadd.f32 %v7741_v53, %v7638_v19  ;;  %v18569_v39 = vpack.c.bf16 %v7877_v47, %v7875_v0  ;;  %v7851_v9 = vadd.f32 %v18403_v8, %v7811_v29 }
 0x347   : > { %v7812_v61 = vmul.f32 %v18371_v27, %v7772_v38  ;;  %v7640_v21 = vpop.f32.mrf.mxu0  ;;  %v7743_v3 = vpop.f32.mrf.mxu1  ;;  %v7028_v6 = vadd.f32 %v19981_v55, %v19980_v41  ;;  %v5989_v30 = vadd.f32 %v5960_v59, %v5150_v56  ;;  %v7878_v44 = vmax.f32 %v7850_v45, 0.0  ;;  %v13545_v45 = vld [vmem:[%s19621_s4 + $0x174] ss:$8 sps:$4 sm:$0xff]  }
 0x348   : > { %v7813_v43 = vmul.f32 %v18382_v16, %v7773_v5  ;;  %v7774_v49 = vadd.f32 %v7742_v60, %v7054_v63  ;;  %v7744_v36 = vadd.f32 %v7743_v3, %v7640_v21  ;;  %8164 = vmatprep.mubr.bf16.mxu0 %v18569_v39  ;;  %v7879_v35 = vmax.f32 %v7851_v9, 0.0 }
 0x349   : > { %v7852_v18 = vadd.f32 %v18392_v28, %v7812_v61  ;;  %v7642_v15 = vpop.f32.mrf.mxu0  ;;  %v7745_v40 = vpop.f32.mrf.mxu1  ;;  %v7057_v29 = vadd.f32 %v7028_v6, %v5989_v30  ;;  %v8195_v61 = vld [vmem:[%s19622_s5] sm:$0x3] }
 0x34a   : > { %v7853_v52 = vadd.f32 %v18403_v8, %v7813_v43  ;;  %v7814_v12 = vmul.f32 %v18371_v27, %v7774_v49  ;;  %v7775_v22 = vadd.f32 %v7744_v36, %v7055_v51  ;;  %v7746_v20 = vadd.f32 %v7745_v40, %v7642_v15  ;;  %8165 = vmatmul.mubr.bf16.gmra.mxu0 %v18561_v7  ;;  %v18623_v51 = vld [vmem:[%s19624_s7] sm:$0xff]  }
 0x34b   : > { %v7880_v48 = vmax.f32 %v7852_v18, 0.0  ;;  %v7644_v11 = vpop.f32.mrf.mxu0  ;;  %v7747_v32 = vpop.f32.mrf.mxu1  ;;  %v18636_v21 = vrot.slane %v8195_v61, %v18360_v13  ;;  %v18639_v3 = vrot.slane %v8195_v61, %v18349_v25  ;;  %v8235_v43 = vld [vmem:[%s19623_s6] sm:$0x3] }
 0x34c   : > { %v7881_v50 = vmax.f32 %v7853_v52, 0.0  ;;  %v7776_v47 = vadd.f32 %v7746_v20, %v7056_v33  ;;  %v7815_v57 = vmul.f32 %v18382_v16, %v7775_v22  ;;  %v7748_v54 = vadd.f32 %v7747_v32, %v7644_v11 }
 0x34d   : > { %v18583_v1 = vpack.c.bf16 %v7880_v48, %v7878_v44  ;;  %v7854_v14 = vadd.f32 %v18392_v28, %v7814_v12  ;;  %v18645_v36 = vrot.slane %v8235_v43, %v18360_v13  ;;  %v18649_v56 = vrot.slane %v8235_v43, %v18349_v25 }
 0x34e   : > { %v7816_v0 = vmul.f32 %v18371_v27, %v7776_v47  ;;  %v18587_v38 = vpack.c.bf16 %v7881_v50, %v7879_v35  ;;  %v7777_v19 = vadd.f32 %v7748_v54, %v7057_v29  ;;  %v7855_v26 = vadd.f32 %v18403_v8, %v7815_v57  ;;  %v13543_v35 = vld [vmem:[%s19621_s4 + $0x170] ss:$8 sps:$4 sm:$0xff]   ;;  %v13548_v29 = vld [vmem:[%s19621_s4 + $0x164] ss:$8 sps:$4 sm:$0xff]  }
 0x34f   : > { %v7882_v59 = vmax.f32 %v7854_v14, 0.0 }
 0x350   : > { %v7856_v53 = vadd.f32 %v18392_v28, %v7816_v0  ;;  %8174 = vmatprep.mubr.bf16.mxu0 %v18587_v38  ;;  %v7817_v42 = vmul.f32 %v18382_v16, %v7777_v19  ;;  %v7883_v27 = vmax.f32 %v7855_v26, 0.0  ;;  %v18604_v16 = vld [vmem:[%s19624_s7 + $0x48] sm:$0xff]  }
 0x351   : > { %12192 = vmatprep.subr.bf16.mxu1 %v18604_v16  ;;  %v18610_v28 = vld [vmem:[%s19624_s7 + $0x8] sm:$0xff]   ;;  %12250 = vmatprep.subr.bf16.mxu0 %v18604_v16 }
 0x352   : > { %v7884_v34 = vmax.f32 %v7856_v53, 0.0  ;;  %8175 = vmatmul.mubr.bf16.gmra.mxu0 %v18583_v1  ;;  %v7857_v63 = vadd.f32 %v18403_v8, %v7817_v42  ;;  %12193 = vmatpush3.bf16.msra.mxu1 %v18610_v28  ;;  %v18618_v8 = vld [vmem:[%s19624_s7 + $0x40] sm:$0xff]  }
 0x353   : > { %12251 = vmatpush3.bf16.msra.mxu0 %v18610_v28  ;;  %12194 = vmatprep.subr.bf16.mxu1 %v18618_v8  ;;  %v13546_v26 = vld [vmem:[%s19621_s4 + $0x160] ss:$8 sps:$4 sm:$0xff]  }
 0x354   : > { %v18595_v5 = vpack.c.bf16 %v7884_v34, %v7882_v59  ;;  %v7885_v60 = vmax.f32 %v7857_v63, 0.0  ;;  %12252 = vmatprep.subr.bf16.mxu0 %v18618_v8  ;;  %v13551_v59 = vld [vmem:[%s19621_s4 + $0x154] ss:$8 sps:$4 sm:$0xff]  }
 0x356   : > { %v18597_v17 = vpack.c.bf16 %v7885_v60, %v7883_v27  ;;  %12195 = vmatpush3.bf16.msra.mxu1 %v18623_v51 }
 0x357   : > { %12253 = vmatpush3.bf16.msra.mxu0 %v18623_v51  ;;  %8818 = vmatprep.subr.bf16.mxu1 %v13545_v45 }
 0x358   : > { %8184 = vmatprep.mubr.bf16.mxu0 %v18597_v17 }
 0x35a   : > { %8185 = vmatmul.mubr.bf16.gmra.mxu0 %v18595_v5 }
 0x3e9   : > { %v8126_v9 = vpop.f32.mrf.mxu0 }
 0x3ea   : > { %v8207_v37 = vmul.f32 %v18639_v3, %v8126_v9 }
 0x3eb   : > { %v8128_v49 = vpop.f32.mrf.mxu0 }
 0x3ec   : > { %v8208_v62 = vmul.f32 %v18636_v21, %v8128_v49  ;;  %v8247_v13 = vadd.f32 %v18649_v56, %v8207_v37  ;;  %v13549_v37 = vld [vmem:[%s19621_s4 + $0x150] ss:$8 sps:$4 sm:$0xff]  }
 0x3ed   : > { %v8130_v33 = vpop.f32.mrf.mxu0 }
 0x3ee   : > { %v8209_v41 = vmul.f32 %v18639_v3, %v8130_v33  ;;  %v8248_v6 = vadd.f32 %v18645_v36, %v8208_v62  ;;  %v8275_v30 = vmax.f32 %v8247_v13, 0.0 }
 0x3ef   : > { %v8132_v55 = vpop.f32.mrf.mxu0 }
 0x3f0   : > { %v8249_v18 = vadd.f32 %v18649_v56, %v8209_v41  ;;  %v8210_v15 = vmul.f32 %v18636_v21, %v8132_v55  ;;  %v8276_v25 = vmax.f32 %v8248_v6, 0.0  ;;  %v13554_v55 = vld [vmem:[%s19621_s4 + $0x144] ss:$8 sps:$4 sm:$0xff]  }
 0x3f2   : > { %v8250_v40 = vadd.f32 %v18645_v36, %v8210_v15  ;;  %v8136_v52 = vpop.f32.mrf.mxu0  ;;  %v8277_v12 = vmax.f32 %v8249_v18, 0.0 }
 0x3f3   : > { %v8211_v48 = vmul.f32 %v18639_v3, %v8136_v52 }
 0x3f4   : > { %v8278_v22 = vmax.f32 %v8250_v40, 0.0  ;;  %v8138_v20 = vpop.f32.mrf.mxu0  ;;  %v8303_v50 = vpack.c.bf16 %v8277_v12, %v8275_v30  ;;  %v13552_v12 = vld [vmem:[%s19621_s4 + $0x140] ss:$8 sps:$4 sm:$0xff]  }
 0x3f5   : > { %v8212_v44 = vmul.f32 %v18636_v21, %v8138_v20  ;;  %v8251_v19 = vadd.f32 %v18649_v56, %v8211_v48  ;;  %v13557_v20 = vld [vmem:[%s19621_s4 + $0x134] ss:$8 sps:$4 sm:$0xff]  }
 0x3f6   : > { %v8140_v11 = vpop.f32.mrf.mxu0  ;;  %v8304_v32 = vpack.c.bf16 %v8278_v22, %v8276_v25 }
 0x3f7   : > { %v8213_v47 = vmul.f32 %v18639_v3, %v8140_v11  ;;  %v8252_v54 = vadd.f32 %v18645_v36, %v8212_v44  ;;  %v8279_v61 = vmax.f32 %v8251_v19, 0.0 }
 0x3f8   : > { %v8142_v57 = vpop.f32.mrf.mxu0  ;;  %8484 = vmatprep.mubr.bf16.mxu1 %v8304_v32 }
 0x3f9   : > { %v8253_v14 = vadd.f32 %v18649_v56, %v8213_v47  ;;  %v8214_v0 = vmul.f32 %v18636_v21, %v8142_v57  ;;  %8485 = vmatmul.mubr.bf16.vlgmr.msra.gmra.mxu1 %v8303_v50  ;;  %v8280_v27 = vmax.f32 %v8252_v54, 0.0 }
 0x3fa   : > { %v8146_v53 = vpop.f32.mrf.mxu0  ;;  %8819 = vmatpush1.bf16.msra.mxu1 %v13543_v35 }
 0x3fb   : > { %v8254_v42 = vadd.f32 %v18645_v36, %v8214_v0  ;;  %8820 = vmatprep.subr.bf16.mxu1 %v13548_v29  ;;  %v8281_v34 = vmax.f32 %v8253_v14, 0.0  ;;  %v8215_v9 = vmul.f32 %v18639_v3, %v8146_v53  ;;  %v13555_v29 = vld [vmem:[%s19621_s4 + $0x130] ss:$8 sps:$4 sm:$0xff]   ;;  %v13560_v14 = vld [vmem:[%s19621_s4 + $0x124] ss:$8 sps:$4 sm:$0xff]  }
 0x3fc   : > { %v8148_v63 = vpop.f32.mrf.mxu0 }
 0x3fd   : > { %v8282_v60 = vmax.f32 %v8254_v42, 0.0  ;;  %v8216_v45 = vmul.f32 %v18636_v21, %v8148_v63  ;;  %v8305_v33 = vpack.c.bf16 %v8281_v34, %v8279_v61  ;;  %v8255_v13 = vadd.f32 %v18649_v56, %v8215_v9  ;;  %v13558_v34 = vld [vmem:[%s19621_s4 + $0x120] ss:$8 sps:$4 sm:$0xff]  }
 0x3fe   : > { %v8150_v43 = vpop.f32.mrf.mxu0  ;;  %8821 = vmatpush1.bf16.msra.mxu1 %v13546_v26 }
 0x3ff   : > { %v8217_v49 = vmul.f32 %v18639_v3, %v8150_v43  ;;  %v8306_v62 = vpack.c.bf16 %v8282_v60, %v8280_v27  ;;  %8822 = vmatprep.subr.bf16.mxu1 %v13551_v59  ;;  %v8256_v6 = vadd.f32 %v18645_v36, %v8216_v45  ;;  %v8283_v11 = vmax.f32 %v8255_v13, 0.0  ;;  %v13563_v60 = vld [vmem:[%s19621_s4 + $0x114] ss:$8 sps:$4 sm:$0xff]  }
 0x400   : > { %v8152_v41 = vpop.f32.mrf.mxu0 }
 0x401   : > { %v8257_v18 = vadd.f32 %v18649_v56, %v8217_v49  ;;  %v8218_v15 = vmul.f32 %v18636_v21, %v8152_v41  ;;  %8492 = vmatprep.mubr.bf16.mxu1 %v8306_v62  ;;  %v8284_v30 = vmax.f32 %v8256_v6, 0.0  ;;  %v13561_v41 = vld [vmem:[%s19621_s4 + $0x110] ss:$8 sps:$4 sm:$0xff]  }
 0x402   : > { %v8156_v40 = vpop.f32.mrf.mxu0  ;;  %8493 = vmatmul.mubr.bf16.gmra.mxu1 %v8305_v33 }
 0x403   : > { %v8258_v52 = vadd.f32 %v18645_v36, %v8218_v15  ;;  %8823 = vmatpush1.bf16.msra.mxu1 %v13549_v37  ;;  %v8285_v25 = vmax.f32 %v8257_v18, 0.0  ;;  %v8219_v32 = vmul.f32 %v18639_v3, %v8156_v40  ;;  %v13566_v18 = vld [vmem:[%s19621_s4 + $0x104] ss:$8 sps:$4 sm:$0xff]  }
 0x404   : > { %v8158_v22 = vpop.f32.mrf.mxu0  ;;  %8824 = vmatprep.subr.bf16.mxu1 %v13554_v55 }
 0x405   : > { %v8286_v44 = vmax.f32 %v8258_v52, 0.0  ;;  %v8220_v48 = vmul.f32 %v18636_v21, %v8158_v22  ;;  %v8307_v57 = vpack.c.bf16 %v8285_v25, %v8283_v11  ;;  %v8259_v26 = vadd.f32 %v18649_v56, %v8219_v32  ;;  %v13564_v22 = vld [vmem:[%s19621_s4 + $0x100] ss:$8 sps:$4 sm:$0xff]  }
 0x406   : > { %v8160_v35 = vpop.f32.mrf.mxu0 }
 0x407   : > { %v8221_v50 = vmul.f32 %v18639_v3, %v8160_v35  ;;  %8825 = vmatpush1.bf16.msra.mxu1 %v13552_v12  ;;  %v8308_v47 = vpack.c.bf16 %v8286_v44, %v8284_v30  ;;  %v8260_v0 = vadd.f32 %v18645_v36, %v8220_v48  ;;  %v8287_v43 = vmax.f32 %v8259_v26, 0.0  ;;  %v13569_v44 = vld [vmem:[%s19621_s4 + $0x1f4] ss:$8 sps:$4 sm:$0xff]  }
 0x408   : > { %v8162_v54 = vpop.f32.mrf.mxu0  ;;  %8826 = vmatprep.subr.bf16.mxu1 %v13557_v20 }
 0x409   : > { %v8261_v19 = vadd.f32 %v18649_v56, %v8221_v50  ;;  %v8222_v53 = vmul.f32 %v18636_v21, %v8162_v54  ;;  %8500 = vmatprep.mubr.bf16.mxu1 %v8308_v47  ;;  %v8288_v45 = vmax.f32 %v8260_v0, 0.0  ;;  %v13567_v54 = vld [vmem:[%s19621_s4 + $0x1f0] ss:$8 sps:$4 sm:$0xff]  }
 0x40a   : > { %v8166_v42 = vpop.f32.mrf.mxu0  ;;  %8501 = vmatmul.mubr.bf16.gmra.mxu1 %v8307_v57 }
 0x40b   : > { %v8262_v59 = vadd.f32 %v18645_v36, %v8222_v53  ;;  %8827 = vmatpush1.bf16.msra.mxu1 %v13555_v29  ;;  %v8289_v63 = vmax.f32 %v8261_v19, 0.0  ;;  %v8223_v49 = vmul.f32 %v18639_v3, %v8166_v42  ;;  %v13572_v19 = vld [vmem:[%s19621_s4 + $0x1e4] ss:$8 sps:$4 sm:$0xff]  }
 0x40c   : > { %v8168_v27 = vpop.f32.mrf.mxu0  ;;  %8828 = vmatprep.subr.bf16.mxu1 %v13560_v14 }
 0x40d   : > { %v8290_v61 = vmax.f32 %v8262_v59, 0.0  ;;  %v8224_v9 = vmul.f32 %v18636_v21, %v8168_v27  ;;  %v8309_v55 = vpack.c.bf16 %v8289_v63, %v8287_v43  ;;  %v8263_v52 = vadd.f32 %v18649_v56, %v8223_v49  ;;  %v13570_v27 = vld [vmem:[%s19621_s4 + $0x1e0] ss:$8 sps:$4 sm:$0xff]  }
 0x40e   : > { %v8170_v62 = vpop.f32.mrf.mxu0 }
 0x40f   : > { %v8225_v37 = vmul.f32 %v18639_v3, %v8170_v62  ;;  %8829 = vmatpush1.bf16.msra.mxu1 %v13558_v34  ;;  %v8310_v33 = vpack.c.bf16 %v8290_v61, %v8288_v45  ;;  %v8264_v15 = vadd.f32 %v18645_v36, %v8224_v9  ;;  %v8291_v35 = vmax.f32 %v8263_v52, 0.0  ;;  %v13575_v61 = vld [vmem:[%s19621_s4 + $0x1d4] ss:$8 sps:$4 sm:$0xff]  }
 0x410   : > { %v8172_v6 = vpop.f32.mrf.mxu0  ;;  %8830 = vmatprep.subr.bf16.mxu1 %v13563_v60 }
 0x411   : > { %v8265_v13 = vadd.f32 %v18649_v56, %v8225_v37  ;;  %v8226_v40 = vmul.f32 %v18636_v21, %v8172_v6  ;;  %8508 = vmatprep.mubr.bf16.mxu1 %v8310_v33  ;;  %v8292_v48 = vmax.f32 %v8264_v15, 0.0  ;;  %v13573_v6 = vld [vmem:[%s19621_s4 + $0x1d0] ss:$8 sps:$4 sm:$0xff]  }
 0x412   : > { %v8176_v12 = vpop.f32.mrf.mxu0  ;;  %8509 = vmatmul.mubr.bf16.gmra.mxu1 %v8309_v55 }
 0x413   : > { %v8266_v25 = vadd.f32 %v18645_v36, %v8226_v40  ;;  %8831 = vmatpush1.bf16.msra.mxu1 %v13561_v41  ;;  %v8293_v20 = vmax.f32 %v8265_v13, 0.0  ;;  %v8227_v50 = vmul.f32 %v18639_v3, %v8176_v12  ;;  %v13578_v13 = vld [vmem:[%s19621_s4 + $0x1c4] ss:$8 sps:$4 sm:$0xff]  }
 0x414   : > { %v8178_v30 = vpop.f32.mrf.mxu0  ;;  %8832 = vmatprep.subr.bf16.mxu1 %v13566_v18 }
 0x415   : > { %v8294_v11 = vmax.f32 %v8266_v25, 0.0  ;;  %v8228_v32 = vmul.f32 %v18636_v21, %v8178_v30  ;;  %v8311_v14 = vpack.c.bf16 %v8293_v20, %v8291_v35  ;;  %v8267_v59 = vadd.f32 %v18649_v56, %v8227_v50  ;;  %v13576_v20 = vld [vmem:[%s19621_s4 + $0x1c0] ss:$8 sps:$4 sm:$0xff]   ;;  %v13579_v50 = vld [vmem:[%s19621_s4 + $0x1b0] ss:$8 sps:$4 sm:$0xff]  }
 0x416   : > { %v8180_v47 = vpop.f32.mrf.mxu0 }
 0x417   : > { %v8229_v29 = vmul.f32 %v18639_v3, %v8180_v47  ;;  %8833 = vmatpush1.bf16.msra.mxu1 %v13564_v22  ;;  %v8312_v57 = vpack.c.bf16 %v8294_v11, %v8292_v48  ;;  %v8268_v53 = vadd.f32 %v18645_v36, %v8228_v32  ;;  %v8295_v62 = vmax.f32 %v8267_v59, 0.0  ;;  %v18823_v59 = vld [vmem:[%s19624_s7 + $0x30] sm:$0xff]  }
 0x418   : > { %v8182_v0 = vpop.f32.mrf.mxu0  ;;  %8834 = vmatprep.subr.bf16.mxu1 %v13569_v44  ;;  %v13581_v44 = vld [vmem:[%s19621_s4 + $0x1b4] ss:$8 sps:$4 sm:$0xff]  }
 0x419   : > { %v8269_v26 = vadd.f32 %v18649_v56, %v8229_v29  ;;  %v8230_v42 = vmul.f32 %v18636_v21, %v8182_v0  ;;  %8516 = vmatprep.mubr.bf16.mxu1 %v8312_v57  ;;  %v8296_v9 = vmax.f32 %v8268_v53, 0.0  ;;  %v13584_v29 = vld [vmem:[%s19621_s4 + $0x1a4] ss:$8 sps:$4 sm:$0xff]   ;;  %v13582_v57 = vld [vmem:[%s19621_s4 + $0x1a0] ss:$8 sps:$4 sm:$0xff]   ;;  %v18803_v53 = vld [vmem:[%s19624_s7 + $0x78] sm:$0xff]  }
 0x41a   : > { %v8186_v34 = vpop.f32.mrf.mxu0  ;;  %8517 = vmatmul.mubr.bf16.gmra.mxu1 %v8311_v14  ;;  %v13585_v14 = vld [vmem:[%s19621_s4 + $0x190] ss:$8 sps:$4 sm:$0xff]   ;;  %v13590_v0 = vld [vmem:[%s19621_s4 + $0x184] ss:$8 sps:$4 sm:$0xff]  }
 0x41b   : > { %v8270_v63 = vadd.f32 %v18645_v36, %v8230_v42  ;;  %8835 = vmatpush2.bf16.msra.mxu1 %v13567_v54  ;;  %v8297_v60 = vmax.f32 %v8269_v26, 0.0  ;;  %v8231_v37 = vmul.f32 %v18639_v3, %v8186_v34  ;;  %v13587_v54 = vld [vmem:[%s19621_s4 + $0x194] ss:$8 sps:$4 sm:$0xff]   ;;  %v18829_v34 = vld [vmem:[%s19624_s7 + $0x68] sm:$0xff]  }
 0x41c   : > { %v8188_v45 = vpop.f32.mrf.mxu0  ;;  %8836 = vmatprep.subr.bf16.mxu1 %v13572_v19  ;;  %v13588_v19 = vld [vmem:[%s19621_s4 + $0x180] ss:$8 sps:$4 sm:$0xff]   ;;  %v18811_v26 = vld [vmem:[%s19624_s7 + $0x38] sm:$0xff]   ;;  %v18817_v42 = vld [vmem:[%s19624_s7 + $0x70] sm:$0xff]  }
 0x41d   : > { %v8298_v43 = vmax.f32 %v8270_v63, 0.0  ;;  %v8232_v49 = vmul.f32 %v18636_v21, %v8188_v45  ;;  %v8313_v18 = vpack.c.bf16 %v8297_v60, %v8295_v62  ;;  %v8271_v25 = vadd.f32 %v18649_v56, %v8231_v37  ;;  %v18837_v63 = vld [vmem:[%s19624_s7 + $0x28] sm:$0xff]   ;;  %v18849_v60 = vld [vmem:[%s19624_s7 + $0x20] sm:$0xff]   ;;  %v18855_v45 = vld [vmem:[%s19624_s7 + $0x58] sm:$0xff]  }
 0x41e   : > { %v8190_v33 = vpop.f32.mrf.mxu0 }
 0x41f   : > { %v8233_v41 = vmul.f32 %v18639_v3, %v8190_v33  ;;  %8837 = vmatpush2.bf16.msra.mxu1 %v13570_v27  ;;  %v8314_v55 = vpack.c.bf16 %v8298_v43, %v8296_v9  ;;  %v8272_v40 = vadd.f32 %v18645_v36, %v8232_v49  ;;  %v8299_v32 = vmax.f32 %v8271_v25, 0.0  ;;  %v18843_v27 = vld [vmem:[%s19624_s7 + $0x60] sm:$0xff]   ;;  %v18869_v9 = vld [vmem:[%s19624_s7 + $0x50] sm:$0xff]  }
 0x420   : > { %v8192_v15 = vpop.f32.mrf.mxu0  ;;  %8838 = vmatprep.subr.bf16.mxu1 %v13575_v61  ;;  %v18863_v61 = vld [vmem:[%s19624_s7 + $0x18] sm:$0xff]   ;;  %v18875_v43 = vld [vmem:[%s19624_s7 + $0x10] sm:$0xff]  }
 0x421   : > { %v8273_v52 = vadd.f32 %v18649_v56, %v8233_v41  ;;  %v8234_v12 = vmul.f32 %v18636_v21, %v8192_v15  ;;  %8524 = vmatprep.mubr.bf16.mxu1 %v8314_v55  ;;  %v8300_v48 = vmax.f32 %v8272_v40, 0.0 }
 0x422   : > { %8525 = vmatmul.mubr.bf16.gmra.mxu1 %v8313_v18 }
 0x423   : > { %v8274_v22 = vadd.f32 %v18645_v36, %v8234_v12  ;;  %8839 = vmatpush2.bf16.msra.mxu1 %v13573_v6  ;;  %v8301_v30 = vmax.f32 %v8273_v52, 0.0 }
 0x424   : > { %8840 = vmatprep.subr.bf16.mxu1 %v13578_v13 }
 0x425   : > { %v8302_v11 = vmax.f32 %v8274_v22, 0.0  ;;  %v8315_v47 = vpack.c.bf16 %v8301_v30, %v8299_v32 }
 0x427   : > { %8841 = vmatpush2.bf16.msra.mxu1 %v13576_v20  ;;  %v8316_v35 = vpack.c.bf16 %v8302_v11, %v8300_v48 }
 0x428   : > { %8842 = vmatprep.subr.bf16.mxu1 %v13581_v44 }
 0x429   : > { %8532 = vmatprep.mubr.bf16.mxu1 %v8316_v35 }
 0x42a   : > { %8533 = vmatmul.mubr.bf16.gmra.mxu1 %v8315_v47 }
 0x42b   : > { %8843 = vmatpush2.bf16.msra.mxu1 %v13579_v50  ;;  %8850 = vmatprep.mubr.bf16.mxu1 %v18443_v46 }
 0x42c   : > { %8844 = vmatprep.subr.bf16.mxu1 %v13584_v29 }
 0x42f   : > { %8845 = vmatpush2.bf16.msra.mxu1 %v13582_v57 }
 0x430   : > { %8846 = vmatprep.subr.bf16.mxu1 %v13587_v54 }
 0x433   : > { %8847 = vmatpush2.bf16.msra.mxu1 %v13585_v14 }
 0x434   : > { %8848 = vmatprep.subr.bf16.mxu1 %v13590_v0 }
 0x437   : > { %8849 = vmatpush2.bf16.msra.mxu1 %v13588_v19 }
 0x438   : > { %12296 = vmatprep.subr.bf16.mxu1 %v18803_v53 }
 0x43a   : > { %8851 = vmatmul.mubr.bf16.vlgmr.msra.gmra.mxu1 %v18436_v4 }
 0x43b   : > { %8860 = vmatprep.mubr.bf16.mxu1 %v18477_v58  ;;  %12297 = vmatpush3.bf16.msra.mxu1 %v18811_v26 }
 0x43c   : > { %12298 = vmatprep.subr.bf16.mxu1 %v18817_v42 }
 0x43f   : > { %12299 = vmatpush3.bf16.msra.mxu1 %v18823_v59 }
 0x440   : > { %12300 = vmatprep.subr.bf16.mxu1 %v18829_v34 }
 0x442   : > { %8861 = vmatmul.mubr.bf16.gmra.mxu1 %v18468_v24 }
 0x443   : > { %8870 = vmatprep.mubr.bf16.mxu1 %v18508_v2  ;;  %12301 = vmatpush3.bf16.msra.mxu1 %v18837_v63 }
 0x444   : > { %12302 = vmatprep.subr.bf16.mxu1 %v18843_v27 }
 0x447   : > { %12303 = vmatpush3.bf16.msra.mxu1 %v18849_v60 }
 0x448   : > { %12304 = vmatprep.subr.bf16.mxu1 %v18855_v45 }
 0x44a   : > { %8871 = vmatmul.mubr.bf16.gmra.mxu1 %v18500_v10 }
 0x44b   : > { %8880 = vmatprep.mubr.bf16.mxu1 %v18540_v31  ;;  %12305 = vmatpush3.bf16.msra.mxu1 %v18863_v61 }
 0x44c   : > { %12306 = vmatprep.subr.bf16.mxu1 %v18869_v9 }
 0x44f   : > { %12307 = vmatpush3.bf16.msra.mxu1 %v18875_v43 }
 0x450   : > { %12308 = vmatprep.subr.bf16.mxu1 %v18604_v16  ;;  %v13593_v16 = vld [vmem:[%s19621_s4 + $0x274] ss:$8 sps:$4 sm:$0xff]  }
 0x451   : > { %9385 = vmatprep.subr.bf16.mxu0 %v13593_v16 }
 0x452   : > { %8881 = vmatmul.mubr.bf16.gmra.mxu1 %v18532_v23 }
 0x453   : > { %8890 = vmatprep.mubr.bf16.mxu1 %v18569_v39  ;;  %12309 = vmatpush3.bf16.msra.mxu1 %v18610_v28 }
 0x454   : > { %12310 = vmatprep.subr.bf16.mxu1 %v18618_v8 }
 0x457   : > { %12311 = vmatpush3.bf16.msra.mxu1 %v18623_v51 }
 0x45a   : > { %8891 = vmatmul.mubr.bf16.gmra.mxu1 %v18561_v7 }
 0x45b   : > { %8900 = vmatprep.mubr.bf16.mxu1 %v18587_v38 }
 0x462   : > { %8901 = vmatmul.mubr.bf16.gmra.mxu1 %v18583_v1 }
 0x463   : > { %8910 = vmatprep.mubr.bf16.mxu1 %v18597_v17 }
 0x46a   : > { %8911 = vmatmul.mubr.bf16.gmra.mxu1 %v18595_v5 }
 0x4b9   : > { %v12196_v28 = vpop.f32.mrf.mxu1 }
 0x4bb   : > { %v12197_v49 = vpop.f32.mrf.mxu1 }
 0x4bc   : > { %v18892_v8 = vadd.f32 %v12197_v49, %v12196_v28 }
 0x4bd   : > { %v12199_v51 = vpop.f32.mrf.mxu1 }
 0x4bf   : > { %v12200_v62 = vpop.f32.mrf.mxu1 }
 0x4c0   : > { %v18894_v37 = vadd.f32 %v12200_v62, %v12199_v51 }
 0x4c2   : > { %v12202_v33 = vpop.f32.mrf.mxu1 }
 0x4c4   : > { %v12203_v41 = vpop.f32.mrf.mxu1 }
 0x4c5   : > { %v18896_v55 = vadd.f32 %v12203_v41, %v12202_v33 }
 0x4c6   : > { %v12205_v6 = vpop.f32.mrf.mxu1 }
 0x4c8   : > { %v12206_v18 = vpop.f32.mrf.mxu1 }
 0x4c9   : > { %v18898_v15 = vadd.f32 %v12206_v18, %v12205_v6 }
 0x4ca   : > { %v12208_v13 = vpop.f32.mrf.mxu1 }
 0x4cc   : > { %v12209_v40 = vpop.f32.mrf.mxu1 }
 0x4cd   : > { %v18900_v52 = vadd.f32 %v12209_v40, %v12208_v13 }
 0x4ce   : > { %v12211_v12 = vpop.f32.mrf.mxu1 }
 0x4d0   : > { %v12212_v25 = vpop.f32.mrf.mxu1 }
 0x4d1   : > { %v18902_v22 = vadd.f32 %v12212_v25, %v12211_v12 }
 0x4d2   : > { %v12214_v20 = vpop.f32.mrf.mxu1 }
 0x4d4   : > { %v12215_v30 = vpop.f32.mrf.mxu1 }
 0x4d5   : > { %v18904_v44 = vadd.f32 %v12215_v30, %v12214_v20 }
 0x4d6   : > { %v12217_v48 = vpop.f32.mrf.mxu1 }
 0x4d8   : > { %v12218_v11 = vpop.f32.mrf.mxu1 }
 0x4d9   : > { %v18906_v32 = vadd.f32 %v12218_v11, %v12217_v48 }
 0x4da   : > { %v12220_v35 = vpop.f32.mrf.mxu1 }
 0x4dc   : > { %v12221_v50 = vpop.f32.mrf.mxu1 }
 0x4dd   : > { %v18908_v47 = vadd.f32 %v12221_v50, %v12220_v35 }
 0x4de   : > { %v12223_v29 = vpop.f32.mrf.mxu1 }
 0x4e0   : > { %v12224_v57 = vpop.f32.mrf.mxu1 }
 0x4e1   : > { %v18910_v54 = vadd.f32 %v12224_v57, %v12223_v29 }
 0x4e2   : > { %v12226_v14 = vpop.f32.mrf.mxu1 }
 0x4e4   : > { %v12227_v0 = vpop.f32.mrf.mxu1 }
 0x4e5   : > { %v18912_v19 = vadd.f32 %v12227_v0, %v12226_v14 }
 0x4e6   : > { %v12229_v16 = vpop.f32.mrf.mxu1 }
 0x4e8   : > { %v12230_v28 = vpop.f32.mrf.mxu1 }
 0x4e9   : > { %v18914_v49 = vadd.f32 %v12230_v28, %v12229_v16 }
 0x4ea   : > { %v12232_v51 = vpop.f32.mrf.mxu1 }
 0x4ec   : > { %v12233_v62 = vpop.f32.mrf.mxu1 }
 0x4ed   : > { %v18916_v33 = vadd.f32 %v12233_v62, %v12232_v51 }
 0x4ee   : > { %v12235_v41 = vpop.f32.mrf.mxu1 }
 0x4f0   : > { %v12236_v6 = vpop.f32.mrf.mxu1 }
 0x4f1   : > { %v18918_v18 = vadd.f32 %v12236_v6, %v12235_v41 }
 0x4fa   : > { %v8852_v13 = vpop.f32.mrf.mxu1 }
 0x4fb   : > { %v8921_v25 = vmul.f32 %v8852_v13, %v18639_v3 }
 0x4fc   : > { %v8854_v40 = vpop.f32.mrf.mxu1 }
 0x4fd   : > { %v8922_v12 = vmul.f32 %v8854_v40, %v18636_v21  ;;  %v8949_v29 = vadd.f32 %v8921_v25, %v18649_v56  ;;  %v13591_v25 = vld [vmem:[%s19621_s4 + $0x270] ss:$8 sps:$4 sm:$0xff]  }
 0x4fe   : > { %v8856_v20 = vpop.f32.mrf.mxu1 }
 0x4ff   : > { %v8923_v30 = vmul.f32 %v8856_v20, %v18639_v3  ;;  %v8950_v11 = vadd.f32 %v8922_v12, %v18645_v36  ;;  %v8977_v62 = vmax.f32 %v8949_v29, 0.0 }
 0x500   : > { %v8858_v48 = vpop.f32.mrf.mxu1 }
 0x501   : > { %v8951_v35 = vadd.f32 %v8923_v30, %v18649_v56  ;;  %v8924_v50 = vmul.f32 %v8858_v48, %v18636_v21  ;;  %v8978_v28 = vmax.f32 %v8950_v11, 0.0  ;;  %v13596_v48 = vld [vmem:[%s19621_s4 + $0x264] ss:$8 sps:$4 sm:$0xff]  }
 0x502   : > { %v8862_v57 = vpop.f32.mrf.mxu1 }
 0x503   : > { %v8952_v14 = vadd.f32 %v8924_v50, %v18645_v36  ;;  %v8979_v0 = vmax.f32 %v8951_v35, 0.0  ;;  %v8925_v41 = vmul.f32 %v8862_v57, %v18639_v3 }
 0x504   : > { %v8864_v16 = vpop.f32.mrf.mxu1 }
 0x505   : > { %v8980_v51 = vmax.f32 %v8952_v14, 0.0  ;;  %v8926_v6 = vmul.f32 %v8864_v16, %v18636_v21  ;;  %v9005_v20 = vpack.c.bf16 %v8979_v0, %v8977_v62  ;;  %v8953_v29 = vadd.f32 %v8925_v41, %v18649_v56  ;;  %v13594_v0 = vld [vmem:[%s19621_s4 + $0x260] ss:$8 sps:$4 sm:$0xff]  }
 0x506   : > { %v8866_v13 = vpop.f32.mrf.mxu1 }
 0x507   : > { %v8927_v40 = vmul.f32 %v8866_v13, %v18639_v3  ;;  %v9006_v12 = vpack.c.bf16 %v8980_v51, %v8978_v28  ;;  %v8954_v11 = vadd.f32 %v8926_v6, %v18645_v36  ;;  %v13599_v51 = vld [vmem:[%s19621_s4 + $0x254] ss:$8 sps:$4 sm:$0xff]   ;;  %v8981_v13 = vmax.f32 %v8953_v29, 0.0 }
 0x508   : > { %v8868_v30 = vpop.f32.mrf.mxu1 }
 0x509   : > { %v8955_v35 = vadd.f32 %v8927_v40, %v18649_v56  ;;  %v8928_v50 = vmul.f32 %v8868_v30, %v18636_v21  ;;  %9051 = vmatprep.mubr.bf16.mxu0 %v9006_v12  ;;  %v8982_v62 = vmax.f32 %v8954_v11, 0.0  ;;  %v13597_v30 = vld [vmem:[%s19621_s4 + $0x250] ss:$8 sps:$4 sm:$0xff]   ;;  %v13602_v11 = vld [vmem:[%s19621_s4 + $0x244] ss:$8 sps:$4 sm:$0xff]  }
 0x50a   : > { %v8872_v57 = vpop.f32.mrf.mxu1  ;;  %9052 = vmatmul.mubr.bf16.vlgmr.msra.gmra.mxu0 %v9005_v20 }
 0x50b   : > { %v8956_v14 = vadd.f32 %v8928_v50, %v18645_v36  ;;  %9386 = vmatpush1.bf16.msra.mxu0 %v13591_v25  ;;  %v8983_v16 = vmax.f32 %v8955_v35, 0.0  ;;  %v8929_v40 = vmul.f32 %v8872_v57, %v18639_v3 }
 0x50c   : > { %v8874_v28 = vpop.f32.mrf.mxu1  ;;  %9387 = vmatprep.subr.bf16.mxu0 %v13596_v48 }
 0x50d   : > { %v8984_v6 = vmax.f32 %v8956_v14, 0.0  ;;  %v8930_v41 = vmul.f32 %v8874_v28, %v18636_v21  ;;  %v9007_v48 = vpack.c.bf16 %v8983_v16, %v8981_v13  ;;  %v8957_v14 = vadd.f32 %v8929_v40, %v18649_v56  ;;  %v13600_v16 = vld [vmem:[%s19621_s4 + $0x240] ss:$8 sps:$4 sm:$0xff]  }
 0x50e   : > { %v8876_v12 = vpop.f32.mrf.mxu1 }
 0x50f   : > { %v8931_v25 = vmul.f32 %v8876_v12, %v18639_v3  ;;  %9388 = vmatpush1.bf16.msra.mxu0 %v13594_v0  ;;  %v9008_v20 = vpack.c.bf16 %v8984_v6, %v8982_v62  ;;  %v8958_v50 = vadd.f32 %v8930_v41, %v18645_v36  ;;  %v13605_v6 = vld [vmem:[%s19621_s4 + $0x234] ss:$8 sps:$4 sm:$0xff]   ;;  %v8985_v12 = vmax.f32 %v8957_v14, 0.0 }
 0x510   : > { %v8878_v35 = vpop.f32.mrf.mxu1  ;;  %9389 = vmatprep.subr.bf16.mxu0 %v13599_v51 }
 0x511   : > { %v8959_v29 = vadd.f32 %v8931_v25, %v18649_v56  ;;  %v8932_v57 = vmul.f32 %v8878_v35, %v18636_v21  ;;  %9059 = vmatprep.mubr.bf16.mxu0 %v9008_v20  ;;  %v8986_v41 = vmax.f32 %v8958_v50, 0.0  ;;  %v13603_v35 = vld [vmem:[%s19621_s4 + $0x230] ss:$8 sps:$4 sm:$0xff]   ;;  %v13608_v50 = vld [vmem:[%s19621_s4 + $0x224] ss:$8 sps:$4 sm:$0xff]  }
 0x512   : > { %v8882_v0 = vpop.f32.mrf.mxu1  ;;  %9060 = vmatmul.mubr.bf16.gmra.mxu0 %v9007_v48 }
 0x513   : > { %v8960_v28 = vadd.f32 %v8932_v57, %v18645_v36  ;;  %9390 = vmatpush1.bf16.msra.mxu0 %v13597_v30  ;;  %v8987_v51 = vmax.f32 %v8959_v29, 0.0  ;;  %v8933_v25 = vmul.f32 %v8882_v0, %v18639_v3 }
 0x514   : > { %v8884_v62 = vpop.f32.mrf.mxu1  ;;  %9391 = vmatprep.subr.bf16.mxu0 %v13602_v11 }
 0x515   : > { %v8988_v13 = vmax.f32 %v8960_v28, 0.0  ;;  %v8934_v40 = vmul.f32 %v8884_v62, %v18636_v21  ;;  %v9009_v11 = vpack.c.bf16 %v8987_v51, %v8985_v12  ;;  %v8961_v28 = vadd.f32 %v8933_v25, %v18649_v56  ;;  %v13606_v51 = vld [vmem:[%s19621_s4 + $0x220] ss:$8 sps:$4 sm:$0xff]  }
 0x516   : > { %v8886_v20 = vpop.f32.mrf.mxu1 }
 0x517   : > { %v8935_v30 = vmul.f32 %v8886_v20, %v18639_v3  ;;  %9392 = vmatpush1.bf16.msra.mxu0 %v13600_v16  ;;  %v9010_v48 = vpack.c.bf16 %v8988_v13, %v8986_v41  ;;  %v8962_v57 = vadd.f32 %v8934_v40, %v18645_v36  ;;  %v13611_v13 = vld [vmem:[%s19621_s4 + $0x214] ss:$8 sps:$4 sm:$0xff]   ;;  %v8989_v20 = vmax.f32 %v8961_v28, 0.0 }
 0x518   : > { %v8888_v29 = vpop.f32.mrf.mxu1  ;;  %9393 = vmatprep.subr.bf16.mxu0 %v13605_v6 }
 0x519   : > { %v8963_v14 = vadd.f32 %v8935_v30, %v18649_v56  ;;  %v8936_v0 = vmul.f32 %v8888_v29, %v18636_v21  ;;  %9067 = vmatprep.mubr.bf16.mxu0 %v9010_v48  ;;  %v8990_v40 = vmax.f32 %v8962_v57, 0.0  ;;  %v13609_v29 = vld [vmem:[%s19621_s4 + $0x210] ss:$8 sps:$4 sm:$0xff]   ;;  %v13614_v57 = vld [vmem:[%s19621_s4 + $0x204] ss:$8 sps:$4 sm:$0xff]  }
 0x51a   : > { %v8892_v16 = vpop.f32.mrf.mxu1  ;;  %9068 = vmatmul.mubr.bf16.gmra.mxu0 %v9009_v11 }
 0x51b   : > { %v8964_v62 = vadd.f32 %v8936_v0, %v18645_v36  ;;  %9394 = vmatpush1.bf16.msra.mxu0 %v13603_v35  ;;  %v8991_v6 = vmax.f32 %v8963_v14, 0.0  ;;  %v8937_v30 = vmul.f32 %v8892_v16, %v18639_v3 }
 0x51c   : > { %v8894_v41 = vpop.f32.mrf.mxu1  ;;  %9395 = vmatprep.subr.bf16.mxu0 %v13608_v50 }
 0x51d   : > { %v8992_v12 = vmax.f32 %v8964_v62, 0.0  ;;  %v8938_v25 = vmul.f32 %v8894_v41, %v18636_v21  ;;  %v9011_v50 = vpack.c.bf16 %v8991_v6, %v8989_v20  ;;  %v8965_v62 = vadd.f32 %v8937_v30, %v18649_v56  ;;  %v13612_v6 = vld [vmem:[%s19621_s4 + $0x200] ss:$8 sps:$4 sm:$0xff]  }
 0x51e   : > { %v8896_v48 = vpop.f32.mrf.mxu1 }
 0x51f   : > { %v8939_v35 = vmul.f32 %v8896_v48, %v18639_v3  ;;  %9396 = vmatpush1.bf16.msra.mxu0 %v13606_v51  ;;  %v9012_v11 = vpack.c.bf16 %v8992_v12, %v8990_v40  ;;  %v8966_v0 = vadd.f32 %v8938_v25, %v18645_v36  ;;  %v13617_v12 = vld [vmem:[%s19621_s4 + $0x2f4] ss:$8 sps:$4 sm:$0xff]   ;;  %v8993_v48 = vmax.f32 %v8965_v62, 0.0 }
 0x520   : > { %v8898_v14 = vpop.f32.mrf.mxu1  ;;  %9397 = vmatprep.subr.bf16.mxu0 %v13611_v13 }
 0x521   : > { %v8967_v28 = vadd.f32 %v8939_v35, %v18649_v56  ;;  %v8940_v16 = vmul.f32 %v8898_v14, %v18636_v21  ;;  %9075 = vmatprep.mubr.bf16.mxu0 %v9012_v11  ;;  %v8994_v25 = vmax.f32 %v8966_v0, 0.0  ;;  %v13615_v14 = vld [vmem:[%s19621_s4 + $0x2f0] ss:$8 sps:$4 sm:$0xff]   ;;  %v13620_v0 = vld [vmem:[%s19621_s4 + $0x2e4] ss:$8 sps:$4 sm:$0xff]  }
 0x522   : > { %v8902_v51 = vpop.f32.mrf.mxu1  ;;  %9076 = vmatmul.mubr.bf16.gmra.mxu0 %v9011_v50 }
 0x523   : > { %v8968_v41 = vadd.f32 %v8940_v16, %v18645_v36  ;;  %9398 = vmatpush1.bf16.msra.mxu0 %v13609_v29  ;;  %v8995_v13 = vmax.f32 %v8967_v28, 0.0  ;;  %v8941_v35 = vmul.f32 %v8902_v51, %v18639_v3 }
 0x524   : > { %v8904_v40 = vpop.f32.mrf.mxu1  ;;  %9399 = vmatprep.subr.bf16.mxu0 %v13614_v57 }
 0x525   : > { %v8996_v20 = vmax.f32 %v8968_v41, 0.0  ;;  %v8942_v30 = vmul.f32 %v8904_v40, %v18636_v21  ;;  %v9013_v57 = vpack.c.bf16 %v8995_v13, %v8993_v48  ;;  %v8969_v41 = vadd.f32 %v8941_v35, %v18649_v56  ;;  %v13618_v13 = vld [vmem:[%s19621_s4 + $0x2e0] ss:$8 sps:$4 sm:$0xff]  }
 0x526   : > { %v8906_v11 = vpop.f32.mrf.mxu1 }
 0x527   : > { %v8943_v29 = vmul.f32 %v8906_v11, %v18639_v3  ;;  %9400 = vmatpush1.bf16.msra.mxu0 %v13612_v6  ;;  %v9014_v50 = vpack.c.bf16 %v8996_v20, %v8994_v25  ;;  %v8970_v16 = vadd.f32 %v8942_v30, %v18645_v36  ;;  %v13623_v20 = vld [vmem:[%s19621_s4 + $0x2d4] ss:$8 sps:$4 sm:$0xff]   ;;  %v8997_v11 = vmax.f32 %v8969_v41, 0.0 }
 0x528   : > { %v8908_v28 = vpop.f32.mrf.mxu1  ;;  %9401 = vmatprep.subr.bf16.mxu0 %v13617_v12 }
 0x529   : > { %v8971_v62 = vadd.f32 %v8943_v29, %v18649_v56  ;;  %v8944_v51 = vmul.f32 %v8908_v28, %v18636_v21  ;;  %9083 = vmatprep.mubr.bf16.mxu0 %v9014_v50  ;;  %v8998_v30 = vmax.f32 %v8970_v16, 0.0  ;;  %v13621_v28 = vld [vmem:[%s19621_s4 + $0x2d0] ss:$8 sps:$4 sm:$0xff]   ;;  %v13626_v16 = vld [vmem:[%s19621_s4 + $0x2c4] ss:$8 sps:$4 sm:$0xff]  }
 0x52a   : > { %v8912_v6 = vpop.f32.mrf.mxu1  ;;  %9084 = vmatmul.mubr.bf16.gmra.mxu0 %v9013_v57 }
 0x52b   : > { %v8972_v40 = vadd.f32 %v8944_v51, %v18645_v36  ;;  %9402 = vmatpush2.bf16.msra.mxu0 %v13615_v14  ;;  %v8999_v12 = vmax.f32 %v8971_v62, 0.0  ;;  %v8945_v29 = vmul.f32 %v8912_v6, %v18639_v3 }
 0x52c   : > { %v8914_v25 = vpop.f32.mrf.mxu1  ;;  %9403 = vmatprep.subr.bf16.mxu0 %v13620_v0 }
 0x52d   : > { %v9000_v48 = vmax.f32 %v8972_v40, 0.0  ;;  %v8946_v35 = vmul.f32 %v8914_v25, %v18636_v21  ;;  %v9015_v0 = vpack.c.bf16 %v8999_v12, %v8997_v11  ;;  %v8973_v40 = vadd.f32 %v8945_v29, %v18649_v56  ;;  %v13624_v12 = vld [vmem:[%s19621_s4 + $0x2c0] ss:$8 sps:$4 sm:$0xff]   ;;  %v13627_v29 = vld [vmem:[%s19621_s4 + $0x2b0] ss:$8 sps:$4 sm:$0xff]  }
 0x52e   : > { %v8916_v50 = vpop.f32.mrf.mxu1 }
 0x52f   : > { %v8947_v14 = vmul.f32 %v8916_v50, %v18639_v3  ;;  %9404 = vmatpush2.bf16.msra.mxu0 %v13618_v13  ;;  %v9016_v57 = vpack.c.bf16 %v9000_v48, %v8998_v30  ;;  %v8974_v51 = vadd.f32 %v8946_v35, %v18645_v36  ;;  %v9001_v35 = vmax.f32 %v8973_v40, 0.0 }
 0x530   : > { %v8918_v62 = vpop.f32.mrf.mxu1  ;;  %9405 = vmatprep.subr.bf16.mxu0 %v13623_v20  ;;  %v13629_v20 = vld [vmem:[%s19621_s4 + $0x2b4] ss:$8 sps:$4 sm:$0xff]  }
 0x531   : > { %v8975_v41 = vadd.f32 %v8947_v14, %v18649_v56  ;;  %v8948_v6 = vmul.f32 %v8918_v62, %v18636_v21  ;;  %9091 = vmatprep.mubr.bf16.mxu0 %v9016_v57  ;;  %v9002_v30 = vmax.f32 %v8974_v51, 0.0  ;;  %v13632_v14 = vld [vmem:[%s19621_s4 + $0x2a4] ss:$8 sps:$4 sm:$0xff]   ;;  %v13630_v57 = vld [vmem:[%s19621_s4 + $0x2a0] ss:$8 sps:$4 sm:$0xff]  }
 0x532   : > { %9092 = vmatmul.mubr.bf16.gmra.mxu0 %v9015_v0  ;;  %v13633_v0 = vld [vmem:[%s19621_s4 + $0x290] ss:$8 sps:$4 sm:$0xff]   ;;  %v13638_v62 = vld [vmem:[%s19621_s4 + $0x284] ss:$8 sps:$4 sm:$0xff]  }
 0x533   : > { %v8976_v13 = vadd.f32 %v8948_v6, %v18645_v36  ;;  %9406 = vmatpush2.bf16.msra.mxu0 %v13621_v28  ;;  %v9003_v25 = vmax.f32 %v8975_v41, 0.0  ;;  %v13635_v28 = vld [vmem:[%s19621_s4 + $0x294] ss:$8 sps:$4 sm:$0xff]  }
 0x534   : > { %9407 = vmatprep.subr.bf16.mxu0 %v13626_v16  ;;  %v13636_v16 = vld [vmem:[%s19621_s4 + $0x280] ss:$8 sps:$4 sm:$0xff]  }
 0x535   : > { %v9004_v48 = vmax.f32 %v8976_v13, 0.0  ;;  %v9017_v50 = vpack.c.bf16 %v9003_v25, %v9001_v35 }
 0x537   : > { %9408 = vmatpush2.bf16.msra.mxu0 %v13624_v12  ;;  %v9018_v11 = vpack.c.bf16 %v9004_v48, %v9002_v30 }
 0x538   : > { %9409 = vmatprep.subr.bf16.mxu0 %v13629_v20 }
 0x539   : > { %9099 = vmatprep.mubr.bf16.mxu0 %v9018_v11 }
 0x53a   : > { %9100 = vmatmul.mubr.bf16.gmra.mxu0 %v9017_v50 }
 0x53b   : > { %9410 = vmatpush2.bf16.msra.mxu0 %v13627_v29  ;;  %9417 = vmatprep.mubr.bf16.mxu0 %v18443_v46 }
 0x53c   : > { %9411 = vmatprep.subr.bf16.mxu0 %v13632_v14 }
 0x53f   : > { %9412 = vmatpush2.bf16.msra.mxu0 %v13630_v57 }
 0x540   : > { %9413 = vmatprep.subr.bf16.mxu0 %v13635_v28 }
 0x543   : > { %9414 = vmatpush2.bf16.msra.mxu0 %v13633_v0 }
 0x544   : > { %9415 = vmatprep.subr.bf16.mxu0 %v13638_v62 }
 0x547   : > { %9416 = vmatpush2.bf16.msra.mxu0 %v13636_v16 }
 0x548   : > { %12354 = vmatprep.subr.bf16.mxu0 %v18803_v53  ;;  %v13983_v53 = vld [vmem:[%s19624_s7 + $0x48] sm:$0xff]  }
 0x54a   : > { %9418 = vmatmul.mubr.bf16.vlgmr.msra.gmra.mxu0 %v18436_v4 }
 0x54b   : > { %9427 = vmatprep.mubr.bf16.mxu0 %v18477_v58  ;;  %12355 = vmatpush3.bf16.msra.mxu0 %v18811_v26  ;;  %v13984_v26 = vld [vmem:[%s19624_s7 + $0x8] sm:$0xff]  }
 0x54c   : > { %12356 = vmatprep.subr.bf16.mxu0 %v18817_v42  ;;  %v13985_v42 = vld [vmem:[%s19624_s7 + $0x40] sm:$0xff]  }
 0x54f   : > { %12357 = vmatpush3.bf16.msra.mxu0 %v18823_v59  ;;  %v13986_v59 = vld [vmem:[%s19624_s7] sm:$0xff]  }
 0x550   : > { %12358 = vmatprep.subr.bf16.mxu0 %v18829_v34  ;;  %v13641_v34 = vld [vmem:[%s19621_s4 + $0x374] ss:$8 sps:$4 sm:$0xff]  }
 0x551   : > { %9952 = vmatprep.subr.bf16.mxu1 %v13641_v34 }
 0x552   : > { %9428 = vmatmul.mubr.bf16.gmra.mxu0 %v18468_v24 }
 0x553   : > { %9437 = vmatprep.mubr.bf16.mxu0 %v18508_v2  ;;  %12359 = vmatpush3.bf16.msra.mxu0 %v18837_v63 }
 0x554   : > { %12360 = vmatprep.subr.bf16.mxu0 %v18843_v27 }
 0x557   : > { %12361 = vmatpush3.bf16.msra.mxu0 %v18849_v60 }
 0x558   : > { %12362 = vmatprep.subr.bf16.mxu0 %v18855_v45  ;;  %v19113_v45 = vld [vmem:[%s19625_s8] ss:$0 sm:$0xff] }
 0x55a   : > { %9438 = vmatmul.mubr.bf16.gmra.mxu0 %v18500_v10 }
 0x55b   : > { %9447 = vmatprep.mubr.bf16.mxu0 %v18540_v31  ;;  %12363 = vmatpush3.bf16.msra.mxu0 %v18863_v61 }
 0x55c   : > { %12364 = vmatprep.subr.bf16.mxu0 %v18869_v9 }
 0x55f   : > { %12365 = vmatpush3.bf16.msra.mxu0 %v18875_v43 }
 0x560   : > { %12366 = vmatprep.subr.bf16.mxu0 %v13983_v53 }
 0x562   : > { %9448 = vmatmul.mubr.bf16.gmra.mxu0 %v18532_v23 }
 0x563   : > { %9457 = vmatprep.mubr.bf16.mxu0 %v18569_v39  ;;  %12367 = vmatpush3.bf16.msra.mxu0 %v13984_v26 }
 0x564   : > { %12368 = vmatprep.subr.bf16.mxu0 %v13985_v42 }
 0x567   : > { %12369 = vmatpush3.bf16.msra.mxu0 %v13986_v59 }
 0x56a   : > { %9458 = vmatmul.mubr.bf16.gmra.mxu0 %v18561_v7 }
 0x56b   : > { %9467 = vmatprep.mubr.bf16.mxu0 %v18587_v38 }
 0x572   : > { %9468 = vmatmul.mubr.bf16.gmra.mxu0 %v18583_v1 }
 0x573   : > { %9477 = vmatprep.mubr.bf16.mxu0 %v18597_v17 }
 0x57a   : > { %9478 = vmatmul.mubr.bf16.gmra.mxu0 %v18595_v5 }
 0x5ca   : > { %v12254_v63 = vpop.f32.mrf.mxu0 }
 0x5cc   : > { %v12255_v27 = vpop.f32.mrf.mxu0 }
 0x5cd   : > { %v12256_v60 = vadd.f32 %v12255_v27, %v12254_v63 }
 0x5ce   : > { %v12257_v61 = vpop.f32.mrf.mxu0 }
 0x5cf   : > { %v9054_v9 = vadd.f32 %v12256_v60, %v19113_v45 }
 0x5d0   : > { %v12258_v43 = vpop.f32.mrf.mxu0 }
 0x5d1   : > { %v12008_v51 = vmul.f32 -1.442695, %v9054_v9  ;;  %v12259_v41 = vadd.f32 %v12258_v43, %v12257_v61 }
 0x5d2   : > { %v12260_v6 = vpop.f32.mrf.mxu0 }
 0x5d3   : > { %13687 = vpow2.f32 %v12008_v51  ;;  %v9057_v40 = vadd.f32 %v12259_v41, %v19113_v45 }
 0x5d4   : > { %v12261_v13 = vpop.f32.mrf.mxu0 }
 0x5d5   : > { %v12009_v12 = vmul.f32 -1.442695, %v9057_v40  ;;  %v12262_v25 = vadd.f32 %v12261_v13, %v12260_v6 }
 0x5d6   : > { %v12263_v20 = vpop.f32.mrf.mxu0 }
 0x5d7   : > { %13689 = vpow2.f32 %v12009_v12  ;;  %v9062_v30 = vadd.f32 %v12262_v25, %v19113_v45 }
 0x5d8   : > { %v12264_v48 = vpop.f32.mrf.mxu0 }
 0x5d9   : > { %v12010_v35 = vmul.f32 -1.442695, %v9062_v30  ;;  %v12265_v11 = vadd.f32 %v12264_v48, %v12263_v20 }
 0x5da   : > { %v12266_v29 = vpop.f32.mrf.mxu0 }
 0x5db   : > { %13691 = vpow2.f32 %v12010_v35  ;;  %v9065_v50 = vadd.f32 %v12265_v11, %v19113_v45 }
 0x5dc   : > { %v12267_v14 = vpop.f32.mrf.mxu0 }
 0x5dd   : > { %v12011_v57 = vmul.f32 -1.442695, %v9065_v50  ;;  %v12268_v28 = vadd.f32 %v12267_v14, %v12266_v29 }
 0x5de   : > { %v12269_v0 = vpop.f32.mrf.mxu0 }
 0x5df   : > { %13693 = vpow2.f32 %v12011_v57  ;;  %v9070_v62 = vadd.f32 %v12268_v28, %v19113_v45 }
 0x5e0   : > { %v13688_v16 = vpop.eup %13687  ;;  %v12270_v53 = vpop.f32.mrf.mxu0 }
 0x5e1   : > { %v9150_v26 = vadd.f32 1.0, %v13688_v16  ;;  %v12012_v42 = vmul.f32 -1.442695, %v9070_v62  ;;  %v12271_v59 = vadd.f32 %v12270_v53, %v12269_v0 }
 0x5e2   : > { %v12272_v34 = vpop.f32.mrf.mxu0 }
 0x5e3   : > { %13695 = vrcp.f32 %v9150_v26  ;;  %v9073_v63 = vadd.f32 %v12271_v59, %v19113_v45 }
 0x5e4   : > { %v13690_v27 = vpop.eup %13689  ;;  %13697 = vpow2.f32 %v12012_v42  ;;  %v12273_v60 = vpop.f32.mrf.mxu0 }
 0x5e5   : > { %v9151_v61 = vadd.f32 1.0, %v13690_v27  ;;  %v12013_v9 = vmul.f32 -1.442695, %v9073_v63  ;;  %v12274_v43 = vadd.f32 %v12273_v60, %v12272_v34 }
 0x5e6   : > { %v12275_v51 = vpop.f32.mrf.mxu0 }
 0x5e7   : > { %13699 = vrcp.f32 %v9151_v61  ;;  %v9078_v41 = vadd.f32 %v12274_v43, %v19113_v45 }
 0x5e8   : > { %v13692_v6 = vpop.eup %13691  ;;  %13701 = vpow2.f32 %v12013_v9  ;;  %v12276_v40 = vpop.f32.mrf.mxu0 }
 0x5e9   : > { %v9152_v13 = vadd.f32 1.0, %v13692_v6  ;;  %v12014_v12 = vmul.f32 -1.442695, %v9078_v41  ;;  %v12277_v25 = vadd.f32 %v12276_v40, %v12275_v51 }
 0x5ea   : > { %v12278_v20 = vpop.f32.mrf.mxu0 }
 0x5eb   : > { %13703 = vrcp.f32 %v9152_v13  ;;  %v9081_v30 = vadd.f32 %v12277_v25, %v19113_v45 }
 0x5ec   : > { %v13694_v48 = vpop.eup %13693  ;;  %13705 = vpow2.f32 %v12014_v12  ;;  %v12279_v35 = vpop.f32.mrf.mxu0 }
 0x5ed   : > { %v9153_v11 = vadd.f32 1.0, %v13694_v48  ;;  %v12015_v29 = vmul.f32 -1.442695, %v9081_v30  ;;  %v12280_v50 = vadd.f32 %v12279_v35, %v12278_v20 }
 0x5ee   : > { %v12281_v14 = vpop.f32.mrf.mxu0 }
 0x5ef   : > { %13707 = vrcp.f32 %v9153_v11  ;;  %v9086_v57 = vadd.f32 %v12280_v50, %v19113_v45 }
 0x5f0   : > { %v13696_v28 = vpop.eup %13695  ;;  %13709 = vpow2.f32 %v12015_v29  ;;  %v12282_v0 = vpop.f32.mrf.mxu0 }
 0x5f1   : > { %v13698_v62 = vpop.eup %13697  ;;  %v12016_v16 = vmul.f32 -1.442695, %v9086_v57  ;;  %v12283_v53 = vadd.f32 %v12282_v0, %v12281_v14  ;;  %10340 = vrot.lane.b32.xlu0 %v13696_v28, %s14028_s27 }
 0x5f2   : > { %v9154_v26 = vadd.f32 1.0, %v13698_v62  ;;  %v12284_v42 = vpop.f32.mrf.mxu0 }
 0x5f3   : > { %13711 = vpow2.f32 %v12016_v16  ;;  %v9089_v59 = vadd.f32 %v12283_v53, %v19113_v45 }
 0x5f4   : > { %v13700_v34 = vpop.eup %13699  ;;  %13713 = vrcp.f32 %v9154_v26  ;;  %v12285_v63 = vpop.f32.mrf.mxu0 }
 0x5f5   : > { %v13702_v27 = vpop.eup %13701  ;;  %v12017_v60 = vmul.f32 -1.442695, %v9089_v59  ;;  %v12286_v61 = vadd.f32 %v12285_v63, %v12284_v42  ;;  %10342 = vrot.lane.b32.xlu0 %v13700_v34, %s14028_s27 }
 0x5f6   : > { %v9155_v9 = vadd.f32 1.0, %v13702_v27  ;;  %v12287_v43 = vpop.f32.mrf.mxu0 }
 0x5f7   : > { %13715 = vpow2.f32 %v12017_v60  ;;  %v9094_v51 = vadd.f32 %v12286_v61, %v19113_v45 }
 0x5f8   : > { %v13704_v41 = vpop.eup %13703  ;;  %13717 = vrcp.f32 %v9155_v9  ;;  %v12288_v6 = vpop.f32.mrf.mxu0 }
 0x5f9   : > { %v13706_v40 = vpop.eup %13705  ;;  %v12018_v13 = vmul.f32 -1.442695, %v9094_v51  ;;  %v12289_v12 = vadd.f32 %v12288_v6, %v12287_v43  ;;  %10344 = vrot.lane.b32.xlu1 %v13704_v41, %s14028_s27 }
 0x5fa   : > { %v9156_v25 = vadd.f32 1.0, %v13706_v40  ;;  %v12290_v20 = vpop.f32.mrf.mxu0 }
 0x5fb   : > { %13719 = vpow2.f32 %v12018_v13  ;;  %v9097_v30 = vadd.f32 %v12289_v12, %v19113_v45 }
 0x5fc   : > { %v13708_v48 = vpop.eup %13707  ;;  %13721 = vrcp.f32 %v9156_v25  ;;  %v12291_v35 = vpop.f32.mrf.mxu0 }
 0x5fd   : > { %v13710_v11 = vpop.eup %13709  ;;  %v12019_v29 = vmul.f32 -1.442695, %v9097_v30  ;;  %v12292_v50 = vadd.f32 %v12291_v35, %v12290_v20  ;;  %10346 = vrot.lane.b32.xlu1 %v13708_v48, %s14028_s27 }
 0x5fe   : > { %v9157_v14 = vadd.f32 1.0, %v13710_v11  ;;  %v12293_v57 = vpop.f32.mrf.mxu0 }
 0x5ff   : > { %13723 = vpow2.f32 %v12019_v29  ;;  %v9102_v28 = vadd.f32 %v12292_v50, %v19113_v45 }
 0x600   : > { %v13712_v0 = vpop.eup %13711  ;;  %13725 = vrcp.f32 %v9157_v14  ;;  %v12294_v62 = vpop.f32.mrf.mxu0 }
 0x601   : > { %v13714_v16 = vpop.eup %13713  ;;  %v9158_v53 = vadd.f32 1.0, %v13712_v0  ;;  %v12020_v26 = vmul.f32 -1.442695, %v9102_v28  ;;  %v12295_v42 = vadd.f32 %v12294_v62, %v12293_v57 }
 0x602   : > { %10348 = vrot.lane.b32.xlu0 %v13714_v16, %s14028_s27 }
 0x603   : > { %13727 = vrcp.f32 %v9158_v53  ;;  %v9105_v59 = vadd.f32 %v12295_v42, %v19113_v45 }
 0x604   : > { %v13716_v34 = vpop.eup %13715  ;;  %13729 = vpow2.f32 %v12020_v26 }
 0x605   : > { %v13718_v63 = vpop.eup %13717  ;;  %v9159_v27 = vadd.f32 1.0, %v13716_v34  ;;  %v12021_v60 = vmul.f32 -1.442695, %v9105_v59 }
 0x606   : > { %10350 = vrot.lane.b32.xlu1 %v13718_v63, %s14028_s27 }
 0x607   : > { %13731 = vrcp.f32 %v9159_v27 }
 0x608   : > { %v13720_v61 = vpop.eup %13719  ;;  %13733 = vpow2.f32 %v12021_v60 }
 0x609   : > { %v13722_v9 = vpop.eup %13721  ;;  %v9160_v43 = vadd.f32 1.0, %v13720_v61 }
 0x60a   : > { %10352 = vrot.lane.b32.xlu0 %v13722_v9, %s14028_s27  ;;  %v9419_v51 = vpop.f32.mrf.mxu0 }
 0x60b   : > { %13735 = vrcp.f32 %v9160_v43  ;;  %v9488_v25 = vmul.f32 %v9419_v51, %v18639_v3 }
 0x60c   : > { %v13724_v41 = vpop.eup %13723  ;;  %v9421_v6 = vpop.f32.mrf.mxu0 }
 0x60d   : > { %v13726_v40 = vpop.eup %13725  ;;  %v9161_v13 = vadd.f32 1.0, %v13724_v41  ;;  %v9489_v12 = vmul.f32 %v9421_v6, %v18636_v21  ;;  %v9516_v28 = vadd.f32 %v9488_v25, %v18649_v56  ;;  %v13639_v41 = vld [vmem:[%s19621_s4 + $0x370] ss:$8 sps:$4 sm:$0xff]  }
 0x60e   : > { %10354 = vrot.lane.b32.xlu1 %v13726_v40, %s14028_s27  ;;  %v9423_v20 = vpop.f32.mrf.mxu0 }
 0x60f   : > { %13737 = vrcp.f32 %v9161_v13  ;;  %v9490_v30 = vmul.f32 %v9423_v20, %v18639_v3  ;;  %v9517_v29 = vadd.f32 %v9489_v12, %v18645_v36  ;;  %v9544_v60 = vmax.f32 %v9516_v28, 0.0  ;;  %v13644_v12 = vld [vmem:[%s19621_s4 + $0x364] ss:$8 sps:$4 sm:$0xff]   ;;  %v13647_v28 = vld [vmem:[%s19621_s4 + $0x354] ss:$8 sps:$4 sm:$0xff]  }
 0x610   : > { %v13728_v48 = vpop.eup %13727  ;;  %v9425_v35 = vpop.f32.mrf.mxu0 }
 0x611   : > { %v13730_v11 = vpop.eup %13729  ;;  %v9518_v50 = vadd.f32 %v9490_v30, %v18649_v56  ;;  %v9491_v14 = vmul.f32 %v9425_v35, %v18636_v21  ;;  %10356 = vrot.lane.b32.xlu0 %v13728_v48, %s14028_s27  ;;  %v9545_v59 = vmax.f32 %v9517_v29, 0.0  ;;  %v13642_v29 = vld [vmem:[%s19621_s4 + $0x360] ss:$8 sps:$4 sm:$0xff]  }
 0x612   : > { %v9162_v57 = vadd.f32 1.0, %v13730_v11  ;;  %v9429_v0 = vpop.f32.mrf.mxu0 }
 0x613   : > { %v9519_v62 = vadd.f32 %v9491_v14, %v18645_v36  ;;  %v9546_v53 = vmax.f32 %v9518_v50, 0.0  ;;  %v9492_v61 = vmul.f32 %v9429_v0, %v18639_v3 }
 0x614   : > { %v13732_v16 = vpop.eup %13731  ;;  %13739 = vrcp.f32 %v9162_v57  ;;  %v9431_v26 = vpop.f32.mrf.mxu0 }
 0x615   : > { %v13734_v42 = vpop.eup %13733  ;;  %v9547_v34 = vmax.f32 %v9519_v62, 0.0  ;;  %v9493_v63 = vmul.f32 %v9431_v26, %v18636_v21  ;;  %10358 = vrot.lane.b32.xlu1 %v13732_v16, %s14028_s27  ;;  %v9572_v40 = vpack.c.bf16 %v9546_v53, %v9544_v60  ;;  %v9520_v48 = vadd.f32 %v9492_v61, %v18649_v56  ;;  %v13650_v61 = vld [vmem:[%s19621_s4 + $0x344] ss:$8 sps:$4 sm:$0xff]  }
 0x616   : > { %v9163_v27 = vadd.f32 1.0, %v13734_v42  ;;  %v9433_v9 = vpop.f32.mrf.mxu0 }
 0x617   : > { %v9494_v43 = vmul.f32 %v9433_v9, %v18639_v3  ;;  %v9573_v51 = vpack.c.bf16 %v9547_v34, %v9545_v59  ;;  %v9521_v25 = vadd.f32 %v9493_v63, %v18645_v36  ;;  %v9548_v53 = vmax.f32 %v9520_v48, 0.0  ;;  %v13645_v63 = vld [vmem:[%s19621_s4 + $0x350] ss:$8 sps:$4 sm:$0xff]  }
 0x618   : > { %v13736_v6 = vpop.eup %13735  ;;  %13741 = vrcp.f32 %v9163_v27  ;;  %v9435_v13 = vpop.f32.mrf.mxu0 }
 0x619   : > { %v9522_v20 = vadd.f32 %v9494_v43, %v18649_v56  ;;  %v9495_v30 = vmul.f32 %v9435_v13, %v18636_v21  ;;  %9618 = vmatprep.mubr.bf16.mxu1 %v9573_v51  ;;  %10360 = vrot.lane.b32.xlu0 %v13736_v6, %s14028_s27  ;;  %v9549_v0 = vmax.f32 %v9521_v25, 0.0 }
 0x61a   : > { %v9439_v35 = vpop.f32.mrf.mxu0  ;;  %9619 = vmatmul.mubr.bf16.vlgmr.msra.gmra.mxu1 %v9572_v40 }
 0x61b   : > { %v9523_v11 = vadd.f32 %v9495_v30, %v18645_v36  ;;  %9953 = vmatpush1.bf16.msra.mxu1 %v13639_v41  ;;  %v9550_v14 = vmax.f32 %v9522_v20, 0.0  ;;  %v9496_v26 = vmul.f32 %v9439_v35, %v18639_v3  ;;  %v13653_v30 = vld [vmem:[%s19621_s4 + $0x334] ss:$8 sps:$4 sm:$0xff]  }
 0x61c   : > { %v13738_v50 = vpop.eup %13737  ;;  %v9441_v57 = vpop.f32.mrf.mxu0  ;;  %9954 = vmatprep.subr.bf16.mxu1 %v13644_v12  ;;  %v13648_v12 = vld [vmem:[%s19621_s4 + $0x340] ss:$8 sps:$4 sm:$0xff]  }
 0x61d   : > { %v9551_v62 = vmax.f32 %v9523_v11, 0.0  ;;  %v9497_v16 = vmul.f32 %v9441_v57, %v18636_v21  ;;  %10362 = vrot.lane.b32.xlu1 %v13738_v50, %s14028_s27  ;;  %v9574_v27 = vpack.c.bf16 %v9550_v14, %v9548_v53  ;;  %v9524_v6 = vadd.f32 %v9496_v26, %v18649_v56  ;;  %v13656_v26 = vld [vmem:[%s19621_s4 + $0x324] ss:$8 sps:$4 sm:$0xff]  }
 0x61e   : > { %v9443_v42 = vpop.f32.mrf.mxu0 }
 0x61f   : > { %v9498_v59 = vmul.f32 %v9443_v42, %v18639_v3  ;;  %9955 = vmatpush1.bf16.msra.mxu1 %v13642_v29  ;;  %v9575_v34 = vpack.c.bf16 %v9551_v62, %v9549_v0  ;;  %v9525_v43 = vadd.f32 %v9497_v16, %v18645_v36  ;;  %v9552_v50 = vmax.f32 %v9524_v6, 0.0  ;;  %v13651_v62 = vld [vmem:[%s19621_s4 + $0x330] ss:$8 sps:$4 sm:$0xff]  }
 0x620   : > { %v9445_v60 = vpop.f32.mrf.mxu0  ;;  %9956 = vmatprep.subr.bf16.mxu1 %v13647_v28 }
 0x621   : > { %v13740_v9 = vpop.eup %13739  ;;  %v9526_v51 = vadd.f32 %v9498_v59, %v18649_v56  ;;  %v9499_v41 = vmul.f32 %v9445_v60, %v18636_v21  ;;  %9626 = vmatprep.mubr.bf16.mxu1 %v9575_v34  ;;  %v9553_v35 = vmax.f32 %v9525_v43, 0.0 }
 0x622   : > { %v9449_v40 = vpop.f32.mrf.mxu0  ;;  %9627 = vmatmul.mubr.bf16.gmra.mxu1 %v9574_v27  ;;  %10364 = vrot.lane.b32.xlu0 %v13740_v9, %s14028_s27 }
 0x623   : > { %v9527_v13 = vadd.f32 %v9499_v41, %v18645_v36  ;;  %9957 = vmatpush1.bf16.msra.mxu1 %v13645_v63  ;;  %v9554_v25 = vmax.f32 %v9526_v51, 0.0  ;;  %v9500_v14 = vmul.f32 %v9449_v40, %v18639_v3  ;;  %v13659_v51 = vld [vmem:[%s19621_s4 + $0x314] ss:$8 sps:$4 sm:$0xff]  }
 0x624   : > { %v9451_v20 = vpop.f32.mrf.mxu0  ;;  %9958 = vmatprep.subr.bf16.mxu1 %v13650_v61  ;;  %v13654_v61 = vld [vmem:[%s19621_s4 + $0x320] ss:$8 sps:$4 sm:$0xff]  }
 0x625   : > { %v13742_v48 = vpop.eup %13741  ;;  %v9555_v11 = vmax.f32 %v9527_v13, 0.0  ;;  %v9501_v29 = vmul.f32 %v9451_v20, %v18636_v21  ;;  %v9576_v16 = vpack.c.bf16 %v9554_v25, %v9552_v50  ;;  %v9528_v63 = vadd.f32 %v9500_v14, %v18649_v56 }
 0x626   : > { %v9453_v57 = vpop.f32.mrf.mxu0  ;;  %10366 = vrot.lane.b32.xlu1 %v13742_v48, %s14028_s27  ;;  %v13657_v48 = vld [vmem:[%s19621_s4 + $0x310] ss:$8 sps:$4 sm:$0xff]   ;;  %s14029_s27 = smov 16  }
 0x627   : > { %v9502_v28 = vmul.f32 %v9453_v57, %v18639_v3  ;;  %9959 = vmatpush1.bf16.msra.mxu1 %v13648_v12  ;;  %v9577_v0 = vpack.c.bf16 %v9555_v11, %v9553_v35  ;;  %v9529_v42 = vadd.f32 %v9501_v29, %v18645_v36  ;;  %v9556_v13 = vmax.f32 %v9528_v63, 0.0  ;;  %v13662_v29 = vld [vmem:[%s19621_s4 + $0x304] ss:$8 sps:$4 sm:$0xff]  }
 0x628   : > { %v9455_v53 = vpop.f32.mrf.mxu0  ;;  %9960 = vmatprep.subr.bf16.mxu1 %v13653_v30 }
 0x629   : > { %v9530_v59 = vadd.f32 %v9502_v28, %v18649_v56  ;;  %v9503_v34 = vmul.f32 %v9455_v53, %v18636_v21  ;;  %9634 = vmatprep.mubr.bf16.mxu1 %v9577_v0  ;;  %v9557_v41 = vmax.f32 %v9529_v42, 0.0  ;;  %v13665_v42 = vld [vmem:[%s19621_s4 + $0x3f4] ss:$8 sps:$4 sm:$0xff]  }
 0x62a   : > { %v9459_v27 = vpop.f32.mrf.mxu0  ;;  %9635 = vmatmul.mubr.bf16.gmra.mxu1 %v9576_v16  ;;  %v13660_v16 = vld [vmem:[%s19621_s4 + $0x300] ss:$8 sps:$4 sm:$0xff]  }
 0x62b   : > { %v9531_v60 = vadd.f32 %v9503_v34, %v18645_v36  ;;  %9961 = vmatpush1.bf16.msra.mxu1 %v13651_v62  ;;  %v9558_v9 = vmax.f32 %v9530_v59, 0.0  ;;  %v9504_v12 = vmul.f32 %v9459_v27, %v18639_v3 }
 0x62c   : > { %v9461_v43 = vpop.f32.mrf.mxu0  ;;  %9962 = vmatprep.subr.bf16.mxu1 %v13656_v26 }
 0x62d   : > { %v9559_v6 = vmax.f32 %v9531_v60, 0.0  ;;  %v9505_v40 = vmul.f32 %v9461_v43, %v18636_v21  ;;  %v9578_v35 = vpack.c.bf16 %v9558_v9, %v9556_v13  ;;  %v9532_v28 = vadd.f32 %v9504_v12, %v18649_v56 }
 0x62e   : > { %v9463_v25 = vpop.f32.mrf.mxu0 }
 0x62f   : > { %v9506_v20 = vmul.f32 %v9463_v25, %v18639_v3  ;;  %9963 = vmatpush1.bf16.msra.mxu1 %v13654_v61  ;;  %v9579_v30 = vpack.c.bf16 %v9559_v6, %v9557_v41  ;;  %v9533_v50 = vadd.f32 %v9505_v40, %v18645_v36  ;;  %v9560_v27 = vmax.f32 %v9532_v28, 0.0  ;;  %v13668_v40 = vld [vmem:[%s19621_s4 + $0x3e4] ss:$8 sps:$4 sm:$0xff]  }
 0x630   : > { %v9465_v11 = vpop.f32.mrf.mxu0  ;;  %9964 = vmatprep.subr.bf16.mxu1 %v13659_v51  ;;  %v13663_v51 = vld [vmem:[%s19621_s4 + $0x3f0] ss:$8 sps:$4 sm:$0xff]  }
 0x631   : > { %v9534_v14 = vadd.f32 %v9506_v20, %v18649_v56  ;;  %v9507_v57 = vmul.f32 %v9465_v11, %v18636_v21  ;;  %9642 = vmatprep.mubr.bf16.mxu1 %v9579_v30  ;;  %v9561_v59 = vmax.f32 %v9533_v50, 0.0  ;;  %v13671_v50 = vld [vmem:[%s19621_s4 + $0x3d4] ss:$8 sps:$4 sm:$0xff]  }
 0x632   : > { %v9469_v0 = vpop.f32.mrf.mxu0  ;;  %9643 = vmatmul.mubr.bf16.gmra.mxu1 %v9578_v35  ;;  %v13666_v35 = vld [vmem:[%s19621_s4 + $0x3e0] ss:$8 sps:$4 sm:$0xff]  }
 0x633   : > { %v9535_v62 = vadd.f32 %v9507_v57, %v18645_v36  ;;  %9965 = vmatpush1.bf16.msra.mxu1 %v13657_v48  ;;  %v9562_v53 = vmax.f32 %v9534_v14, 0.0  ;;  %v9508_v60 = vmul.f32 %v9469_v0, %v18639_v3 }
 0x634   : > { %v9471_v26 = vpop.f32.mrf.mxu0  ;;  %9966 = vmatprep.subr.bf16.mxu1 %v13662_v29 }
 0x635   : > { %v9563_v34 = vmax.f32 %v9535_v62, 0.0  ;;  %v9509_v63 = vmul.f32 %v9471_v26, %v18636_v21  ;;  %v9580_v41 = vpack.c.bf16 %v9562_v53, %v9560_v27  ;;  %v9536_v20 = vadd.f32 %v9508_v60, %v18649_v56 }
 0x636   : > { %v9473_v61 = vpop.f32.mrf.mxu0 }
 0x637   : > { %v9510_v9 = vmul.f32 %v9473_v61, %v18639_v3  ;;  %9967 = vmatpush1.bf16.msra.mxu1 %v13660_v16  ;;  %v9581_v43 = vpack.c.bf16 %v9563_v34, %v9561_v59  ;;  %v9537_v13 = vadd.f32 %v9509_v63, %v18645_v36  ;;  %v9564_v0 = vmax.f32 %v9536_v20, 0.0  ;;  %v13674_v63 = vld [vmem:[%s19621_s4 + $0x3c4] ss:$8 sps:$4 sm:$0xff]   ;;  %v13675_v20 = vld [vmem:[%s19621_s4 + $0x3b0] ss:$8 sps:$4 sm:$0xff]  }
 0x638   : > { %v9475_v6 = vpop.f32.mrf.mxu0  ;;  %9968 = vmatprep.subr.bf16.mxu1 %v13665_v42  ;;  %v13669_v42 = vld [vmem:[%s19621_s4 + $0x3d0] ss:$8 sps:$4 sm:$0xff]  }
 0x639   : > { %v9538_v12 = vadd.f32 %v9510_v9, %v18649_v56  ;;  %v9511_v25 = vmul.f32 %v9475_v6, %v18636_v21  ;;  %9650 = vmatprep.mubr.bf16.mxu1 %v9581_v43  ;;  %v9565_v14 = vmax.f32 %v9537_v13, 0.0  ;;  %v13677_v6 = vld [vmem:[%s19621_s4 + $0x3b4] ss:$8 sps:$4 sm:$0xff]  }
 0x63a   : > { %v9479_v30 = vpop.f32.mrf.mxu0  ;;  %9651 = vmatmul.mubr.bf16.gmra.mxu1 %v9580_v41 }
 0x63b   : > { %v9539_v48 = vadd.f32 %v9511_v25, %v18645_v36  ;;  %9969 = vmatpush2.bf16.msra.mxu1 %v13663_v51  ;;  %v9566_v11 = vmax.f32 %v9538_v12, 0.0  ;;  %v9512_v62 = vmul.f32 %v9479_v30, %v18639_v3  ;;  %v13672_v51 = vld [vmem:[%s19621_s4 + $0x3c0] ss:$8 sps:$4 sm:$0xff]  }
 0x63c   : > { %v9481_v29 = vpop.f32.mrf.mxu0  ;;  %9970 = vmatprep.subr.bf16.mxu1 %v13668_v40 }
 0x63d   : > { %v9567_v57 = vmax.f32 %v9539_v48, 0.0  ;;  %v9513_v28 = vmul.f32 %v9481_v29, %v18636_v21  ;;  %v9582_v59 = vpack.c.bf16 %v9566_v11, %v9564_v0  ;;  %v9540_v9 = vadd.f32 %v9512_v62, %v18649_v56  ;;  %v13680_v48 = vld [vmem:[%s19621_s4 + $0x3a4] ss:$8 sps:$4 sm:$0xff]   ;;  %v13683_v11 = vld [vmem:[%s19621_s4 + $0x394] ss:$8 sps:$4 sm:$0xff]  }
 0x63e   : > { %v9483_v16 = vpop.f32.mrf.mxu0  ;;  %v13681_v29 = vld [vmem:[%s19621_s4 + $0x390] ss:$8 sps:$4 sm:$0xff]   ;;  %v8519_v0 = vadd.f32 %v18908_v47, %v19113_v45  ;;  %v8530_v47 = vadd.f32 %v18914_v49, %v19113_v45 }
 0x63f   : > { %v9514_v53 = vmul.f32 %v9483_v16, %v18639_v3  ;;  %9971 = vmatpush2.bf16.msra.mxu1 %v13666_v35  ;;  %v9583_v26 = vpack.c.bf16 %v9567_v57, %v9565_v14  ;;  %v9541_v27 = vadd.f32 %v9513_v28, %v18645_v36  ;;  %v9568_v12 = vmax.f32 %v9540_v9, 0.0  ;;  %v13678_v35 = vld [vmem:[%s19621_s4 + $0x3a0] ss:$8 sps:$4 sm:$0xff]  }
 0x640   : > { %v9485_v34 = vpop.f32.mrf.mxu0  ;;  %9972 = vmatprep.subr.bf16.mxu1 %v13671_v50  ;;  %v13686_v50 = vld [vmem:[%s19621_s4 + $0x384] ss:$8 sps:$4 sm:$0xff]   ;;  %v13684_v14 = vld [vmem:[%s19621_s4 + $0x380] ss:$8 sps:$4 sm:$0xff]   ;;  %v8514_v28 = vadd.f32 %v18906_v32, %v19113_v45  ;;  %v8522_v16 = vadd.f32 %v18910_v54, %v19113_v45  ;;  %v8527_v32 = vadd.f32 %v18912_v19, %v19113_v45 }
 0x641   : > { %v9542_v60 = vadd.f32 %v9514_v53, %v18649_v56  ;;  %v9515_v61 = vmul.f32 %v9485_v34, %v18636_v21  ;;  %9658 = vmatprep.mubr.bf16.mxu1 %v9583_v26  ;;  %v9569_v40 = vmax.f32 %v9541_v27, 0.0  ;;  %v11941_v26 = vmul.f32 -1.442695, %v8530_v47 }
 0x642   : > { %9659 = vmatmul.mubr.bf16.gmra.mxu1 %v9582_v59  ;;  %v11937_v62 = vmul.f32 -1.442695, %v8514_v28  ;;  %v11939_v53 = vmul.f32 -1.442695, %v8522_v16 }
 0x643   : > { %v9543_v43 = vadd.f32 %v9515_v61, %v18645_v36  ;;  %9973 = vmatpush2.bf16.msra.mxu1 %v13669_v42  ;;  %v9570_v41 = vmax.f32 %v9542_v60, 0.0 }
 0x644   : > { %9974 = vmatprep.subr.bf16.mxu1 %v13674_v63 }
 0x645   : > { %v9571_v13 = vmax.f32 %v9543_v43, 0.0  ;;  %v9584_v30 = vpack.c.bf16 %v9570_v41, %v9568_v12 }
 0x647   : > { %9975 = vmatpush2.bf16.msra.mxu1 %v13672_v51  ;;  %v9585_v25 = vpack.c.bf16 %v9571_v13, %v9569_v40 }
 0x648   : > { %9976 = vmatprep.subr.bf16.mxu1 %v13677_v6 }
 0x649   : > { %9666 = vmatprep.mubr.bf16.mxu1 %v9585_v25 }
 0x64a   : > { %9667 = vmatmul.mubr.bf16.gmra.mxu1 %v9584_v30 }
 0x64b   : > { %9977 = vmatpush2.bf16.msra.mxu1 %v13675_v20  ;;  %9984 = vmatprep.mubr.bf16.mxu1 %v18443_v46  ;;  %v8511_v46 = vadd.f32 %v18904_v44, %v19113_v45  ;;  %v11938_v44 = vmul.f32 -1.442695, %v8519_v0 }
 0x64c   : > { %9978 = vmatprep.subr.bf16.mxu1 %v13680_v48 }
 0x64d   : > { %v11936_v57 = vmul.f32 -1.442695, %v8511_v46 }
 0x64f   : > { %9979 = vmatpush2.bf16.msra.mxu1 %v13678_v35  ;;  %13743 = vpow2.f32 %v11936_v57 }
 0x650   : > { %9980 = vmatprep.subr.bf16.mxu1 %v13683_v11  ;;  %13745 = vpow2.f32 %v11937_v62 }
 0x651   : > { %13747 = vpow2.f32 %v11938_v44 }
 0x652   : > { %13749 = vpow2.f32 %v11939_v53 }
 0x653   : > { %9981 = vmatpush2.bf16.msra.mxu1 %v13681_v29 }
 0x654   : > { %9982 = vmatprep.subr.bf16.mxu1 %v13686_v50 }
 0x657   : > { %9983 = vmatpush2.bf16.msra.mxu1 %v13684_v14 }
 0x65a   : > { %9985 = vmatmul.mubr.bf16.vlgmr.msra.gmra.mxu1 %v18436_v4  ;;  %v11940_v4 = vmul.f32 -1.442695, %v8527_v32 }
 0x65b   : > { %9994 = vmatprep.mubr.bf16.mxu1 %v18477_v58 }
 0x65c   : > { %v13744_v58 = vpop.eup %13743  ;;  %13751 = vpow2.f32 %v11940_v4 }
 0x65d   : > { %v8589_v54 = vadd.f32 1.0, %v13744_v58  ;;  %v13746_v42 = vpop.eup %13745  ;;  %13753 = vpow2.f32 %v11941_v26 }
 0x65f   : > { %13755 = vrcp.f32 %v8589_v54 }
 0x662   : > { %9995 = vmatmul.mubr.bf16.gmra.mxu1 %v18468_v24  ;;  %v13748_v24 = vpop.eup %13747 }
 0x663   : > { %10004 = vmatprep.mubr.bf16.mxu1 %v18508_v2  ;;  %v19311_v19 = vpop.permute.xlu0 %10340  ;;  %v8590_v2 = vadd.f32 1.0, %v13746_v42  ;;  %v8591_v59 = vadd.f32 1.0, %v13748_v24  ;;  %v13750_v49 = vpop.eup %13749 }
 0x665   : > { %13757 = vrcp.f32 %v8590_v2 }
 0x666   : > { %13759 = vrcp.f32 %v8591_v59 }
 0x669   : > { %v13752_v63 = vpop.eup %13751 }
 0x66a   : > { %10005 = vmatmul.mubr.bf16.gmra.mxu1 %v18500_v10  ;;  %v19317_v10 = vpop.permute.xlu0 %10342  ;;  %v8593_v61 = vadd.f32 1.0, %v13752_v63  ;;  %v13754_v9 = vpop.eup %13753 }
 0x66b   : > { %10014 = vmatprep.mubr.bf16.mxu1 %v18540_v31  ;;  %v19313_v34 = vpop.permute.xlu1 %10344  ;;  %v8592_v31 = vadd.f32 1.0, %v13750_v49  ;;  %v8594_v41 = vadd.f32 1.0, %v13754_v9 }
 0x66d   : > { %13761 = vrcp.f32 %v8592_v31 }
 0x66e   : > { %13763 = vrcp.f32 %v8593_v61 }
 0x66f   : > { %v19319_v27 = vpop.permute.xlu1 %10346  ;;  %13765 = vrcp.f32 %v8594_v41 }
 0x672   : > { %10015 = vmatmul.mubr.bf16.gmra.mxu1 %v18532_v23  ;;  %v13756_v23 = vpop.eup %13755 }
 0x673   : > { %10024 = vmatprep.mubr.bf16.mxu1 %v18569_v39  ;;  %v13758_v6 = vpop.eup %13757 }
 0x674   : > { %v19321_v60 = vpop.permute.xlu0 %10348 }
 0x678   : > { %v19325_v43 = vpop.permute.xlu1 %10350 }
 0x67a   : > { %10025 = vmatmul.mubr.bf16.gmra.mxu1 %v18561_v7  ;;  %v13760_v7 = vpop.eup %13759 }
 0x67b   : > { %10034 = vmatprep.mubr.bf16.mxu1 %v18587_v38  ;;  %v13762_v25 = vpop.eup %13761 }
 0x67c   : > { %v10353_v39 = vpop.permute.xlu0 %10352  ;;  %v13764_v48 = vpop.eup %13763 }
 0x67d   : > { %v19328_v51 = vsel %vm10494_vm6, %v13756_v23, %v10353_v39 }
 0x680   : > { %v10355_v40 = vpop.permute.xlu1 %10354 }
 0x681   : > { %v19331_v13 = vsel %vm10494_vm6, %v13758_v6, %v10355_v40 }
 0x682   : > { %10035 = vmatmul.mubr.bf16.gmra.mxu1 %v18583_v1  ;;  %v13766_v1 = vpop.eup %13765 }
 0x683   : > { %10044 = vmatprep.mubr.bf16.mxu1 %v18597_v17  ;;  %v10357_v38 = vpop.permute.xlu0 %10356 }
 0x684   : > { %v19336_v12 = vsel %vm10494_vm6, %v13760_v7, %v10357_v38 }
 0x687   : > { %v10359_v20 = vpop.permute.xlu1 %10358 }
 0x688   : > { %v19339_v30 = vsel %vm10494_vm6, %v13762_v25, %v10359_v20 }
 0x68a   : > { %10045 = vmatmul.mubr.bf16.gmra.mxu1 %v18595_v5 }
 0x68b   : > { %v10361_v35 = vpop.permute.xlu0 %10360 }
 0x68c   : > { %v19343_v11 = vsel %vm10494_vm6, %v13764_v48, %v10361_v35 }
 0x68f   : > { %v10363_v29 = vpop.permute.xlu1 %10362 }
 0x690   : > { %v19346_v17 = vsel %vm10494_vm6, %v13766_v1, %v10363_v29 }
 0x6da   : > { %v12312_v50 = vpop.f32.mrf.mxu1 }
 0x6dc   : > { %v12313_v46 = vpop.f32.mrf.mxu1 }
 0x6dd   : > { %v12314_v14 = vadd.f32 %v12313_v46, %v12312_v50 }
 0x6de   : > { %v12315_v57 = vpop.f32.mrf.mxu1 }
 0x6df   : > { %v9621_v28 = vadd.f32 %v12314_v14, %v19113_v45 }
 0x6e0   : > { %v12316_v0 = vpop.f32.mrf.mxu1 }
 0x6e1   : > { %v12086_v62 = vmul.f32 -1.442695, %v9621_v28  ;;  %v12317_v44 = vadd.f32 %v12316_v0, %v12315_v57 }
 0x6e2   : > { %v12318_v5 = vpop.f32.mrf.mxu1 }
 0x6e3   : > { %13767 = vpow2.f32 %v12086_v62  ;;  %v9624_v16 = vadd.f32 %v12317_v44, %v19113_v45 }
 0x6e4   : > { %v12319_v53 = vpop.f32.mrf.mxu1 }
 0x6e5   : > { %v12087_v32 = vmul.f32 -1.442695, %v9624_v16  ;;  %v12320_v4 = vadd.f32 %v12319_v53, %v12318_v5 }
 0x6e6   : > { %v12321_v47 = vpop.f32.mrf.mxu1 }
 0x6e7   : > { %13769 = vpow2.f32 %v12087_v32  ;;  %v9629_v58 = vadd.f32 %v12320_v4, %v19113_v45 }
 0x6e8   : > { %v12322_v26 = vpop.f32.mrf.mxu1 }
 0x6e9   : > { %v12088_v54 = vmul.f32 -1.442695, %v9629_v58  ;;  %v12323_v42 = vadd.f32 %v12322_v26, %v12321_v47 }
 0x6ea   : > { %v12324_v24 = vpop.f32.mrf.mxu1 }
 0x6eb   : > { %13771 = vpow2.f32 %v12088_v54  ;;  %v9632_v2 = vadd.f32 %v12323_v42, %v19113_v45 }
 0x6ec   : > { %v12325_v59 = vpop.f32.mrf.mxu1 }
 0x6ed   : > { %v12089_v49 = vmul.f32 -1.442695, %v9632_v2  ;;  %v12326_v31 = vadd.f32 %v12325_v59, %v12324_v24 }
 0x6ee   : > { %v12327_v63 = vpop.f32.mrf.mxu1 }
 0x6ef   : > { %13773 = vpow2.f32 %v12089_v49  ;;  %v9637_v61 = vadd.f32 %v12326_v31, %v19113_v45 }
 0x6f0   : > { %v13768_v9 = vpop.eup %13767  ;;  %v12328_v23 = vpop.f32.mrf.mxu1 }
 0x6f1   : > { %v9717_v39 = vadd.f32 1.0, %v13768_v9  ;;  %v12090_v41 = vmul.f32 -1.442695, %v9637_v61  ;;  %v12329_v6 = vadd.f32 %v12328_v23, %v12327_v63 }
 0x6f2   : > { %v12330_v40 = vpop.f32.mrf.mxu1 }
 0x6f3   : > { %13775 = vrcp.f32 %v9717_v39  ;;  %v9640_v7 = vadd.f32 %v12329_v6, %v19113_v45  ;;  %v19363_v6 = vld [vmem:[%s19625_s8] ss:$0 sm:$0xff] }
 0x6f4   : > { %v13770_v38 = vpop.eup %13769  ;;  %13777 = vpow2.f32 %v12090_v41  ;;  %v12331_v25 = vpop.f32.mrf.mxu1 }
 0x6f5   : > { %v9718_v20 = vadd.f32 1.0, %v13770_v38  ;;  %v12091_v48 = vmul.f32 -1.442695, %v9640_v7  ;;  %v12332_v35 = vadd.f32 %v12331_v25, %v12330_v40 }
 0x6f6   : > { %v12333_v1 = vpop.f32.mrf.mxu1 }
 0x6f7   : > { %13779 = vrcp.f32 %v9718_v20  ;;  %v9645_v29 = vadd.f32 %v12332_v35, %v19113_v45 }
 0x6f8   : > { %v13772_v50 = vpop.eup %13771  ;;  %13781 = vpow2.f32 %v12091_v48  ;;  %v12334_v46 = vpop.f32.mrf.mxu1 }
 0x6f9   : > { %v9719_v14 = vadd.f32 1.0, %v13772_v50  ;;  %v12092_v57 = vmul.f32 -1.442695, %v9645_v29  ;;  %v12335_v28 = vadd.f32 %v12334_v46, %v12333_v1 }
 0x6fa   : > { %v12336_v0 = vpop.f32.mrf.mxu1 }
 0x6fb   : > { %13783 = vrcp.f32 %v9719_v14  ;;  %v9648_v62 = vadd.f32 %v12335_v28, %v19113_v45 }
 0x6fc   : > { %v13774_v44 = vpop.eup %13773  ;;  %13785 = vpow2.f32 %v12092_v57  ;;  %v12337_v5 = vpop.f32.mrf.mxu1 }
 0x6fd   : > { %v9720_v16 = vadd.f32 1.0, %v13774_v44  ;;  %v12093_v53 = vmul.f32 -1.442695, %v9648_v62  ;;  %v12338_v32 = vadd.f32 %v12337_v5, %v12336_v0 }
 0x6fe   : > { %v12339_v4 = vpop.f32.mrf.mxu1 }
 0x6ff   : > { %13787 = vrcp.f32 %v9720_v16  ;;  %v9653_v47 = vadd.f32 %v12338_v32, %v19113_v45 }
 0x700   : > { %v13776_v58 = vpop.eup %13775  ;;  %13789 = vpow2.f32 %v12093_v53  ;;  %v12340_v26 = vpop.f32.mrf.mxu1 }
 0x701   : > { %v13778_v54 = vpop.eup %13777  ;;  %v12094_v42 = vmul.f32 -1.442695, %v9653_v47  ;;  %v12341_v24 = vadd.f32 %v12340_v26, %v12339_v4  ;;  %10396 = vrot.lane.b32.xlu0 %v13776_v58, %s14029_s27 }
 0x702   : > { %v9721_v2 = vadd.f32 1.0, %v13778_v54  ;;  %v12342_v59 = vpop.f32.mrf.mxu1 }
 0x703   : > { %13791 = vpow2.f32 %v12094_v42  ;;  %v9656_v49 = vadd.f32 %v12341_v24, %v19113_v45 }
 0x704   : > { %v13780_v31 = vpop.eup %13779  ;;  %13793 = vrcp.f32 %v9721_v2  ;;  %v12343_v63 = vpop.f32.mrf.mxu1 }
 0x705   : > { %v13782_v61 = vpop.eup %13781  ;;  %v12095_v9 = vmul.f32 -1.442695, %v9656_v49  ;;  %v12344_v23 = vadd.f32 %v12343_v63, %v12342_v59  ;;  %10398 = vrot.lane.b32.xlu1 %v13780_v31, %s14029_s27 }
 0x706   : > { %v9722_v39 = vadd.f32 1.0, %v13782_v61  ;;  %v12345_v41 = vpop.f32.mrf.mxu1 }
 0x707   : > { %13795 = vpow2.f32 %v12095_v9  ;;  %v9661_v40 = vadd.f32 %v19363_v6, %v12344_v23 }
 0x708   : > { %v13784_v7 = vpop.eup %13783  ;;  %13797 = vrcp.f32 %v9722_v39  ;;  %v12346_v45 = vpop.f32.mrf.mxu1 }
 0x709   : > { %v13786_v38 = vpop.eup %13785  ;;  %v12096_v25 = vmul.f32 -1.442695, %v9661_v40  ;;  %v12347_v20 = vadd.f32 %v12346_v45, %v12345_v41  ;;  %10400 = vrot.lane.b32.xlu0 %v13784_v7, %s14029_s27 }
 0x70a   : > { %v9723_v48 = vadd.f32 1.0, %v13786_v38  ;;  %v12348_v35 = vpop.f32.mrf.mxu1 }
 0x70b   : > { %13799 = vpow2.f32 %v12096_v25  ;;  %v9664_v1 = vadd.f32 %v19363_v6, %v12347_v20 }
 0x70c   : > { %v13788_v29 = vpop.eup %13787  ;;  %13801 = vrcp.f32 %v9723_v48  ;;  %v12349_v50 = vpop.f32.mrf.mxu1 }
 0x70d   : > { %v13790_v46 = vpop.eup %13789  ;;  %v12097_v14 = vmul.f32 -1.442695, %v9664_v1  ;;  %v12350_v57 = vadd.f32 %v12349_v50, %v12348_v35  ;;  %10402 = vrot.lane.b32.xlu1 %v13788_v29, %s14029_s27 }
 0x70e   : > { %v9724_v28 = vadd.f32 1.0, %v13790_v46  ;;  %v12351_v0 = vpop.f32.mrf.mxu1 }
 0x70f   : > { %13803 = vpow2.f32 %v12097_v14  ;;  %v9669_v62 = vadd.f32 %v19363_v6, %v12350_v57 }
 0x710   : > { %v13792_v44 = vpop.eup %13791  ;;  %13805 = vrcp.f32 %v9724_v28  ;;  %v12352_v5 = vpop.f32.mrf.mxu1 }
 0x711   : > { %v13794_v16 = vpop.eup %13793  ;;  %v9725_v53 = vadd.f32 1.0, %v13792_v44  ;;  %v12098_v32 = vmul.f32 -1.442695, %v9669_v62  ;;  %v12353_v4 = vadd.f32 %v12352_v5, %v12351_v0 }
 0x712   : > { %10404 = vrot.lane.b32.xlu0 %v13794_v16, %s14029_s27 }
 0x713   : > { %13807 = vrcp.f32 %v9725_v53  ;;  %v9672_v47 = vadd.f32 %v19363_v6, %v12353_v4 }
 0x714   : > { %v13796_v58 = vpop.eup %13795  ;;  %13809 = vpow2.f32 %v12098_v32 }
 0x715   : > { %v13798_v26 = vpop.eup %13797  ;;  %v9726_v54 = vadd.f32 1.0, %v13796_v58  ;;  %v12099_v42 = vmul.f32 -1.442695, %v9672_v47 }
 0x716   : > { %10406 = vrot.lane.b32.xlu1 %v13798_v26, %s14029_s27 }
 0x717   : > { %13811 = vrcp.f32 %v9726_v54 }
 0x718   : > { %v13800_v24 = vpop.eup %13799  ;;  %13813 = vpow2.f32 %v12099_v42 }
 0x719   : > { %v13802_v2 = vpop.eup %13801  ;;  %v9727_v59 = vadd.f32 1.0, %v13800_v24 }
 0x71a   : > { %v9986_v49 = vpop.f32.mrf.mxu1  ;;  %10408 = vrot.lane.b32.xlu0 %v13802_v2, %s14029_s27 }
 0x71b   : > { %13815 = vrcp.f32 %v9727_v59  ;;  %v10055_v39 = vmul.f32 %v9986_v49, %v18639_v3 }
 0x71c   : > { %v13804_v31 = vpop.eup %13803  ;;  %v9988_v63 = vpop.f32.mrf.mxu1 }
 0x71d   : > { %v13806_v61 = vpop.eup %13805  ;;  %v9728_v9 = vadd.f32 1.0, %v13804_v31  ;;  %v10056_v23 = vmul.f32 %v9988_v63, %v18636_v21  ;;  %v10083_v1 = vadd.f32 %v10055_v39, %v18649_v56 }
 0x71e   : > { %v9990_v41 = vpop.f32.mrf.mxu1  ;;  %10410 = vrot.lane.b32.xlu1 %v13806_v61, %s14029_s27 }
 0x71f   : > { %13817 = vrcp.f32 %v9728_v9  ;;  %v10057_v40 = vmul.f32 %v9990_v41, %v18639_v3  ;;  %v10084_v25 = vadd.f32 %v10056_v23, %v18645_v36  ;;  %v10111_v16 = vmax.f32 %v10083_v1, 0.0 }
 0x720   : > { %v13808_v7 = vpop.eup %13807  ;;  %v9992_v45 = vpop.f32.mrf.mxu1 }
 0x721   : > { %v13810_v38 = vpop.eup %13809  ;;  %v10085_v20 = vadd.f32 %v10057_v40, %v18649_v56  ;;  %v10058_v48 = vmul.f32 %v9992_v45, %v18636_v21  ;;  %10412 = vrot.lane.b32.xlu0 %v13808_v7, %s14029_s27  ;;  %v10112_v0 = vmax.f32 %v10084_v25, 0.0 }
 0x722   : > { %v9729_v35 = vadd.f32 1.0, %v13810_v38  ;;  %v9996_v29 = vpop.f32.mrf.mxu1 }
 0x723   : > { %v10086_v50 = vadd.f32 %v10058_v48, %v18645_v36  ;;  %v10113_v14 = vmax.f32 %v10085_v20, 0.0  ;;  %v10059_v53 = vmul.f32 %v9996_v29, %v18639_v3 }
 0x724   : > { %v13812_v46 = vpop.eup %13811  ;;  %13819 = vrcp.f32 %v9729_v35  ;;  %v9998_v57 = vpop.f32.mrf.mxu1 }
 0x725   : > { %v13814_v28 = vpop.eup %13813  ;;  %v10114_v62 = vmax.f32 %v10086_v50, 0.0  ;;  %v10060_v44 = vmul.f32 %v9998_v57, %v18636_v21  ;;  %10414 = vrot.lane.b32.xlu1 %v13812_v46, %s14029_s27  ;;  %v10139_v26 = vpack.c.bf16 %v10113_v14, %v10111_v16  ;;  %v10087_v59 = vadd.f32 %v10059_v53, %v18649_v56 }
 0x726   : > { %v9730_v5 = vadd.f32 1.0, %v13814_v28  ;;  %v10000_v32 = vpop.f32.mrf.mxu1 }
 0x727   : > { %v10061_v4 = vmul.f32 %v10000_v32, %v18639_v3  ;;  %v10140_v47 = vpack.c.bf16 %v10114_v62, %v10112_v0  ;;  %v10088_v42 = vadd.f32 %v10060_v44, %v18645_v36  ;;  %v10115_v40 = vmax.f32 %v10087_v59, 0.0 }
 0x728   : > { %v13816_v58 = vpop.eup %13815  ;;  %13821 = vrcp.f32 %v9730_v5  ;;  %v10002_v54 = vpop.f32.mrf.mxu1 }
 0x729   : > { %v10089_v24 = vadd.f32 %v10061_v4, %v18649_v56  ;;  %v10062_v2 = vmul.f32 %v10002_v54, %v18636_v21  ;;  %10185 = vmatprep.mubr.bf16.mxu0 %v10140_v47  ;;  %10416 = vrot.lane.b32.xlu0 %v13816_v58, %s14029_s27  ;;  %v10116_v23 = vmax.f32 %v10088_v42, 0.0 }
 0x72a   : > { %v10006_v49 = vpop.f32.mrf.mxu1  ;;  %10186 = vmatmul.mubr.bf16.vlgmr.msra.gmra.mxu0 %v10139_v26 }
 0x72b   : > { %v10090_v31 = vadd.f32 %v10062_v2, %v18645_v36  ;;  %v10117_v61 = vmax.f32 %v10089_v24, 0.0  ;;  %v10063_v7 = vmul.f32 %v10006_v49, %v18639_v3 }
 0x72c   : > { %v13818_v63 = vpop.eup %13817  ;;  %v10008_v9 = vpop.f32.mrf.mxu1 }
 0x72d   : > { %v10118_v39 = vmax.f32 %v10090_v31, 0.0  ;;  %v10064_v41 = vmul.f32 %v10008_v9, %v18636_v21  ;;  %10418 = vrot.lane.b32.xlu1 %v13818_v63, %s14029_s27  ;;  %v10141_v20 = vpack.c.bf16 %v10117_v61, %v10115_v40  ;;  %v10091_v46 = vadd.f32 %v10063_v7, %v18649_v56 }
 0x72e   : > { %v10010_v45 = vpop.f32.mrf.mxu1 }
 0x72f   : > { %v10065_v38 = vmul.f32 %v10010_v45, %v18639_v3  ;;  %v10142_v25 = vpack.c.bf16 %v10118_v39, %v10116_v23  ;;  %v10092_v1 = vadd.f32 %v10064_v41, %v18645_v36  ;;  %v10119_v53 = vmax.f32 %v10091_v46, 0.0 }
 0x730   : > { %v10012_v48 = vpop.f32.mrf.mxu1 }
 0x731   : > { %v13820_v35 = vpop.eup %13819  ;;  %v10093_v29 = vadd.f32 %v10065_v38, %v18649_v56  ;;  %v10066_v50 = vmul.f32 %v10012_v48, %v18636_v21  ;;  %10193 = vmatprep.mubr.bf16.mxu0 %v10142_v25  ;;  %v10120_v44 = vmax.f32 %v10092_v1, 0.0 }
 0x732   : > { %v10016_v14 = vpop.f32.mrf.mxu1  ;;  %10194 = vmatmul.mubr.bf16.gmra.mxu0 %v10141_v20  ;;  %10420 = vrot.lane.b32.xlu0 %v13820_v35, %s14029_s27 }
 0x733   : > { %v10094_v57 = vadd.f32 %v10066_v50, %v18645_v36  ;;  %v10121_v28 = vmax.f32 %v10093_v29, 0.0  ;;  %v10067_v32 = vmul.f32 %v10016_v14, %v18639_v3 }
 0x734   : > { %v10018_v0 = vpop.f32.mrf.mxu1 }
 0x735   : > { %v13822_v62 = vpop.eup %13821  ;;  %v10122_v5 = vmax.f32 %v10094_v57, 0.0  ;;  %v10068_v16 = vmul.f32 %v10018_v0, %v18636_v21  ;;  %v10143_v26 = vpack.c.bf16 %v10121_v28, %v10119_v53  ;;  %v10095_v59 = vadd.f32 %v10067_v32, %v18649_v56 }
 0x736   : > { %v10020_v4 = vpop.f32.mrf.mxu1  ;;  %10422 = vrot.lane.b32.xlu1 %v13822_v62, %s14029_s27 }
 0x737   : > { %v10069_v47 = vmul.f32 %v10020_v4, %v18639_v3  ;;  %v10144_v58 = vpack.c.bf16 %v10122_v5, %v10120_v44  ;;  %v10096_v42 = vadd.f32 %v10068_v16, %v18645_v36  ;;  %v10123_v41 = vmax.f32 %v10095_v59, 0.0 }
 0x738   : > { %v10022_v54 = vpop.f32.mrf.mxu1 }
 0x739   : > { %v10097_v24 = vadd.f32 %v10069_v47, %v18649_v56  ;;  %v10070_v2 = vmul.f32 %v10022_v54, %v18636_v21  ;;  %10201 = vmatprep.mubr.bf16.mxu0 %v10144_v58  ;;  %v10124_v9 = vmax.f32 %v10096_v42, 0.0 }
 0x73a   : > { %v10026_v49 = vpop.f32.mrf.mxu1  ;;  %10202 = vmatmul.mubr.bf16.gmra.mxu0 %v10143_v26 }
 0x73b   : > { %v10098_v31 = vadd.f32 %v10070_v2, %v18645_v36  ;;  %v10125_v63 = vmax.f32 %v10097_v24, 0.0  ;;  %v10071_v40 = vmul.f32 %v10026_v49, %v18639_v3 }
 0x73c   : > { %v10028_v61 = vpop.f32.mrf.mxu1 }
 0x73d   : > { %v10126_v23 = vmax.f32 %v10098_v31, 0.0  ;;  %v10072_v39 = vmul.f32 %v10028_v61, %v18636_v21  ;;  %v10145_v25 = vpack.c.bf16 %v10125_v63, %v10123_v41  ;;  %v10099_v29 = vadd.f32 %v10071_v40, %v18649_v56 }
 0x73e   : > { %v10030_v7 = vpop.f32.mrf.mxu1 }
 0x73f   : > { %v10073_v45 = vmul.f32 %v10030_v7, %v18639_v3  ;;  %v10146_v38 = vpack.c.bf16 %v10126_v23, %v10124_v9  ;;  %v10100_v48 = vadd.f32 %v10072_v39, %v18645_v36  ;;  %v10127_v44 = vmax.f32 %v10099_v29, 0.0 }
 0x740   : > { %v10032_v20 = vpop.f32.mrf.mxu1 }
 0x741   : > { %v10101_v35 = vadd.f32 %v10073_v45, %v18649_v56  ;;  %v10074_v1 = vmul.f32 %v10032_v20, %v18636_v21  ;;  %10209 = vmatprep.mubr.bf16.mxu0 %v10146_v38  ;;  %v10128_v28 = vmax.f32 %v10100_v48, 0.0 }
 0x742   : > { %v10036_v50 = vpop.f32.mrf.mxu1  ;;  %10210 = vmatmul.mubr.bf16.gmra.mxu0 %v10145_v25 }
 0x743   : > { %v10102_v46 = vadd.f32 %v10074_v1, %v18645_v36  ;;  %v10129_v14 = vmax.f32 %v10101_v35, 0.0  ;;  %v10075_v5 = vmul.f32 %v10036_v50, %v18639_v3 }
 0x744   : > { %v10038_v57 = vpop.f32.mrf.mxu1 }
 0x745   : > { %v10130_v0 = vmax.f32 %v10102_v46, 0.0  ;;  %v10076_v62 = vmul.f32 %v10038_v57, %v18636_v21  ;;  %v10147_v4 = vpack.c.bf16 %v10129_v14, %v10127_v44  ;;  %v10103_v42 = vadd.f32 %v10075_v5, %v18649_v56 }
 0x746   : > { %v10040_v16 = vpop.f32.mrf.mxu1 }
 0x747   : > { %v10077_v53 = vmul.f32 %v10040_v16, %v18639_v3  ;;  %v10148_v32 = vpack.c.bf16 %v10130_v0, %v10128_v28  ;;  %v10104_v58 = vadd.f32 %v10076_v62, %v18645_v36  ;;  %v10131_v9 = vmax.f32 %v10103_v42, 0.0 }
 0x748   : > { %v10042_v47 = vpop.f32.mrf.mxu1 }
 0x749   : > { %v10105_v26 = vadd.f32 %v10077_v53, %v18649_v56  ;;  %v10078_v54 = vmul.f32 %v10042_v47, %v18636_v21  ;;  %10217 = vmatprep.mubr.bf16.mxu0 %v10148_v32  ;;  %v10132_v31 = vmax.f32 %v10104_v58, 0.0 }
 0x74a   : > { %v10046_v24 = vpop.f32.mrf.mxu1  ;;  %10218 = vmatmul.mubr.bf16.gmra.mxu0 %v10147_v4 }
 0x74b   : > { %v10106_v2 = vadd.f32 %v10078_v54, %v18645_v36  ;;  %v10133_v59 = vmax.f32 %v10105_v26, 0.0  ;;  %v10079_v23 = vmul.f32 %v10046_v24, %v18639_v3 }
 0x74c   : > { %v10048_v49 = vpop.f32.mrf.mxu1 }
 0x74d   : > { %v10134_v63 = vmax.f32 %v10106_v2, 0.0  ;;  %v10080_v61 = vmul.f32 %v10048_v49, %v18636_v21  ;;  %v10149_v7 = vpack.c.bf16 %v10133_v59, %v10131_v9  ;;  %v10107_v48 = vadd.f32 %v10079_v23, %v18649_v56 }
 0x74e   : > { %v10050_v39 = vpop.f32.mrf.mxu1 }
 0x74f   : > { %v10081_v41 = vmul.f32 %v10050_v39, %v18639_v3  ;;  %v10150_v40 = vpack.c.bf16 %v10134_v63, %v10132_v31  ;;  %v10108_v38 = vadd.f32 %v10080_v61, %v18645_v36  ;;  %v10135_v46 = vmax.f32 %v10107_v48, 0.0 }
 0x750   : > { %v10052_v45 = vpop.f32.mrf.mxu1 }
 0x751   : > { %v10109_v25 = vadd.f32 %v10081_v41, %v18649_v56  ;;  %v10082_v20 = vmul.f32 %v10052_v45, %v18636_v21  ;;  %10225 = vmatprep.mubr.bf16.mxu0 %v10150_v40  ;;  %v10136_v29 = vmax.f32 %v10108_v38, 0.0 }
 0x752   : > { %10226 = vmatmul.mubr.bf16.gmra.mxu0 %v10149_v7 }
 0x753   : > { %v10110_v35 = vadd.f32 %v10082_v20, %v18645_v36  ;;  %v10137_v1 = vmax.f32 %v10109_v25, 0.0 }
 0x755   : > { %v10138_v50 = vmax.f32 %v10110_v35, 0.0  ;;  %v10151_v14 = vpack.c.bf16 %v10137_v1, %v10135_v46 }
 0x757   : > { %v10152_v3 = vpack.c.bf16 %v10138_v50, %v10136_v29 }
 0x759   : > { %10233 = vmatprep.mubr.bf16.mxu0 %v10152_v3 }
 0x75a   : > { %10234 = vmatmul.mubr.bf16.gmra.mxu0 %v10151_v14 }
 0x7ea   : > { %v12370_v57 = vpop.f32.mrf.mxu0 }
 0x7ec   : > { %v12371_v28 = vpop.f32.mrf.mxu0 }
 0x7ed   : > { %v12372_v0 = vadd.f32 %v12371_v28, %v12370_v57 }
 0x7ee   : > { %v12373_v62 = vpop.f32.mrf.mxu0 }
 0x7ef   : > { %v10188_v21 = vadd.f32 %v19363_v6, %v12372_v0 }
 0x7f0   : > { %v12374_v44 = vpop.f32.mrf.mxu0 }
 0x7f1   : > { %v12164_v5 = vmul.f32 -1.442695, %v10188_v21  ;;  %v12375_v56 = vadd.f32 %v12374_v44, %v12373_v62 }
 0x7f2   : > { %v12376_v16 = vpop.f32.mrf.mxu0 }
 0x7f3   : > { %13823 = vpow2.f32 %v12164_v5  ;;  %v10191_v36 = vadd.f32 %v19363_v6, %v12375_v56 }
 0x7f4   : > { %v12377_v53 = vpop.f32.mrf.mxu0 }
 0x7f5   : > { %v12165_v32 = vmul.f32 -1.442695, %v10191_v36  ;;  %v12378_v4 = vadd.f32 %v12377_v53, %v12376_v16 }
 0x7f6   : > { %v12379_v47 = vpop.f32.mrf.mxu0 }
 0x7f7   : > { %13825 = vpow2.f32 %v12165_v32  ;;  %v10196_v58 = vadd.f32 %v19363_v6, %v12378_v4 }
 0x7f8   : > { %v12380_v26 = vpop.f32.mrf.mxu0 }
 0x7f9   : > { %v12166_v54 = vmul.f32 -1.442695, %v10196_v58  ;;  %v12381_v42 = vadd.f32 %v12380_v26, %v12379_v47 }
 0x7fa   : > { %v12382_v24 = vpop.f32.mrf.mxu0 }
 0x7fb   : > { %13827 = vpow2.f32 %v12166_v54  ;;  %v10199_v2 = vadd.f32 %v19363_v6, %v12381_v42 }
 0x7fc   : > { %v12383_v59 = vpop.f32.mrf.mxu0 }
 0x7fd   : > { %v12167_v49 = vmul.f32 -1.442695, %v10199_v2  ;;  %v12384_v31 = vadd.f32 %v12383_v59, %v12382_v24 }
 0x7fe   : > { %v12385_v63 = vpop.f32.mrf.mxu0 }
 0x7ff   : > { %13829 = vpow2.f32 %v12167_v49  ;;  %v10204_v61 = vadd.f32 %v19363_v6, %v12384_v31 }
 0x800   : > { %v13824_v9 = vpop.eup %13823  ;;  %v12386_v23 = vpop.f32.mrf.mxu0 }
 0x801   : > { %v10284_v39 = vadd.f32 1.0, %v13824_v9  ;;  %v12168_v41 = vmul.f32 -1.442695, %v10204_v61  ;;  %v12387_v40 = vadd.f32 %v12386_v23, %v12385_v63 }
 0x802   : > { %v12388_v7 = vpop.f32.mrf.mxu0 }
 0x803   : > { %13831 = vrcp.f32 %v10284_v39  ;;  %v10207_v45 = vadd.f32 %v19363_v6, %v12387_v40 }
 0x804   : > { %v13826_v38 = vpop.eup %13825  ;;  %13833 = vpow2.f32 %v12168_v41  ;;  %v12389_v25 = vpop.f32.mrf.mxu0 }
 0x805   : > { %v10285_v20 = vadd.f32 1.0, %v13826_v38  ;;  %v12169_v48 = vmul.f32 -1.442695, %v10207_v45  ;;  %v12390_v35 = vadd.f32 %v12389_v25, %v12388_v7 }
 0x806   : > { %v12391_v1 = vpop.f32.mrf.mxu0 }
 0x807   : > { %13835 = vrcp.f32 %v10285_v20  ;;  %v10212_v29 = vadd.f32 %v19363_v6, %v12390_v35 }
 0x808   : > { %v13828_v50 = vpop.eup %13827  ;;  %13837 = vpow2.f32 %v12169_v48  ;;  %v12392_v46 = vpop.f32.mrf.mxu0 }
 0x809   : > { %v10286_v3 = vadd.f32 1.0, %v13828_v50  ;;  %v12170_v14 = vmul.f32 -1.442695, %v10212_v29  ;;  %v12393_v57 = vadd.f32 %v12392_v46, %v12391_v1 }
 0x80a   : > { %v12394_v28 = vpop.f32.mrf.mxu0 }
 0x80b   : > { %13839 = vrcp.f32 %v10286_v3  ;;  %v10215_v0 = vadd.f32 %v19363_v6, %v12393_v57 }
 0x80c   : > { %v13830_v62 = vpop.eup %13829  ;;  %13841 = vpow2.f32 %v12170_v14  ;;  %v12395_v21 = vpop.f32.mrf.mxu0 }
 0x80d   : > { %v10287_v44 = vadd.f32 1.0, %v13830_v62  ;;  %v12171_v5 = vmul.f32 -1.442695, %v10215_v0  ;;  %v12396_v56 = vadd.f32 %v12395_v21, %v12394_v28 }
 0x80e   : > { %v12397_v16 = vpop.f32.mrf.mxu0 }
 0x80f   : > { %13843 = vrcp.f32 %v10287_v44  ;;  %v10220_v36 = vadd.f32 %v19363_v6, %v12396_v56 }
 0x810   : > { %v13832_v53 = vpop.eup %13831  ;;  %13845 = vpow2.f32 %v12171_v5  ;;  %v12398_v32 = vpop.f32.mrf.mxu0 }
 0x811   : > { %v13834_v4 = vpop.eup %13833  ;;  %v12172_v47 = vmul.f32 -1.442695, %v10220_v36  ;;  %v12399_v58 = vadd.f32 %v12398_v32, %v12397_v16  ;;  %10452 = vrot.lane.b32.xlu0 %v13832_v53, %s14030_s22 }
 0x812   : > { %v10288_v26 = vadd.f32 1.0, %v13834_v4  ;;  %v12400_v54 = vpop.f32.mrf.mxu0 }
 0x813   : > { %13847 = vpow2.f32 %v12172_v47  ;;  %v10223_v42 = vadd.f32 %v19363_v6, %v12399_v58 }
 0x814   : > { %v13836_v24 = vpop.eup %13835  ;;  %13849 = vrcp.f32 %v10288_v26  ;;  %v12401_v2 = vpop.f32.mrf.mxu0 }
 0x815   : > { %v13838_v59 = vpop.eup %13837  ;;  %v12173_v49 = vmul.f32 -1.442695, %v10223_v42  ;;  %v12402_v31 = vadd.f32 %v12401_v2, %v12400_v54  ;;  %10454 = vrot.lane.b32.xlu1 %v13836_v24, %s14030_s22 }
 0x816   : > { %v10289_v63 = vadd.f32 1.0, %v13838_v59  ;;  %v12403_v61 = vpop.f32.mrf.mxu0 }
 0x817   : > { %13851 = vpow2.f32 %v12173_v49  ;;  %v10228_v9 = vadd.f32 %v19363_v6, %v12402_v31 }
 0x818   : > { %v13840_v23 = vpop.eup %13839  ;;  %13853 = vrcp.f32 %v10289_v63  ;;  %v12404_v39 = vpop.f32.mrf.mxu0 }
 0x819   : > { %v13842_v41 = vpop.eup %13841  ;;  %v12174_v40 = vmul.f32 -1.442695, %v10228_v9  ;;  %v12405_v7 = vadd.f32 %v12404_v39, %v12403_v61  ;;  %10456 = vrot.lane.b32.xlu0 %v13840_v23, %s14030_s22  ;;  %v8487_v23 = vadd.f32 %v19363_v6, %v18892_v8 }
 0x81a   : > { %v10290_v45 = vadd.f32 1.0, %v13842_v41  ;;  %v12406_v38 = vpop.f32.mrf.mxu0  ;;  %v8490_v41 = vadd.f32 %v19363_v6, %v18894_v37  ;;  %v8503_v37 = vadd.f32 %v19363_v6, %v18900_v52 }
 0x81b   : > { %13855 = vpow2.f32 %v12174_v40  ;;  %v10231_v25 = vadd.f32 %v19363_v6, %v12405_v7  ;;  %v11930_v39 = vmul.f32 -1.442695, %v8487_v23  ;;  %v8495_v7 = vadd.f32 %v19363_v6, %v18896_v55 }
 0x81c   : > { %v13844_v20 = vpop.eup %13843  ;;  %13857 = vrcp.f32 %v10290_v45  ;;  %v12407_v48 = vpop.f32.mrf.mxu0  ;;  %v11931_v40 = vmul.f32 -1.442695, %v8490_v41  ;;  %v11934_v55 = vmul.f32 -1.442695, %v8503_v37 }
 0x81d   : > { %v13846_v35 = vpop.eup %13845  ;;  %v12175_v1 = vmul.f32 -1.442695, %v10231_v25  ;;  %v12408_v29 = vadd.f32 %v12407_v48, %v12406_v38  ;;  %10458 = vrot.lane.b32.xlu1 %v13844_v20, %s14030_s22  ;;  %v19471_v45 = vpop.permute.xlu0 %10364  ;;  %v11932_v38 = vmul.f32 -1.442695, %v8495_v7  ;;  %v8498_v25 = vadd.f32 %v19363_v6, %v18898_v15 }
 0x81e   : > { %v10291_v50 = vadd.f32 1.0, %v13846_v35  ;;  %v12409_v46 = vpop.f32.mrf.mxu0  ;;  %v19475_v20 = vpop.permute.xlu1 %10366 }
 0x81f   : > { %13859 = vpow2.f32 %v12175_v1  ;;  %v10236_v3 = vadd.f32 %v19363_v6, %v12408_v29  ;;  %v11933_v8 = vmul.f32 -1.442695, %v8498_v25 }
 0x820   : > { %v13848_v14 = vpop.eup %13847  ;;  %13861 = vrcp.f32 %v10291_v50  ;;  %v12410_v57 = vpop.f32.mrf.mxu0  ;;  %v8506_v50 = vadd.f32 %v19363_v6, %v18902_v22 }
 0x821   : > { %v13850_v28 = vpop.eup %13849  ;;  %v10292_v0 = vadd.f32 1.0, %v13848_v14  ;;  %v12176_v62 = vmul.f32 -1.442695, %v10236_v3  ;;  %v12411_v21 = vadd.f32 %v12410_v57, %v12409_v46  ;;  %v10397_v48 = vpop.permute.xlu0 %10396 }
 0x822   : > { %10460 = vrot.lane.b32.xlu0 %v13850_v28, %s14030_s22  ;;  %v10399_v35 = vpop.permute.xlu1 %10398  ;;  %v11935_v57 = vmul.f32 -1.442695, %v8506_v50 }
 0x823   : > { %13863 = vrcp.f32 %v10292_v0  ;;  %v10239_v44 = vadd.f32 %v19363_v6, %v12411_v21 }
 0x824   : > { %v13852_v5 = vpop.eup %13851  ;;  %13865 = vpow2.f32 %v12176_v62 }
 0x825   : > { %v13854_v56 = vpop.eup %13853  ;;  %v10293_v16 = vadd.f32 1.0, %v13852_v5  ;;  %v12177_v36 = vmul.f32 -1.442695, %v10239_v44  ;;  %v10401_v1 = vpop.permute.xlu0 %10400 }
 0x826   : > { %10462 = vrot.lane.b32.xlu1 %v13854_v56, %s14030_s22  ;;  %v19481_v46 = vpop.permute.xlu1 %10402 }
 0x827   : > { %13867 = vrcp.f32 %v10293_v16 }
 0x828   : > { %v13856_v53 = vpop.eup %13855  ;;  %13869 = vpow2.f32 %v12177_v36 }
 0x829   : > { %v13858_v32 = vpop.eup %13857  ;;  %v10294_v4 = vadd.f32 1.0, %v13856_v53  ;;  %v19483_v15 = vpop.permute.xlu0 %10404 }
 0x82a   : > { %10464 = vrot.lane.b32.xlu0 %v13858_v32, %s14030_s22  ;;  %v19485_v28 = vpop.permute.xlu1 %10406 }
 0x82b   : > { %13871 = vrcp.f32 %v10294_v4 }
 0x82c   : > { %v13860_v47 = vpop.eup %13859 }
 0x82d   : > { %v13862_v58 = vpop.eup %13861  ;;  %v10295_v26 = vadd.f32 1.0, %v13860_v47  ;;  %v19487_v52 = vpop.permute.xlu0 %10408 }
 0x82e   : > { %10466 = vrot.lane.b32.xlu1 %v13862_v58, %s14030_s22  ;;  %v19489_v21 = vpop.permute.xlu1 %10410 }
 0x82f   : > { %13873 = vrcp.f32 %v10295_v26 }
 0x830   : > { %v13864_v54 = vpop.eup %13863 }
 0x831   : > { %v13866_v42 = vpop.eup %13865  ;;  %10468 = vrot.lane.b32.xlu0 %v13864_v54, %s14030_s22  ;;  %v19491_v22 = vpop.permute.xlu0 %10412 }
 0x832   : > { %v10296_v24 = vadd.f32 1.0, %v13866_v42  ;;  %v19495_v56 = vpop.permute.xlu1 %10414 }
 0x834   : > { %v13868_v2 = vpop.eup %13867  ;;  %13875 = vrcp.f32 %v10296_v24 }
 0x835   : > { %v13870_v59 = vpop.eup %13869  ;;  %10470 = vrot.lane.b32.xlu1 %v13868_v2, %s14030_s22  ;;  %v19497_v16 = vpop.permute.xlu0 %10416 }
 0x836   : > { %v10297_v49 = vadd.f32 1.0, %v13870_v59  ;;  %v19499_v32 = vpop.permute.xlu1 %10418 }
 0x838   : > { %v13872_v31 = vpop.eup %13871  ;;  %13877 = vrcp.f32 %v10297_v49 }
 0x839   : > { %10472 = vrot.lane.b32.xlu0 %v13872_v31, %s14030_s22  ;;  %13879 = vpow2.f32 %v11930_v39  ;;  %v19501_v4 = vpop.permute.xlu0 %10420  ;;  %v8535_v39 = vadd.f32 %v19363_v6, %v18916_v33 }
 0x83a   : > { %13881 = vpow2.f32 %v11931_v40  ;;  %v19511_v24 = vpop.permute.xlu1 %10422 }
 0x83b   : > { %13883 = vpow2.f32 %v11932_v38  ;;  %v11942_v25 = vmul.f32 -1.442695, %v8535_v39 }
 0x83c   : > { %v13874_v63 = vpop.eup %13873  ;;  %13885 = vpow2.f32 %v11933_v8 }
 0x83d   : > { %10474 = vrot.lane.b32.xlu1 %v13874_v63, %s14030_s22  ;;  %13887 = vpow2.f32 %v11934_v55 }
 0x841   : > { %v13876_v61 = vpop.eup %13875 }
 0x842   : > { %10476 = vrot.lane.b32.xlu0 %v13876_v61, %s14030_s22 }
 0x845   : > { %v13878_v9 = vpop.eup %13877 }
 0x846   : > { %10478 = vrot.lane.b32.xlu1 %v13878_v9, %s14030_s22  ;;  %v13880_v29 = vpop.eup %13879 }
 0x847   : > { %v8583_v3 = vadd.f32 1.0, %v13880_v29  ;;  %v13882_v14 = vpop.eup %13881 }
 0x848   : > { %v8584_v0 = vadd.f32 1.0, %v13882_v14  ;;  %v13884_v62 = vpop.eup %13883 }
 0x849   : > { %13889 = vrcp.f32 %v8583_v3  ;;  %v8585_v44 = vadd.f32 1.0, %v13884_v62  ;;  %v13886_v5 = vpop.eup %13885 }
 0x84a   : > { %13891 = vpow2.f32 %v11935_v57  ;;  %v8586_v36 = vadd.f32 1.0, %v13886_v5  ;;  %v13888_v53 = vpop.eup %13887 }
 0x84b   : > { %13893 = vrcp.f32 %v8584_v0  ;;  %v8587_v58 = vadd.f32 1.0, %v13888_v53 }
 0x84c   : > { %13895 = vrcp.f32 %v8585_v44 }
 0x84d   : > { %13897 = vrcp.f32 %v8586_v36 }
 0x84e   : > { %13899 = vrcp.f32 %v8587_v58 }
 0x856   : > { %v13890_v47 = vpop.eup %13889 }
 0x857   : > { %v13892_v26 = vpop.eup %13891  ;;  %v10495_v54 = vsel %vm10494_vm6, %v13890_v47, %v19311_v19 }
 0x858   : > { %v10510_v42 = vsel %vm10509_vm7, %v10495_v54, %v10397_v48  ;;  %v13894_v49 = vpop.eup %13893  ;;  %v8588_v31 = vadd.f32 1.0, %v13892_v26  ;;  %v8538_v48 = vadd.f32 %v19363_v6, %v18918_v18 }
 0x859   : > { %v10496_v19 = vsel %vm10494_vm6, %v13894_v49, %v19317_v10  ;;  %v13896_v23 = vpop.eup %13895 }
 0x85a   : > { %v10511_v63 = vsel %vm10509_vm7, %v10496_v19, %v10399_v35  ;;  %13901 = vrcp.f32 %v8588_v31  ;;  %v10497_v41 = vsel %vm10494_vm6, %v13896_v23, %v19313_v34  ;;  %v13898_v38 = vpop.eup %13897  ;;  %v11943_v35 = vmul.f32 -1.442695, %v8538_v48 }
 0x85b   : > { %v10512_v40 = vsel %vm10509_vm7, %v10497_v41, %v10401_v1  ;;  %v10498_v33 = vsel %vm10494_vm6, %v13898_v38, %v19319_v27  ;;  %13903 = vpow2.f32 %v11942_v25  ;;  %v13900_v1 = vpop.eup %13899 }
 0x85c   : > { %v10513_v8 = vsel %vm10509_vm7, %v10498_v33, %v19481_v46  ;;  %v10499_v18 = vsel %vm10494_vm6, %v13900_v1, %v19321_v60  ;;  %13905 = vpow2.f32 %v11943_v35 }
 0x85d   : > { %v10514_v6 = vsel %vm10509_vm7, %v10499_v18, %v19483_v15  ;;  %v10516_v15 = vsel %vm10509_vm7, %v19328_v51, %v19487_v52  ;;  %v10518_v51 = vsel %vm10509_vm7, %v19336_v12, %v19491_v22  ;;  %v10520_v12 = vsel %vm10509_vm7, %v19343_v11, %v19497_v16 }
 0x867   : > { %v13902_v55 = vpop.eup %13901 }
 0x868   : > { %v10500_v50 = vsel %vm10494_vm6, %v13902_v55, %v19325_v43  ;;  %v13904_v0 = vpop.eup %13903  ;;  %v10517_v43 = vsel %vm10509_vm7, %v19331_v13, %v19489_v21  ;;  %v10519_v13 = vsel %vm10509_vm7, %v19339_v30, %v19495_v56  ;;  %v10521_v30 = vsel %vm10509_vm7, %v19346_v17, %v19499_v32 }
 0x869   : > { %v10515_v46 = vsel %vm10509_vm7, %v10500_v50, %v19485_v28  ;;  %v8595_v62 = vadd.f32 1.0, %v13904_v0  ;;  %v13906_v5 = vpop.eup %13905 }
 0x86a   : > { %v8596_v53 = vadd.f32 1.0, %v13906_v5 }
 0x86b   : > { %13907 = vrcp.f32 %v8595_v62 }
 0x86c   : > { %13909 = vrcp.f32 %v8596_v53 }
 0x878   : > { %v13908_v54 = vpop.eup %13907 }
 0x883   : > { %v10453_v2 = vpop.permute.xlu0 %10452 }
 0x884   : > { %v10525_v59 = vsel %vm10524_vm8, %v10510_v42, %v10453_v2  ;;  %v10507_v42 = vsel %vm10494_vm6, %v13908_v54, %v19471_v45 }
 0x885   : > { %10540 = vst.msk [vmem:[%s19508_s16] sm:$0xff] %vm10539_vm9, %v10525_v59  ;;  %v10522_v11 = vsel %vm10509_vm7, %v10507_v42, %v19501_v4  ;;  %v13910_v59 = vpop.eup %13909 }
 0x886   : > { %v10508_v17 = vsel %vm10494_vm6, %v13910_v59, %v19475_v20 }
 0x887   : > { %v10455_v61 = vpop.permute.xlu1 %10454  ;;  %v10523_v32 = vsel %vm10509_vm7, %v10508_v17, %v19511_v24 }
 0x888   : > { %v10526_v9 = vsel %vm10524_vm8, %v10511_v63, %v10455_v61 }
 0x889   : > { %10541 = vst.msk [vmem:[%s19508_s16 + $0x8] sm:$0xff] %vm10539_vm9, %v10526_v9 }
 0x88b   : > { %v10457_v7 = vpop.permute.xlu0 %10456 }
 0x88c   : > { %v10527_v10 = vsel %vm10524_vm8, %v10512_v40, %v10457_v7 }
 0x88d   : > { %10542 = vst.msk [vmem:[%s19508_s16 + $0x10] sm:$0xff] %vm10539_vm9, %v10527_v10 }
 0x88f   : > { %v10459_v34 = vpop.permute.xlu1 %10458 }
 0x890   : > { %v10528_v37 = vsel %vm10524_vm8, %v10513_v8, %v10459_v34 }
 0x891   : > { %10543 = vst.msk [vmem:[%s19508_s16 + $0x18] sm:$0xff] %vm10539_vm9, %v10528_v37 }
 0x894   : > { %v10461_v27 = vpop.permute.xlu0 %10460 }
 0x895   : > { %v10529_v29 = vsel %vm10524_vm8, %v10514_v6, %v10461_v27 }
 0x896   : > { %10544 = vst.msk [vmem:[%s19508_s16 + $0x20] sm:$0xff] %vm10539_vm9, %v10529_v29 }
 0x898   : > { %v10463_v3 = vpop.permute.xlu1 %10462 }
 0x899   : > { %v10530_v60 = vsel %vm10524_vm8, %v10515_v46, %v10463_v3 }
 0x89a   : > { %10545 = vst.msk [vmem:[%s19508_s16 + $0x28] sm:$0xff] %vm10539_vm9, %v10530_v60 }
 0x89c   : > { %v10465_v14 = vpop.permute.xlu0 %10464 }
 0x89d   : > { %v10531_v57 = vsel %vm10524_vm8, %v10516_v15, %v10465_v14 }
 0x89e   : > { %10546 = vst.msk [vmem:[%s19508_s16 + $0x30] sm:$0xff] %vm10539_vm9, %v10531_v57 }
 0x8a0   : > { %v10467_v28 = vpop.permute.xlu1 %10466 }
 0x8a1   : > { %v10532_v44 = vsel %vm10524_vm8, %v10517_v43, %v10467_v28 }
 0x8a2   : > { %10547 = vst.msk [vmem:[%s19508_s16 + $0x38] sm:$0xff] %vm10539_vm9, %v10532_v44 }
 0x8a3   : > { %v10469_v52 = vpop.permute.xlu0 %10468 }
 0x8a4   : > { %v10533_v36 = vsel %vm10524_vm8, %v10518_v51, %v10469_v52 }
 0x8a5   : > { %10548 = vst.msk [vmem:[%s19508_s16 + $0x40] sm:$0xff] %vm10539_vm9, %v10533_v36 }
 0x8a7   : > { %v10471_v21 = vpop.permute.xlu1 %10470 }
 0x8a8   : > { %v10534_v47 = vsel %vm10524_vm8, %v10519_v13, %v10471_v21 }
 0x8a9   : > { %10549 = vst.msk [vmem:[%s19508_s16 + $0x48] sm:$0xff] %vm10539_vm9, %v10534_v47 }
 0x8ab   : > { %v10473_v22 = vpop.permute.xlu0 %10472 }
 0x8ac   : > { %v10535_v58 = vsel %vm10524_vm8, %v10520_v12, %v10473_v22 }
 0x8ad   : > { %10550 = vst.msk [vmem:[%s19508_s16 + $0x50] sm:$0xff] %vm10539_vm9, %v10535_v58 }
 0x8af   : > { %v10475_v56 = vpop.permute.xlu1 %10474 }
 0x8b0   : > { %v10536_v26 = vsel %vm10524_vm8, %v10521_v30, %v10475_v56 }
 0x8b1   : > { %10551 = vst.msk [vmem:[%s19508_s16 + $0x58] sm:$0xff] %vm10539_vm9, %v10536_v26 }
 0x8b4   : > { %v10477_v16 = vpop.permute.xlu0 %10476 }
 0x8b5   : > { %v10537_v2 = vsel %vm10524_vm8, %v10522_v11, %v10477_v16 }
 0x8b6   : > { %10552 = vst.msk [vmem:[%s19508_s16 + $0x60] sm:$0xff] %vm10539_vm9, %v10537_v2 }
 0x8b8   : > { %v10479_v49 = vpop.permute.xlu1 %10478 }
 0x8b9   : > { %v10538_v31 = vsel %vm10524_vm8, %v10523_v32, %v10479_v49 }
 0x8ba   : > { %10554 = vst.msk [vmem:[%s19508_s16 + $0x68] sm:$0xf] %vm10553_vm10, %v10538_v31 }
 0x8bb PF: > { %s19_s13 = sadd.s32 1, %s14026_s13   ;;  %s19982_s30 = smov %s14018_s11 }
 0x8bc   : > { %p16_p7 = scmp.ge.s32.totalorder %s19_s13, 8   ;;  %s19983_s10 = smov %s14022_s12 }
 0x8bd   : > { %s19984_s11 = smov %s19987_s14  ;;  %s19985_s12 = smov %s19991_s15 }
 0x8be   :  { %18 = sbr.rel (!%p16_p7) target bundleno = 3 (0x3), region = 97 }

</bundles_post_ra>
